<compile_context>
chip_gen: v7x
topology: tpu7x:2x2x1
jax: 0.10.0
libtpu: 0.0.40
codegen_flags: <defaults>
</compile_context>

<pallas_src>
import jax
import jax.numpy as jnp
from jax.experimental import pallas as pl
from jax.experimental.pallas import tpu as pltpu


def _round_up(n, m):
    return ((n + m - 1) // m) * m


def _fused_linear_kernel(x_ref, w_ref, b_ref, o_ref):
    """One MXU matmul per batch tile.

    x_ref: (TB, K)   w_ref: (K, O) f32   b_ref: (1, O) f32   o_ref: (TB, O)
    """
    acc = jnp.dot(x_ref[...].astype(jnp.float32), w_ref[...],
                  preferred_element_type=jnp.float32)          # (TB, O)
    o_ref[...] = (acc + b_ref[...]).astype(o_ref.dtype)


def _pick_tile_rows(B, K, O, itemsize):
    """Batch-tile rows: ~1 MiB per input DMA, VMEM (lane-padded, double-buffered) <= ~16 MiB."""
    rows_dma = max((1 << 20) // (K * itemsize), 8)
    padded_row_bytes = (_round_up(K, 128) + _round_up(O, 128)) * 4 * 2  # in+out, f32, x2 buffers
    rows_vmem = max((16 << 20) // padded_row_bytes, 8)
    tb = min(rows_dma, rows_vmem, _round_up(B, 8))
    return max(_round_up(tb, 8), 8)


def _dimension_semantics(num_steps):
    """Real 2-TensorCore split on v7x; plain 'parallel' elsewhere (safe everywhere)."""
    try:
        kind = jax.devices()[0].device_kind.lower()
    except Exception:  # pragma: no cover
        kind = ""
    if "v7" in kind and num_steps >= 2:
        return (getattr(pltpu, "CORE_PARALLEL", "parallel"),)
    return ("parallel",)


def simple_linear_model(x, w1, b1, w2, b2, *, force_pallas=False, tile_rows=None):
    """x: (B, L, M); w1: (1, M); b1: (1,); w2: (O, L); b2: (O,). Returns (B, O)."""
    B, L, M = x.shape
    O = w2.shape[0]
    K = L * M
    dtype = x.dtype
    itemsize = jnp.dtype(dtype).itemsize

    # ---- wrapper-side algebraic fusion of the two affine layers (kept in f32) ----
    w1f = w1.astype(jnp.float32)
    w2f = w2.astype(jnp.float32)
    w_f = (w2f[:, :, None] * w1f.reshape(1, 1, M)).reshape(O, K).T          # (K, O) f32
    bc = (b2.astype(jnp.float32)
          + b1.astype(jnp.float32)[0] * jnp.sum(w2f, axis=1)).reshape(1, O)  # (1, O) f32

    x2d = x.reshape(B, K)                                                    # natural layout, no transpose

    # ---- tiny-shape dispatch: a pallas_call launch is pure overhead here ----
    if (not force_pallas) and (B * K * itemsize < 512 * 1024):
        out = x2d.astype(jnp.float32) @ w_f + bc
        return out.astype(dtype)

    # ---- Pallas path: tile batch on the sublane axis, partial last block allowed ----
    TB = _pick_tile_rows(B, K, O, itemsize) if tile_rows is None \
        else max(_round_up(min(int(tile_rows), _round_up(B, 8)), 8), 8)
    num_steps = pl.cdiv(B, TB)

    out = pl.pallas_call(
        _fused_linear_kernel,
        out_shape=jax.ShapeDtypeStruct((B, O), dtype),
        grid_spec=pltpu.PrefetchScalarGridSpec(
            num_scalar_prefetch=0,
            grid=(num_steps,),
            in_specs=[
                pl.BlockSpec((TB, K), lambda i: (i, 0)),   # x tile, pipelined over batch
                pl.BlockSpec((K, O), lambda i: (0, 0)),    # fused weight (resident)
                pl.BlockSpec((1, O), lambda i: (0, 0)),    # fused bias   (resident)
            ],
            out_specs=pl.BlockSpec((TB, O), lambda i: (i, 0)),
        ),
        compiler_params=pltpu.CompilerParams(
            dimension_semantics=_dimension_semantics(num_steps),
            vmem_limit_bytes=32 * 1024 * 1024,             # tiles budgeted <= ~16 MiB; safe on v7x too
        ),
    )(x2d, w_f, bc)

    return out                                             # (B, O) == torch view(-1, O)


def _reference(x, w1, b1, w2, b2):
    """Pure-JAX reference matching the (unfused) PyTorch forward exactly."""
    h = x @ w1.T + b1                 # (B, L, 1)
    h = jnp.transpose(h, (0, 2, 1))   # (B, 1, L)
    y = h @ w2.T + b2                 # (B, 1, O)
    return y.reshape(-1, w2.shape[0])


def _make_params(key, L, M, O):
    k1, k2, k3, k4 = jax.random.split(key, 4)
    bound1 = 1.0 / jnp.sqrt(jnp.float32(M))
    w1 = jax.random.uniform(k1, (1, M), minval=-bound1, maxval=bound1, dtype=jnp.float32)
    b1 = jax.random.uniform(k2, (1,), minval=-bound1, maxval=bound1, dtype=jnp.float32)
    bound2 = 1.0 / jnp.sqrt(jnp.float32(L))
    w2 = jax.random.uniform(k3, (O, L), minval=-bound2, maxval=bound2, dtype=jnp.float32)
    b2 = jax.random.uniform(k4, (O,), minval=-bound2, maxval=bound2, dtype=jnp.float32)
    return w1, b1, w2, b2


if __name__ == "__main__":
    key = jax.random.PRNGKey(0)
    kx1, kp1, kx2, kp2, kx3, kp3 = jax.random.split(key, 6)

    # Case 1: module-default shapes (seq=8, n_time_series=4, O=1) -> tiny-shape XLA path.
    B, L, M, O = 2, 8, 4, 1
    x = jax.random.normal(kx1, (B, L, M), dtype=jnp.float32)
    w1, b1, w2, b2 = _make_params(kp1, L, M, O)
    out = jax.block_until_ready(simple_linear_model(x, w1, b1, w2, b2))
    ref = _reference(x, w1, b1, w2, b2)
    assert out.shape == (B, O), out.shape
    assert jnp.allclose(out, ref, atol=1e-4, rtol=1e-5)

    # Case 2: large batch -> natural Pallas path (default tile, multi-step grid,
    # partial last block, O == 1 through the MXU kernel).
    B2, L2, M2, O2 = 20000, 8, 4, 1
    x2 = jax.random.normal(kx2, (B2, L2, M2), dtype=jnp.float32)
    w1b, b1b, w2b, b2b = _make_params(kp2, L2, M2, O2)
    out2 = jax.block_until_ready(simple_linear_model(x2, w1b, b1b, w2b, b2b))
    ref2 = _reference(x2, w1b, b1b, w2b, b2b)
    assert out2.shape == (B2, O2), out2.shape
    assert jnp.allclose(out2, ref2, atol=1e-4, rtol=1e-5)

    # Case 3: small shapes, forced Pallas with a small tile -> exercises multi-output O,
    # a multi-step grid and the masked partial last block at modest sizes.
    B3, L3, M3, O3 = 600, 8, 4, 3
    x3 = jax.random.normal(kx3, (B3, L3, M3), dtype=jnp.float32)
    w1c, b1c, w2c, b2c = _make_params(kp3, L3, M3, O3)
    out3 = jax.block_until_ready(
        simple_linear_model(x3, w1c, b1c, w2c, b2c, force_pallas=True, tile_rows=256))
    ref3 = _reference(x3, w1c, b1c, w2c, b2c)
    assert out3.shape == (B3, O3), out3.shape
    assert jnp.allclose(out3, ref3, atol=1e-4, rtol=1e-5)

    print("KERNEL_OK")
</pallas_src>

<mosaic_0001>
module attributes {stable_mosaic.version = 11 : i64} {
  func.func @_fused_linear_kernel(%arg0: i32, %arg1: memref<8192x32xf32, #tpu.memory_space<vmem>>, %arg2: memref<32x1xf32, #tpu.memory_space<vmem>>, %arg3: memref<1x1xf32, #tpu.memory_space<vmem>>, %arg4: memref<8192x1xf32, #tpu.memory_space<vmem>>) attributes {dimension_semantics = [#tpu.dimension_semantics<parallel>], iteration_bounds = array<i64: 3>, scalar_prefetch = 0 : i64, scratch_operands = 0 : i64, tpu.core_type = #tpu.core_type<tc>, window_params = [{transform_indices = @transform_0, window_bounds = array<i64: 8192, 32>}, {pipeline_mode = #tpu.pipeline_mode<synchronous>, transform_indices = @transform_1, window_bounds = array<i64: 32, 1>}, {pipeline_mode = #tpu.pipeline_mode<synchronous>, transform_indices = @transform_2, window_bounds = array<i64: 1, 1>}, {transform_indices = @transform_3, window_bounds = array<i64: 8192, 1>}]} {
    %c0 = arith.constant 0 : index
    %c0_0 = arith.constant 0 : index
    %0 = vector.load %arg1[%c0, %c0_0] : memref<8192x32xf32, #tpu.memory_space<vmem>>, vector<8192x32xf32>
    %c0_1 = arith.constant 0 : index
    %c0_2 = arith.constant 0 : index
    %1 = vector.load %arg2[%c0_1, %c0_2] : memref<32x1xf32, #tpu.memory_space<vmem>>, vector<32x1xf32>
    %cst = arith.constant dense<0.000000e+00> : vector<8192x1xf32>
    %2 = tpu.matmul %0, %1, %cst {dimension_numbers = #tpu.dot_dimension_numbers<[1], [0], [0], [1], [0, 0, 1, 1], [], []>} : vector<8192x32xf32>, vector<32x1xf32>, vector<8192x1xf32> -> vector<8192x1xf32>
    %c0_3 = arith.constant 0 : index
    %c0_4 = arith.constant 0 : index
    %3 = vector.load %arg3[%c0_3, %c0_4] : memref<1x1xf32, #tpu.memory_space<vmem>>, vector<1x1xf32>
    %4 = vector.broadcast %3 : vector<1x1xf32> to vector<8192x1xf32>
    %5 = arith.addf %2, %4 : vector<8192x1xf32>
    %c0_5 = arith.constant 0 : index
    %c0_6 = arith.constant 0 : index
    %6 = vector.load %arg4[%c0_5, %c0_6] : memref<8192x1xf32, #tpu.memory_space<vmem>>, vector<8192x1xf32>
    tpu.vector_store %arg4[%c0_5, %c0_6], %5 {strides = array<i32>} : memref<8192x1xf32, #tpu.memory_space<vmem>>, vector<8192x1xf32>,
    return
  }
  func.func @transform_0(%arg0: i32) -> (i32, i32) {
    %c0_i32 = arith.constant 0 : i32
    %c0_i32_0 = arith.constant 0 : i32
    return %arg0, %c0_i32 : i32, i32
  }
  func.func @transform_1(%arg0: i32) -> (i32, i32) {
    %c0_i32 = arith.constant 0 : i32
    %c0_i32_0 = arith.constant 0 : i32
    %c0_i32_1 = arith.constant 0 : i32
    return %c0_i32, %c0_i32_0 : i32, i32
  }
  func.func @transform_2(%arg0: i32) -> (i32, i32) {
    %c0_i32 = arith.constant 0 : i32
    %c0_i32_0 = arith.constant 0 : i32
    %c0_i32_1 = arith.constant 0 : i32
    return %c0_i32, %c0_i32_0 : i32, i32
  }
  func.func @transform_3(%arg0: i32) -> (i32, i32) {
    %c0_i32 = arith.constant 0 : i32
    %c0_i32_0 = arith.constant 0 : i32
    return %arg0, %c0_i32 : i32, i32
  }
}

</mosaic_0001>

<bundles_post_ra>
// kernel: tpu_custom_call.1
= control target key start
LH: loop header
LB: loop body
LE: loop exit
PB: predicated region body
PF: predicated region fallthrough
CT: control target
= control target key end

     0   :  { %s20209_s0 = inlined_call_operand.vmem [shape: f32[20000,32], index: 0, kind: input, shape index: {}]   ;;  %s20210_s1 = inlined_call_operand.vmem [shape: f32[32,1], index: 1, kind: input, shape index: {}]   ;;  %s20211_s2 = inlined_call_operand.<no memory space> [shape: f32[1,1], index: 2, kind: input, shape index: {}]   ;;  %s20212_s3 = inlined_call_operand.vmem [shape: f32[20000,1], index: 3, kind: output, shape index: {}]  }
   0x1   :  { %v8_v0 = vstv %s20211_s2 }
   0x2   :  { %9 = vst [vmem:[#allocation2] sm:$0x1] %v8_v0 }
   0x3   :  { %s14823_s14 = smov 0   ;;  %s14825_s15 = smov 0  }
   0x4   :  { %s14827_s16 = smov 0  }
   0x5 LB: > { %s14836_s2 = sadd.s32 4294967295, %s14766_s16   ;;  %s14838_s17 = sadd.s32 1, %s14766_s16   ;;  %s14766_s16 = sphi %s14827_s16, %s20221_s16   ;;  %s14762_s15 = sphi %s14825_s15, %s20220_s15   ;;  %s14758_s14 = sphi %s14823_s14, %s20219_s14  }
   0x6   : > { %s87_s18 = ssub.s32 %s14766_s16, %s14838_s17  ;;  %s90_s19 = sadd.s32 1, %s14762_s15 }
   0x7   : > { %p88_p0 = scmp.eq.s32.totalorder %s87_s18, 0  ;;  %p100_p1 = scmp.ne.s32.totalorder %s14762_s15, %s14758_s14 }
   0x8   : > { %p101_p2 = scmp.eq.s32.totalorder %s14836_s2, 2  ;;  %p10982_p3 = scmp.ge.s32.totalorder %s14766_s16, 1 }
   0x9   : > { %s14846_s20 = scalar_select %p88_p0, %s14762_s15, %s90_s19  }
   0xa   : > { %p14848_p4 = por %p101_p2, %p100_p1  ;;  %p148_p5 = scmp.lt.s32.totalorder %s14766_s16, 4 }
   0xc   : > { %p149_p6 = pnand %p10982_p3, %p148_p5 }
   0xd   : > { %v1218_v1 = vld [vmem:[%s20210_s1] sm:$0xff] (!%p149_p6)  ;;  %v1219_v2 = vld [vmem:[%s20210_s1 + $0x8] sm:$0xff] (!%p149_p6)  ;;  %v1220_v3 = vld [vmem:[%s20210_s1 + $0x10] sm:$0xff] (!%p149_p6)  ;;  %s14862_s28 = sshll.u32 (!%p149_p6), %s14836_s2, 10  ;;  %vm1229_vm0 = vcmask (!%p149_p6), 261120   ;;  %s172_s9 = sand.u32 (!%p149_p6), 1, %s14758_s14  }
   0xe   : > { %152 = sbr.rel (%p149_p6) target bundleno = 1336 (0x538), region = 32  ;;  %v14603_v4 = vpack.c.bf16 (!%p149_p6), %v1219_v2, %v1218_v1  ;;  %v1221_v5 = vld [vmem:[%s20210_s1 + $0x18] sm:$0xff] (!%p149_p6)  ;;  %p180_p7 = scmp.lt.s32.totalorder (!%p149_p6), %s14862_s28, 2499  ;;  %vm9487_vm1 = vcmask (!%p149_p6), 7168  }
   0xf   : > { %v14607_v6 = vpack.c.bf16 (!%p149_p6), %v1221_v5, %v1220_v3  ;;  %s10983_s10 = sshll.u32 (!%p149_p6), %s172_s9, 13 }
  0x10   : > { %14604 = vmatprep.subr.bf16.mxu0 (!%p149_p6), %v14603_v4  ;;  %14611 = vmatprep.subr.bf16.mxu1 (!%p149_p6), %v14603_v4  ;;  %s15319_s11 = scalar_lea.vmem (!%p149_p6), [#allocation3], %s10983_s10  }
  0x11   : > { %14606 = vmatpush3.bf16.msra.mxu0 (!%p149_p6), %v14603_v4  ;;  %14613 = vmatpush3.bf16.msra.mxu1 (!%p149_p6), %v14603_v4 }
  0x12   : > { %14608 = vmatprep.subr.bf16.mxu0 (!%p149_p6), %v14607_v6  ;;  %14612 = vmatprep.subr.bf16.mxu1 (!%p149_p6), %v14607_v6 }
  0x15   : > { %s181_s4 = scalar_select %p180_p7, %s14862_s28, 2499  ;;  %14610 = vmatpush3.bf16.msra.mxu0 %v14607_v6  ;;  %14614 = vmatpush3.bf16.msra.mxu1 %v14607_v6 }
  0x16   : > { %s10520_s12 = ssub.s32 (%p14848_p4), 2500, %s14862_s28  ;;  %s12028_s13 = sshll.u32 (%p14848_p4), %s14836_s2, 13 }
  0x17   : > { %s10985_s5 = sshll.u32 %s181_s4, 3  ;;  %p10521_p8 = scmp.lt.s32.totalorder (%p14848_p4), %s10520_s12, 1024 }
  0x18   : > { %s14872_s8 = scalar_lea.vmem %s20209_s0, %s10985_s5  ;;  %s20010_s18 = scalar_lea.vmem (%p14848_p4), %s20212_s3, %s12028_s13  }
  0x19   : > { %v194_v7 = vld [vmem:[%s14872_s8] sm:$0xff]  ;;  %v195_v9 = vld [vmem:[%s14872_s8 + $0x8] sm:$0xff]  ;;  %v196_v11 = vld [vmem:[%s14872_s8 + $0x10] sm:$0xff] }
  0x1a   : > { %v706_v8 = vld [vmem:[%s14872_s8 + $0x1000] sm:$0xff]  ;;  %v707_v10 = vld [vmem:[%s14872_s8 + $0x1008] sm:$0xff]  ;;  %13067 = vmatprep.mubr.msk.f32.mxu0 %vm1229_vm0, %v194_v7  ;;  %v708_v12 = vld [vmem:[%s14872_s8 + $0x1010] sm:$0xff] }
  0x1b   : > { %13835 = vmatprep.mubr.msk.f32.mxu1 %vm1229_vm0, %v706_v8  ;;  %13068 = vmatmul.mubr.msk.f32.vlgmr.msra.gmra.mrb[0].mxu0 %vm1229_vm0, %v195_v9  ;;  %v197_v13 = vld [vmem:[%s14872_s8 + $0x18] sm:$0xff]  ;;  %v198_v15 = vld [vmem:[%s14872_s8 + $0x20] sm:$0xff]  ;;  %v199_v17 = vld [vmem:[%s14872_s8 + $0x28] sm:$0xff] }
  0x1c   : > { %13836 = vmatmul.mubr.msk.f32.vlgmr.msra.gmra.mrb[0].mxu1 %vm1229_vm0, %v707_v10  ;;  %13070 = vmatprep.mubr.msk.f32.mxu0 %vm1229_vm0, %v196_v11  ;;  %v709_v14 = vld [vmem:[%s14872_s8 + $0x1018] sm:$0xff]  ;;  %v710_v16 = vld [vmem:[%s14872_s8 + $0x1020] sm:$0xff]  ;;  %v711_v18 = vld [vmem:[%s14872_s8 + $0x1028] sm:$0xff] }
  0x1d   : > { %13838 = vmatprep.mubr.msk.f32.mxu1 %vm1229_vm0, %v708_v12  ;;  %v200_v19 = vld [vmem:[%s14872_s8 + $0x30] sm:$0xff]  ;;  %v201_v21 = vld [vmem:[%s14872_s8 + $0x38] sm:$0xff]  ;;  %v202_v23 = vld [vmem:[%s14872_s8 + $0x40] sm:$0xff] }
  0x1e   : > { %v712_v20 = vld [vmem:[%s14872_s8 + $0x1030] sm:$0xff]  ;;  %v713_v22 = vld [vmem:[%s14872_s8 + $0x1038] sm:$0xff]  ;;  %v714_v24 = vld [vmem:[%s14872_s8 + $0x1040] sm:$0xff] }
  0x1f   : > { %13071 = vmatmul.mubr.msk.f32.gmra.mrb[2].mxu0 %vm1229_vm0, %v197_v13  ;;  %v203_v25 = vld [vmem:[%s14872_s8 + $0x48] sm:$0xff]  ;;  %v204_v27 = vld [vmem:[%s14872_s8 + $0x50] sm:$0xff]  ;;  %v205_v29 = vld [vmem:[%s14872_s8 + $0x58] sm:$0xff] }
  0x20   : > { %13839 = vmatmul.mubr.msk.f32.gmra.mrb[2].mxu1 %vm1229_vm0, %v709_v14  ;;  %13073 = vmatprep.mubr.msk.f32.mxu0 %vm1229_vm0, %v198_v15  ;;  %v715_v26 = vld [vmem:[%s14872_s8 + $0x1048] sm:$0xff]  ;;  %v716_v28 = vld [vmem:[%s14872_s8 + $0x1050] sm:$0xff]  ;;  %v717_v30 = vld [vmem:[%s14872_s8 + $0x1058] sm:$0xff] }
  0x21   : > { %13841 = vmatprep.mubr.msk.f32.mxu1 %vm1229_vm0, %v710_v16  ;;  %v206_v31 = vld [vmem:[%s14872_s8 + $0x60] sm:$0xff]  ;;  %v207_v33 = vld [vmem:[%s14872_s8 + $0x68] sm:$0xff]  ;;  %v208_v35 = vld [vmem:[%s14872_s8 + $0x70] sm:$0xff] }
  0x22   : > { %v718_v32 = vld [vmem:[%s14872_s8 + $0x1060] sm:$0xff]  ;;  %v719_v34 = vld [vmem:[%s14872_s8 + $0x1068] sm:$0xff]  ;;  %v720_v36 = vld [vmem:[%s14872_s8 + $0x1070] sm:$0xff] }
  0x23   : > { %13074 = vmatmul.mubr.msk.f32.gmra.mrb[4].mxu0 %vm1229_vm0, %v199_v17  ;;  %v209_v37 = vld [vmem:[%s14872_s8 + $0x78] sm:$0xff]  ;;  %v210_v39 = vld [vmem:[%s14872_s8 + $0x80] sm:$0xff]  ;;  %v211_v41 = vld [vmem:[%s14872_s8 + $0x88] sm:$0xff] }
  0x24   : > { %13842 = vmatmul.mubr.msk.f32.gmra.mrb[4].mxu1 %vm1229_vm0, %v711_v18  ;;  %13076 = vmatprep.mubr.msk.f32.mxu0 %vm1229_vm0, %v200_v19  ;;  %v721_v38 = vld [vmem:[%s14872_s8 + $0x1078] sm:$0xff]  ;;  %v722_v40 = vld [vmem:[%s14872_s8 + $0x1080] sm:$0xff]  ;;  %v723_v42 = vld [vmem:[%s14872_s8 + $0x1088] sm:$0xff] }
  0x25   : > { %13844 = vmatprep.mubr.msk.f32.mxu1 %vm1229_vm0, %v712_v20  ;;  %v212_v43 = vld [vmem:[%s14872_s8 + $0x90] sm:$0xff]  ;;  %v213_v45 = vld [vmem:[%s14872_s8 + $0x98] sm:$0xff]  ;;  %v214_v47 = vld [vmem:[%s14872_s8 + $0xa0] sm:$0xff] }
  0x26   : > { %v724_v44 = vld [vmem:[%s14872_s8 + $0x1090] sm:$0xff]  ;;  %v725_v46 = vld [vmem:[%s14872_s8 + $0x1098] sm:$0xff]  ;;  %v726_v48 = vld [vmem:[%s14872_s8 + $0x10a0] sm:$0xff] }
  0x27   : > { %13077 = vmatmul.mubr.msk.f32.gmra.mrb[6].mxu0 %vm1229_vm0, %v201_v21  ;;  %v215_v49 = vld [vmem:[%s14872_s8 + $0xa8] sm:$0xff]  ;;  %v216_v51 = vld [vmem:[%s14872_s8 + $0xb0] sm:$0xff]  ;;  %v217_v53 = vld [vmem:[%s14872_s8 + $0xb8] sm:$0xff] }
  0x28   : > { %13845 = vmatmul.mubr.msk.f32.gmra.mrb[6].mxu1 %vm1229_vm0, %v713_v22  ;;  %13079 = vmatprep.mubr.msk.f32.mxu0 %vm1229_vm0, %v202_v23  ;;  %v727_v50 = vld [vmem:[%s14872_s8 + $0x10a8] sm:$0xff]  ;;  %v728_v52 = vld [vmem:[%s14872_s8 + $0x10b0] sm:$0xff]  ;;  %v729_v54 = vld [vmem:[%s14872_s8 + $0x10b8] sm:$0xff] }
  0x29   : > { %13847 = vmatprep.mubr.msk.f32.mxu1 %vm1229_vm0, %v714_v24  ;;  %v218_v55 = vld [vmem:[%s14872_s8 + $0xc0] sm:$0xff]  ;;  %v219_v57 = vld [vmem:[%s14872_s8 + $0xc8] sm:$0xff]  ;;  %v220_v59 = vld [vmem:[%s14872_s8 + $0xd0] sm:$0xff] }
  0x2a   : > { %v730_v56 = vld [vmem:[%s14872_s8 + $0x10c0] sm:$0xff]  ;;  %v731_v58 = vld [vmem:[%s14872_s8 + $0x10c8] sm:$0xff]  ;;  %v732_v60 = vld [vmem:[%s14872_s8 + $0x10d0] sm:$0xff] }
  0x2b   : > { %13080 = vmatmul.mubr.msk.f32.gmra.mrb[8].mxu0 %vm1229_vm0, %v203_v25  ;;  %v221_v61 = vld [vmem:[%s14872_s8 + $0xd8] sm:$0xff]  ;;  %v222_v63 = vld [vmem:[%s14872_s8 + $0xe0] sm:$0xff]  ;;  %v223_v1 = vld [vmem:[%s14872_s8 + $0xe8] sm:$0xff] }
  0x2c   : > { %13848 = vmatmul.mubr.msk.f32.gmra.mrb[8].mxu1 %vm1229_vm0, %v715_v26  ;;  %13082 = vmatprep.mubr.msk.f32.mxu0 %vm1229_vm0, %v204_v27  ;;  %v733_v62 = vld [vmem:[%s14872_s8 + $0x10d8] sm:$0xff]  ;;  %v734_v0 = vld [vmem:[%s14872_s8 + $0x10e0] sm:$0xff]  ;;  %v735_v2 = vld [vmem:[%s14872_s8 + $0x10e8] sm:$0xff] }
  0x2d   : > { %13850 = vmatprep.mubr.msk.f32.mxu1 %vm1229_vm0, %v716_v28  ;;  %v224_v3 = vld [vmem:[%s14872_s8 + $0xf0] sm:$0xff]  ;;  %v225_v5 = vld [vmem:[%s14872_s8 + $0xf8] sm:$0xff]  ;;  %v226_v7 = vld [vmem:[%s14872_s8 + $0x100] sm:$0xff] }
  0x2e   : > { %v736_v4 = vld [vmem:[%s14872_s8 + $0x10f0] sm:$0xff]  ;;  %v737_v6 = vld [vmem:[%s14872_s8 + $0x10f8] sm:$0xff]  ;;  %v738_v8 = vld [vmem:[%s14872_s8 + $0x1100] sm:$0xff] }
  0x2f   : > { %13083 = vmatmul.mubr.msk.f32.gmra.mrb[10].mxu0 %vm1229_vm0, %v205_v29  ;;  %v227_v9 = vld [vmem:[%s14872_s8 + $0x108] sm:$0xff]  ;;  %v228_v11 = vld [vmem:[%s14872_s8 + $0x110] sm:$0xff]  ;;  %v229_v13 = vld [vmem:[%s14872_s8 + $0x118] sm:$0xff] }
  0x30   : > { %13851 = vmatmul.mubr.msk.f32.gmra.mrb[10].mxu1 %vm1229_vm0, %v717_v30  ;;  %13085 = vmatprep.mubr.msk.f32.mxu0 %vm1229_vm0, %v206_v31  ;;  %v739_v10 = vld [vmem:[%s14872_s8 + $0x1108] sm:$0xff]  ;;  %v740_v12 = vld [vmem:[%s14872_s8 + $0x1110] sm:$0xff]  ;;  %v741_v14 = vld [vmem:[%s14872_s8 + $0x1118] sm:$0xff] }
  0x31   : > { %13853 = vmatprep.mubr.msk.f32.mxu1 %vm1229_vm0, %v718_v32  ;;  %v230_v15 = vld [vmem:[%s14872_s8 + $0x120] sm:$0xff]  ;;  %v231_v17 = vld [vmem:[%s14872_s8 + $0x128] sm:$0xff]  ;;  %v232_v19 = vld [vmem:[%s14872_s8 + $0x130] sm:$0xff] }
  0x32   : > { %v742_v16 = vld [vmem:[%s14872_s8 + $0x1120] sm:$0xff]  ;;  %v743_v18 = vld [vmem:[%s14872_s8 + $0x1128] sm:$0xff]  ;;  %v744_v20 = vld [vmem:[%s14872_s8 + $0x1130] sm:$0xff] }
  0x33   : > { %13086 = vmatmul.mubr.msk.f32.gmra.mrb[12].mxu0 %vm1229_vm0, %v207_v33  ;;  %v233_v21 = vld [vmem:[%s14872_s8 + $0x138] sm:$0xff]  ;;  %v234_v23 = vld [vmem:[%s14872_s8 + $0x140] sm:$0xff]  ;;  %v235_v25 = vld [vmem:[%s14872_s8 + $0x148] sm:$0xff] }
  0x34   : > { %13854 = vmatmul.mubr.msk.f32.gmra.mrb[12].mxu1 %vm1229_vm0, %v719_v34  ;;  %13088 = vmatprep.mubr.msk.f32.mxu0 %vm1229_vm0, %v208_v35  ;;  %v745_v22 = vld [vmem:[%s14872_s8 + $0x1138] sm:$0xff]  ;;  %v746_v24 = vld [vmem:[%s14872_s8 + $0x1140] sm:$0xff]  ;;  %v747_v26 = vld [vmem:[%s14872_s8 + $0x1148] sm:$0xff] }
  0x35   : > { %13856 = vmatprep.mubr.msk.f32.mxu1 %vm1229_vm0, %v720_v36  ;;  %v236_v27 = vld [vmem:[%s14872_s8 + $0x150] sm:$0xff]  ;;  %v237_v29 = vld [vmem:[%s14872_s8 + $0x158] sm:$0xff]  ;;  %v238_v31 = vld [vmem:[%s14872_s8 + $0x160] sm:$0xff] }
  0x36   : > { %v748_v28 = vld [vmem:[%s14872_s8 + $0x1150] sm:$0xff]  ;;  %v749_v30 = vld [vmem:[%s14872_s8 + $0x1158] sm:$0xff]  ;;  %v750_v32 = vld [vmem:[%s14872_s8 + $0x1160] sm:$0xff] }
  0x37   : > { %13089 = vmatmul.mubr.msk.f32.gmra.mrb[14].mxu0 %vm1229_vm0, %v209_v37  ;;  %v239_v33 = vld [vmem:[%s14872_s8 + $0x168] sm:$0xff]  ;;  %v240_v35 = vld [vmem:[%s14872_s8 + $0x170] sm:$0xff]  ;;  %v241_v37 = vld [vmem:[%s14872_s8 + $0x178] sm:$0xff] }
  0x38   : > { %13857 = vmatmul.mubr.msk.f32.gmra.mrb[14].mxu1 %vm1229_vm0, %v721_v38  ;;  %13091 = vmatprep.mubr.msk.f32.mxu0 %vm1229_vm0, %v210_v39  ;;  %v751_v34 = vld [vmem:[%s14872_s8 + $0x1168] sm:$0xff]  ;;  %v752_v36 = vld [vmem:[%s14872_s8 + $0x1170] sm:$0xff]  ;;  %v753_v38 = vld [vmem:[%s14872_s8 + $0x1178] sm:$0xff] }
  0x39   : > { %13859 = vmatprep.mubr.msk.f32.mxu1 %vm1229_vm0, %v722_v40  ;;  %v242_v39 = vld [vmem:[%s14872_s8 + $0x180] sm:$0xff] }
  0x3a   : > { %v754_v40 = vld [vmem:[%s14872_s8 + $0x1180] sm:$0xff] }
  0x3b   : > { %13092 = vmatmul.mubr.msk.f32.gmra.mrb[16].mxu0 %vm1229_vm0, %v211_v41  ;;  %v243_v41 = vld [vmem:[%s14872_s8 + $0x188] sm:$0xff] }
  0x3c   : > { %13860 = vmatmul.mubr.msk.f32.gmra.mrb[16].mxu1 %vm1229_vm0, %v723_v42  ;;  %13094 = vmatprep.mubr.msk.f32.mxu0 %vm1229_vm0, %v212_v43  ;;  %v755_v42 = vld [vmem:[%s14872_s8 + $0x1188] sm:$0xff]  ;;  %v244_v43 = vld [vmem:[%s14872_s8 + $0x190] sm:$0xff] }
  0x3d   : > { %13862 = vmatprep.mubr.msk.f32.mxu1 %vm1229_vm0, %v724_v44  ;;  %v756_v44 = vld [vmem:[%s14872_s8 + $0x1190] sm:$0xff] }
  0x3f   : > { %13095 = vmatmul.mubr.msk.f32.gmra.mrb[18].mxu0 %vm1229_vm0, %v213_v45  ;;  %v245_v45 = vld [vmem:[%s14872_s8 + $0x198] sm:$0xff] }
  0x40   : > { %13863 = vmatmul.mubr.msk.f32.gmra.mrb[18].mxu1 %vm1229_vm0, %v725_v46  ;;  %13097 = vmatprep.mubr.msk.f32.mxu0 %vm1229_vm0, %v214_v47  ;;  %v757_v46 = vld [vmem:[%s14872_s8 + $0x1198] sm:$0xff]  ;;  %v246_v47 = vld [vmem:[%s14872_s8 + $0x1a0] sm:$0xff] }
  0x41   : > { %13865 = vmatprep.mubr.msk.f32.mxu1 %vm1229_vm0, %v726_v48  ;;  %v758_v48 = vld [vmem:[%s14872_s8 + $0x11a0] sm:$0xff] }
  0x43   : > { %13098 = vmatmul.mubr.msk.f32.gmra.mrb[20].mxu0 %vm1229_vm0, %v215_v49  ;;  %v247_v49 = vld [vmem:[%s14872_s8 + $0x1a8] sm:$0xff] }
  0x44   : > { %13866 = vmatmul.mubr.msk.f32.gmra.mrb[20].mxu1 %vm1229_vm0, %v727_v50  ;;  %13100 = vmatprep.mubr.msk.f32.mxu0 %vm1229_vm0, %v216_v51  ;;  %v759_v50 = vld [vmem:[%s14872_s8 + $0x11a8] sm:$0xff]  ;;  %v248_v51 = vld [vmem:[%s14872_s8 + $0x1b0] sm:$0xff] }
  0x45   : > { %13868 = vmatprep.mubr.msk.f32.mxu1 %vm1229_vm0, %v728_v52  ;;  %v760_v52 = vld [vmem:[%s14872_s8 + $0x11b0] sm:$0xff] }
  0x47   : > { %13101 = vmatmul.mubr.msk.f32.gmra.mrb[22].mxu0 %vm1229_vm0, %v217_v53  ;;  %v249_v53 = vld [vmem:[%s14872_s8 + $0x1b8] sm:$0xff] }
  0x48   : > { %13869 = vmatmul.mubr.msk.f32.gmra.mrb[22].mxu1 %vm1229_vm0, %v729_v54  ;;  %13103 = vmatprep.mubr.msk.f32.mxu0 %vm1229_vm0, %v218_v55  ;;  %v761_v54 = vld [vmem:[%s14872_s8 + $0x11b8] sm:$0xff]  ;;  %v250_v55 = vld [vmem:[%s14872_s8 + $0x1c0] sm:$0xff] }
  0x49   : > { %13871 = vmatprep.mubr.msk.f32.mxu1 %vm1229_vm0, %v730_v56  ;;  %v762_v56 = vld [vmem:[%s14872_s8 + $0x11c0] sm:$0xff] }
  0x4b   : > { %13104 = vmatmul.mubr.msk.f32.gmra.mrb[24].mxu0 %vm1229_vm0, %v219_v57  ;;  %v251_v57 = vld [vmem:[%s14872_s8 + $0x1c8] sm:$0xff] }
  0x4c   : > { %13872 = vmatmul.mubr.msk.f32.gmra.mrb[24].mxu1 %vm1229_vm0, %v731_v58  ;;  %13106 = vmatprep.mubr.msk.f32.mxu0 %vm1229_vm0, %v220_v59  ;;  %v763_v58 = vld [vmem:[%s14872_s8 + $0x11c8] sm:$0xff]  ;;  %v252_v59 = vld [vmem:[%s14872_s8 + $0x1d0] sm:$0xff] }
  0x4d   : > { %13874 = vmatprep.mubr.msk.f32.mxu1 %vm1229_vm0, %v732_v60  ;;  %v764_v60 = vld [vmem:[%s14872_s8 + $0x11d0] sm:$0xff] }
  0x4f   : > { %13107 = vmatmul.mubr.msk.f32.gmra.mrb[26].mxu0 %vm1229_vm0, %v221_v61  ;;  %v253_v61 = vld [vmem:[%s14872_s8 + $0x1d8] sm:$0xff] }
  0x50   : > { %13875 = vmatmul.mubr.msk.f32.gmra.mrb[26].mxu1 %vm1229_vm0, %v733_v62  ;;  %13109 = vmatprep.mubr.msk.f32.mxu0 %vm1229_vm0, %v222_v63  ;;  %v765_v62 = vld [vmem:[%s14872_s8 + $0x11d8] sm:$0xff]  ;;  %v254_v63 = vld [vmem:[%s14872_s8 + $0x1e0] sm:$0xff] }
  0x51   : > { %13877 = vmatprep.mubr.msk.f32.mxu1 %vm1229_vm0, %v734_v0  ;;  %v766_v0 = vld [vmem:[%s14872_s8 + $0x11e0] sm:$0xff] }
  0x53   : > { %13110 = vmatmul.mubr.msk.f32.gmra.mrb[28].mxu0 %vm1229_vm0, %v223_v1  ;;  %v255_v1 = vld [vmem:[%s14872_s8 + $0x1e8] sm:$0xff] }
  0x54   : > { %13878 = vmatmul.mubr.msk.f32.gmra.mrb[28].mxu1 %vm1229_vm0, %v735_v2  ;;  %13112 = vmatprep.mubr.msk.f32.mxu0 %vm1229_vm0, %v224_v3  ;;  %v767_v2 = vld [vmem:[%s14872_s8 + $0x11e8] sm:$0xff]  ;;  %v256_v3 = vld [vmem:[%s14872_s8 + $0x1f0] sm:$0xff] }
  0x55   : > { %13880 = vmatprep.mubr.msk.f32.mxu1 %vm1229_vm0, %v736_v4  ;;  %v768_v4 = vld [vmem:[%s14872_s8 + $0x11f0] sm:$0xff] }
  0x57   : > { %13113 = vmatmul.mubr.msk.f32.gmra.mrb[30].mxu0 %vm1229_vm0, %v225_v5  ;;  %v257_v5 = vld [vmem:[%s14872_s8 + $0x1f8] sm:$0xff] }
  0x58   : > { %13881 = vmatmul.mubr.msk.f32.gmra.mrb[30].mxu1 %vm1229_vm0, %v737_v6  ;;  %13115 = vmatprep.mubr.msk.f32.mxu0 %vm1229_vm0, %v226_v7  ;;  %v769_v6 = vld [vmem:[%s14872_s8 + $0x11f8] sm:$0xff]  ;;  %v258_v7 = vld [vmem:[%s14872_s8 + $0x200] sm:$0xff] }
  0x59   : > { %13883 = vmatprep.mubr.msk.f32.mxu1 %vm1229_vm0, %v738_v8  ;;  %v770_v8 = vld [vmem:[%s14872_s8 + $0x1200] sm:$0xff] }
  0x5b   : > { %13116 = vmatmul.mubr.msk.f32.gmra.mrb[32].mxu0 %vm1229_vm0, %v227_v9  ;;  %v259_v9 = vld [vmem:[%s14872_s8 + $0x208] sm:$0xff] }
  0x5c   : > { %13884 = vmatmul.mubr.msk.f32.gmra.mrb[32].mxu1 %vm1229_vm0, %v739_v10  ;;  %13118 = vmatprep.mubr.msk.f32.mxu0 %vm1229_vm0, %v228_v11  ;;  %v771_v10 = vld [vmem:[%s14872_s8 + $0x1208] sm:$0xff]  ;;  %v260_v11 = vld [vmem:[%s14872_s8 + $0x210] sm:$0xff] }
  0x5d   : > { %13886 = vmatprep.mubr.msk.f32.mxu1 %vm1229_vm0, %v740_v12  ;;  %v772_v12 = vld [vmem:[%s14872_s8 + $0x1210] sm:$0xff] }
  0x5f   : > { %13119 = vmatmul.mubr.msk.f32.gmra.mrb[34].mxu0 %vm1229_vm0, %v229_v13  ;;  %v261_v13 = vld [vmem:[%s14872_s8 + $0x218] sm:$0xff] }
  0x60   : > { %13887 = vmatmul.mubr.msk.f32.gmra.mrb[34].mxu1 %vm1229_vm0, %v741_v14  ;;  %13121 = vmatprep.mubr.msk.f32.mxu0 %vm1229_vm0, %v230_v15  ;;  %v773_v14 = vld [vmem:[%s14872_s8 + $0x1218] sm:$0xff]  ;;  %v262_v15 = vld [vmem:[%s14872_s8 + $0x220] sm:$0xff] }
  0x61   : > { %13889 = vmatprep.mubr.msk.f32.mxu1 %vm1229_vm0, %v742_v16  ;;  %v774_v16 = vld [vmem:[%s14872_s8 + $0x1220] sm:$0xff] }
  0x63   : > { %13122 = vmatmul.mubr.msk.f32.gmra.mrb[36].mxu0 %vm1229_vm0, %v231_v17  ;;  %v263_v17 = vld [vmem:[%s14872_s8 + $0x228] sm:$0xff] }
  0x64   : > { %13890 = vmatmul.mubr.msk.f32.gmra.mrb[36].mxu1 %vm1229_vm0, %v743_v18  ;;  %13124 = vmatprep.mubr.msk.f32.mxu0 %vm1229_vm0, %v232_v19  ;;  %v775_v18 = vld [vmem:[%s14872_s8 + $0x1228] sm:$0xff]  ;;  %v264_v19 = vld [vmem:[%s14872_s8 + $0x230] sm:$0xff] }
  0x65   : > { %13892 = vmatprep.mubr.msk.f32.mxu1 %vm1229_vm0, %v744_v20  ;;  %v776_v20 = vld [vmem:[%s14872_s8 + $0x1230] sm:$0xff] }
  0x67   : > { %13125 = vmatmul.mubr.msk.f32.gmra.mrb[38].mxu0 %vm1229_vm0, %v233_v21  ;;  %v265_v21 = vld [vmem:[%s14872_s8 + $0x238] sm:$0xff] }
  0x68   : > { %13893 = vmatmul.mubr.msk.f32.gmra.mrb[38].mxu1 %vm1229_vm0, %v745_v22  ;;  %13127 = vmatprep.mubr.msk.f32.mxu0 %vm1229_vm0, %v234_v23  ;;  %v777_v22 = vld [vmem:[%s14872_s8 + $0x1238] sm:$0xff]  ;;  %v266_v23 = vld [vmem:[%s14872_s8 + $0x240] sm:$0xff] }
  0x69   : > { %13895 = vmatprep.mubr.msk.f32.mxu1 %vm1229_vm0, %v746_v24  ;;  %v778_v24 = vld [vmem:[%s14872_s8 + $0x1240] sm:$0xff] }
  0x6b   : > { %13128 = vmatmul.mubr.msk.f32.gmra.mrb[40].mxu0 %vm1229_vm0, %v235_v25  ;;  %v267_v25 = vld [vmem:[%s14872_s8 + $0x248] sm:$0xff] }
  0x6c   : > { %13896 = vmatmul.mubr.msk.f32.gmra.mrb[40].mxu1 %vm1229_vm0, %v747_v26  ;;  %13130 = vmatprep.mubr.msk.f32.mxu0 %vm1229_vm0, %v236_v27  ;;  %v779_v26 = vld [vmem:[%s14872_s8 + $0x1248] sm:$0xff]  ;;  %v268_v27 = vld [vmem:[%s14872_s8 + $0x250] sm:$0xff] }
  0x6d   : > { %13898 = vmatprep.mubr.msk.f32.mxu1 %vm1229_vm0, %v748_v28  ;;  %v780_v28 = vld [vmem:[%s14872_s8 + $0x1250] sm:$0xff] }
  0x6f   : > { %13131 = vmatmul.mubr.msk.f32.gmra.mrb[42].mxu0 %vm1229_vm0, %v237_v29  ;;  %v269_v29 = vld [vmem:[%s14872_s8 + $0x258] sm:$0xff] }
  0x70   : > { %13899 = vmatmul.mubr.msk.f32.gmra.mrb[42].mxu1 %vm1229_vm0, %v749_v30  ;;  %13133 = vmatprep.mubr.msk.f32.mxu0 %vm1229_vm0, %v238_v31  ;;  %v781_v30 = vld [vmem:[%s14872_s8 + $0x1258] sm:$0xff]  ;;  %v270_v31 = vld [vmem:[%s14872_s8 + $0x260] sm:$0xff] }
  0x71   : > { %13901 = vmatprep.mubr.msk.f32.mxu1 %vm1229_vm0, %v750_v32  ;;  %v782_v32 = vld [vmem:[%s14872_s8 + $0x1260] sm:$0xff] }
  0x73   : > { %13134 = vmatmul.mubr.msk.f32.gmra.mrb[44].mxu0 %vm1229_vm0, %v239_v33  ;;  %v271_v33 = vld [vmem:[%s14872_s8 + $0x268] sm:$0xff] }
  0x74   : > { %13902 = vmatmul.mubr.msk.f32.gmra.mrb[44].mxu1 %vm1229_vm0, %v751_v34  ;;  %13136 = vmatprep.mubr.msk.f32.mxu0 %vm1229_vm0, %v240_v35  ;;  %v783_v34 = vld [vmem:[%s14872_s8 + $0x1268] sm:$0xff]  ;;  %v272_v35 = vld [vmem:[%s14872_s8 + $0x270] sm:$0xff] }
  0x75   : > { %13904 = vmatprep.mubr.msk.f32.mxu1 %vm1229_vm0, %v752_v36  ;;  %v784_v36 = vld [vmem:[%s14872_s8 + $0x1270] sm:$0xff] }
  0x77   : > { %13137 = vmatmul.mubr.msk.f32.gmra.mrb[46].mxu0 %vm1229_vm0, %v241_v37  ;;  %v273_v37 = vld [vmem:[%s14872_s8 + $0x278] sm:$0xff] }
  0x78   : > { %13905 = vmatmul.mubr.msk.f32.gmra.mrb[46].mxu1 %vm1229_vm0, %v753_v38  ;;  %13139 = vmatprep.mubr.msk.f32.mxu0 %vm1229_vm0, %v242_v39  ;;  %v785_v38 = vld [vmem:[%s14872_s8 + $0x1278] sm:$0xff]  ;;  %v274_v39 = vld [vmem:[%s14872_s8 + $0x280] sm:$0xff] }
  0x79   : > { %13907 = vmatprep.mubr.msk.f32.mxu1 %vm1229_vm0, %v754_v40  ;;  %v786_v40 = vld [vmem:[%s14872_s8 + $0x1280] sm:$0xff] }
  0x7b   : > { %13140 = vmatmul.mubr.msk.f32.gmra.mrb[48].mxu0 %vm1229_vm0, %v243_v41  ;;  %v275_v41 = vld [vmem:[%s14872_s8 + $0x288] sm:$0xff] }
  0x7c   : > { %13908 = vmatmul.mubr.msk.f32.gmra.mrb[48].mxu1 %vm1229_vm0, %v755_v42  ;;  %13142 = vmatprep.mubr.msk.f32.mxu0 %vm1229_vm0, %v244_v43  ;;  %v787_v42 = vld [vmem:[%s14872_s8 + $0x1288] sm:$0xff]  ;;  %v276_v43 = vld [vmem:[%s14872_s8 + $0x290] sm:$0xff] }
  0x7d   : > { %13910 = vmatprep.mubr.msk.f32.mxu1 %vm1229_vm0, %v756_v44  ;;  %v788_v44 = vld [vmem:[%s14872_s8 + $0x1290] sm:$0xff] }
  0x7f   : > { %13143 = vmatmul.mubr.msk.f32.gmra.mrb[50].mxu0 %vm1229_vm0, %v245_v45  ;;  %v277_v45 = vld [vmem:[%s14872_s8 + $0x298] sm:$0xff] }
  0x80   : > { %13911 = vmatmul.mubr.msk.f32.gmra.mrb[50].mxu1 %vm1229_vm0, %v757_v46  ;;  %13145 = vmatprep.mubr.msk.f32.mxu0 %vm1229_vm0, %v246_v47  ;;  %v789_v46 = vld [vmem:[%s14872_s8 + $0x1298] sm:$0xff]  ;;  %v278_v47 = vld [vmem:[%s14872_s8 + $0x2a0] sm:$0xff] }
  0x81   : > { %13913 = vmatprep.mubr.msk.f32.mxu1 %vm1229_vm0, %v758_v48  ;;  %v790_v48 = vld [vmem:[%s14872_s8 + $0x12a0] sm:$0xff] }
  0x83   : > { %13146 = vmatmul.mubr.msk.f32.gmra.mrb[52].mxu0 %vm1229_vm0, %v247_v49  ;;  %v279_v49 = vld [vmem:[%s14872_s8 + $0x2a8] sm:$0xff] }
  0x84   : > { %13914 = vmatmul.mubr.msk.f32.gmra.mrb[52].mxu1 %vm1229_vm0, %v759_v50  ;;  %13148 = vmatprep.mubr.msk.f32.mxu0 %vm1229_vm0, %v248_v51  ;;  %v791_v50 = vld [vmem:[%s14872_s8 + $0x12a8] sm:$0xff]  ;;  %v280_v51 = vld [vmem:[%s14872_s8 + $0x2b0] sm:$0xff] }
  0x85   : > { %13916 = vmatprep.mubr.msk.f32.mxu1 %vm1229_vm0, %v760_v52  ;;  %v792_v52 = vld [vmem:[%s14872_s8 + $0x12b0] sm:$0xff] }
  0x87   : > { %13149 = vmatmul.mubr.msk.f32.gmra.mrb[54].mxu0 %vm1229_vm0, %v249_v53  ;;  %v281_v53 = vld [vmem:[%s14872_s8 + $0x2b8] sm:$0xff] }
  0x88   : > { %13917 = vmatmul.mubr.msk.f32.gmra.mrb[54].mxu1 %vm1229_vm0, %v761_v54  ;;  %13151 = vmatprep.mubr.msk.f32.mxu0 %vm1229_vm0, %v250_v55  ;;  %v793_v54 = vld [vmem:[%s14872_s8 + $0x12b8] sm:$0xff]  ;;  %v282_v55 = vld [vmem:[%s14872_s8 + $0x2c0] sm:$0xff] }
  0x89   : > { %13919 = vmatprep.mubr.msk.f32.mxu1 %vm1229_vm0, %v762_v56  ;;  %v794_v56 = vld [vmem:[%s14872_s8 + $0x12c0] sm:$0xff] }
  0x8b   : > { %13152 = vmatmul.mubr.msk.f32.gmra.mrb[56].mxu0 %vm1229_vm0, %v251_v57  ;;  %v283_v57 = vld [vmem:[%s14872_s8 + $0x2c8] sm:$0xff] }
  0x8c   : > { %13920 = vmatmul.mubr.msk.f32.gmra.mrb[56].mxu1 %vm1229_vm0, %v763_v58  ;;  %13154 = vmatprep.mubr.msk.f32.mxu0 %vm1229_vm0, %v252_v59  ;;  %v795_v58 = vld [vmem:[%s14872_s8 + $0x12c8] sm:$0xff]  ;;  %v284_v59 = vld [vmem:[%s14872_s8 + $0x2d0] sm:$0xff] }
  0x8d   : > { %13922 = vmatprep.mubr.msk.f32.mxu1 %vm1229_vm0, %v764_v60  ;;  %v796_v60 = vld [vmem:[%s14872_s8 + $0x12d0] sm:$0xff] }
  0x8f   : > { %13155 = vmatmul.mubr.msk.f32.gmra.mrb[58].mxu0 %vm1229_vm0, %v253_v61  ;;  %v285_v61 = vld [vmem:[%s14872_s8 + $0x2d8] sm:$0xff] }
  0x90   : > { %13923 = vmatmul.mubr.msk.f32.gmra.mrb[58].mxu1 %vm1229_vm0, %v765_v62  ;;  %13157 = vmatprep.mubr.msk.f32.mxu0 %vm1229_vm0, %v254_v63  ;;  %v797_v62 = vld [vmem:[%s14872_s8 + $0x12d8] sm:$0xff]  ;;  %v286_v63 = vld [vmem:[%s14872_s8 + $0x2e0] sm:$0xff] }
  0x91   : > { %13925 = vmatprep.mubr.msk.f32.mxu1 %vm1229_vm0, %v766_v0  ;;  %v798_v0 = vld [vmem:[%s14872_s8 + $0x12e0] sm:$0xff] }
  0x93   : > { %13158 = vmatmul.mubr.msk.f32.gmra.mrb[60].mxu0 %vm1229_vm0, %v255_v1  ;;  %v287_v1 = vld [vmem:[%s14872_s8 + $0x2e8] sm:$0xff] }
  0x94   : > { %13926 = vmatmul.mubr.msk.f32.gmra.mrb[60].mxu1 %vm1229_vm0, %v767_v2  ;;  %13160 = vmatprep.mubr.msk.f32.mxu0 %vm1229_vm0, %v256_v3  ;;  %v799_v2 = vld [vmem:[%s14872_s8 + $0x12e8] sm:$0xff]  ;;  %v288_v3 = vld [vmem:[%s14872_s8 + $0x2f0] sm:$0xff] }
  0x95   : > { %13928 = vmatprep.mubr.msk.f32.mxu1 %vm1229_vm0, %v768_v4  ;;  %v800_v4 = vld [vmem:[%s14872_s8 + $0x12f0] sm:$0xff] }
  0x97   : > { %13161 = vmatmul.mubr.msk.f32.gmra.mrb[62].mxu0 %vm1229_vm0, %v257_v5  ;;  %v289_v5 = vld [vmem:[%s14872_s8 + $0x2f8] sm:$0xff] }
  0x98   : > { %13929 = vmatmul.mubr.msk.f32.gmra.mrb[62].mxu1 %vm1229_vm0, %v769_v6  ;;  %13163 = vmatprep.mubr.msk.f32.mxu0 %vm1229_vm0, %v258_v7  ;;  %v801_v6 = vld [vmem:[%s14872_s8 + $0x12f8] sm:$0xff]  ;;  %v290_v7 = vld [vmem:[%s14872_s8 + $0x300] sm:$0xff] }
  0x99   : > { %13931 = vmatprep.mubr.msk.f32.mxu1 %vm1229_vm0, %v770_v8  ;;  %v802_v8 = vld [vmem:[%s14872_s8 + $0x1300] sm:$0xff] }
  0x9b   : > { %13164 = vmatmul.mubr.msk.f32.gmra.mrb[64].mxu0 %vm1229_vm0, %v259_v9  ;;  %v291_v9 = vld [vmem:[%s14872_s8 + $0x308] sm:$0xff] }
  0x9c   : > { %13932 = vmatmul.mubr.msk.f32.gmra.mrb[64].mxu1 %vm1229_vm0, %v771_v10  ;;  %13166 = vmatprep.mubr.msk.f32.mxu0 %vm1229_vm0, %v260_v11  ;;  %v803_v10 = vld [vmem:[%s14872_s8 + $0x1308] sm:$0xff]  ;;  %v292_v11 = vld [vmem:[%s14872_s8 + $0x310] sm:$0xff] }
  0x9d   : > { %13934 = vmatprep.mubr.msk.f32.mxu1 %vm1229_vm0, %v772_v12  ;;  %v804_v12 = vld [vmem:[%s14872_s8 + $0x1310] sm:$0xff] }
  0x9f   : > { %13167 = vmatmul.mubr.msk.f32.gmra.mrb[66].mxu0 %vm1229_vm0, %v261_v13  ;;  %v293_v13 = vld [vmem:[%s14872_s8 + $0x318] sm:$0xff] }
  0xa0   : > { %13935 = vmatmul.mubr.msk.f32.gmra.mrb[66].mxu1 %vm1229_vm0, %v773_v14  ;;  %13169 = vmatprep.mubr.msk.f32.mxu0 %vm1229_vm0, %v262_v15  ;;  %v805_v14 = vld [vmem:[%s14872_s8 + $0x1318] sm:$0xff]  ;;  %v294_v15 = vld [vmem:[%s14872_s8 + $0x320] sm:$0xff] }
  0xa1   : > { %13937 = vmatprep.mubr.msk.f32.mxu1 %vm1229_vm0, %v774_v16  ;;  %v806_v16 = vld [vmem:[%s14872_s8 + $0x1320] sm:$0xff] }
  0xa3   : > { %13170 = vmatmul.mubr.msk.f32.gmra.mrb[68].mxu0 %vm1229_vm0, %v263_v17  ;;  %v295_v17 = vld [vmem:[%s14872_s8 + $0x328] sm:$0xff] }
  0xa4   : > { %13938 = vmatmul.mubr.msk.f32.gmra.mrb[68].mxu1 %vm1229_vm0, %v775_v18  ;;  %13172 = vmatprep.mubr.msk.f32.mxu0 %vm1229_vm0, %v264_v19  ;;  %v807_v18 = vld [vmem:[%s14872_s8 + $0x1328] sm:$0xff]  ;;  %v296_v19 = vld [vmem:[%s14872_s8 + $0x330] sm:$0xff] }
  0xa5   : > { %13940 = vmatprep.mubr.msk.f32.mxu1 %vm1229_vm0, %v776_v20  ;;  %v808_v20 = vld [vmem:[%s14872_s8 + $0x1330] sm:$0xff] }
  0xa7   : > { %13173 = vmatmul.mubr.msk.f32.gmra.mrb[70].mxu0 %vm1229_vm0, %v265_v21  ;;  %v297_v21 = vld [vmem:[%s14872_s8 + $0x338] sm:$0xff] }
  0xa8   : > { %13941 = vmatmul.mubr.msk.f32.gmra.mrb[70].mxu1 %vm1229_vm0, %v777_v22  ;;  %13175 = vmatprep.mubr.msk.f32.mxu0 %vm1229_vm0, %v266_v23  ;;  %v809_v22 = vld [vmem:[%s14872_s8 + $0x1338] sm:$0xff]  ;;  %v298_v23 = vld [vmem:[%s14872_s8 + $0x340] sm:$0xff] }
  0xa9   : > { %13943 = vmatprep.mubr.msk.f32.mxu1 %vm1229_vm0, %v778_v24  ;;  %v810_v24 = vld [vmem:[%s14872_s8 + $0x1340] sm:$0xff] }
  0xab   : > { %13176 = vmatmul.mubr.msk.f32.gmra.mrb[72].mxu0 %vm1229_vm0, %v267_v25  ;;  %v299_v25 = vld [vmem:[%s14872_s8 + $0x348] sm:$0xff] }
  0xac   : > { %13944 = vmatmul.mubr.msk.f32.gmra.mrb[72].mxu1 %vm1229_vm0, %v779_v26  ;;  %13178 = vmatprep.mubr.msk.f32.mxu0 %vm1229_vm0, %v268_v27  ;;  %v811_v26 = vld [vmem:[%s14872_s8 + $0x1348] sm:$0xff]  ;;  %v300_v27 = vld [vmem:[%s14872_s8 + $0x350] sm:$0xff] }
  0xad   : > { %13946 = vmatprep.mubr.msk.f32.mxu1 %vm1229_vm0, %v780_v28  ;;  %v812_v28 = vld [vmem:[%s14872_s8 + $0x1350] sm:$0xff] }
  0xaf   : > { %13179 = vmatmul.mubr.msk.f32.gmra.mrb[74].mxu0 %vm1229_vm0, %v269_v29  ;;  %v15301_v29 = vld [vmem:[#allocation2] ss:$0 sm:$0xff] }
  0xb0   : > { %13947 = vmatmul.mubr.msk.f32.gmra.mrb[74].mxu1 %vm1229_vm0, %v781_v30  ;;  %13181 = vmatprep.mubr.msk.f32.mxu0 %vm1229_vm0, %v270_v31  ;;  %v301_v30 = vld [vmem:[%s14872_s8 + $0x358] sm:$0xff] }
  0xb1   : > { %13949 = vmatprep.mubr.msk.f32.mxu1 %vm1229_vm0, %v782_v32  ;;  %v813_v31 = vld [vmem:[%s14872_s8 + $0x1358] sm:$0xff]  ;;  %v302_v32 = vld [vmem:[%s14872_s8 + $0x360] sm:$0xff] }
  0xb3   : > { %13182 = vmatmul.mubr.msk.f32.gmra.mrb[76].mxu0 %vm1229_vm0, %v271_v33  ;;  %v814_v33 = vld [vmem:[%s14872_s8 + $0x1360] sm:$0xff] }
  0xb4   : > { %13950 = vmatmul.mubr.msk.f32.gmra.mrb[76].mxu1 %vm1229_vm0, %v783_v34  ;;  %13184 = vmatprep.mubr.msk.f32.mxu0 %vm1229_vm0, %v272_v35 }
  0xb5   : > { %13952 = vmatprep.mubr.msk.f32.mxu1 %vm1229_vm0, %v784_v36 }
  0xb7   : > { %13185 = vmatmul.mubr.msk.f32.gmra.mrb[78].mxu0 %vm1229_vm0, %v273_v37 }
  0xb8   : > { %13953 = vmatmul.mubr.msk.f32.gmra.mrb[78].mxu1 %vm1229_vm0, %v785_v38  ;;  %13187 = vmatprep.mubr.msk.f32.mxu0 %vm1229_vm0, %v274_v39 }
  0xb9   : > { %13955 = vmatprep.mubr.msk.f32.mxu1 %vm1229_vm0, %v786_v40 }
  0xbb   : > { %13188 = vmatmul.mubr.msk.f32.gmra.mrb[80].mxu0 %vm1229_vm0, %v275_v41 }
  0xbc   : > { %13956 = vmatmul.mubr.msk.f32.gmra.mrb[80].mxu1 %vm1229_vm0, %v787_v42  ;;  %13190 = vmatprep.mubr.msk.f32.mxu0 %vm1229_vm0, %v276_v43  ;;  %v303_v42 = vld [vmem:[%s14872_s8 + $0x368] sm:$0xff] }
  0xbd   : > { %13958 = vmatprep.mubr.msk.f32.mxu1 %vm1229_vm0, %v788_v44  ;;  %v815_v43 = vld [vmem:[%s14872_s8 + $0x1368] sm:$0xff]  ;;  %v304_v44 = vld [vmem:[%s14872_s8 + $0x370] sm:$0xff] }
  0xbf   : > { %13191 = vmatmul.mubr.msk.f32.gmra.mrb[82].mxu0 %vm1229_vm0, %v277_v45  ;;  %v816_v45 = vld [vmem:[%s14872_s8 + $0x1370] sm:$0xff] }
  0xc0   : > { %13959 = vmatmul.mubr.msk.f32.gmra.mrb[82].mxu1 %vm1229_vm0, %v789_v46  ;;  %13193 = vmatprep.mubr.msk.f32.mxu0 %vm1229_vm0, %v278_v47 }
  0xc1   : > { %13961 = vmatprep.mubr.msk.f32.mxu1 %vm1229_vm0, %v790_v48 }
  0xc3   : > { %13194 = vmatmul.mubr.msk.f32.gmra.mrb[84].mxu0 %vm1229_vm0, %v279_v49 }
  0xc4   : > { %13962 = vmatmul.mubr.msk.f32.gmra.mrb[84].mxu1 %vm1229_vm0, %v791_v50  ;;  %13196 = vmatprep.mubr.msk.f32.mxu0 %vm1229_vm0, %v280_v51 }
  0xc5   : > { %13964 = vmatprep.mubr.msk.f32.mxu1 %vm1229_vm0, %v792_v52 }
  0xc7   : > { %13197 = vmatmul.mubr.msk.f32.gmra.mrb[86].mxu0 %vm1229_vm0, %v281_v53 }
  0xc8   : > { %13965 = vmatmul.mubr.msk.f32.gmra.mrb[86].mxu1 %vm1229_vm0, %v793_v54  ;;  %13199 = vmatprep.mubr.msk.f32.mxu0 %vm1229_vm0, %v282_v55  ;;  %v305_v54 = vld [vmem:[%s14872_s8 + $0x378] sm:$0xff] }
  0xc9   : > { %13967 = vmatprep.mubr.msk.f32.mxu1 %vm1229_vm0, %v794_v56  ;;  %v817_v55 = vld [vmem:[%s14872_s8 + $0x1378] sm:$0xff]  ;;  %v306_v56 = vld [vmem:[%s14872_s8 + $0x380] sm:$0xff] }
  0xcb   : > { %13200 = vmatmul.mubr.msk.f32.gmra.mrb[88].mxu0 %vm1229_vm0, %v283_v57  ;;  %v818_v57 = vld [vmem:[%s14872_s8 + $0x1380] sm:$0xff] }
  0xcc   : > { %13968 = vmatmul.mubr.msk.f32.gmra.mrb[88].mxu1 %vm1229_vm0, %v795_v58  ;;  %13202 = vmatprep.mubr.msk.f32.mxu0 %vm1229_vm0, %v284_v59 }
  0xcd   : > { %13970 = vmatprep.mubr.msk.f32.mxu1 %vm1229_vm0, %v796_v60 }
  0xcf   : > { %13203 = vmatmul.mubr.msk.f32.gmra.mrb[90].mxu0 %vm1229_vm0, %v285_v61 }
  0xd0   : > { %13971 = vmatmul.mubr.msk.f32.gmra.mrb[90].mxu1 %vm1229_vm0, %v797_v62  ;;  %13205 = vmatprep.mubr.msk.f32.mxu0 %vm1229_vm0, %v286_v63 }
  0xd1   : > { %13973 = vmatprep.mubr.msk.f32.mxu1 %vm1229_vm0, %v798_v0 }
  0xd3   : > { %13206 = vmatmul.mubr.msk.f32.gmra.mrb[92].mxu0 %vm1229_vm0, %v287_v1 }
  0xd4   : > { %13974 = vmatmul.mubr.msk.f32.gmra.mrb[92].mxu1 %vm1229_vm0, %v799_v2  ;;  %13208 = vmatprep.mubr.msk.f32.mxu0 %vm1229_vm0, %v288_v3  ;;  %v307_v2 = vld [vmem:[%s14872_s8 + $0x388] sm:$0xff] }
  0xd5   : > { %13976 = vmatprep.mubr.msk.f32.mxu1 %vm1229_vm0, %v800_v4  ;;  %v819_v3 = vld [vmem:[%s14872_s8 + $0x1388] sm:$0xff]  ;;  %v308_v4 = vld [vmem:[%s14872_s8 + $0x390] sm:$0xff] }
  0xd7   : > { %13209 = vmatmul.mubr.msk.f32.gmra.mrb[94].mxu0 %vm1229_vm0, %v289_v5  ;;  %v820_v5 = vld [vmem:[%s14872_s8 + $0x1390] sm:$0xff] }
  0xd8   : > { %13977 = vmatmul.mubr.msk.f32.gmra.mrb[94].mxu1 %vm1229_vm0, %v801_v6  ;;  %13211 = vmatprep.mubr.msk.f32.mxu0 %vm1229_vm0, %v290_v7 }
  0xd9   : > { %13979 = vmatprep.mubr.msk.f32.mxu1 %vm1229_vm0, %v802_v8 }
  0xdb   : > { %13212 = vmatmul.mubr.msk.f32.gmra.mrb[96].mxu0 %vm1229_vm0, %v291_v9 }
  0xdc   : > { %13980 = vmatmul.mubr.msk.f32.gmra.mrb[96].mxu1 %vm1229_vm0, %v803_v10  ;;  %13214 = vmatprep.mubr.msk.f32.mxu0 %vm1229_vm0, %v292_v11 }
  0xdd   : > { %13982 = vmatprep.mubr.msk.f32.mxu1 %vm1229_vm0, %v804_v12 }
  0xdf   : > { %13215 = vmatmul.mubr.msk.f32.gmra.mrb[98].mxu0 %vm1229_vm0, %v293_v13 }
  0xe0   : > { %13983 = vmatmul.mubr.msk.f32.gmra.mrb[98].mxu1 %vm1229_vm0, %v805_v14  ;;  %13217 = vmatprep.mubr.msk.f32.mxu0 %vm1229_vm0, %v294_v15  ;;  %v309_v14 = vld [vmem:[%s14872_s8 + $0x398] sm:$0xff] }
  0xe1   : > { %13985 = vmatprep.mubr.msk.f32.mxu1 %vm1229_vm0, %v806_v16  ;;  %v821_v15 = vld [vmem:[%s14872_s8 + $0x1398] sm:$0xff]  ;;  %v310_v16 = vld [vmem:[%s14872_s8 + $0x3a0] sm:$0xff] }
  0xe3   : > { %13218 = vmatmul.mubr.msk.f32.gmra.mrb[100].mxu0 %vm1229_vm0, %v295_v17  ;;  %v822_v17 = vld [vmem:[%s14872_s8 + $0x13a0] sm:$0xff] }
  0xe4   : > { %13986 = vmatmul.mubr.msk.f32.gmra.mrb[100].mxu1 %vm1229_vm0, %v807_v18  ;;  %13220 = vmatprep.mubr.msk.f32.mxu0 %vm1229_vm0, %v296_v19 }
  0xe5   : > { %13988 = vmatprep.mubr.msk.f32.mxu1 %vm1229_vm0, %v808_v20 }
  0xe7   : > { %13221 = vmatmul.mubr.msk.f32.gmra.mrb[102].mxu0 %vm1229_vm0, %v297_v21 }
  0xe8   : > { %13989 = vmatmul.mubr.msk.f32.gmra.mrb[102].mxu1 %vm1229_vm0, %v809_v22  ;;  %13223 = vmatprep.mubr.msk.f32.mxu0 %vm1229_vm0, %v298_v23 }
  0xe9   : > { %13991 = vmatprep.mubr.msk.f32.mxu1 %vm1229_vm0, %v810_v24 }
  0xeb   : > { %13224 = vmatmul.mubr.msk.f32.gmra.mrb[104].mxu0 %vm1229_vm0, %v299_v25 }
  0xec   : > { %13992 = vmatmul.mubr.msk.f32.gmra.mrb[104].mxu1 %vm1229_vm0, %v811_v26  ;;  %13226 = vmatprep.mubr.msk.f32.mxu0 %vm1229_vm0, %v300_v27  ;;  %v311_v26 = vld [vmem:[%s14872_s8 + $0x3a8] sm:$0xff] }
  0xed   : > { %13994 = vmatprep.mubr.msk.f32.mxu1 %vm1229_vm0, %v812_v28  ;;  %v823_v27 = vld [vmem:[%s14872_s8 + $0x13a8] sm:$0xff]  ;;  %v312_v28 = vld [vmem:[%s14872_s8 + $0x3b0] sm:$0xff] }
  0xee   : > { %v13069_v34 = vpop.f32.mrb[0].mxu0 }
  0xef   : > { %v13837_v35 = vpop.f32.mrb[0].mxu1  ;;  %v4374_v36 = vadd.f32 %v13069_v34, %v15301_v29  ;;  %v4368_v38 = vpop.f32.mrb[1].mxu0  ;;  %13227 = vmatmul.mubr.msk.f32.gmra.mrb[106].mxu0 %vm1229_vm0, %v301_v30  ;;  %v824_v30 = vld [vmem:[%s14872_s8 + $0x13b0] sm:$0xff] }
  0xf0   : > { %v6934_v37 = vadd.f32 %v13837_v35, %v15301_v29  ;;  %v6928_v39 = vpop.f32.mrb[1].mxu1  ;;  %13995 = vmatmul.mubr.msk.f32.gmra.mrb[106].mxu1 %vm1229_vm0, %v813_v31  ;;  %v4369_v40 = vadd.f32 %v15301_v29, %v4368_v38  ;;  %13229 = vmatprep.mubr.msk.f32.mxu0 %vm1229_vm0, %v302_v32 }
  0xf1   : > { %v6929_v41 = vadd.f32 %v15301_v29, %v6928_v39  ;;  %13997 = vmatprep.mubr.msk.f32.mxu1 %vm1229_vm0, %v814_v33  ;;  %9489 = vst.msk [vmem:[%s15319_s11 + $0x8] sm:$0xff] %vm9487_vm1, %v4374_v36  ;;  %v313_v39 = vld [vmem:[%s14872_s8 + $0x3b8] sm:$0xff] }
  0xf2   : > { %10001 = vst.msk [vmem:[%s15319_s11 + $0x1008] sm:$0xff] %vm9487_vm1, %v6934_v37  ;;  %9488 = vst.msk [vmem:[%s15319_s11] sm:$0xff] %vm9487_vm1, %v4369_v40  ;;  %v13072_v46 = vpop.f32.mrb[2].mxu0  ;;  %v825_v40 = vld [vmem:[%s14872_s8 + $0x13b8] sm:$0xff] }
  0xf3   : > { %10000 = vst.msk [vmem:[%s15319_s11 + $0x1000] sm:$0xff] %vm9487_vm1, %v6929_v41  ;;  %v13840_v47 = vpop.f32.mrb[2].mxu1  ;;  %v4384_v48 = vadd.f32 %v13072_v46, %v15301_v29  ;;  %v4378_v50 = vpop.f32.mrb[3].mxu0  ;;  %13230 = vmatmul.mubr.msk.f32.gmra.mrb[108].mxu0 %vm1229_vm0, %v303_v42  ;;  %v314_v41 = vld [vmem:[%s14872_s8 + $0x3c0] sm:$0xff] }
  0xf4   : > { %v6944_v49 = vadd.f32 %v13840_v47, %v15301_v29  ;;  %v6938_v51 = vpop.f32.mrb[3].mxu1  ;;  %13998 = vmatmul.mubr.msk.f32.gmra.mrb[108].mxu1 %vm1229_vm0, %v815_v43  ;;  %v4379_v52 = vadd.f32 %v15301_v29, %v4378_v50  ;;  %13232 = vmatprep.mubr.msk.f32.mxu0 %vm1229_vm0, %v304_v44  ;;  %v826_v42 = vld [vmem:[%s14872_s8 + $0x13c0] sm:$0xff] }
  0xf5   : > { %v6939_v53 = vadd.f32 %v15301_v29, %v6938_v51  ;;  %14000 = vmatprep.mubr.msk.f32.mxu1 %vm1229_vm0, %v816_v45  ;;  %9491 = vst.msk [vmem:[%s15319_s11 + $0x18] sm:$0xff] %vm9487_vm1, %v4384_v48  ;;  %v315_v51 = vld [vmem:[%s14872_s8 + $0x3c8] sm:$0xff] }
  0xf6   : > { %10003 = vst.msk [vmem:[%s15319_s11 + $0x1018] sm:$0xff] %vm9487_vm1, %v6944_v49  ;;  %9490 = vst.msk [vmem:[%s15319_s11 + $0x10] sm:$0xff] %vm9487_vm1, %v4379_v52  ;;  %v13075_v58 = vpop.f32.mrb[4].mxu0  ;;  %v827_v52 = vld [vmem:[%s14872_s8 + $0x13c8] sm:$0xff] }
  0xf7   : > { %10002 = vst.msk [vmem:[%s15319_s11 + $0x1010] sm:$0xff] %vm9487_vm1, %v6939_v53  ;;  %v13843_v59 = vpop.f32.mrb[4].mxu1  ;;  %v4394_v60 = vadd.f32 %v13075_v58, %v15301_v29  ;;  %v4388_v62 = vpop.f32.mrb[5].mxu0  ;;  %13233 = vmatmul.mubr.msk.f32.gmra.mrb[110].mxu0 %vm1229_vm0, %v305_v54  ;;  %v316_v53 = vld [vmem:[%s14872_s8 + $0x3d0] sm:$0xff] }
  0xf8   : > { %v6954_v61 = vadd.f32 %v13843_v59, %v15301_v29  ;;  %v6948_v63 = vpop.f32.mrb[5].mxu1  ;;  %14001 = vmatmul.mubr.msk.f32.gmra.mrb[110].mxu1 %vm1229_vm0, %v817_v55  ;;  %v4389_v0 = vadd.f32 %v15301_v29, %v4388_v62  ;;  %13235 = vmatprep.mubr.msk.f32.mxu0 %vm1229_vm0, %v306_v56  ;;  %v828_v54 = vld [vmem:[%s14872_s8 + $0x13d0] sm:$0xff] }
  0xf9   : > { %v6949_v1 = vadd.f32 %v15301_v29, %v6948_v63  ;;  %14003 = vmatprep.mubr.msk.f32.mxu1 %vm1229_vm0, %v818_v57  ;;  %9493 = vst.msk [vmem:[%s15319_s11 + $0x28] sm:$0xff] %vm9487_vm1, %v4394_v60  ;;  %v317_v63 = vld [vmem:[%s14872_s8 + $0x3d8] sm:$0xff] }
  0xfa   : > { %10005 = vst.msk [vmem:[%s15319_s11 + $0x1028] sm:$0xff] %vm9487_vm1, %v6954_v61  ;;  %9492 = vst.msk [vmem:[%s15319_s11 + $0x20] sm:$0xff] %vm9487_vm1, %v4389_v0  ;;  %v13078_v6 = vpop.f32.mrb[6].mxu0  ;;  %v829_v0 = vld [vmem:[%s14872_s8 + $0x13d8] sm:$0xff] }
  0xfb   : > { %10004 = vst.msk [vmem:[%s15319_s11 + $0x1020] sm:$0xff] %vm9487_vm1, %v6949_v1  ;;  %v13846_v7 = vpop.f32.mrb[6].mxu1  ;;  %v4404_v8 = vadd.f32 %v13078_v6, %v15301_v29  ;;  %v4398_v10 = vpop.f32.mrb[7].mxu0  ;;  %13236 = vmatmul.mubr.msk.f32.gmra.mrb[112].mxu0 %vm1229_vm0, %v307_v2  ;;  %v318_v1 = vld [vmem:[%s14872_s8 + $0x3e0] sm:$0xff] }
  0xfc   : > { %v6964_v9 = vadd.f32 %v13846_v7, %v15301_v29  ;;  %v6958_v11 = vpop.f32.mrb[7].mxu1  ;;  %14004 = vmatmul.mubr.msk.f32.gmra.mrb[112].mxu1 %vm1229_vm0, %v819_v3  ;;  %v4399_v12 = vadd.f32 %v15301_v29, %v4398_v10  ;;  %13238 = vmatprep.mubr.msk.f32.mxu0 %vm1229_vm0, %v308_v4  ;;  %v830_v2 = vld [vmem:[%s14872_s8 + $0x13e0] sm:$0xff] }
  0xfd   : > { %v6959_v13 = vadd.f32 %v15301_v29, %v6958_v11  ;;  %14006 = vmatprep.mubr.msk.f32.mxu1 %vm1229_vm0, %v820_v5  ;;  %9495 = vst.msk [vmem:[%s15319_s11 + $0x38] sm:$0xff] %vm9487_vm1, %v4404_v8  ;;  %v319_v11 = vld [vmem:[%s14872_s8 + $0x3e8] sm:$0xff] }
  0xfe   : > { %10007 = vst.msk [vmem:[%s15319_s11 + $0x1038] sm:$0xff] %vm9487_vm1, %v6964_v9  ;;  %9494 = vst.msk [vmem:[%s15319_s11 + $0x30] sm:$0xff] %vm9487_vm1, %v4399_v12  ;;  %v13081_v18 = vpop.f32.mrb[8].mxu0  ;;  %v831_v12 = vld [vmem:[%s14872_s8 + $0x13e8] sm:$0xff] }
  0xff   : > { %10006 = vst.msk [vmem:[%s15319_s11 + $0x1030] sm:$0xff] %vm9487_vm1, %v6959_v13  ;;  %v13849_v19 = vpop.f32.mrb[8].mxu1  ;;  %v4414_v20 = vadd.f32 %v13081_v18, %v15301_v29  ;;  %v4408_v22 = vpop.f32.mrb[9].mxu0  ;;  %13239 = vmatmul.mubr.msk.f32.gmra.mrb[114].mxu0 %vm1229_vm0, %v309_v14  ;;  %v320_v13 = vld [vmem:[%s14872_s8 + $0x3f0] sm:$0xff] }
 0x100   : > { %v6974_v21 = vadd.f32 %v13849_v19, %v15301_v29  ;;  %v6968_v23 = vpop.f32.mrb[9].mxu1  ;;  %14007 = vmatmul.mubr.msk.f32.gmra.mrb[114].mxu1 %vm1229_vm0, %v821_v15  ;;  %v4409_v24 = vadd.f32 %v15301_v29, %v4408_v22  ;;  %13241 = vmatprep.mubr.msk.f32.mxu0 %vm1229_vm0, %v310_v16  ;;  %v832_v14 = vld [vmem:[%s14872_s8 + $0x13f0] sm:$0xff] }
 0x101   : > { %v6969_v25 = vadd.f32 %v15301_v29, %v6968_v23  ;;  %14009 = vmatprep.mubr.msk.f32.mxu1 %vm1229_vm0, %v822_v17  ;;  %9497 = vst.msk [vmem:[%s15319_s11 + $0x48] sm:$0xff] %vm9487_vm1, %v4414_v20  ;;  %v321_v23 = vld [vmem:[%s14872_s8 + $0x3f8] sm:$0xff] }
 0x102   : > { %10009 = vst.msk [vmem:[%s15319_s11 + $0x1048] sm:$0xff] %vm9487_vm1, %v6974_v21  ;;  %9496 = vst.msk [vmem:[%s15319_s11 + $0x40] sm:$0xff] %vm9487_vm1, %v4409_v24  ;;  %v13084_v31 = vpop.f32.mrb[10].mxu0  ;;  %v833_v24 = vld [vmem:[%s14872_s8 + $0x13f8] sm:$0xff] }
 0x103   : > { %10008 = vst.msk [vmem:[%s15319_s11 + $0x1040] sm:$0xff] %vm9487_vm1, %v6969_v25  ;;  %v13852_v32 = vpop.f32.mrb[10].mxu1  ;;  %v4424_v33 = vadd.f32 %v13084_v31, %v15301_v29  ;;  %v4418_v35 = vpop.f32.mrb[11].mxu0  ;;  %13242 = vmatmul.mubr.msk.f32.gmra.mrb[116].mxu0 %vm1229_vm0, %v311_v26  ;;  %v322_v25 = vld [vmem:[%s14872_s8 + $0x400] sm:$0xff] }
 0x104   : > { %v6984_v34 = vadd.f32 %v13852_v32, %v15301_v29  ;;  %v6978_v36 = vpop.f32.mrb[11].mxu1  ;;  %14010 = vmatmul.mubr.msk.f32.gmra.mrb[116].mxu1 %vm1229_vm0, %v823_v27  ;;  %v4419_v37 = vadd.f32 %v15301_v29, %v4418_v35  ;;  %13244 = vmatprep.mubr.msk.f32.mxu0 %vm1229_vm0, %v312_v28  ;;  %v834_v26 = vld [vmem:[%s14872_s8 + $0x1400] sm:$0xff] }
 0x105   : > { %v6979_v38 = vadd.f32 %v15301_v29, %v6978_v36  ;;  %14012 = vmatprep.mubr.msk.f32.mxu1 %vm1229_vm0, %v824_v30  ;;  %9499 = vst.msk [vmem:[%s15319_s11 + $0x58] sm:$0xff] %vm9487_vm1, %v4424_v33  ;;  %v323_v36 = vld [vmem:[%s14872_s8 + $0x408] sm:$0xff] }
 0x106   : > { %10011 = vst.msk [vmem:[%s15319_s11 + $0x1058] sm:$0xff] %vm9487_vm1, %v6984_v34  ;;  %9498 = vst.msk [vmem:[%s15319_s11 + $0x50] sm:$0xff] %vm9487_vm1, %v4419_v37  ;;  %v13087_v43 = vpop.f32.mrb[12].mxu0  ;;  %v835_v37 = vld [vmem:[%s14872_s8 + $0x1408] sm:$0xff] }
 0x107   : > { %10010 = vst.msk [vmem:[%s15319_s11 + $0x1050] sm:$0xff] %vm9487_vm1, %v6979_v38  ;;  %v13855_v44 = vpop.f32.mrb[12].mxu1  ;;  %v4434_v45 = vadd.f32 %v13087_v43, %v15301_v29  ;;  %v4428_v47 = vpop.f32.mrb[13].mxu0  ;;  %13245 = vmatmul.mubr.msk.f32.gmra.mrb[118].mxu0 %vm1229_vm0, %v313_v39  ;;  %v324_v38 = vld [vmem:[%s14872_s8 + $0x410] sm:$0xff] }
 0x108   : > { %v6994_v46 = vadd.f32 %v13855_v44, %v15301_v29  ;;  %v6988_v48 = vpop.f32.mrb[13].mxu1  ;;  %14013 = vmatmul.mubr.msk.f32.gmra.mrb[118].mxu1 %vm1229_vm0, %v825_v40  ;;  %v4429_v49 = vadd.f32 %v15301_v29, %v4428_v47  ;;  %13247 = vmatprep.mubr.msk.f32.mxu0 %vm1229_vm0, %v314_v41  ;;  %v836_v39 = vld [vmem:[%s14872_s8 + $0x1410] sm:$0xff] }
 0x109   : > { %v6989_v50 = vadd.f32 %v15301_v29, %v6988_v48  ;;  %14015 = vmatprep.mubr.msk.f32.mxu1 %vm1229_vm0, %v826_v42  ;;  %9501 = vst.msk [vmem:[%s15319_s11 + $0x68] sm:$0xff] %vm9487_vm1, %v4434_v45  ;;  %v325_v48 = vld [vmem:[%s14872_s8 + $0x418] sm:$0xff] }
 0x10a   : > { %10013 = vst.msk [vmem:[%s15319_s11 + $0x1068] sm:$0xff] %vm9487_vm1, %v6994_v46  ;;  %9500 = vst.msk [vmem:[%s15319_s11 + $0x60] sm:$0xff] %vm9487_vm1, %v4429_v49  ;;  %v13090_v55 = vpop.f32.mrb[14].mxu0  ;;  %v837_v49 = vld [vmem:[%s14872_s8 + $0x1418] sm:$0xff] }
 0x10b   : > { %10012 = vst.msk [vmem:[%s15319_s11 + $0x1060] sm:$0xff] %vm9487_vm1, %v6989_v50  ;;  %v13858_v56 = vpop.f32.mrb[14].mxu1  ;;  %v4444_v57 = vadd.f32 %v13090_v55, %v15301_v29  ;;  %v4438_v59 = vpop.f32.mrb[15].mxu0  ;;  %13248 = vmatmul.mubr.msk.f32.gmra.mrb[120].mxu0 %vm1229_vm0, %v315_v51  ;;  %v326_v50 = vld [vmem:[%s14872_s8 + $0x420] sm:$0xff] }
 0x10c   : > { %v7004_v58 = vadd.f32 %v13858_v56, %v15301_v29  ;;  %v6998_v60 = vpop.f32.mrb[15].mxu1  ;;  %14016 = vmatmul.mubr.msk.f32.gmra.mrb[120].mxu1 %vm1229_vm0, %v827_v52  ;;  %v4439_v61 = vadd.f32 %v15301_v29, %v4438_v59  ;;  %13250 = vmatprep.mubr.msk.f32.mxu0 %vm1229_vm0, %v316_v53  ;;  %v838_v51 = vld [vmem:[%s14872_s8 + $0x1420] sm:$0xff] }
 0x10d   : > { %v6999_v62 = vadd.f32 %v15301_v29, %v6998_v60  ;;  %14018 = vmatprep.mubr.msk.f32.mxu1 %vm1229_vm0, %v828_v54  ;;  %9503 = vst.msk [vmem:[%s15319_s11 + $0x78] sm:$0xff] %vm9487_vm1, %v4444_v57  ;;  %v327_v60 = vld [vmem:[%s14872_s8 + $0x428] sm:$0xff] }
 0x10e   : > { %10015 = vst.msk [vmem:[%s15319_s11 + $0x1078] sm:$0xff] %vm9487_vm1, %v7004_v58  ;;  %9502 = vst.msk [vmem:[%s15319_s11 + $0x70] sm:$0xff] %vm9487_vm1, %v4439_v61  ;;  %v13093_v3 = vpop.f32.mrb[16].mxu0  ;;  %v839_v61 = vld [vmem:[%s14872_s8 + $0x1428] sm:$0xff] }
 0x10f   : > { %10014 = vst.msk [vmem:[%s15319_s11 + $0x1070] sm:$0xff] %vm9487_vm1, %v6999_v62  ;;  %v13861_v4 = vpop.f32.mrb[16].mxu1  ;;  %v4454_v5 = vadd.f32 %v13093_v3, %v15301_v29  ;;  %v4448_v7 = vpop.f32.mrb[17].mxu0  ;;  %13251 = vmatmul.mubr.msk.f32.gmra.mrb[122].mxu0 %vm1229_vm0, %v317_v63  ;;  %v328_v62 = vld [vmem:[%s14872_s8 + $0x430] sm:$0xff] }
 0x110   : > { %v7014_v6 = vadd.f32 %v13861_v4, %v15301_v29  ;;  %v7008_v8 = vpop.f32.mrb[17].mxu1  ;;  %14019 = vmatmul.mubr.msk.f32.gmra.mrb[122].mxu1 %vm1229_vm0, %v829_v0  ;;  %v4449_v9 = vadd.f32 %v15301_v29, %v4448_v7  ;;  %13253 = vmatprep.mubr.msk.f32.mxu0 %vm1229_vm0, %v318_v1  ;;  %v840_v63 = vld [vmem:[%s14872_s8 + $0x1430] sm:$0xff] }
 0x111   : > { %v7009_v10 = vadd.f32 %v15301_v29, %v7008_v8  ;;  %14021 = vmatprep.mubr.msk.f32.mxu1 %vm1229_vm0, %v830_v2  ;;  %9505 = vst.msk [vmem:[%s15319_s11 + $0x88] sm:$0xff] %vm9487_vm1, %v4454_v5  ;;  %v329_v8 = vld [vmem:[%s14872_s8 + $0x438] sm:$0xff] }
 0x112   : > { %10017 = vst.msk [vmem:[%s15319_s11 + $0x1088] sm:$0xff] %vm9487_vm1, %v7014_v6  ;;  %9504 = vst.msk [vmem:[%s15319_s11 + $0x80] sm:$0xff] %vm9487_vm1, %v4449_v9  ;;  %v13096_v15 = vpop.f32.mrb[18].mxu0  ;;  %v841_v9 = vld [vmem:[%s14872_s8 + $0x1438] sm:$0xff] }
 0x113   : > { %10016 = vst.msk [vmem:[%s15319_s11 + $0x1080] sm:$0xff] %vm9487_vm1, %v7009_v10  ;;  %v13864_v16 = vpop.f32.mrb[18].mxu1  ;;  %v4464_v17 = vadd.f32 %v13096_v15, %v15301_v29  ;;  %v4458_v19 = vpop.f32.mrb[19].mxu0  ;;  %13254 = vmatmul.mubr.msk.f32.gmra.mrb[124].mxu0 %vm1229_vm0, %v319_v11  ;;  %v330_v10 = vld [vmem:[%s14872_s8 + $0x440] sm:$0xff] }
 0x114   : > { %v7024_v18 = vadd.f32 %v13864_v16, %v15301_v29  ;;  %v7018_v20 = vpop.f32.mrb[19].mxu1  ;;  %14022 = vmatmul.mubr.msk.f32.gmra.mrb[124].mxu1 %vm1229_vm0, %v831_v12  ;;  %v4459_v21 = vadd.f32 %v15301_v29, %v4458_v19  ;;  %13256 = vmatprep.mubr.msk.f32.mxu0 %vm1229_vm0, %v320_v13  ;;  %v842_v11 = vld [vmem:[%s14872_s8 + $0x1440] sm:$0xff] }
 0x115   : > { %v7019_v22 = vadd.f32 %v15301_v29, %v7018_v20  ;;  %14024 = vmatprep.mubr.msk.f32.mxu1 %vm1229_vm0, %v832_v14  ;;  %9507 = vst.msk [vmem:[%s15319_s11 + $0x98] sm:$0xff] %vm9487_vm1, %v4464_v17  ;;  %v331_v20 = vld [vmem:[%s14872_s8 + $0x448] sm:$0xff] }
 0x116   : > { %10019 = vst.msk [vmem:[%s15319_s11 + $0x1098] sm:$0xff] %vm9487_vm1, %v7024_v18  ;;  %9506 = vst.msk [vmem:[%s15319_s11 + $0x90] sm:$0xff] %vm9487_vm1, %v4459_v21  ;;  %v13099_v27 = vpop.f32.mrb[20].mxu0  ;;  %v843_v21 = vld [vmem:[%s14872_s8 + $0x1448] sm:$0xff] }
 0x117   : > { %10018 = vst.msk [vmem:[%s15319_s11 + $0x1090] sm:$0xff] %vm9487_vm1, %v7019_v22  ;;  %v13867_v28 = vpop.f32.mrb[20].mxu1  ;;  %v4474_v30 = vadd.f32 %v13099_v27, %v15301_v29  ;;  %v4468_v32 = vpop.f32.mrb[21].mxu0  ;;  %13257 = vmatmul.mubr.msk.f32.gmra.mrb[126].mxu0 %vm1229_vm0, %v321_v23  ;;  %v332_v22 = vld [vmem:[%s14872_s8 + $0x450] sm:$0xff] }
 0x118   : > { %v7034_v31 = vadd.f32 %v13867_v28, %v15301_v29  ;;  %v7028_v33 = vpop.f32.mrb[21].mxu1  ;;  %14025 = vmatmul.mubr.msk.f32.gmra.mrb[126].mxu1 %vm1229_vm0, %v833_v24  ;;  %v4469_v34 = vadd.f32 %v15301_v29, %v4468_v32  ;;  %13259 = vmatprep.mubr.msk.f32.mxu0 %vm1229_vm0, %v322_v25  ;;  %v844_v23 = vld [vmem:[%s14872_s8 + $0x1450] sm:$0xff] }
 0x119   : > { %v7029_v35 = vadd.f32 %v15301_v29, %v7028_v33  ;;  %14027 = vmatprep.mubr.msk.f32.mxu1 %vm1229_vm0, %v834_v26  ;;  %9509 = vst.msk [vmem:[%s15319_s11 + $0xa8] sm:$0xff] %vm9487_vm1, %v4474_v30  ;;  %v333_v33 = vld [vmem:[%s14872_s8 + $0x458] sm:$0xff] }
 0x11a   : > { %10021 = vst.msk [vmem:[%s15319_s11 + $0x10a8] sm:$0xff] %vm9487_vm1, %v7034_v31  ;;  %9508 = vst.msk [vmem:[%s15319_s11 + $0xa0] sm:$0xff] %vm9487_vm1, %v4469_v34  ;;  %v13102_v40 = vpop.f32.mrb[22].mxu0  ;;  %v845_v34 = vld [vmem:[%s14872_s8 + $0x1458] sm:$0xff] }
 0x11b   : > { %10020 = vst.msk [vmem:[%s15319_s11 + $0x10a0] sm:$0xff] %vm9487_vm1, %v7029_v35  ;;  %v13870_v41 = vpop.f32.mrb[22].mxu1  ;;  %v4484_v42 = vadd.f32 %v13102_v40, %v15301_v29  ;;  %v4478_v44 = vpop.f32.mrb[23].mxu0  ;;  %13260 = vmatmul.mubr.msk.f32.gmra.mrb[128].mxu0 %vm1229_vm0, %v323_v36  ;;  %v334_v35 = vld [vmem:[%s14872_s8 + $0x460] sm:$0xff] }
 0x11c   : > { %v7044_v43 = vadd.f32 %v13870_v41, %v15301_v29  ;;  %v7038_v45 = vpop.f32.mrb[23].mxu1  ;;  %14028 = vmatmul.mubr.msk.f32.gmra.mrb[128].mxu1 %vm1229_vm0, %v835_v37  ;;  %v4479_v46 = vadd.f32 %v15301_v29, %v4478_v44  ;;  %13262 = vmatprep.mubr.msk.f32.mxu0 %vm1229_vm0, %v324_v38  ;;  %v846_v36 = vld [vmem:[%s14872_s8 + $0x1460] sm:$0xff] }
 0x11d   : > { %v7039_v47 = vadd.f32 %v15301_v29, %v7038_v45  ;;  %14030 = vmatprep.mubr.msk.f32.mxu1 %vm1229_vm0, %v836_v39  ;;  %9511 = vst.msk [vmem:[%s15319_s11 + $0xb8] sm:$0xff] %vm9487_vm1, %v4484_v42  ;;  %v335_v45 = vld [vmem:[%s14872_s8 + $0x468] sm:$0xff] }
 0x11e   : > { %10023 = vst.msk [vmem:[%s15319_s11 + $0x10b8] sm:$0xff] %vm9487_vm1, %v7044_v43  ;;  %9510 = vst.msk [vmem:[%s15319_s11 + $0xb0] sm:$0xff] %vm9487_vm1, %v4479_v46  ;;  %v13105_v52 = vpop.f32.mrb[24].mxu0  ;;  %v847_v46 = vld [vmem:[%s14872_s8 + $0x1468] sm:$0xff] }
 0x11f   : > { %10022 = vst.msk [vmem:[%s15319_s11 + $0x10b0] sm:$0xff] %vm9487_vm1, %v7039_v47  ;;  %v13873_v53 = vpop.f32.mrb[24].mxu1  ;;  %v4494_v54 = vadd.f32 %v13105_v52, %v15301_v29  ;;  %v4488_v56 = vpop.f32.mrb[25].mxu0  ;;  %13263 = vmatmul.mubr.msk.f32.gmra.mrb[130].mxu0 %vm1229_vm0, %v325_v48  ;;  %v336_v47 = vld [vmem:[%s14872_s8 + $0x470] sm:$0xff] }
 0x120   : > { %v7054_v55 = vadd.f32 %v13873_v53, %v15301_v29  ;;  %v7048_v57 = vpop.f32.mrb[25].mxu1  ;;  %14031 = vmatmul.mubr.msk.f32.gmra.mrb[130].mxu1 %vm1229_vm0, %v837_v49  ;;  %v4489_v58 = vadd.f32 %v15301_v29, %v4488_v56  ;;  %13265 = vmatprep.mubr.msk.f32.mxu0 %vm1229_vm0, %v326_v50  ;;  %v848_v48 = vld [vmem:[%s14872_s8 + $0x1470] sm:$0xff] }
 0x121   : > { %v7049_v59 = vadd.f32 %v15301_v29, %v7048_v57  ;;  %14033 = vmatprep.mubr.msk.f32.mxu1 %vm1229_vm0, %v838_v51  ;;  %9513 = vst.msk [vmem:[%s15319_s11 + $0xc8] sm:$0xff] %vm9487_vm1, %v4494_v54  ;;  %v337_v57 = vld [vmem:[%s14872_s8 + $0x478] sm:$0xff] }
 0x122   : > { %10025 = vst.msk [vmem:[%s15319_s11 + $0x10c8] sm:$0xff] %vm9487_vm1, %v7054_v55  ;;  %9512 = vst.msk [vmem:[%s15319_s11 + $0xc0] sm:$0xff] %vm9487_vm1, %v4489_v58  ;;  %v13108_v0 = vpop.f32.mrb[26].mxu0  ;;  %v849_v58 = vld [vmem:[%s14872_s8 + $0x1478] sm:$0xff] }
 0x123   : > { %10024 = vst.msk [vmem:[%s15319_s11 + $0x10c0] sm:$0xff] %vm9487_vm1, %v7049_v59  ;;  %v13876_v1 = vpop.f32.mrb[26].mxu1  ;;  %v4504_v2 = vadd.f32 %v13108_v0, %v15301_v29  ;;  %v4498_v4 = vpop.f32.mrb[27].mxu0  ;;  %13266 = vmatmul.mubr.msk.f32.gmra.mrb[132].mxu0 %vm1229_vm0, %v327_v60  ;;  %v338_v59 = vld [vmem:[%s14872_s8 + $0x480] sm:$0xff] }
 0x124   : > { %v7064_v3 = vadd.f32 %v13876_v1, %v15301_v29  ;;  %v7058_v5 = vpop.f32.mrb[27].mxu1  ;;  %14034 = vmatmul.mubr.msk.f32.gmra.mrb[132].mxu1 %vm1229_vm0, %v839_v61  ;;  %v4499_v6 = vadd.f32 %v15301_v29, %v4498_v4  ;;  %13268 = vmatprep.mubr.msk.f32.mxu0 %vm1229_vm0, %v328_v62  ;;  %v850_v60 = vld [vmem:[%s14872_s8 + $0x1480] sm:$0xff] }
 0x125   : > { %v7059_v7 = vadd.f32 %v15301_v29, %v7058_v5  ;;  %14036 = vmatprep.mubr.msk.f32.mxu1 %vm1229_vm0, %v840_v63  ;;  %9515 = vst.msk [vmem:[%s15319_s11 + $0xd8] sm:$0xff] %vm9487_vm1, %v4504_v2  ;;  %v339_v5 = vld [vmem:[%s14872_s8 + $0x488] sm:$0xff] }
 0x126   : > { %10027 = vst.msk [vmem:[%s15319_s11 + $0x10d8] sm:$0xff] %vm9487_vm1, %v7064_v3  ;;  %9514 = vst.msk [vmem:[%s15319_s11 + $0xd0] sm:$0xff] %vm9487_vm1, %v4499_v6  ;;  %v13111_v12 = vpop.f32.mrb[28].mxu0  ;;  %v851_v6 = vld [vmem:[%s14872_s8 + $0x1488] sm:$0xff] }
 0x127   : > { %10026 = vst.msk [vmem:[%s15319_s11 + $0x10d0] sm:$0xff] %vm9487_vm1, %v7059_v7  ;;  %v13879_v13 = vpop.f32.mrb[28].mxu1  ;;  %v4514_v14 = vadd.f32 %v13111_v12, %v15301_v29  ;;  %v4508_v16 = vpop.f32.mrb[29].mxu0  ;;  %13269 = vmatmul.mubr.msk.f32.gmra.mrb[134].mxu0 %vm1229_vm0, %v329_v8  ;;  %v340_v7 = vld [vmem:[%s14872_s8 + $0x490] sm:$0xff] }
 0x128   : > { %v7074_v15 = vadd.f32 %v13879_v13, %v15301_v29  ;;  %v7068_v17 = vpop.f32.mrb[29].mxu1  ;;  %14037 = vmatmul.mubr.msk.f32.gmra.mrb[134].mxu1 %vm1229_vm0, %v841_v9  ;;  %v4509_v18 = vadd.f32 %v15301_v29, %v4508_v16  ;;  %13271 = vmatprep.mubr.msk.f32.mxu0 %vm1229_vm0, %v330_v10  ;;  %v852_v8 = vld [vmem:[%s14872_s8 + $0x1490] sm:$0xff] }
 0x129   : > { %v7069_v19 = vadd.f32 %v15301_v29, %v7068_v17  ;;  %14039 = vmatprep.mubr.msk.f32.mxu1 %vm1229_vm0, %v842_v11  ;;  %9517 = vst.msk [vmem:[%s15319_s11 + $0xe8] sm:$0xff] %vm9487_vm1, %v4514_v14  ;;  %v341_v17 = vld [vmem:[%s14872_s8 + $0x498] sm:$0xff] }
 0x12a   : > { %10029 = vst.msk [vmem:[%s15319_s11 + $0x10e8] sm:$0xff] %vm9487_vm1, %v7074_v15  ;;  %9516 = vst.msk [vmem:[%s15319_s11 + $0xe0] sm:$0xff] %vm9487_vm1, %v4509_v18  ;;  %v13114_v24 = vpop.f32.mrb[30].mxu0  ;;  %v853_v18 = vld [vmem:[%s14872_s8 + $0x1498] sm:$0xff] }
 0x12b   : > { %10028 = vst.msk [vmem:[%s15319_s11 + $0x10e0] sm:$0xff] %vm9487_vm1, %v7069_v19  ;;  %v13882_v25 = vpop.f32.mrb[30].mxu1  ;;  %v4524_v26 = vadd.f32 %v13114_v24, %v15301_v29  ;;  %v4518_v28 = vpop.f32.mrb[31].mxu0  ;;  %13272 = vmatmul.mubr.msk.f32.gmra.mrb[136].mxu0 %vm1229_vm0, %v331_v20  ;;  %v342_v19 = vld [vmem:[%s14872_s8 + $0x4a0] sm:$0xff] }
 0x12c   : > { %v7084_v27 = vadd.f32 %v13882_v25, %v15301_v29  ;;  %v7078_v30 = vpop.f32.mrb[31].mxu1  ;;  %14040 = vmatmul.mubr.msk.f32.gmra.mrb[136].mxu1 %vm1229_vm0, %v843_v21  ;;  %v4519_v31 = vadd.f32 %v15301_v29, %v4518_v28  ;;  %13274 = vmatprep.mubr.msk.f32.mxu0 %vm1229_vm0, %v332_v22  ;;  %v854_v20 = vld [vmem:[%s14872_s8 + $0x14a0] sm:$0xff] }
 0x12d   : > { %v7079_v32 = vadd.f32 %v15301_v29, %v7078_v30  ;;  %14042 = vmatprep.mubr.msk.f32.mxu1 %vm1229_vm0, %v844_v23  ;;  %9519 = vst.msk [vmem:[%s15319_s11 + $0xf8] sm:$0xff] %vm9487_vm1, %v4524_v26  ;;  %v343_v30 = vld [vmem:[%s14872_s8 + $0x4a8] sm:$0xff] }
 0x12e   : > { %10031 = vst.msk [vmem:[%s15319_s11 + $0x10f8] sm:$0xff] %vm9487_vm1, %v7084_v27  ;;  %9518 = vst.msk [vmem:[%s15319_s11 + $0xf0] sm:$0xff] %vm9487_vm1, %v4519_v31  ;;  %v13117_v37 = vpop.f32.mrb[32].mxu0  ;;  %v855_v31 = vld [vmem:[%s14872_s8 + $0x14a8] sm:$0xff] }
 0x12f   : > { %10030 = vst.msk [vmem:[%s15319_s11 + $0x10f0] sm:$0xff] %vm9487_vm1, %v7079_v32  ;;  %v13885_v38 = vpop.f32.mrb[32].mxu1  ;;  %v4534_v39 = vadd.f32 %v13117_v37, %v15301_v29  ;;  %v4528_v41 = vpop.f32.mrb[33].mxu0  ;;  %13275 = vmatmul.mubr.msk.f32.gmra.mrb[138].mxu0 %vm1229_vm0, %v333_v33  ;;  %v344_v32 = vld [vmem:[%s14872_s8 + $0x4b0] sm:$0xff] }
 0x130   : > { %v7094_v40 = vadd.f32 %v13885_v38, %v15301_v29  ;;  %v7088_v42 = vpop.f32.mrb[33].mxu1  ;;  %14043 = vmatmul.mubr.msk.f32.gmra.mrb[138].mxu1 %vm1229_vm0, %v845_v34  ;;  %v4529_v43 = vadd.f32 %v15301_v29, %v4528_v41  ;;  %13277 = vmatprep.mubr.msk.f32.mxu0 %vm1229_vm0, %v334_v35  ;;  %v856_v33 = vld [vmem:[%s14872_s8 + $0x14b0] sm:$0xff] }
 0x131   : > { %v7089_v44 = vadd.f32 %v15301_v29, %v7088_v42  ;;  %14045 = vmatprep.mubr.msk.f32.mxu1 %vm1229_vm0, %v846_v36  ;;  %9521 = vst.msk [vmem:[%s15319_s11 + $0x108] sm:$0xff] %vm9487_vm1, %v4534_v39  ;;  %v345_v42 = vld [vmem:[%s14872_s8 + $0x4b8] sm:$0xff] }
 0x132   : > { %10033 = vst.msk [vmem:[%s15319_s11 + $0x1108] sm:$0xff] %vm9487_vm1, %v7094_v40  ;;  %9520 = vst.msk [vmem:[%s15319_s11 + $0x100] sm:$0xff] %vm9487_vm1, %v4529_v43  ;;  %v13120_v49 = vpop.f32.mrb[34].mxu0  ;;  %v857_v43 = vld [vmem:[%s14872_s8 + $0x14b8] sm:$0xff] }
 0x133   : > { %10032 = vst.msk [vmem:[%s15319_s11 + $0x1100] sm:$0xff] %vm9487_vm1, %v7089_v44  ;;  %v13888_v50 = vpop.f32.mrb[34].mxu1  ;;  %v4544_v51 = vadd.f32 %v13120_v49, %v15301_v29  ;;  %v4538_v53 = vpop.f32.mrb[35].mxu0  ;;  %13278 = vmatmul.mubr.msk.f32.gmra.mrb[140].mxu0 %vm1229_vm0, %v335_v45  ;;  %v346_v44 = vld [vmem:[%s14872_s8 + $0x4c0] sm:$0xff] }
 0x134   : > { %v7104_v52 = vadd.f32 %v13888_v50, %v15301_v29  ;;  %v7098_v54 = vpop.f32.mrb[35].mxu1  ;;  %14046 = vmatmul.mubr.msk.f32.gmra.mrb[140].mxu1 %vm1229_vm0, %v847_v46  ;;  %v4539_v55 = vadd.f32 %v15301_v29, %v4538_v53  ;;  %13280 = vmatprep.mubr.msk.f32.mxu0 %vm1229_vm0, %v336_v47  ;;  %v858_v45 = vld [vmem:[%s14872_s8 + $0x14c0] sm:$0xff] }
 0x135   : > { %v7099_v56 = vadd.f32 %v15301_v29, %v7098_v54  ;;  %14048 = vmatprep.mubr.msk.f32.mxu1 %vm1229_vm0, %v848_v48  ;;  %9523 = vst.msk [vmem:[%s15319_s11 + $0x118] sm:$0xff] %vm9487_vm1, %v4544_v51  ;;  %v347_v54 = vld [vmem:[%s14872_s8 + $0x4c8] sm:$0xff] }
 0x136   : > { %10035 = vst.msk [vmem:[%s15319_s11 + $0x1118] sm:$0xff] %vm9487_vm1, %v7104_v52  ;;  %9522 = vst.msk [vmem:[%s15319_s11 + $0x110] sm:$0xff] %vm9487_vm1, %v4539_v55  ;;  %v13123_v61 = vpop.f32.mrb[36].mxu0  ;;  %v859_v55 = vld [vmem:[%s14872_s8 + $0x14c8] sm:$0xff] }
 0x137   : > { %10034 = vst.msk [vmem:[%s15319_s11 + $0x1110] sm:$0xff] %vm9487_vm1, %v7099_v56  ;;  %v13891_v62 = vpop.f32.mrb[36].mxu1  ;;  %v4554_v63 = vadd.f32 %v13123_v61, %v15301_v29  ;;  %v4548_v1 = vpop.f32.mrb[37].mxu0  ;;  %13281 = vmatmul.mubr.msk.f32.gmra.mrb[142].mxu0 %vm1229_vm0, %v337_v57  ;;  %v348_v56 = vld [vmem:[%s14872_s8 + $0x4d0] sm:$0xff] }
 0x138   : > { %v7114_v0 = vadd.f32 %v13891_v62, %v15301_v29  ;;  %v7108_v2 = vpop.f32.mrb[37].mxu1  ;;  %14049 = vmatmul.mubr.msk.f32.gmra.mrb[142].mxu1 %vm1229_vm0, %v849_v58  ;;  %v4549_v3 = vadd.f32 %v15301_v29, %v4548_v1  ;;  %13283 = vmatprep.mubr.msk.f32.mxu0 %vm1229_vm0, %v338_v59  ;;  %v860_v57 = vld [vmem:[%s14872_s8 + $0x14d0] sm:$0xff] }
 0x139   : > { %v7109_v4 = vadd.f32 %v15301_v29, %v7108_v2  ;;  %14051 = vmatprep.mubr.msk.f32.mxu1 %vm1229_vm0, %v850_v60  ;;  %9525 = vst.msk [vmem:[%s15319_s11 + $0x128] sm:$0xff] %vm9487_vm1, %v4554_v63  ;;  %v349_v2 = vld [vmem:[%s14872_s8 + $0x4d8] sm:$0xff] }
 0x13a   : > { %10037 = vst.msk [vmem:[%s15319_s11 + $0x1128] sm:$0xff] %vm9487_vm1, %v7114_v0  ;;  %9524 = vst.msk [vmem:[%s15319_s11 + $0x120] sm:$0xff] %vm9487_vm1, %v4549_v3  ;;  %v13126_v9 = vpop.f32.mrb[38].mxu0  ;;  %v861_v3 = vld [vmem:[%s14872_s8 + $0x14d8] sm:$0xff] }
 0x13b   : > { %10036 = vst.msk [vmem:[%s15319_s11 + $0x1120] sm:$0xff] %vm9487_vm1, %v7109_v4  ;;  %v13894_v10 = vpop.f32.mrb[38].mxu1  ;;  %v4564_v11 = vadd.f32 %v13126_v9, %v15301_v29  ;;  %v4558_v13 = vpop.f32.mrb[39].mxu0  ;;  %13284 = vmatmul.mubr.msk.f32.gmra.mrb[144].mxu0 %vm1229_vm0, %v339_v5  ;;  %v350_v4 = vld [vmem:[%s14872_s8 + $0x4e0] sm:$0xff] }
 0x13c   : > { %v7124_v12 = vadd.f32 %v13894_v10, %v15301_v29  ;;  %v7118_v14 = vpop.f32.mrb[39].mxu1  ;;  %14052 = vmatmul.mubr.msk.f32.gmra.mrb[144].mxu1 %vm1229_vm0, %v851_v6  ;;  %v4559_v15 = vadd.f32 %v15301_v29, %v4558_v13  ;;  %13286 = vmatprep.mubr.msk.f32.mxu0 %vm1229_vm0, %v340_v7  ;;  %v862_v5 = vld [vmem:[%s14872_s8 + $0x14e0] sm:$0xff] }
 0x13d   : > { %v7119_v16 = vadd.f32 %v15301_v29, %v7118_v14  ;;  %14054 = vmatprep.mubr.msk.f32.mxu1 %vm1229_vm0, %v852_v8  ;;  %9527 = vst.msk [vmem:[%s15319_s11 + $0x138] sm:$0xff] %vm9487_vm1, %v4564_v11  ;;  %v351_v14 = vld [vmem:[%s14872_s8 + $0x4e8] sm:$0xff] }
 0x13e   : > { %10039 = vst.msk [vmem:[%s15319_s11 + $0x1138] sm:$0xff] %vm9487_vm1, %v7124_v12  ;;  %9526 = vst.msk [vmem:[%s15319_s11 + $0x130] sm:$0xff] %vm9487_vm1, %v4559_v15  ;;  %v13129_v21 = vpop.f32.mrb[40].mxu0  ;;  %v863_v15 = vld [vmem:[%s14872_s8 + $0x14e8] sm:$0xff] }
 0x13f   : > { %10038 = vst.msk [vmem:[%s15319_s11 + $0x1130] sm:$0xff] %vm9487_vm1, %v7119_v16  ;;  %v13897_v22 = vpop.f32.mrb[40].mxu1  ;;  %v4574_v23 = vadd.f32 %v13129_v21, %v15301_v29  ;;  %v4568_v25 = vpop.f32.mrb[41].mxu0  ;;  %13287 = vmatmul.mubr.msk.f32.gmra.mrb[146].mxu0 %vm1229_vm0, %v341_v17  ;;  %v352_v16 = vld [vmem:[%s14872_s8 + $0x4f0] sm:$0xff]  ;;  %v15812_v21 = vld [vmem:[#allocation2] ss:$0 sm:$0xff] }
 0x140   : > { %v7134_v24 = vadd.f32 %v13897_v22, %v15301_v29  ;;  %v7128_v26 = vpop.f32.mrb[41].mxu1  ;;  %14055 = vmatmul.mubr.msk.f32.gmra.mrb[146].mxu1 %vm1229_vm0, %v853_v18  ;;  %v4569_v27 = vadd.f32 %v15301_v29, %v4568_v25  ;;  %13289 = vmatprep.mubr.msk.f32.mxu0 %vm1229_vm0, %v342_v19  ;;  %v864_v17 = vld [vmem:[%s14872_s8 + $0x14f0] sm:$0xff] }
 0x141   : > { %v7129_v28 = vadd.f32 %v15301_v29, %v7128_v26  ;;  %14057 = vmatprep.mubr.msk.f32.mxu1 %vm1229_vm0, %v854_v20  ;;  %9529 = vst.msk [vmem:[%s15319_s11 + $0x148] sm:$0xff] %vm9487_vm1, %v4574_v23 }
 0x142   : > { %10041 = vst.msk [vmem:[%s15319_s11 + $0x1148] sm:$0xff] %vm9487_vm1, %v7134_v24  ;;  %9528 = vst.msk [vmem:[%s15319_s11 + $0x140] sm:$0xff] %vm9487_vm1, %v4569_v27  ;;  %v13132_v34 = vpop.f32.mrb[42].mxu0  ;;  %v865_v27 = vld [vmem:[%s14872_s8 + $0x14f8] sm:$0xff] }
 0x143   : > { %10040 = vst.msk [vmem:[%s15319_s11 + $0x1140] sm:$0xff] %vm9487_vm1, %v7129_v28  ;;  %v13900_v35 = vpop.f32.mrb[42].mxu1  ;;  %v4584_v36 = vadd.f32 %v13132_v34, %v15301_v29  ;;  %v4578_v38 = vpop.f32.mrb[43].mxu0  ;;  %13290 = vmatmul.mubr.msk.f32.gmra.mrb[148].mxu0 %vm1229_vm0, %v343_v30  ;;  %v354_v28 = vld [vmem:[%s14872_s8 + $0x500] sm:$0xff] }
 0x144   : > { %v7144_v37 = vadd.f32 %v13900_v35, %v15301_v29  ;;  %v7138_v39 = vpop.f32.mrb[43].mxu1  ;;  %14058 = vmatmul.mubr.msk.f32.gmra.mrb[148].mxu1 %vm1229_vm0, %v855_v31  ;;  %v4579_v40 = vadd.f32 %v15301_v29, %v4578_v38  ;;  %13292 = vmatprep.mubr.msk.f32.mxu0 %vm1229_vm0, %v344_v32  ;;  %v866_v30 = vld [vmem:[%s14872_s8 + $0x1500] sm:$0xff] }
 0x145   : > { %v7139_v41 = vadd.f32 %v15301_v29, %v7138_v39  ;;  %14060 = vmatprep.mubr.msk.f32.mxu1 %vm1229_vm0, %v856_v33  ;;  %9531 = vst.msk [vmem:[%s15319_s11 + $0x158] sm:$0xff] %vm9487_vm1, %v4584_v36  ;;  %v355_v39 = vld [vmem:[%s14872_s8 + $0x508] sm:$0xff] }
 0x146   : > { %10043 = vst.msk [vmem:[%s15319_s11 + $0x1158] sm:$0xff] %vm9487_vm1, %v7144_v37  ;;  %9530 = vst.msk [vmem:[%s15319_s11 + $0x150] sm:$0xff] %vm9487_vm1, %v4579_v40  ;;  %v13135_v46 = vpop.f32.mrb[44].mxu0  ;;  %v867_v40 = vld [vmem:[%s14872_s8 + $0x1508] sm:$0xff] }
 0x147   : > { %10042 = vst.msk [vmem:[%s15319_s11 + $0x1150] sm:$0xff] %vm9487_vm1, %v7139_v41  ;;  %v13903_v47 = vpop.f32.mrb[44].mxu1  ;;  %v4594_v48 = vadd.f32 %v13135_v46, %v15301_v29  ;;  %v4588_v50 = vpop.f32.mrb[45].mxu0  ;;  %13293 = vmatmul.mubr.msk.f32.gmra.mrb[150].mxu0 %vm1229_vm0, %v345_v42  ;;  %v356_v41 = vld [vmem:[%s14872_s8 + $0x510] sm:$0xff] }
 0x148   : > { %v7154_v49 = vadd.f32 %v13903_v47, %v15301_v29  ;;  %v7148_v51 = vpop.f32.mrb[45].mxu1  ;;  %14061 = vmatmul.mubr.msk.f32.gmra.mrb[150].mxu1 %vm1229_vm0, %v857_v43  ;;  %v4589_v52 = vadd.f32 %v15301_v29, %v4588_v50  ;;  %13295 = vmatprep.mubr.msk.f32.mxu0 %vm1229_vm0, %v346_v44  ;;  %v868_v42 = vld [vmem:[%s14872_s8 + $0x1510] sm:$0xff] }
 0x149   : > { %v7149_v53 = vadd.f32 %v15301_v29, %v7148_v51  ;;  %14063 = vmatprep.mubr.msk.f32.mxu1 %vm1229_vm0, %v858_v45  ;;  %9533 = vst.msk [vmem:[%s15319_s11 + $0x168] sm:$0xff] %vm9487_vm1, %v4594_v48  ;;  %v357_v51 = vld [vmem:[%s14872_s8 + $0x518] sm:$0xff] }
 0x14a   : > { %10045 = vst.msk [vmem:[%s15319_s11 + $0x1168] sm:$0xff] %vm9487_vm1, %v7154_v49  ;;  %9532 = vst.msk [vmem:[%s15319_s11 + $0x160] sm:$0xff] %vm9487_vm1, %v4589_v52  ;;  %v13138_v58 = vpop.f32.mrb[46].mxu0  ;;  %v869_v52 = vld [vmem:[%s14872_s8 + $0x1518] sm:$0xff] }
 0x14b   : > { %10044 = vst.msk [vmem:[%s15319_s11 + $0x1160] sm:$0xff] %vm9487_vm1, %v7149_v53  ;;  %v13906_v59 = vpop.f32.mrb[46].mxu1  ;;  %v4604_v60 = vadd.f32 %v13138_v58, %v15301_v29  ;;  %v4598_v62 = vpop.f32.mrb[47].mxu0  ;;  %13296 = vmatmul.mubr.msk.f32.gmra.mrb[152].mxu0 %vm1229_vm0, %v347_v54  ;;  %v358_v53 = vld [vmem:[%s14872_s8 + $0x520] sm:$0xff] }
 0x14c   : > { %v7164_v61 = vadd.f32 %v13906_v59, %v15301_v29  ;;  %v7158_v63 = vpop.f32.mrb[47].mxu1  ;;  %14064 = vmatmul.mubr.msk.f32.gmra.mrb[152].mxu1 %vm1229_vm0, %v859_v55  ;;  %v4599_v0 = vadd.f32 %v15301_v29, %v4598_v62  ;;  %13298 = vmatprep.mubr.msk.f32.mxu0 %vm1229_vm0, %v348_v56  ;;  %v870_v54 = vld [vmem:[%s14872_s8 + $0x1520] sm:$0xff] }
 0x14d   : > { %v7159_v1 = vadd.f32 %v15301_v29, %v7158_v63  ;;  %14066 = vmatprep.mubr.msk.f32.mxu1 %vm1229_vm0, %v860_v57  ;;  %9535 = vst.msk [vmem:[%s15319_s11 + $0x178] sm:$0xff] %vm9487_vm1, %v4604_v60  ;;  %v359_v63 = vld [vmem:[%s14872_s8 + $0x528] sm:$0xff] }
 0x14e   : > { %10047 = vst.msk [vmem:[%s15319_s11 + $0x1178] sm:$0xff] %vm9487_vm1, %v7164_v61  ;;  %9534 = vst.msk [vmem:[%s15319_s11 + $0x170] sm:$0xff] %vm9487_vm1, %v4599_v0  ;;  %v13141_v6 = vpop.f32.mrb[48].mxu0  ;;  %v871_v0 = vld [vmem:[%s14872_s8 + $0x1528] sm:$0xff] }
 0x14f   : > { %10046 = vst.msk [vmem:[%s15319_s11 + $0x1170] sm:$0xff] %vm9487_vm1, %v7159_v1  ;;  %v13909_v7 = vpop.f32.mrb[48].mxu1  ;;  %v4614_v8 = vadd.f32 %v13141_v6, %v15301_v29  ;;  %v4608_v10 = vpop.f32.mrb[49].mxu0  ;;  %13299 = vmatmul.mubr.msk.f32.gmra.mrb[154].mxu0 %vm1229_vm0, %v349_v2  ;;  %v360_v1 = vld [vmem:[%s14872_s8 + $0x530] sm:$0xff] }
 0x150   : > { %v7174_v9 = vadd.f32 %v13909_v7, %v15301_v29  ;;  %v7168_v11 = vpop.f32.mrb[49].mxu1  ;;  %14067 = vmatmul.mubr.msk.f32.gmra.mrb[154].mxu1 %vm1229_vm0, %v861_v3  ;;  %v4609_v12 = vadd.f32 %v15301_v29, %v4608_v10  ;;  %13301 = vmatprep.mubr.msk.f32.mxu0 %vm1229_vm0, %v350_v4  ;;  %v872_v2 = vld [vmem:[%s14872_s8 + $0x1530] sm:$0xff] }
 0x151   : > { %v7169_v13 = vadd.f32 %v15301_v29, %v7168_v11  ;;  %14069 = vmatprep.mubr.msk.f32.mxu1 %vm1229_vm0, %v862_v5  ;;  %9537 = vst.msk [vmem:[%s15319_s11 + $0x188] sm:$0xff] %vm9487_vm1, %v4614_v8  ;;  %v361_v11 = vld [vmem:[%s14872_s8 + $0x538] sm:$0xff] }
 0x152   : > { %10049 = vst.msk [vmem:[%s15319_s11 + $0x1188] sm:$0xff] %vm9487_vm1, %v7174_v9  ;;  %9536 = vst.msk [vmem:[%s15319_s11 + $0x180] sm:$0xff] %vm9487_vm1, %v4609_v12  ;;  %v13144_v18 = vpop.f32.mrb[50].mxu0  ;;  %v873_v12 = vld [vmem:[%s14872_s8 + $0x1538] sm:$0xff] }
 0x153   : > { %10048 = vst.msk [vmem:[%s15319_s11 + $0x1180] sm:$0xff] %vm9487_vm1, %v7169_v13  ;;  %v13912_v19 = vpop.f32.mrb[50].mxu1  ;;  %v4624_v20 = vadd.f32 %v13144_v18, %v15301_v29  ;;  %v4618_v23 = vpop.f32.mrb[51].mxu0  ;;  %13302 = vmatmul.mubr.msk.f32.gmra.mrb[156].mxu0 %vm1229_vm0, %v351_v14  ;;  %v353_v29 = vld [vmem:[%s14872_s8 + $0x4f8] sm:$0xff]  ;;  %v362_v13 = vld [vmem:[%s14872_s8 + $0x540] sm:$0xff] }
 0x154   : > { %v7184_v22 = vadd.f32 %v15812_v21, %v13912_v19  ;;  %v7178_v24 = vpop.f32.mrb[51].mxu1  ;;  %14070 = vmatmul.mubr.msk.f32.gmra.mrb[156].mxu1 %vm1229_vm0, %v863_v15  ;;  %v4619_v25 = vadd.f32 %v15812_v21, %v4618_v23  ;;  %13304 = vmatprep.mubr.msk.f32.mxu0 %vm1229_vm0, %v352_v16  ;;  %v874_v14 = vld [vmem:[%s14872_s8 + $0x1540] sm:$0xff] }
 0x155   : > { %v7179_v26 = vadd.f32 %v15812_v21, %v7178_v24  ;;  %14072 = vmatprep.mubr.msk.f32.mxu1 %vm1229_vm0, %v864_v17  ;;  %9539 = vst.msk [vmem:[%s15319_s11 + $0x198] sm:$0xff] %vm9487_vm1, %v4624_v20  ;;  %v363_v24 = vld [vmem:[%s14872_s8 + $0x548] sm:$0xff] }
 0x156   : > { %10051 = vst.msk [vmem:[%s15319_s11 + $0x1198] sm:$0xff] %vm9487_vm1, %v7184_v22  ;;  %9538 = vst.msk [vmem:[%s15319_s11 + $0x190] sm:$0xff] %vm9487_vm1, %v4619_v25  ;;  %v13147_v31 = vpop.f32.mrb[52].mxu0  ;;  %v875_v25 = vld [vmem:[%s14872_s8 + $0x1548] sm:$0xff] }
 0x157   : > { %10050 = vst.msk [vmem:[%s15319_s11 + $0x1190] sm:$0xff] %vm9487_vm1, %v7179_v26  ;;  %v13915_v32 = vpop.f32.mrb[52].mxu1  ;;  %v4634_v33 = vadd.f32 %v15812_v21, %v13147_v31  ;;  %v4628_v35 = vpop.f32.mrb[53].mxu0  ;;  %13305 = vmatmul.mubr.msk.f32.gmra.mrb[158].mxu0 %vm1229_vm0, %v353_v29  ;;  %v364_v26 = vld [vmem:[%s14872_s8 + $0x550] sm:$0xff] }
 0x158   : > { %v7194_v34 = vadd.f32 %v15812_v21, %v13915_v32  ;;  %v7188_v36 = vpop.f32.mrb[53].mxu1  ;;  %14073 = vmatmul.mubr.msk.f32.gmra.mrb[158].mxu1 %vm1229_vm0, %v865_v27  ;;  %v4629_v37 = vadd.f32 %v15812_v21, %v4628_v35  ;;  %13307 = vmatprep.mubr.msk.f32.mxu0 %vm1229_vm0, %v354_v28  ;;  %v876_v29 = vld [vmem:[%s14872_s8 + $0x1550] sm:$0xff] }
 0x159   : > { %v7189_v38 = vadd.f32 %v15812_v21, %v7188_v36  ;;  %14075 = vmatprep.mubr.msk.f32.mxu1 %vm1229_vm0, %v866_v30  ;;  %9541 = vst.msk [vmem:[%s15319_s11 + $0x1a8] sm:$0xff] %vm9487_vm1, %v4634_v33  ;;  %v365_v36 = vld [vmem:[%s14872_s8 + $0x558] sm:$0xff] }
 0x15a   : > { %10053 = vst.msk [vmem:[%s15319_s11 + $0x11a8] sm:$0xff] %vm9487_vm1, %v7194_v34  ;;  %9540 = vst.msk [vmem:[%s15319_s11 + $0x1a0] sm:$0xff] %vm9487_vm1, %v4629_v37  ;;  %v13150_v43 = vpop.f32.mrb[54].mxu0  ;;  %v877_v37 = vld [vmem:[%s14872_s8 + $0x1558] sm:$0xff] }
 0x15b   : > { %10052 = vst.msk [vmem:[%s15319_s11 + $0x11a0] sm:$0xff] %vm9487_vm1, %v7189_v38  ;;  %v13918_v44 = vpop.f32.mrb[54].mxu1  ;;  %v4644_v45 = vadd.f32 %v15812_v21, %v13150_v43  ;;  %v4638_v47 = vpop.f32.mrb[55].mxu0  ;;  %13308 = vmatmul.mubr.msk.f32.gmra.mrb[160].mxu0 %vm1229_vm0, %v355_v39  ;;  %v366_v38 = vld [vmem:[%s14872_s8 + $0x560] sm:$0xff] }
 0x15c   : > { %v7204_v46 = vadd.f32 %v15812_v21, %v13918_v44  ;;  %v7198_v48 = vpop.f32.mrb[55].mxu1  ;;  %14076 = vmatmul.mubr.msk.f32.gmra.mrb[160].mxu1 %vm1229_vm0, %v867_v40  ;;  %v4639_v49 = vadd.f32 %v15812_v21, %v4638_v47  ;;  %13310 = vmatprep.mubr.msk.f32.mxu0 %vm1229_vm0, %v356_v41  ;;  %v878_v39 = vld [vmem:[%s14872_s8 + $0x1560] sm:$0xff] }
 0x15d   : > { %v7199_v50 = vadd.f32 %v15812_v21, %v7198_v48  ;;  %14078 = vmatprep.mubr.msk.f32.mxu1 %vm1229_vm0, %v868_v42  ;;  %9543 = vst.msk [vmem:[%s15319_s11 + $0x1b8] sm:$0xff] %vm9487_vm1, %v4644_v45  ;;  %v367_v48 = vld [vmem:[%s14872_s8 + $0x568] sm:$0xff] }
 0x15e   : > { %10055 = vst.msk [vmem:[%s15319_s11 + $0x11b8] sm:$0xff] %vm9487_vm1, %v7204_v46  ;;  %9542 = vst.msk [vmem:[%s15319_s11 + $0x1b0] sm:$0xff] %vm9487_vm1, %v4639_v49  ;;  %v13153_v55 = vpop.f32.mrb[56].mxu0  ;;  %v879_v49 = vld [vmem:[%s14872_s8 + $0x1568] sm:$0xff] }
 0x15f   : > { %10054 = vst.msk [vmem:[%s15319_s11 + $0x11b0] sm:$0xff] %vm9487_vm1, %v7199_v50  ;;  %v13921_v56 = vpop.f32.mrb[56].mxu1  ;;  %v4654_v57 = vadd.f32 %v15812_v21, %v13153_v55  ;;  %v4648_v59 = vpop.f32.mrb[57].mxu0  ;;  %13311 = vmatmul.mubr.msk.f32.gmra.mrb[162].mxu0 %vm1229_vm0, %v357_v51  ;;  %v368_v50 = vld [vmem:[%s14872_s8 + $0x570] sm:$0xff] }
 0x160   : > { %v7214_v58 = vadd.f32 %v15812_v21, %v13921_v56  ;;  %v7208_v60 = vpop.f32.mrb[57].mxu1  ;;  %14079 = vmatmul.mubr.msk.f32.gmra.mrb[162].mxu1 %vm1229_vm0, %v869_v52  ;;  %v4649_v61 = vadd.f32 %v15812_v21, %v4648_v59  ;;  %13313 = vmatprep.mubr.msk.f32.mxu0 %vm1229_vm0, %v358_v53  ;;  %v880_v51 = vld [vmem:[%s14872_s8 + $0x1570] sm:$0xff] }
 0x161   : > { %v7209_v62 = vadd.f32 %v15812_v21, %v7208_v60  ;;  %14081 = vmatprep.mubr.msk.f32.mxu1 %vm1229_vm0, %v870_v54  ;;  %9545 = vst.msk [vmem:[%s15319_s11 + $0x1c8] sm:$0xff] %vm9487_vm1, %v4654_v57  ;;  %v369_v60 = vld [vmem:[%s14872_s8 + $0x578] sm:$0xff] }
 0x162   : > { %10057 = vst.msk [vmem:[%s15319_s11 + $0x11c8] sm:$0xff] %vm9487_vm1, %v7214_v58  ;;  %9544 = vst.msk [vmem:[%s15319_s11 + $0x1c0] sm:$0xff] %vm9487_vm1, %v4649_v61  ;;  %v13156_v3 = vpop.f32.mrb[58].mxu0  ;;  %v881_v61 = vld [vmem:[%s14872_s8 + $0x1578] sm:$0xff] }
 0x163   : > { %10056 = vst.msk [vmem:[%s15319_s11 + $0x11c0] sm:$0xff] %vm9487_vm1, %v7209_v62  ;;  %v13924_v4 = vpop.f32.mrb[58].mxu1  ;;  %v4664_v5 = vadd.f32 %v15812_v21, %v13156_v3  ;;  %v4658_v7 = vpop.f32.mrb[59].mxu0  ;;  %13314 = vmatmul.mubr.msk.f32.gmra.mrb[164].mxu0 %vm1229_vm0, %v359_v63  ;;  %v370_v62 = vld [vmem:[%s14872_s8 + $0x580] sm:$0xff] }
 0x164   : > { %v7224_v6 = vadd.f32 %v15812_v21, %v13924_v4  ;;  %v7218_v8 = vpop.f32.mrb[59].mxu1  ;;  %14082 = vmatmul.mubr.msk.f32.gmra.mrb[164].mxu1 %vm1229_vm0, %v871_v0  ;;  %v4659_v9 = vadd.f32 %v15812_v21, %v4658_v7  ;;  %13316 = vmatprep.mubr.msk.f32.mxu0 %vm1229_vm0, %v360_v1  ;;  %v882_v63 = vld [vmem:[%s14872_s8 + $0x1580] sm:$0xff] }
 0x165   : > { %v7219_v10 = vadd.f32 %v15812_v21, %v7218_v8  ;;  %14084 = vmatprep.mubr.msk.f32.mxu1 %vm1229_vm0, %v872_v2  ;;  %9547 = vst.msk [vmem:[%s15319_s11 + $0x1d8] sm:$0xff] %vm9487_vm1, %v4664_v5  ;;  %v371_v8 = vld [vmem:[%s14872_s8 + $0x588] sm:$0xff] }
 0x166   : > { %10059 = vst.msk [vmem:[%s15319_s11 + $0x11d8] sm:$0xff] %vm9487_vm1, %v7224_v6  ;;  %9546 = vst.msk [vmem:[%s15319_s11 + $0x1d0] sm:$0xff] %vm9487_vm1, %v4659_v9  ;;  %v13159_v15 = vpop.f32.mrb[60].mxu0  ;;  %v883_v9 = vld [vmem:[%s14872_s8 + $0x1588] sm:$0xff] }
 0x167   : > { %10058 = vst.msk [vmem:[%s15319_s11 + $0x11d0] sm:$0xff] %vm9487_vm1, %v7219_v10  ;;  %v13927_v16 = vpop.f32.mrb[60].mxu1  ;;  %v4674_v17 = vadd.f32 %v15812_v21, %v13159_v15  ;;  %v4668_v19 = vpop.f32.mrb[61].mxu0  ;;  %13317 = vmatmul.mubr.msk.f32.gmra.mrb[166].mxu0 %vm1229_vm0, %v361_v11  ;;  %v372_v10 = vld [vmem:[%s14872_s8 + $0x590] sm:$0xff] }
 0x168   : > { %v7234_v18 = vadd.f32 %v15812_v21, %v13927_v16  ;;  %v7228_v20 = vpop.f32.mrb[61].mxu1  ;;  %14085 = vmatmul.mubr.msk.f32.gmra.mrb[166].mxu1 %vm1229_vm0, %v873_v12  ;;  %v4669_v22 = vadd.f32 %v15812_v21, %v4668_v19  ;;  %13319 = vmatprep.mubr.msk.f32.mxu0 %vm1229_vm0, %v362_v13  ;;  %v884_v11 = vld [vmem:[%s14872_s8 + $0x1590] sm:$0xff] }
 0x169   : > { %v7229_v23 = vadd.f32 %v15812_v21, %v7228_v20  ;;  %14087 = vmatprep.mubr.msk.f32.mxu1 %vm1229_vm0, %v874_v14  ;;  %9549 = vst.msk [vmem:[%s15319_s11 + $0x1e8] sm:$0xff] %vm9487_vm1, %v4674_v17  ;;  %v373_v20 = vld [vmem:[%s14872_s8 + $0x598] sm:$0xff] }
 0x16a   : > { %10061 = vst.msk [vmem:[%s15319_s11 + $0x11e8] sm:$0xff] %vm9487_vm1, %v7234_v18  ;;  %9548 = vst.msk [vmem:[%s15319_s11 + $0x1e0] sm:$0xff] %vm9487_vm1, %v4669_v22  ;;  %v13162_v27 = vpop.f32.mrb[62].mxu0  ;;  %v885_v22 = vld [vmem:[%s14872_s8 + $0x1598] sm:$0xff] }
 0x16b   : > { %10060 = vst.msk [vmem:[%s15319_s11 + $0x11e0] sm:$0xff] %vm9487_vm1, %v7229_v23  ;;  %v13930_v28 = vpop.f32.mrb[62].mxu1  ;;  %v4684_v30 = vadd.f32 %v15812_v21, %v13162_v27  ;;  %v4678_v32 = vpop.f32.mrb[63].mxu0  ;;  %13320 = vmatmul.mubr.msk.f32.gmra.mrb[168].mxu0 %vm1229_vm0, %v363_v24  ;;  %v374_v23 = vld [vmem:[%s14872_s8 + $0x5a0] sm:$0xff] }
 0x16c   : > { %v7244_v31 = vadd.f32 %v15812_v21, %v13930_v28  ;;  %v7238_v33 = vpop.f32.mrb[63].mxu1  ;;  %14088 = vmatmul.mubr.msk.f32.gmra.mrb[168].mxu1 %vm1229_vm0, %v875_v25  ;;  %v4679_v34 = vadd.f32 %v15812_v21, %v4678_v32  ;;  %13322 = vmatprep.mubr.msk.f32.mxu0 %vm1229_vm0, %v364_v26  ;;  %v886_v24 = vld [vmem:[%s14872_s8 + $0x15a0] sm:$0xff] }
 0x16d   : > { %v7239_v35 = vadd.f32 %v15812_v21, %v7238_v33  ;;  %14090 = vmatprep.mubr.msk.f32.mxu1 %vm1229_vm0, %v876_v29  ;;  %9551 = vst.msk [vmem:[%s15319_s11 + $0x1f8] sm:$0xff] %vm9487_vm1, %v4684_v30  ;;  %v375_v33 = vld [vmem:[%s14872_s8 + $0x5a8] sm:$0xff] }
 0x16e   : > { %10063 = vst.msk [vmem:[%s15319_s11 + $0x11f8] sm:$0xff] %vm9487_vm1, %v7244_v31  ;;  %9550 = vst.msk [vmem:[%s15319_s11 + $0x1f0] sm:$0xff] %vm9487_vm1, %v4679_v34  ;;  %v13165_v40 = vpop.f32.mrb[64].mxu0  ;;  %v887_v34 = vld [vmem:[%s14872_s8 + $0x15a8] sm:$0xff] }
 0x16f   : > { %10062 = vst.msk [vmem:[%s15319_s11 + $0x11f0] sm:$0xff] %vm9487_vm1, %v7239_v35  ;;  %v13933_v41 = vpop.f32.mrb[64].mxu1  ;;  %v4694_v42 = vadd.f32 %v15812_v21, %v13165_v40  ;;  %v4688_v44 = vpop.f32.mrb[65].mxu0  ;;  %13323 = vmatmul.mubr.msk.f32.gmra.mrb[170].mxu0 %vm1229_vm0, %v365_v36  ;;  %v376_v35 = vld [vmem:[%s14872_s8 + $0x5b0] sm:$0xff] }
 0x170   : > { %v7254_v43 = vadd.f32 %v15812_v21, %v13933_v41  ;;  %v7248_v45 = vpop.f32.mrb[65].mxu1  ;;  %14091 = vmatmul.mubr.msk.f32.gmra.mrb[170].mxu1 %vm1229_vm0, %v877_v37  ;;  %v4689_v46 = vadd.f32 %v15812_v21, %v4688_v44  ;;  %13325 = vmatprep.mubr.msk.f32.mxu0 %vm1229_vm0, %v366_v38  ;;  %v888_v36 = vld [vmem:[%s14872_s8 + $0x15b0] sm:$0xff] }
 0x171   : > { %v7249_v47 = vadd.f32 %v15812_v21, %v7248_v45  ;;  %14093 = vmatprep.mubr.msk.f32.mxu1 %vm1229_vm0, %v878_v39  ;;  %9553 = vst.msk [vmem:[%s15319_s11 + $0x208] sm:$0xff] %vm9487_vm1, %v4694_v42  ;;  %v377_v45 = vld [vmem:[%s14872_s8 + $0x5b8] sm:$0xff] }
 0x172   : > { %10065 = vst.msk [vmem:[%s15319_s11 + $0x1208] sm:$0xff] %vm9487_vm1, %v7254_v43  ;;  %9552 = vst.msk [vmem:[%s15319_s11 + $0x200] sm:$0xff] %vm9487_vm1, %v4689_v46  ;;  %v13168_v52 = vpop.f32.mrb[66].mxu0  ;;  %v889_v46 = vld [vmem:[%s14872_s8 + $0x15b8] sm:$0xff] }
 0x173   : > { %10064 = vst.msk [vmem:[%s15319_s11 + $0x1200] sm:$0xff] %vm9487_vm1, %v7249_v47  ;;  %v13936_v53 = vpop.f32.mrb[66].mxu1  ;;  %v4704_v54 = vadd.f32 %v15812_v21, %v13168_v52  ;;  %v4698_v56 = vpop.f32.mrb[67].mxu0  ;;  %13326 = vmatmul.mubr.msk.f32.gmra.mrb[172].mxu0 %vm1229_vm0, %v367_v48  ;;  %v378_v47 = vld [vmem:[%s14872_s8 + $0x5c0] sm:$0xff] }
 0x174   : > { %v7264_v55 = vadd.f32 %v15812_v21, %v13936_v53  ;;  %v7258_v57 = vpop.f32.mrb[67].mxu1  ;;  %14094 = vmatmul.mubr.msk.f32.gmra.mrb[172].mxu1 %vm1229_vm0, %v879_v49  ;;  %v4699_v58 = vadd.f32 %v15812_v21, %v4698_v56  ;;  %13328 = vmatprep.mubr.msk.f32.mxu0 %vm1229_vm0, %v368_v50  ;;  %v890_v48 = vld [vmem:[%s14872_s8 + $0x15c0] sm:$0xff] }
 0x175   : > { %v7259_v59 = vadd.f32 %v15812_v21, %v7258_v57  ;;  %14096 = vmatprep.mubr.msk.f32.mxu1 %vm1229_vm0, %v880_v51  ;;  %9555 = vst.msk [vmem:[%s15319_s11 + $0x218] sm:$0xff] %vm9487_vm1, %v4704_v54  ;;  %v379_v57 = vld [vmem:[%s14872_s8 + $0x5c8] sm:$0xff] }
 0x176   : > { %10067 = vst.msk [vmem:[%s15319_s11 + $0x1218] sm:$0xff] %vm9487_vm1, %v7264_v55  ;;  %9554 = vst.msk [vmem:[%s15319_s11 + $0x210] sm:$0xff] %vm9487_vm1, %v4699_v58  ;;  %v13171_v0 = vpop.f32.mrb[68].mxu0  ;;  %v891_v58 = vld [vmem:[%s14872_s8 + $0x15c8] sm:$0xff] }
 0x177   : > { %10066 = vst.msk [vmem:[%s15319_s11 + $0x1210] sm:$0xff] %vm9487_vm1, %v7259_v59  ;;  %v13939_v1 = vpop.f32.mrb[68].mxu1  ;;  %v4714_v2 = vadd.f32 %v15812_v21, %v13171_v0  ;;  %v4708_v4 = vpop.f32.mrb[69].mxu0  ;;  %13329 = vmatmul.mubr.msk.f32.gmra.mrb[174].mxu0 %vm1229_vm0, %v369_v60  ;;  %v380_v59 = vld [vmem:[%s14872_s8 + $0x5d0] sm:$0xff] }
 0x178   : > { %v7274_v3 = vadd.f32 %v15812_v21, %v13939_v1  ;;  %v7268_v5 = vpop.f32.mrb[69].mxu1  ;;  %14097 = vmatmul.mubr.msk.f32.gmra.mrb[174].mxu1 %vm1229_vm0, %v881_v61  ;;  %v4709_v6 = vadd.f32 %v15812_v21, %v4708_v4  ;;  %13331 = vmatprep.mubr.msk.f32.mxu0 %vm1229_vm0, %v370_v62  ;;  %v892_v60 = vld [vmem:[%s14872_s8 + $0x15d0] sm:$0xff] }
 0x179   : > { %v7269_v7 = vadd.f32 %v15812_v21, %v7268_v5  ;;  %14099 = vmatprep.mubr.msk.f32.mxu1 %vm1229_vm0, %v882_v63  ;;  %9557 = vst.msk [vmem:[%s15319_s11 + $0x228] sm:$0xff] %vm9487_vm1, %v4714_v2  ;;  %v381_v5 = vld [vmem:[%s14872_s8 + $0x5d8] sm:$0xff] }
 0x17a   : > { %10069 = vst.msk [vmem:[%s15319_s11 + $0x1228] sm:$0xff] %vm9487_vm1, %v7274_v3  ;;  %9556 = vst.msk [vmem:[%s15319_s11 + $0x220] sm:$0xff] %vm9487_vm1, %v4709_v6  ;;  %v13174_v12 = vpop.f32.mrb[70].mxu0  ;;  %v893_v6 = vld [vmem:[%s14872_s8 + $0x15d8] sm:$0xff] }
 0x17b   : > { %10068 = vst.msk [vmem:[%s15319_s11 + $0x1220] sm:$0xff] %vm9487_vm1, %v7269_v7  ;;  %v13942_v13 = vpop.f32.mrb[70].mxu1  ;;  %v4724_v14 = vadd.f32 %v15812_v21, %v13174_v12  ;;  %v4718_v16 = vpop.f32.mrb[71].mxu0  ;;  %13332 = vmatmul.mubr.msk.f32.gmra.mrb[176].mxu0 %vm1229_vm0, %v371_v8  ;;  %v382_v7 = vld [vmem:[%s14872_s8 + $0x5e0] sm:$0xff] }
 0x17c   : > { %v7284_v15 = vadd.f32 %v15812_v21, %v13942_v13  ;;  %v7278_v17 = vpop.f32.mrb[71].mxu1  ;;  %14100 = vmatmul.mubr.msk.f32.gmra.mrb[176].mxu1 %vm1229_vm0, %v883_v9  ;;  %v4719_v18 = vadd.f32 %v15812_v21, %v4718_v16  ;;  %13334 = vmatprep.mubr.msk.f32.mxu0 %vm1229_vm0, %v372_v10  ;;  %v894_v8 = vld [vmem:[%s14872_s8 + $0x15e0] sm:$0xff] }
 0x17d   : > { %v7279_v19 = vadd.f32 %v15812_v21, %v7278_v17  ;;  %14102 = vmatprep.mubr.msk.f32.mxu1 %vm1229_vm0, %v884_v11  ;;  %9559 = vst.msk [vmem:[%s15319_s11 + $0x238] sm:$0xff] %vm9487_vm1, %v4724_v14  ;;  %v383_v17 = vld [vmem:[%s14872_s8 + $0x5e8] sm:$0xff] }
 0x17e   : > { %10071 = vst.msk [vmem:[%s15319_s11 + $0x1238] sm:$0xff] %vm9487_vm1, %v7284_v15  ;;  %9558 = vst.msk [vmem:[%s15319_s11 + $0x230] sm:$0xff] %vm9487_vm1, %v4719_v18  ;;  %v13177_v25 = vpop.f32.mrb[72].mxu0  ;;  %v895_v18 = vld [vmem:[%s14872_s8 + $0x15e8] sm:$0xff] }
 0x17f   : > { %10070 = vst.msk [vmem:[%s15319_s11 + $0x1230] sm:$0xff] %vm9487_vm1, %v7279_v19  ;;  %v13945_v26 = vpop.f32.mrb[72].mxu1  ;;  %v4734_v29 = vadd.f32 %v15812_v21, %v13177_v25  ;;  %v4728_v28 = vpop.f32.mrb[73].mxu0  ;;  %13335 = vmatmul.mubr.msk.f32.gmra.mrb[178].mxu0 %vm1229_vm0, %v373_v20  ;;  %v384_v19 = vld [vmem:[%s14872_s8 + $0x5f0] sm:$0xff] }
 0x180   : > { %v7294_v27 = vadd.f32 %v15812_v21, %v13945_v26  ;;  %v7288_v30 = vpop.f32.mrb[73].mxu1  ;;  %14103 = vmatmul.mubr.msk.f32.gmra.mrb[178].mxu1 %vm1229_vm0, %v885_v22  ;;  %v4729_v31 = vadd.f32 %v15812_v21, %v4728_v28  ;;  %13337 = vmatprep.mubr.msk.f32.mxu0 %vm1229_vm0, %v374_v23  ;;  %v896_v20 = vld [vmem:[%s14872_s8 + $0x15f0] sm:$0xff] }
 0x181   : > { %v7289_v32 = vadd.f32 %v15812_v21, %v7288_v30  ;;  %14105 = vmatprep.mubr.msk.f32.mxu1 %vm1229_vm0, %v886_v24  ;;  %9561 = vst.msk [vmem:[%s15319_s11 + $0x248] sm:$0xff] %vm9487_vm1, %v4734_v29  ;;  %v385_v30 = vld [vmem:[%s14872_s8 + $0x5f8] sm:$0xff] }
 0x182   : > { %10073 = vst.msk [vmem:[%s15319_s11 + $0x1248] sm:$0xff] %vm9487_vm1, %v7294_v27  ;;  %9560 = vst.msk [vmem:[%s15319_s11 + $0x240] sm:$0xff] %vm9487_vm1, %v4729_v31  ;;  %v13180_v37 = vpop.f32.mrb[74].mxu0  ;;  %v897_v31 = vld [vmem:[%s14872_s8 + $0x15f8] sm:$0xff] }
 0x183   : > { %10072 = vst.msk [vmem:[%s15319_s11 + $0x1240] sm:$0xff] %vm9487_vm1, %v7289_v32  ;;  %v13948_v38 = vpop.f32.mrb[74].mxu1  ;;  %v4744_v39 = vadd.f32 %v15812_v21, %v13180_v37  ;;  %v4738_v41 = vpop.f32.mrb[75].mxu0  ;;  %13338 = vmatmul.mubr.msk.f32.gmra.mrb[180].mxu0 %vm1229_vm0, %v375_v33  ;;  %v386_v32 = vld [vmem:[%s14872_s8 + $0x600] sm:$0xff] }
 0x184   : > { %v7304_v40 = vadd.f32 %v15812_v21, %v13948_v38  ;;  %v7298_v42 = vpop.f32.mrb[75].mxu1  ;;  %14106 = vmatmul.mubr.msk.f32.gmra.mrb[180].mxu1 %vm1229_vm0, %v887_v34  ;;  %v4739_v43 = vadd.f32 %v15812_v21, %v4738_v41  ;;  %13340 = vmatprep.mubr.msk.f32.mxu0 %vm1229_vm0, %v376_v35  ;;  %v898_v33 = vld [vmem:[%s14872_s8 + $0x1600] sm:$0xff] }
 0x185   : > { %v7299_v44 = vadd.f32 %v15812_v21, %v7298_v42  ;;  %14108 = vmatprep.mubr.msk.f32.mxu1 %vm1229_vm0, %v888_v36  ;;  %9563 = vst.msk [vmem:[%s15319_s11 + $0x258] sm:$0xff] %vm9487_vm1, %v4744_v39  ;;  %v387_v42 = vld [vmem:[%s14872_s8 + $0x608] sm:$0xff] }
 0x186   : > { %10075 = vst.msk [vmem:[%s15319_s11 + $0x1258] sm:$0xff] %vm9487_vm1, %v7304_v40  ;;  %9562 = vst.msk [vmem:[%s15319_s11 + $0x250] sm:$0xff] %vm9487_vm1, %v4739_v43  ;;  %v13183_v49 = vpop.f32.mrb[76].mxu0  ;;  %v899_v43 = vld [vmem:[%s14872_s8 + $0x1608] sm:$0xff] }
 0x187   : > { %10074 = vst.msk [vmem:[%s15319_s11 + $0x1250] sm:$0xff] %vm9487_vm1, %v7299_v44  ;;  %v13951_v50 = vpop.f32.mrb[76].mxu1  ;;  %v4754_v51 = vadd.f32 %v15812_v21, %v13183_v49  ;;  %v4748_v53 = vpop.f32.mrb[77].mxu0  ;;  %13341 = vmatmul.mubr.msk.f32.gmra.mrb[182].mxu0 %vm1229_vm0, %v377_v45  ;;  %v388_v44 = vld [vmem:[%s14872_s8 + $0x610] sm:$0xff] }
 0x188   : > { %v7314_v52 = vadd.f32 %v15812_v21, %v13951_v50  ;;  %v7308_v54 = vpop.f32.mrb[77].mxu1  ;;  %14109 = vmatmul.mubr.msk.f32.gmra.mrb[182].mxu1 %vm1229_vm0, %v889_v46  ;;  %v4749_v55 = vadd.f32 %v15812_v21, %v4748_v53  ;;  %13343 = vmatprep.mubr.msk.f32.mxu0 %vm1229_vm0, %v378_v47  ;;  %v900_v45 = vld [vmem:[%s14872_s8 + $0x1610] sm:$0xff] }
 0x189   : > { %v7309_v56 = vadd.f32 %v15812_v21, %v7308_v54  ;;  %14111 = vmatprep.mubr.msk.f32.mxu1 %vm1229_vm0, %v890_v48  ;;  %9565 = vst.msk [vmem:[%s15319_s11 + $0x268] sm:$0xff] %vm9487_vm1, %v4754_v51  ;;  %v389_v54 = vld [vmem:[%s14872_s8 + $0x618] sm:$0xff] }
 0x18a   : > { %10077 = vst.msk [vmem:[%s15319_s11 + $0x1268] sm:$0xff] %vm9487_vm1, %v7314_v52  ;;  %9564 = vst.msk [vmem:[%s15319_s11 + $0x260] sm:$0xff] %vm9487_vm1, %v4749_v55  ;;  %v13186_v61 = vpop.f32.mrb[78].mxu0  ;;  %v901_v55 = vld [vmem:[%s14872_s8 + $0x1618] sm:$0xff] }
 0x18b   : > { %10076 = vst.msk [vmem:[%s15319_s11 + $0x1260] sm:$0xff] %vm9487_vm1, %v7309_v56  ;;  %v13954_v62 = vpop.f32.mrb[78].mxu1  ;;  %v4764_v63 = vadd.f32 %v15812_v21, %v13186_v61  ;;  %v4758_v1 = vpop.f32.mrb[79].mxu0  ;;  %13344 = vmatmul.mubr.msk.f32.gmra.mrb[184].mxu0 %vm1229_vm0, %v379_v57  ;;  %v390_v56 = vld [vmem:[%s14872_s8 + $0x620] sm:$0xff] }
 0x18c   : > { %v7324_v0 = vadd.f32 %v15812_v21, %v13954_v62  ;;  %v7318_v2 = vpop.f32.mrb[79].mxu1  ;;  %14112 = vmatmul.mubr.msk.f32.gmra.mrb[184].mxu1 %vm1229_vm0, %v891_v58  ;;  %v4759_v3 = vadd.f32 %v15812_v21, %v4758_v1  ;;  %13346 = vmatprep.mubr.msk.f32.mxu0 %vm1229_vm0, %v380_v59  ;;  %v902_v57 = vld [vmem:[%s14872_s8 + $0x1620] sm:$0xff] }
 0x18d   : > { %v7319_v4 = vadd.f32 %v15812_v21, %v7318_v2  ;;  %14114 = vmatprep.mubr.msk.f32.mxu1 %vm1229_vm0, %v892_v60  ;;  %9567 = vst.msk [vmem:[%s15319_s11 + $0x278] sm:$0xff] %vm9487_vm1, %v4764_v63  ;;  %v391_v2 = vld [vmem:[%s14872_s8 + $0x628] sm:$0xff] }
 0x18e   : > { %10079 = vst.msk [vmem:[%s15319_s11 + $0x1278] sm:$0xff] %vm9487_vm1, %v7324_v0  ;;  %9566 = vst.msk [vmem:[%s15319_s11 + $0x270] sm:$0xff] %vm9487_vm1, %v4759_v3  ;;  %v13189_v9 = vpop.f32.mrb[80].mxu0  ;;  %v903_v3 = vld [vmem:[%s14872_s8 + $0x1628] sm:$0xff] }
 0x18f   : > { %10078 = vst.msk [vmem:[%s15319_s11 + $0x1270] sm:$0xff] %vm9487_vm1, %v7319_v4  ;;  %v13957_v10 = vpop.f32.mrb[80].mxu1  ;;  %v4774_v11 = vadd.f32 %v15812_v21, %v13189_v9  ;;  %v4768_v13 = vpop.f32.mrb[81].mxu0  ;;  %13347 = vmatmul.mubr.msk.f32.gmra.mrb[186].mxu0 %vm1229_vm0, %v381_v5  ;;  %v392_v4 = vld [vmem:[%s14872_s8 + $0x630] sm:$0xff] }
 0x190   : > { %v7334_v12 = vadd.f32 %v15812_v21, %v13957_v10  ;;  %v7328_v14 = vpop.f32.mrb[81].mxu1  ;;  %14115 = vmatmul.mubr.msk.f32.gmra.mrb[186].mxu1 %vm1229_vm0, %v893_v6  ;;  %v4769_v15 = vadd.f32 %v15812_v21, %v4768_v13  ;;  %13349 = vmatprep.mubr.msk.f32.mxu0 %vm1229_vm0, %v382_v7  ;;  %v904_v5 = vld [vmem:[%s14872_s8 + $0x1630] sm:$0xff] }
 0x191   : > { %v7329_v16 = vadd.f32 %v15812_v21, %v7328_v14  ;;  %14117 = vmatprep.mubr.msk.f32.mxu1 %vm1229_vm0, %v894_v8  ;;  %9569 = vst.msk [vmem:[%s15319_s11 + $0x288] sm:$0xff] %vm9487_vm1, %v4774_v11  ;;  %v393_v14 = vld [vmem:[%s14872_s8 + $0x638] sm:$0xff] }
 0x192   : > { %10081 = vst.msk [vmem:[%s15319_s11 + $0x1288] sm:$0xff] %vm9487_vm1, %v7334_v12  ;;  %9568 = vst.msk [vmem:[%s15319_s11 + $0x280] sm:$0xff] %vm9487_vm1, %v4769_v15  ;;  %v13192_v22 = vpop.f32.mrb[82].mxu0  ;;  %v905_v15 = vld [vmem:[%s14872_s8 + $0x1638] sm:$0xff] }
 0x193   : > { %10080 = vst.msk [vmem:[%s15319_s11 + $0x1280] sm:$0xff] %vm9487_vm1, %v7329_v16  ;;  %v13960_v23 = vpop.f32.mrb[82].mxu1  ;;  %v4784_v24 = vadd.f32 %v15812_v21, %v13192_v22  ;;  %v4778_v26 = vpop.f32.mrb[83].mxu0  ;;  %13350 = vmatmul.mubr.msk.f32.gmra.mrb[188].mxu0 %vm1229_vm0, %v383_v17  ;;  %v394_v16 = vld [vmem:[%s14872_s8 + $0x640] sm:$0xff] }
 0x194   : > { %v7344_v25 = vadd.f32 %v15812_v21, %v13960_v23  ;;  %v7338_v29 = vpop.f32.mrb[83].mxu1  ;;  %14118 = vmatmul.mubr.msk.f32.gmra.mrb[188].mxu1 %vm1229_vm0, %v895_v18  ;;  %v4779_v27 = vadd.f32 %v15812_v21, %v4778_v26  ;;  %13352 = vmatprep.mubr.msk.f32.mxu0 %vm1229_vm0, %v384_v19  ;;  %v906_v17 = vld [vmem:[%s14872_s8 + $0x1640] sm:$0xff] }
 0x195   : > { %v7339_v28 = vadd.f32 %v15812_v21, %v7338_v29  ;;  %14120 = vmatprep.mubr.msk.f32.mxu1 %vm1229_vm0, %v896_v20  ;;  %9571 = vst.msk [vmem:[%s15319_s11 + $0x298] sm:$0xff] %vm9487_vm1, %v4784_v24  ;;  %v395_v29 = vld [vmem:[%s14872_s8 + $0x648] sm:$0xff] }
 0x196   : > { %10083 = vst.msk [vmem:[%s15319_s11 + $0x1298] sm:$0xff] %vm9487_vm1, %v7344_v25  ;;  %9570 = vst.msk [vmem:[%s15319_s11 + $0x290] sm:$0xff] %vm9487_vm1, %v4779_v27  ;;  %v13195_v34 = vpop.f32.mrb[84].mxu0  ;;  %v907_v27 = vld [vmem:[%s14872_s8 + $0x1648] sm:$0xff] }
 0x197   : > { %10082 = vst.msk [vmem:[%s15319_s11 + $0x1290] sm:$0xff] %vm9487_vm1, %v7339_v28  ;;  %v13963_v35 = vpop.f32.mrb[84].mxu1  ;;  %v4794_v36 = vadd.f32 %v15812_v21, %v13195_v34  ;;  %v4788_v38 = vpop.f32.mrb[85].mxu0  ;;  %13353 = vmatmul.mubr.msk.f32.gmra.mrb[190].mxu0 %vm1229_vm0, %v385_v30  ;;  %v396_v28 = vld [vmem:[%s14872_s8 + $0x650] sm:$0xff] }
 0x198   : > { %v7354_v37 = vadd.f32 %v15812_v21, %v13963_v35  ;;  %v7348_v39 = vpop.f32.mrb[85].mxu1  ;;  %14121 = vmatmul.mubr.msk.f32.gmra.mrb[190].mxu1 %vm1229_vm0, %v897_v31  ;;  %v4789_v40 = vadd.f32 %v15812_v21, %v4788_v38  ;;  %13355 = vmatprep.mubr.msk.f32.mxu0 %vm1229_vm0, %v386_v32  ;;  %v908_v30 = vld [vmem:[%s14872_s8 + $0x1650] sm:$0xff] }
 0x199   : > { %v7349_v41 = vadd.f32 %v15812_v21, %v7348_v39  ;;  %14123 = vmatprep.mubr.msk.f32.mxu1 %vm1229_vm0, %v898_v33  ;;  %9573 = vst.msk [vmem:[%s15319_s11 + $0x2a8] sm:$0xff] %vm9487_vm1, %v4794_v36  ;;  %v397_v39 = vld [vmem:[%s14872_s8 + $0x658] sm:$0xff] }
 0x19a   : > { %10085 = vst.msk [vmem:[%s15319_s11 + $0x12a8] sm:$0xff] %vm9487_vm1, %v7354_v37  ;;  %9572 = vst.msk [vmem:[%s15319_s11 + $0x2a0] sm:$0xff] %vm9487_vm1, %v4789_v40  ;;  %v13198_v46 = vpop.f32.mrb[86].mxu0  ;;  %v909_v40 = vld [vmem:[%s14872_s8 + $0x1658] sm:$0xff] }
 0x19b   : > { %10084 = vst.msk [vmem:[%s15319_s11 + $0x12a0] sm:$0xff] %vm9487_vm1, %v7349_v41  ;;  %v13966_v47 = vpop.f32.mrb[86].mxu1  ;;  %v4804_v48 = vadd.f32 %v15812_v21, %v13198_v46  ;;  %v4798_v50 = vpop.f32.mrb[87].mxu0  ;;  %13356 = vmatmul.mubr.msk.f32.gmra.mrb[192].mxu0 %vm1229_vm0, %v387_v42  ;;  %v398_v41 = vld [vmem:[%s14872_s8 + $0x660] sm:$0xff] }
 0x19c   : > { %v7364_v49 = vadd.f32 %v15812_v21, %v13966_v47  ;;  %v7358_v51 = vpop.f32.mrb[87].mxu1  ;;  %14124 = vmatmul.mubr.msk.f32.gmra.mrb[192].mxu1 %vm1229_vm0, %v899_v43  ;;  %v4799_v52 = vadd.f32 %v15812_v21, %v4798_v50  ;;  %13358 = vmatprep.mubr.msk.f32.mxu0 %vm1229_vm0, %v388_v44  ;;  %v910_v42 = vld [vmem:[%s14872_s8 + $0x1660] sm:$0xff] }
 0x19d   : > { %v7359_v53 = vadd.f32 %v15812_v21, %v7358_v51  ;;  %14126 = vmatprep.mubr.msk.f32.mxu1 %vm1229_vm0, %v900_v45  ;;  %9575 = vst.msk [vmem:[%s15319_s11 + $0x2b8] sm:$0xff] %vm9487_vm1, %v4804_v48  ;;  %v399_v51 = vld [vmem:[%s14872_s8 + $0x668] sm:$0xff] }
 0x19e   : > { %10087 = vst.msk [vmem:[%s15319_s11 + $0x12b8] sm:$0xff] %vm9487_vm1, %v7364_v49  ;;  %9574 = vst.msk [vmem:[%s15319_s11 + $0x2b0] sm:$0xff] %vm9487_vm1, %v4799_v52  ;;  %v13201_v58 = vpop.f32.mrb[88].mxu0  ;;  %v911_v52 = vld [vmem:[%s14872_s8 + $0x1668] sm:$0xff] }
 0x19f   : > { %10086 = vst.msk [vmem:[%s15319_s11 + $0x12b0] sm:$0xff] %vm9487_vm1, %v7359_v53  ;;  %v13969_v59 = vpop.f32.mrb[88].mxu1  ;;  %v4814_v60 = vadd.f32 %v15812_v21, %v13201_v58  ;;  %v4808_v62 = vpop.f32.mrb[89].mxu0  ;;  %13359 = vmatmul.mubr.msk.f32.gmra.mrb[194].mxu0 %vm1229_vm0, %v389_v54  ;;  %v400_v53 = vld [vmem:[%s14872_s8 + $0x670] sm:$0xff] }
 0x1a0   : > { %v7374_v61 = vadd.f32 %v15812_v21, %v13969_v59  ;;  %v7368_v63 = vpop.f32.mrb[89].mxu1  ;;  %14127 = vmatmul.mubr.msk.f32.gmra.mrb[194].mxu1 %vm1229_vm0, %v901_v55  ;;  %v4809_v0 = vadd.f32 %v15812_v21, %v4808_v62  ;;  %13361 = vmatprep.mubr.msk.f32.mxu0 %vm1229_vm0, %v390_v56  ;;  %v912_v54 = vld [vmem:[%s14872_s8 + $0x1670] sm:$0xff] }
 0x1a1   : > { %v7369_v1 = vadd.f32 %v15812_v21, %v7368_v63  ;;  %14129 = vmatprep.mubr.msk.f32.mxu1 %vm1229_vm0, %v902_v57  ;;  %9577 = vst.msk [vmem:[%s15319_s11 + $0x2c8] sm:$0xff] %vm9487_vm1, %v4814_v60  ;;  %v401_v63 = vld [vmem:[%s14872_s8 + $0x678] sm:$0xff] }
 0x1a2   : > { %10089 = vst.msk [vmem:[%s15319_s11 + $0x12c8] sm:$0xff] %vm9487_vm1, %v7374_v61  ;;  %9576 = vst.msk [vmem:[%s15319_s11 + $0x2c0] sm:$0xff] %vm9487_vm1, %v4809_v0  ;;  %v13204_v6 = vpop.f32.mrb[90].mxu0  ;;  %v913_v0 = vld [vmem:[%s14872_s8 + $0x1678] sm:$0xff] }
 0x1a3   : > { %10088 = vst.msk [vmem:[%s15319_s11 + $0x12c0] sm:$0xff] %vm9487_vm1, %v7369_v1  ;;  %v13972_v7 = vpop.f32.mrb[90].mxu1  ;;  %v4824_v8 = vadd.f32 %v15812_v21, %v13204_v6  ;;  %v4818_v10 = vpop.f32.mrb[91].mxu0  ;;  %13362 = vmatmul.mubr.msk.f32.gmra.mrb[196].mxu0 %vm1229_vm0, %v391_v2  ;;  %v402_v1 = vld [vmem:[%s14872_s8 + $0x680] sm:$0xff] }
 0x1a4   : > { %v7384_v9 = vadd.f32 %v15812_v21, %v13972_v7  ;;  %v7378_v11 = vpop.f32.mrb[91].mxu1  ;;  %14130 = vmatmul.mubr.msk.f32.gmra.mrb[196].mxu1 %vm1229_vm0, %v903_v3  ;;  %v4819_v12 = vadd.f32 %v15812_v21, %v4818_v10  ;;  %13364 = vmatprep.mubr.msk.f32.mxu0 %vm1229_vm0, %v392_v4  ;;  %v914_v2 = vld [vmem:[%s14872_s8 + $0x1680] sm:$0xff] }
 0x1a5   : > { %v7379_v13 = vadd.f32 %v15812_v21, %v7378_v11  ;;  %14132 = vmatprep.mubr.msk.f32.mxu1 %vm1229_vm0, %v904_v5  ;;  %9579 = vst.msk [vmem:[%s15319_s11 + $0x2d8] sm:$0xff] %vm9487_vm1, %v4824_v8  ;;  %v403_v11 = vld [vmem:[%s14872_s8 + $0x688] sm:$0xff] }
 0x1a6   : > { %10091 = vst.msk [vmem:[%s15319_s11 + $0x12d8] sm:$0xff] %vm9487_vm1, %v7384_v9  ;;  %9578 = vst.msk [vmem:[%s15319_s11 + $0x2d0] sm:$0xff] %vm9487_vm1, %v4819_v12  ;;  %v13207_v18 = vpop.f32.mrb[92].mxu0  ;;  %v915_v12 = vld [vmem:[%s14872_s8 + $0x1688] sm:$0xff] }
 0x1a7   : > { %10090 = vst.msk [vmem:[%s15319_s11 + $0x12d0] sm:$0xff] %vm9487_vm1, %v7379_v13  ;;  %v13975_v19 = vpop.f32.mrb[92].mxu1  ;;  %v4834_v20 = vadd.f32 %v15812_v21, %v13207_v18  ;;  %v4828_v23 = vpop.f32.mrb[93].mxu0  ;;  %13365 = vmatmul.mubr.msk.f32.gmra.mrb[198].mxu0 %vm1229_vm0, %v393_v14  ;;  %v404_v13 = vld [vmem:[%s14872_s8 + $0x690] sm:$0xff] }
 0x1a8   : > { %v7394_v22 = vadd.f32 %v15812_v21, %v13975_v19  ;;  %v7388_v24 = vpop.f32.mrb[93].mxu1  ;;  %14133 = vmatmul.mubr.msk.f32.gmra.mrb[198].mxu1 %vm1229_vm0, %v905_v15  ;;  %v4829_v25 = vadd.f32 %v15812_v21, %v4828_v23  ;;  %13367 = vmatprep.mubr.msk.f32.mxu0 %vm1229_vm0, %v394_v16  ;;  %v916_v14 = vld [vmem:[%s14872_s8 + $0x1690] sm:$0xff]  ;;  %v16333_v16 = vld [vmem:[#allocation2] ss:$0 sm:$0xff] }
 0x1a9   : > { %v7389_v26 = vadd.f32 %v15812_v21, %v7388_v24  ;;  %14135 = vmatprep.mubr.msk.f32.mxu1 %vm1229_vm0, %v906_v17  ;;  %9581 = vst.msk [vmem:[%s15319_s11 + $0x2e8] sm:$0xff] %vm9487_vm1, %v4834_v20  ;;  %v405_v24 = vld [vmem:[%s14872_s8 + $0x698] sm:$0xff] }
 0x1aa   : > { %10093 = vst.msk [vmem:[%s15319_s11 + $0x12e8] sm:$0xff] %vm9487_vm1, %v7394_v22  ;;  %9580 = vst.msk [vmem:[%s15319_s11 + $0x2e0] sm:$0xff] %vm9487_vm1, %v4829_v25  ;;  %v13210_v31 = vpop.f32.mrb[94].mxu0  ;;  %v917_v25 = vld [vmem:[%s14872_s8 + $0x1698] sm:$0xff] }
 0x1ab   : > { %10092 = vst.msk [vmem:[%s15319_s11 + $0x12e0] sm:$0xff] %vm9487_vm1, %v7389_v26  ;;  %v13978_v32 = vpop.f32.mrb[94].mxu1  ;;  %v4844_v33 = vadd.f32 %v15812_v21, %v13210_v31  ;;  %v4838_v35 = vpop.f32.mrb[95].mxu0  ;;  %13368 = vmatmul.mubr.msk.f32.gmra.mrb[200].mxu0 %vm1229_vm0, %v395_v29  ;;  %v406_v26 = vld [vmem:[%s14872_s8 + $0x6a0] sm:$0xff] }
 0x1ac   : > { %v7404_v34 = vadd.f32 %v15812_v21, %v13978_v32  ;;  %v7398_v36 = vpop.f32.mrb[95].mxu1  ;;  %14136 = vmatmul.mubr.msk.f32.gmra.mrb[200].mxu1 %vm1229_vm0, %v907_v27  ;;  %v4839_v37 = vadd.f32 %v15812_v21, %v4838_v35  ;;  %13370 = vmatprep.mubr.msk.f32.mxu0 %vm1229_vm0, %v396_v28  ;;  %v918_v29 = vld [vmem:[%s14872_s8 + $0x16a0] sm:$0xff] }
 0x1ad   : > { %v7399_v38 = vadd.f32 %v15812_v21, %v7398_v36  ;;  %14138 = vmatprep.mubr.msk.f32.mxu1 %vm1229_vm0, %v908_v30  ;;  %9583 = vst.msk [vmem:[%s15319_s11 + $0x2f8] sm:$0xff] %vm9487_vm1, %v4844_v33  ;;  %v407_v36 = vld [vmem:[%s14872_s8 + $0x6a8] sm:$0xff] }
 0x1ae   : > { %10095 = vst.msk [vmem:[%s15319_s11 + $0x12f8] sm:$0xff] %vm9487_vm1, %v7404_v34  ;;  %9582 = vst.msk [vmem:[%s15319_s11 + $0x2f0] sm:$0xff] %vm9487_vm1, %v4839_v37  ;;  %v13213_v43 = vpop.f32.mrb[96].mxu0  ;;  %v919_v37 = vld [vmem:[%s14872_s8 + $0x16a8] sm:$0xff] }
 0x1af   : > { %10094 = vst.msk [vmem:[%s15319_s11 + $0x12f0] sm:$0xff] %vm9487_vm1, %v7399_v38  ;;  %v13981_v44 = vpop.f32.mrb[96].mxu1  ;;  %v4854_v45 = vadd.f32 %v15812_v21, %v13213_v43  ;;  %v4848_v47 = vpop.f32.mrb[97].mxu0  ;;  %13371 = vmatmul.mubr.msk.f32.gmra.mrb[202].mxu0 %vm1229_vm0, %v397_v39  ;;  %v408_v38 = vld [vmem:[%s14872_s8 + $0x6b0] sm:$0xff] }
 0x1b0   : > { %v7414_v46 = vadd.f32 %v15812_v21, %v13981_v44  ;;  %v7408_v48 = vpop.f32.mrb[97].mxu1  ;;  %14139 = vmatmul.mubr.msk.f32.gmra.mrb[202].mxu1 %vm1229_vm0, %v909_v40  ;;  %v4849_v49 = vadd.f32 %v15812_v21, %v4848_v47  ;;  %13373 = vmatprep.mubr.msk.f32.mxu0 %vm1229_vm0, %v398_v41  ;;  %v920_v39 = vld [vmem:[%s14872_s8 + $0x16b0] sm:$0xff] }
 0x1b1   : > { %v7409_v50 = vadd.f32 %v15812_v21, %v7408_v48  ;;  %14141 = vmatprep.mubr.msk.f32.mxu1 %vm1229_vm0, %v910_v42  ;;  %9585 = vst.msk [vmem:[%s15319_s11 + $0x308] sm:$0xff] %vm9487_vm1, %v4854_v45  ;;  %v409_v48 = vld [vmem:[%s14872_s8 + $0x6b8] sm:$0xff] }
 0x1b2   : > { %10097 = vst.msk [vmem:[%s15319_s11 + $0x1308] sm:$0xff] %vm9487_vm1, %v7414_v46  ;;  %9584 = vst.msk [vmem:[%s15319_s11 + $0x300] sm:$0xff] %vm9487_vm1, %v4849_v49  ;;  %v13216_v55 = vpop.f32.mrb[98].mxu0  ;;  %v921_v49 = vld [vmem:[%s14872_s8 + $0x16b8] sm:$0xff] }
 0x1b3   : > { %10096 = vst.msk [vmem:[%s15319_s11 + $0x1300] sm:$0xff] %vm9487_vm1, %v7409_v50  ;;  %v13984_v56 = vpop.f32.mrb[98].mxu1  ;;  %v4864_v57 = vadd.f32 %v15812_v21, %v13216_v55  ;;  %v4858_v59 = vpop.f32.mrb[99].mxu0  ;;  %13374 = vmatmul.mubr.msk.f32.gmra.mrb[204].mxu0 %vm1229_vm0, %v399_v51  ;;  %v410_v50 = vld [vmem:[%s14872_s8 + $0x6c0] sm:$0xff] }
 0x1b4   : > { %v7424_v58 = vadd.f32 %v15812_v21, %v13984_v56  ;;  %v7418_v60 = vpop.f32.mrb[99].mxu1  ;;  %14142 = vmatmul.mubr.msk.f32.gmra.mrb[204].mxu1 %vm1229_vm0, %v911_v52  ;;  %v4859_v61 = vadd.f32 %v15812_v21, %v4858_v59  ;;  %13376 = vmatprep.mubr.msk.f32.mxu0 %vm1229_vm0, %v400_v53  ;;  %v922_v51 = vld [vmem:[%s14872_s8 + $0x16c0] sm:$0xff] }
 0x1b5   : > { %v7419_v62 = vadd.f32 %v15812_v21, %v7418_v60  ;;  %14144 = vmatprep.mubr.msk.f32.mxu1 %vm1229_vm0, %v912_v54  ;;  %9587 = vst.msk [vmem:[%s15319_s11 + $0x318] sm:$0xff] %vm9487_vm1, %v4864_v57  ;;  %v411_v60 = vld [vmem:[%s14872_s8 + $0x6c8] sm:$0xff] }
 0x1b6   : > { %10099 = vst.msk [vmem:[%s15319_s11 + $0x1318] sm:$0xff] %vm9487_vm1, %v7424_v58  ;;  %9586 = vst.msk [vmem:[%s15319_s11 + $0x310] sm:$0xff] %vm9487_vm1, %v4859_v61  ;;  %v13219_v3 = vpop.f32.mrb[100].mxu0  ;;  %v923_v61 = vld [vmem:[%s14872_s8 + $0x16c8] sm:$0xff] }
 0x1b7   : > { %10098 = vst.msk [vmem:[%s15319_s11 + $0x1310] sm:$0xff] %vm9487_vm1, %v7419_v62  ;;  %v13987_v4 = vpop.f32.mrb[100].mxu1  ;;  %v4874_v5 = vadd.f32 %v15812_v21, %v13219_v3  ;;  %v4868_v7 = vpop.f32.mrb[101].mxu0  ;;  %13377 = vmatmul.mubr.msk.f32.gmra.mrb[206].mxu0 %vm1229_vm0, %v401_v63  ;;  %v412_v62 = vld [vmem:[%s14872_s8 + $0x6d0] sm:$0xff] }
 0x1b8   : > { %v7434_v6 = vadd.f32 %v15812_v21, %v13987_v4  ;;  %v7428_v8 = vpop.f32.mrb[101].mxu1  ;;  %14145 = vmatmul.mubr.msk.f32.gmra.mrb[206].mxu1 %vm1229_vm0, %v913_v0  ;;  %v4869_v9 = vadd.f32 %v15812_v21, %v4868_v7  ;;  %13379 = vmatprep.mubr.msk.f32.mxu0 %vm1229_vm0, %v402_v1  ;;  %v924_v63 = vld [vmem:[%s14872_s8 + $0x16d0] sm:$0xff] }
 0x1b9   : > { %v7429_v10 = vadd.f32 %v15812_v21, %v7428_v8  ;;  %14147 = vmatprep.mubr.msk.f32.mxu1 %vm1229_vm0, %v914_v2  ;;  %9589 = vst.msk [vmem:[%s15319_s11 + $0x328] sm:$0xff] %vm9487_vm1, %v4874_v5  ;;  %v413_v8 = vld [vmem:[%s14872_s8 + $0x6d8] sm:$0xff] }
 0x1ba   : > { %10101 = vst.msk [vmem:[%s15319_s11 + $0x1328] sm:$0xff] %vm9487_vm1, %v7434_v6  ;;  %9588 = vst.msk [vmem:[%s15319_s11 + $0x320] sm:$0xff] %vm9487_vm1, %v4869_v9  ;;  %v13222_v21 = vpop.f32.mrb[102].mxu0  ;;  %v925_v9 = vld [vmem:[%s14872_s8 + $0x16d8] sm:$0xff] }
 0x1bb   : > { %10100 = vst.msk [vmem:[%s15319_s11 + $0x1320] sm:$0xff] %vm9487_vm1, %v7429_v10  ;;  %v13990_v15 = vpop.f32.mrb[102].mxu1  ;;  %v4884_v17 = vadd.f32 %v16333_v16, %v13222_v21  ;;  %v4878_v19 = vpop.f32.mrb[103].mxu0  ;;  %13380 = vmatmul.mubr.msk.f32.gmra.mrb[208].mxu0 %vm1229_vm0, %v403_v11  ;;  %v414_v10 = vld [vmem:[%s14872_s8 + $0x6e0] sm:$0xff] }
 0x1bc   : > { %v7444_v18 = vadd.f32 %v16333_v16, %v13990_v15  ;;  %v7438_v20 = vpop.f32.mrb[103].mxu1  ;;  %14148 = vmatmul.mubr.msk.f32.gmra.mrb[208].mxu1 %vm1229_vm0, %v915_v12  ;;  %v4879_v22 = vadd.f32 %v16333_v16, %v4878_v19  ;;  %13382 = vmatprep.mubr.msk.f32.mxu0 %vm1229_vm0, %v404_v13  ;;  %v926_v11 = vld [vmem:[%s14872_s8 + $0x16e0] sm:$0xff] }
 0x1bd   : > { %v7439_v23 = vadd.f32 %v16333_v16, %v7438_v20  ;;  %14150 = vmatprep.mubr.msk.f32.mxu1 %vm1229_vm0, %v916_v14  ;;  %9591 = vst.msk [vmem:[%s15319_s11 + $0x338] sm:$0xff] %vm9487_vm1, %v4884_v17  ;;  %v415_v20 = vld [vmem:[%s14872_s8 + $0x6e8] sm:$0xff] }
 0x1be   : > { %10103 = vst.msk [vmem:[%s15319_s11 + $0x1338] sm:$0xff] %vm9487_vm1, %v7444_v18  ;;  %9590 = vst.msk [vmem:[%s15319_s11 + $0x330] sm:$0xff] %vm9487_vm1, %v4879_v22  ;;  %v13225_v27 = vpop.f32.mrb[104].mxu0  ;;  %v927_v22 = vld [vmem:[%s14872_s8 + $0x16e8] sm:$0xff] }
 0x1bf   : > { %10102 = vst.msk [vmem:[%s15319_s11 + $0x1330] sm:$0xff] %vm9487_vm1, %v7439_v23  ;;  %v13993_v28 = vpop.f32.mrb[104].mxu1  ;;  %v4894_v30 = vadd.f32 %v16333_v16, %v13225_v27  ;;  %v4888_v32 = vpop.f32.mrb[105].mxu0  ;;  %13383 = vmatmul.mubr.msk.f32.gmra.mrb[210].mxu0 %vm1229_vm0, %v405_v24  ;;  %v416_v23 = vld [vmem:[%s14872_s8 + $0x6f0] sm:$0xff] }
 0x1c0   : > { %v7454_v31 = vadd.f32 %v16333_v16, %v13993_v28  ;;  %v7448_v33 = vpop.f32.mrb[105].mxu1  ;;  %14151 = vmatmul.mubr.msk.f32.gmra.mrb[210].mxu1 %vm1229_vm0, %v917_v25  ;;  %v4889_v34 = vadd.f32 %v16333_v16, %v4888_v32  ;;  %13385 = vmatprep.mubr.msk.f32.mxu0 %vm1229_vm0, %v406_v26  ;;  %v928_v24 = vld [vmem:[%s14872_s8 + $0x16f0] sm:$0xff] }
 0x1c1   : > { %v7449_v35 = vadd.f32 %v16333_v16, %v7448_v33  ;;  %14153 = vmatprep.mubr.msk.f32.mxu1 %vm1229_vm0, %v918_v29  ;;  %9593 = vst.msk [vmem:[%s15319_s11 + $0x348] sm:$0xff] %vm9487_vm1, %v4894_v30  ;;  %v417_v33 = vld [vmem:[%s14872_s8 + $0x6f8] sm:$0xff] }
 0x1c2   : > { %10105 = vst.msk [vmem:[%s15319_s11 + $0x1348] sm:$0xff] %vm9487_vm1, %v7454_v31  ;;  %9592 = vst.msk [vmem:[%s15319_s11 + $0x340] sm:$0xff] %vm9487_vm1, %v4889_v34  ;;  %v13228_v40 = vpop.f32.mrb[106].mxu0  ;;  %v929_v34 = vld [vmem:[%s14872_s8 + $0x16f8] sm:$0xff] }
 0x1c3   : > { %10104 = vst.msk [vmem:[%s15319_s11 + $0x1340] sm:$0xff] %vm9487_vm1, %v7449_v35  ;;  %v13996_v41 = vpop.f32.mrb[106].mxu1  ;;  %v4904_v42 = vadd.f32 %v16333_v16, %v13228_v40  ;;  %v4898_v44 = vpop.f32.mrb[107].mxu0  ;;  %13386 = vmatmul.mubr.msk.f32.gmra.mrb[212].mxu0 %vm1229_vm0, %v407_v36  ;;  %v418_v35 = vld [vmem:[%s14872_s8 + $0x700] sm:$0xff] }
 0x1c4   : > { %v7464_v43 = vadd.f32 %v16333_v16, %v13996_v41  ;;  %v7458_v45 = vpop.f32.mrb[107].mxu1  ;;  %14154 = vmatmul.mubr.msk.f32.gmra.mrb[212].mxu1 %vm1229_vm0, %v919_v37  ;;  %v4899_v46 = vadd.f32 %v16333_v16, %v4898_v44  ;;  %13388 = vmatprep.mubr.msk.f32.mxu0 %vm1229_vm0, %v408_v38  ;;  %v930_v36 = vld [vmem:[%s14872_s8 + $0x1700] sm:$0xff] }
 0x1c5   : > { %v7459_v47 = vadd.f32 %v16333_v16, %v7458_v45  ;;  %14156 = vmatprep.mubr.msk.f32.mxu1 %vm1229_vm0, %v920_v39  ;;  %9595 = vst.msk [vmem:[%s15319_s11 + $0x358] sm:$0xff] %vm9487_vm1, %v4904_v42  ;;  %v419_v45 = vld [vmem:[%s14872_s8 + $0x708] sm:$0xff] }
 0x1c6   : > { %10107 = vst.msk [vmem:[%s15319_s11 + $0x1358] sm:$0xff] %vm9487_vm1, %v7464_v43  ;;  %9594 = vst.msk [vmem:[%s15319_s11 + $0x350] sm:$0xff] %vm9487_vm1, %v4899_v46  ;;  %v13231_v52 = vpop.f32.mrb[108].mxu0  ;;  %v931_v46 = vld [vmem:[%s14872_s8 + $0x1708] sm:$0xff] }
 0x1c7   : > { %10106 = vst.msk [vmem:[%s15319_s11 + $0x1350] sm:$0xff] %vm9487_vm1, %v7459_v47  ;;  %v13999_v53 = vpop.f32.mrb[108].mxu1  ;;  %v4914_v54 = vadd.f32 %v16333_v16, %v13231_v52  ;;  %v4908_v56 = vpop.f32.mrb[109].mxu0  ;;  %13389 = vmatmul.mubr.msk.f32.gmra.mrb[214].mxu0 %vm1229_vm0, %v409_v48  ;;  %v420_v47 = vld [vmem:[%s14872_s8 + $0x710] sm:$0xff] }
 0x1c8   : > { %v7474_v55 = vadd.f32 %v16333_v16, %v13999_v53  ;;  %v7468_v57 = vpop.f32.mrb[109].mxu1  ;;  %14157 = vmatmul.mubr.msk.f32.gmra.mrb[214].mxu1 %vm1229_vm0, %v921_v49  ;;  %v4909_v58 = vadd.f32 %v16333_v16, %v4908_v56  ;;  %13391 = vmatprep.mubr.msk.f32.mxu0 %vm1229_vm0, %v410_v50  ;;  %v932_v48 = vld [vmem:[%s14872_s8 + $0x1710] sm:$0xff] }
 0x1c9   : > { %v7469_v59 = vadd.f32 %v16333_v16, %v7468_v57  ;;  %14159 = vmatprep.mubr.msk.f32.mxu1 %vm1229_vm0, %v922_v51  ;;  %9597 = vst.msk [vmem:[%s15319_s11 + $0x368] sm:$0xff] %vm9487_vm1, %v4914_v54  ;;  %v421_v57 = vld [vmem:[%s14872_s8 + $0x718] sm:$0xff] }
 0x1ca   : > { %10109 = vst.msk [vmem:[%s15319_s11 + $0x1368] sm:$0xff] %vm9487_vm1, %v7474_v55  ;;  %9596 = vst.msk [vmem:[%s15319_s11 + $0x360] sm:$0xff] %vm9487_vm1, %v4909_v58  ;;  %v13234_v0 = vpop.f32.mrb[110].mxu0  ;;  %v933_v58 = vld [vmem:[%s14872_s8 + $0x1718] sm:$0xff] }
 0x1cb   : > { %10108 = vst.msk [vmem:[%s15319_s11 + $0x1360] sm:$0xff] %vm9487_vm1, %v7469_v59  ;;  %v14002_v1 = vpop.f32.mrb[110].mxu1  ;;  %v4924_v2 = vadd.f32 %v16333_v16, %v13234_v0  ;;  %v4918_v4 = vpop.f32.mrb[111].mxu0  ;;  %13392 = vmatmul.mubr.msk.f32.gmra.mrb[216].mxu0 %vm1229_vm0, %v411_v60  ;;  %v422_v59 = vld [vmem:[%s14872_s8 + $0x720] sm:$0xff] }
 0x1cc   : > { %v7484_v3 = vadd.f32 %v16333_v16, %v14002_v1  ;;  %v7478_v5 = vpop.f32.mrb[111].mxu1  ;;  %14160 = vmatmul.mubr.msk.f32.gmra.mrb[216].mxu1 %vm1229_vm0, %v923_v61  ;;  %v4919_v6 = vadd.f32 %v16333_v16, %v4918_v4  ;;  %13394 = vmatprep.mubr.msk.f32.mxu0 %vm1229_vm0, %v412_v62  ;;  %v934_v60 = vld [vmem:[%s14872_s8 + $0x1720] sm:$0xff] }
 0x1cd   : > { %v7479_v7 = vadd.f32 %v16333_v16, %v7478_v5  ;;  %14162 = vmatprep.mubr.msk.f32.mxu1 %vm1229_vm0, %v924_v63  ;;  %9599 = vst.msk [vmem:[%s15319_s11 + $0x378] sm:$0xff] %vm9487_vm1, %v4924_v2  ;;  %v423_v5 = vld [vmem:[%s14872_s8 + $0x728] sm:$0xff] }
 0x1ce   : > { %10111 = vst.msk [vmem:[%s15319_s11 + $0x1378] sm:$0xff] %vm9487_vm1, %v7484_v3  ;;  %9598 = vst.msk [vmem:[%s15319_s11 + $0x370] sm:$0xff] %vm9487_vm1, %v4919_v6  ;;  %v13237_v12 = vpop.f32.mrb[112].mxu0  ;;  %v935_v6 = vld [vmem:[%s14872_s8 + $0x1728] sm:$0xff] }
 0x1cf   : > { %10110 = vst.msk [vmem:[%s15319_s11 + $0x1370] sm:$0xff] %vm9487_vm1, %v7479_v7  ;;  %v14005_v13 = vpop.f32.mrb[112].mxu1  ;;  %v4934_v14 = vadd.f32 %v16333_v16, %v13237_v12  ;;  %v4928_v15 = vpop.f32.mrb[113].mxu0  ;;  %13395 = vmatmul.mubr.msk.f32.gmra.mrb[218].mxu0 %vm1229_vm0, %v413_v8  ;;  %v424_v7 = vld [vmem:[%s14872_s8 + $0x730] sm:$0xff] }
 0x1d0   : > { %v7494_v21 = vadd.f32 %v16333_v16, %v14005_v13  ;;  %v7488_v17 = vpop.f32.mrb[113].mxu1  ;;  %14163 = vmatmul.mubr.msk.f32.gmra.mrb[218].mxu1 %vm1229_vm0, %v925_v9  ;;  %v4929_v18 = vadd.f32 %v16333_v16, %v4928_v15  ;;  %13397 = vmatprep.mubr.msk.f32.mxu0 %vm1229_vm0, %v414_v10  ;;  %v936_v8 = vld [vmem:[%s14872_s8 + $0x1730] sm:$0xff] }
 0x1d1   : > { %v7489_v19 = vadd.f32 %v16333_v16, %v7488_v17  ;;  %14165 = vmatprep.mubr.msk.f32.mxu1 %vm1229_vm0, %v926_v11  ;;  %9601 = vst.msk [vmem:[%s15319_s11 + $0x388] sm:$0xff] %vm9487_vm1, %v4934_v14  ;;  %v425_v17 = vld [vmem:[%s14872_s8 + $0x738] sm:$0xff] }
 0x1d2   : > { %10113 = vst.msk [vmem:[%s15319_s11 + $0x1388] sm:$0xff] %vm9487_vm1, %v7494_v21  ;;  %9600 = vst.msk [vmem:[%s15319_s11 + $0x380] sm:$0xff] %vm9487_vm1, %v4929_v18  ;;  %v13240_v25 = vpop.f32.mrb[114].mxu0  ;;  %v937_v18 = vld [vmem:[%s14872_s8 + $0x1738] sm:$0xff] }
 0x1d3   : > { %10112 = vst.msk [vmem:[%s15319_s11 + $0x1380] sm:$0xff] %vm9487_vm1, %v7489_v19  ;;  %v14008_v26 = vpop.f32.mrb[114].mxu1  ;;  %v4944_v29 = vadd.f32 %v16333_v16, %v13240_v25  ;;  %v4938_v28 = vpop.f32.mrb[115].mxu0  ;;  %13398 = vmatmul.mubr.msk.f32.gmra.mrb[220].mxu0 %vm1229_vm0, %v415_v20  ;;  %v426_v19 = vld [vmem:[%s14872_s8 + $0x740] sm:$0xff] }
 0x1d4   : > { %v7504_v27 = vadd.f32 %v16333_v16, %v14008_v26  ;;  %v7498_v30 = vpop.f32.mrb[115].mxu1  ;;  %14166 = vmatmul.mubr.msk.f32.gmra.mrb[220].mxu1 %vm1229_vm0, %v927_v22  ;;  %v4939_v31 = vadd.f32 %v16333_v16, %v4938_v28  ;;  %13400 = vmatprep.mubr.msk.f32.mxu0 %vm1229_vm0, %v416_v23  ;;  %v938_v20 = vld [vmem:[%s14872_s8 + $0x1740] sm:$0xff] }
 0x1d5   : > { %v7499_v32 = vadd.f32 %v16333_v16, %v7498_v30  ;;  %14168 = vmatprep.mubr.msk.f32.mxu1 %vm1229_vm0, %v928_v24  ;;  %9603 = vst.msk [vmem:[%s15319_s11 + $0x398] sm:$0xff] %vm9487_vm1, %v4944_v29  ;;  %v427_v30 = vld [vmem:[%s14872_s8 + $0x748] sm:$0xff] }
 0x1d6   : > { %10115 = vst.msk [vmem:[%s15319_s11 + $0x1398] sm:$0xff] %vm9487_vm1, %v7504_v27  ;;  %9602 = vst.msk [vmem:[%s15319_s11 + $0x390] sm:$0xff] %vm9487_vm1, %v4939_v31  ;;  %v13243_v37 = vpop.f32.mrb[116].mxu0  ;;  %v939_v31 = vld [vmem:[%s14872_s8 + $0x1748] sm:$0xff] }
 0x1d7   : > { %10114 = vst.msk [vmem:[%s15319_s11 + $0x1390] sm:$0xff] %vm9487_vm1, %v7499_v32  ;;  %v14011_v38 = vpop.f32.mrb[116].mxu1  ;;  %v4954_v39 = vadd.f32 %v16333_v16, %v13243_v37  ;;  %v4948_v41 = vpop.f32.mrb[117].mxu0  ;;  %13401 = vmatmul.mubr.msk.f32.gmra.mrb[222].mxu0 %vm1229_vm0, %v417_v33  ;;  %v428_v32 = vld [vmem:[%s14872_s8 + $0x750] sm:$0xff] }
 0x1d8   : > { %v7514_v40 = vadd.f32 %v16333_v16, %v14011_v38  ;;  %v7508_v42 = vpop.f32.mrb[117].mxu1  ;;  %14169 = vmatmul.mubr.msk.f32.gmra.mrb[222].mxu1 %vm1229_vm0, %v929_v34  ;;  %v4949_v43 = vadd.f32 %v16333_v16, %v4948_v41  ;;  %13403 = vmatprep.mubr.msk.f32.mxu0 %vm1229_vm0, %v418_v35  ;;  %v940_v33 = vld [vmem:[%s14872_s8 + $0x1750] sm:$0xff] }
 0x1d9   : > { %v7509_v44 = vadd.f32 %v16333_v16, %v7508_v42  ;;  %14171 = vmatprep.mubr.msk.f32.mxu1 %vm1229_vm0, %v930_v36  ;;  %9605 = vst.msk [vmem:[%s15319_s11 + $0x3a8] sm:$0xff] %vm9487_vm1, %v4954_v39  ;;  %v429_v42 = vld [vmem:[%s14872_s8 + $0x758] sm:$0xff] }
 0x1da   : > { %10117 = vst.msk [vmem:[%s15319_s11 + $0x13a8] sm:$0xff] %vm9487_vm1, %v7514_v40  ;;  %9604 = vst.msk [vmem:[%s15319_s11 + $0x3a0] sm:$0xff] %vm9487_vm1, %v4949_v43  ;;  %v13246_v49 = vpop.f32.mrb[118].mxu0  ;;  %v941_v43 = vld [vmem:[%s14872_s8 + $0x1758] sm:$0xff] }
 0x1db   : > { %10116 = vst.msk [vmem:[%s15319_s11 + $0x13a0] sm:$0xff] %vm9487_vm1, %v7509_v44  ;;  %v14014_v50 = vpop.f32.mrb[118].mxu1  ;;  %v4964_v51 = vadd.f32 %v16333_v16, %v13246_v49  ;;  %v4958_v53 = vpop.f32.mrb[119].mxu0  ;;  %13404 = vmatmul.mubr.msk.f32.gmra.mrb[224].mxu0 %vm1229_vm0, %v419_v45  ;;  %v430_v44 = vld [vmem:[%s14872_s8 + $0x760] sm:$0xff] }
 0x1dc   : > { %v7524_v52 = vadd.f32 %v16333_v16, %v14014_v50  ;;  %v7518_v54 = vpop.f32.mrb[119].mxu1  ;;  %14172 = vmatmul.mubr.msk.f32.gmra.mrb[224].mxu1 %vm1229_vm0, %v931_v46  ;;  %v4959_v55 = vadd.f32 %v16333_v16, %v4958_v53  ;;  %13406 = vmatprep.mubr.msk.f32.mxu0 %vm1229_vm0, %v420_v47  ;;  %v942_v45 = vld [vmem:[%s14872_s8 + $0x1760] sm:$0xff] }
 0x1dd   : > { %v7519_v56 = vadd.f32 %v16333_v16, %v7518_v54  ;;  %14174 = vmatprep.mubr.msk.f32.mxu1 %vm1229_vm0, %v932_v48  ;;  %9607 = vst.msk [vmem:[%s15319_s11 + $0x3b8] sm:$0xff] %vm9487_vm1, %v4964_v51  ;;  %v431_v54 = vld [vmem:[%s14872_s8 + $0x768] sm:$0xff] }
 0x1de   : > { %10119 = vst.msk [vmem:[%s15319_s11 + $0x13b8] sm:$0xff] %vm9487_vm1, %v7524_v52  ;;  %9606 = vst.msk [vmem:[%s15319_s11 + $0x3b0] sm:$0xff] %vm9487_vm1, %v4959_v55  ;;  %v13249_v61 = vpop.f32.mrb[120].mxu0  ;;  %v943_v55 = vld [vmem:[%s14872_s8 + $0x1768] sm:$0xff] }
 0x1df   : > { %10118 = vst.msk [vmem:[%s15319_s11 + $0x13b0] sm:$0xff] %vm9487_vm1, %v7519_v56  ;;  %v14017_v62 = vpop.f32.mrb[120].mxu1  ;;  %v4974_v63 = vadd.f32 %v16333_v16, %v13249_v61  ;;  %v4968_v1 = vpop.f32.mrb[121].mxu0  ;;  %13407 = vmatmul.mubr.msk.f32.gmra.mrb[226].mxu0 %vm1229_vm0, %v421_v57  ;;  %v432_v56 = vld [vmem:[%s14872_s8 + $0x770] sm:$0xff] }
 0x1e0   : > { %v7534_v0 = vadd.f32 %v16333_v16, %v14017_v62  ;;  %v7528_v2 = vpop.f32.mrb[121].mxu1  ;;  %14175 = vmatmul.mubr.msk.f32.gmra.mrb[226].mxu1 %vm1229_vm0, %v933_v58  ;;  %v4969_v3 = vadd.f32 %v16333_v16, %v4968_v1  ;;  %13409 = vmatprep.mubr.msk.f32.mxu0 %vm1229_vm0, %v422_v59  ;;  %v944_v57 = vld [vmem:[%s14872_s8 + $0x1770] sm:$0xff] }
 0x1e1   : > { %v7529_v4 = vadd.f32 %v16333_v16, %v7528_v2  ;;  %14177 = vmatprep.mubr.msk.f32.mxu1 %vm1229_vm0, %v934_v60  ;;  %9609 = vst.msk [vmem:[%s15319_s11 + $0x3c8] sm:$0xff] %vm9487_vm1, %v4974_v63  ;;  %v433_v2 = vld [vmem:[%s14872_s8 + $0x778] sm:$0xff] }
 0x1e2   : > { %10121 = vst.msk [vmem:[%s15319_s11 + $0x13c8] sm:$0xff] %vm9487_vm1, %v7534_v0  ;;  %9608 = vst.msk [vmem:[%s15319_s11 + $0x3c0] sm:$0xff] %vm9487_vm1, %v4969_v3  ;;  %v13252_v9 = vpop.f32.mrb[122].mxu0  ;;  %v945_v3 = vld [vmem:[%s14872_s8 + $0x1778] sm:$0xff] }
 0x1e3   : > { %10120 = vst.msk [vmem:[%s15319_s11 + $0x13c0] sm:$0xff] %vm9487_vm1, %v7529_v4  ;;  %v14020_v10 = vpop.f32.mrb[122].mxu1  ;;  %v4984_v11 = vadd.f32 %v16333_v16, %v13252_v9  ;;  %v4978_v13 = vpop.f32.mrb[123].mxu0  ;;  %13410 = vmatmul.mubr.msk.f32.gmra.mrb[228].mxu0 %vm1229_vm0, %v423_v5  ;;  %v434_v4 = vld [vmem:[%s14872_s8 + $0x780] sm:$0xff] }
 0x1e4   : > { %v7544_v12 = vadd.f32 %v16333_v16, %v14020_v10  ;;  %v7538_v14 = vpop.f32.mrb[123].mxu1  ;;  %14178 = vmatmul.mubr.msk.f32.gmra.mrb[228].mxu1 %vm1229_vm0, %v935_v6  ;;  %v4979_v21 = vadd.f32 %v16333_v16, %v4978_v13  ;;  %13412 = vmatprep.mubr.msk.f32.mxu0 %vm1229_vm0, %v424_v7  ;;  %v946_v5 = vld [vmem:[%s14872_s8 + $0x1780] sm:$0xff] }
 0x1e5   : > { %v7539_v15 = vadd.f32 %v16333_v16, %v7538_v14  ;;  %14180 = vmatprep.mubr.msk.f32.mxu1 %vm1229_vm0, %v936_v8  ;;  %9611 = vst.msk [vmem:[%s15319_s11 + $0x3d8] sm:$0xff] %vm9487_vm1, %v4984_v11  ;;  %v435_v14 = vld [vmem:[%s14872_s8 + $0x788] sm:$0xff] }
 0x1e6   : > { %10123 = vst.msk [vmem:[%s15319_s11 + $0x13d8] sm:$0xff] %vm9487_vm1, %v7544_v12  ;;  %9610 = vst.msk [vmem:[%s15319_s11 + $0x3d0] sm:$0xff] %vm9487_vm1, %v4979_v21  ;;  %v13255_v22 = vpop.f32.mrb[124].mxu0  ;;  %v947_v21 = vld [vmem:[%s14872_s8 + $0x1788] sm:$0xff] }
 0x1e7   : > { %10122 = vst.msk [vmem:[%s15319_s11 + $0x13d0] sm:$0xff] %vm9487_vm1, %v7539_v15  ;;  %v14023_v23 = vpop.f32.mrb[124].mxu1  ;;  %v4994_v24 = vadd.f32 %v16333_v16, %v13255_v22  ;;  %v4988_v26 = vpop.f32.mrb[125].mxu0  ;;  %13413 = vmatmul.mubr.msk.f32.gmra.mrb[230].mxu0 %vm1229_vm0, %v425_v17  ;;  %v436_v15 = vld [vmem:[%s14872_s8 + $0x790] sm:$0xff] }
 0x1e8   : > { %v7554_v25 = vadd.f32 %v16333_v16, %v14023_v23  ;;  %v7548_v29 = vpop.f32.mrb[125].mxu1  ;;  %14181 = vmatmul.mubr.msk.f32.gmra.mrb[230].mxu1 %vm1229_vm0, %v937_v18  ;;  %v4989_v27 = vadd.f32 %v16333_v16, %v4988_v26  ;;  %13415 = vmatprep.mubr.msk.f32.mxu0 %vm1229_vm0, %v426_v19  ;;  %v948_v17 = vld [vmem:[%s14872_s8 + $0x1790] sm:$0xff] }
 0x1e9   : > { %v7549_v28 = vadd.f32 %v16333_v16, %v7548_v29  ;;  %14183 = vmatprep.mubr.msk.f32.mxu1 %vm1229_vm0, %v938_v20  ;;  %9613 = vst.msk [vmem:[%s15319_s11 + $0x3e8] sm:$0xff] %vm9487_vm1, %v4994_v24  ;;  %v437_v29 = vld [vmem:[%s14872_s8 + $0x798] sm:$0xff] }
 0x1ea   : > { %10125 = vst.msk [vmem:[%s15319_s11 + $0x13e8] sm:$0xff] %vm9487_vm1, %v7554_v25  ;;  %9612 = vst.msk [vmem:[%s15319_s11 + $0x3e0] sm:$0xff] %vm9487_vm1, %v4989_v27  ;;  %v13258_v34 = vpop.f32.mrb[126].mxu0  ;;  %v949_v27 = vld [vmem:[%s14872_s8 + $0x1798] sm:$0xff] }
 0x1eb   : > { %10124 = vst.msk [vmem:[%s15319_s11 + $0x13e0] sm:$0xff] %vm9487_vm1, %v7549_v28  ;;  %v14026_v35 = vpop.f32.mrb[126].mxu1  ;;  %v5004_v36 = vadd.f32 %v16333_v16, %v13258_v34  ;;  %v4998_v38 = vpop.f32.mrb[127].mxu0  ;;  %13416 = vmatmul.mubr.msk.f32.gmra.mrb[232].mxu0 %vm1229_vm0, %v427_v30  ;;  %v438_v28 = vld [vmem:[%s14872_s8 + $0x7a0] sm:$0xff] }
 0x1ec   : > { %v7564_v37 = vadd.f32 %v16333_v16, %v14026_v35  ;;  %v7558_v39 = vpop.f32.mrb[127].mxu1  ;;  %14184 = vmatmul.mubr.msk.f32.gmra.mrb[232].mxu1 %vm1229_vm0, %v939_v31  ;;  %v4999_v40 = vadd.f32 %v16333_v16, %v4998_v38  ;;  %13418 = vmatprep.mubr.msk.f32.mxu0 %vm1229_vm0, %v428_v32  ;;  %v950_v30 = vld [vmem:[%s14872_s8 + $0x17a0] sm:$0xff] }
 0x1ed   : > { %v7559_v41 = vadd.f32 %v16333_v16, %v7558_v39  ;;  %14186 = vmatprep.mubr.msk.f32.mxu1 %vm1229_vm0, %v940_v33  ;;  %9615 = vst.msk [vmem:[%s15319_s11 + $0x3f8] sm:$0xff] %vm9487_vm1, %v5004_v36  ;;  %v439_v39 = vld [vmem:[%s14872_s8 + $0x7a8] sm:$0xff] }
 0x1ee   : > { %10127 = vst.msk [vmem:[%s15319_s11 + $0x13f8] sm:$0xff] %vm9487_vm1, %v7564_v37  ;;  %9614 = vst.msk [vmem:[%s15319_s11 + $0x3f0] sm:$0xff] %vm9487_vm1, %v4999_v40  ;;  %v13261_v46 = vpop.f32.mrb[128].mxu0  ;;  %v951_v40 = vld [vmem:[%s14872_s8 + $0x17a8] sm:$0xff] }
 0x1ef   : > { %10126 = vst.msk [vmem:[%s15319_s11 + $0x13f0] sm:$0xff] %vm9487_vm1, %v7559_v41  ;;  %v14029_v47 = vpop.f32.mrb[128].mxu1  ;;  %v5014_v48 = vadd.f32 %v16333_v16, %v13261_v46  ;;  %v5008_v50 = vpop.f32.mrb[129].mxu0  ;;  %13419 = vmatmul.mubr.msk.f32.gmra.mrb[234].mxu0 %vm1229_vm0, %v429_v42  ;;  %v440_v41 = vld [vmem:[%s14872_s8 + $0x7b0] sm:$0xff] }
 0x1f0   : > { %v7574_v49 = vadd.f32 %v16333_v16, %v14029_v47  ;;  %v7568_v51 = vpop.f32.mrb[129].mxu1  ;;  %14187 = vmatmul.mubr.msk.f32.gmra.mrb[234].mxu1 %vm1229_vm0, %v941_v43  ;;  %v5009_v52 = vadd.f32 %v16333_v16, %v5008_v50  ;;  %13421 = vmatprep.mubr.msk.f32.mxu0 %vm1229_vm0, %v430_v44  ;;  %v952_v42 = vld [vmem:[%s14872_s8 + $0x17b0] sm:$0xff] }
 0x1f1   : > { %v7569_v53 = vadd.f32 %v16333_v16, %v7568_v51  ;;  %14189 = vmatprep.mubr.msk.f32.mxu1 %vm1229_vm0, %v942_v45  ;;  %9617 = vst.msk [vmem:[%s15319_s11 + $0x408] sm:$0xff] %vm9487_vm1, %v5014_v48  ;;  %v441_v51 = vld [vmem:[%s14872_s8 + $0x7b8] sm:$0xff] }
 0x1f2   : > { %10129 = vst.msk [vmem:[%s15319_s11 + $0x1408] sm:$0xff] %vm9487_vm1, %v7574_v49  ;;  %9616 = vst.msk [vmem:[%s15319_s11 + $0x400] sm:$0xff] %vm9487_vm1, %v5009_v52  ;;  %v13264_v58 = vpop.f32.mrb[130].mxu0  ;;  %v953_v52 = vld [vmem:[%s14872_s8 + $0x17b8] sm:$0xff] }
 0x1f3   : > { %10128 = vst.msk [vmem:[%s15319_s11 + $0x1400] sm:$0xff] %vm9487_vm1, %v7569_v53  ;;  %v14032_v59 = vpop.f32.mrb[130].mxu1  ;;  %v5024_v60 = vadd.f32 %v16333_v16, %v13264_v58  ;;  %v5018_v62 = vpop.f32.mrb[131].mxu0  ;;  %13422 = vmatmul.mubr.msk.f32.gmra.mrb[236].mxu0 %vm1229_vm0, %v431_v54  ;;  %v442_v53 = vld [vmem:[%s14872_s8 + $0x7c0] sm:$0xff] }
 0x1f4   : > { %v7584_v61 = vadd.f32 %v16333_v16, %v14032_v59  ;;  %v7578_v63 = vpop.f32.mrb[131].mxu1  ;;  %14190 = vmatmul.mubr.msk.f32.gmra.mrb[236].mxu1 %vm1229_vm0, %v943_v55  ;;  %v5019_v0 = vadd.f32 %v16333_v16, %v5018_v62  ;;  %13424 = vmatprep.mubr.msk.f32.mxu0 %vm1229_vm0, %v432_v56  ;;  %v954_v54 = vld [vmem:[%s14872_s8 + $0x17c0] sm:$0xff] }
 0x1f5   : > { %v7579_v1 = vadd.f32 %v16333_v16, %v7578_v63  ;;  %14192 = vmatprep.mubr.msk.f32.mxu1 %vm1229_vm0, %v944_v57  ;;  %9619 = vst.msk [vmem:[%s15319_s11 + $0x418] sm:$0xff] %vm9487_vm1, %v5024_v60  ;;  %v443_v63 = vld [vmem:[%s14872_s8 + $0x7c8] sm:$0xff] }
 0x1f6   : > { %10131 = vst.msk [vmem:[%s15319_s11 + $0x1418] sm:$0xff] %vm9487_vm1, %v7584_v61  ;;  %9618 = vst.msk [vmem:[%s15319_s11 + $0x410] sm:$0xff] %vm9487_vm1, %v5019_v0  ;;  %v13267_v6 = vpop.f32.mrb[132].mxu0  ;;  %v955_v0 = vld [vmem:[%s14872_s8 + $0x17c8] sm:$0xff] }
 0x1f7   : > { %10130 = vst.msk [vmem:[%s15319_s11 + $0x1410] sm:$0xff] %vm9487_vm1, %v7579_v1  ;;  %v14035_v7 = vpop.f32.mrb[132].mxu1  ;;  %v5034_v8 = vadd.f32 %v16333_v16, %v13267_v6  ;;  %v5028_v10 = vpop.f32.mrb[133].mxu0  ;;  %13425 = vmatmul.mubr.msk.f32.gmra.mrb[238].mxu0 %vm1229_vm0, %v433_v2  ;;  %v444_v1 = vld [vmem:[%s14872_s8 + $0x7d0] sm:$0xff] }
 0x1f8   : > { %v7594_v9 = vadd.f32 %v16333_v16, %v14035_v7  ;;  %v7588_v11 = vpop.f32.mrb[133].mxu1  ;;  %14193 = vmatmul.mubr.msk.f32.gmra.mrb[238].mxu1 %vm1229_vm0, %v945_v3  ;;  %v5029_v12 = vadd.f32 %v16333_v16, %v5028_v10  ;;  %13427 = vmatprep.mubr.msk.f32.mxu0 %vm1229_vm0, %v434_v4  ;;  %v956_v2 = vld [vmem:[%s14872_s8 + $0x17d0] sm:$0xff] }
 0x1f9   : > { %v7589_v13 = vadd.f32 %v16333_v16, %v7588_v11  ;;  %14195 = vmatprep.mubr.msk.f32.mxu1 %vm1229_vm0, %v946_v5  ;;  %9621 = vst.msk [vmem:[%s15319_s11 + $0x428] sm:$0xff] %vm9487_vm1, %v5034_v8  ;;  %v445_v11 = vld [vmem:[%s14872_s8 + $0x7d8] sm:$0xff] }
 0x1fa   : > { %10133 = vst.msk [vmem:[%s15319_s11 + $0x1428] sm:$0xff] %vm9487_vm1, %v7594_v9  ;;  %9620 = vst.msk [vmem:[%s15319_s11 + $0x420] sm:$0xff] %vm9487_vm1, %v5029_v12  ;;  %v13270_v18 = vpop.f32.mrb[134].mxu0  ;;  %v957_v12 = vld [vmem:[%s14872_s8 + $0x17d8] sm:$0xff] }
 0x1fb   : > { %10132 = vst.msk [vmem:[%s15319_s11 + $0x1420] sm:$0xff] %vm9487_vm1, %v7589_v13  ;;  %v14038_v19 = vpop.f32.mrb[134].mxu1  ;;  %v5044_v20 = vadd.f32 %v16333_v16, %v13270_v18  ;;  %v5038_v23 = vpop.f32.mrb[135].mxu0  ;;  %13428 = vmatmul.mubr.msk.f32.gmra.mrb[240].mxu0 %vm1229_vm0, %v435_v14  ;;  %v446_v13 = vld [vmem:[%s14872_s8 + $0x7e0] sm:$0xff] }
 0x1fc   : > { %v7604_v22 = vadd.f32 %v16333_v16, %v14038_v19  ;;  %v7598_v24 = vpop.f32.mrb[135].mxu1  ;;  %14196 = vmatmul.mubr.msk.f32.gmra.mrb[240].mxu1 %vm1229_vm0, %v947_v21  ;;  %v5039_v25 = vadd.f32 %v16333_v16, %v5038_v23  ;;  %13430 = vmatprep.mubr.msk.f32.mxu0 %vm1229_vm0, %v436_v15  ;;  %v958_v14 = vld [vmem:[%s14872_s8 + $0x17e0] sm:$0xff] }
 0x1fd   : > { %v7599_v26 = vadd.f32 %v16333_v16, %v7598_v24  ;;  %14198 = vmatprep.mubr.msk.f32.mxu1 %vm1229_vm0, %v948_v17  ;;  %9623 = vst.msk [vmem:[%s15319_s11 + $0x438] sm:$0xff] %vm9487_vm1, %v5044_v20  ;;  %v447_v24 = vld [vmem:[%s14872_s8 + $0x7e8] sm:$0xff] }
 0x1fe   : > { %10135 = vst.msk [vmem:[%s15319_s11 + $0x1438] sm:$0xff] %vm9487_vm1, %v7604_v22  ;;  %9622 = vst.msk [vmem:[%s15319_s11 + $0x430] sm:$0xff] %vm9487_vm1, %v5039_v25  ;;  %v13273_v31 = vpop.f32.mrb[136].mxu0  ;;  %v959_v25 = vld [vmem:[%s14872_s8 + $0x17e8] sm:$0xff] }
 0x1ff   : > { %10134 = vst.msk [vmem:[%s15319_s11 + $0x1430] sm:$0xff] %vm9487_vm1, %v7599_v26  ;;  %v14041_v32 = vpop.f32.mrb[136].mxu1  ;;  %v5054_v33 = vadd.f32 %v16333_v16, %v13273_v31  ;;  %v5048_v35 = vpop.f32.mrb[137].mxu0  ;;  %13431 = vmatmul.mubr.msk.f32.gmra.mrb[242].mxu0 %vm1229_vm0, %v437_v29  ;;  %v448_v26 = vld [vmem:[%s14872_s8 + $0x7f0] sm:$0xff] }
 0x200   : > { %v7614_v34 = vadd.f32 %v16333_v16, %v14041_v32  ;;  %v7608_v36 = vpop.f32.mrb[137].mxu1  ;;  %14199 = vmatmul.mubr.msk.f32.gmra.mrb[242].mxu1 %vm1229_vm0, %v949_v27  ;;  %v5049_v37 = vadd.f32 %v16333_v16, %v5048_v35  ;;  %13433 = vmatprep.mubr.msk.f32.mxu0 %vm1229_vm0, %v438_v28  ;;  %v960_v29 = vld [vmem:[%s14872_s8 + $0x17f0] sm:$0xff] }
 0x201   : > { %v7609_v38 = vadd.f32 %v16333_v16, %v7608_v36  ;;  %14201 = vmatprep.mubr.msk.f32.mxu1 %vm1229_vm0, %v950_v30  ;;  %9625 = vst.msk [vmem:[%s15319_s11 + $0x448] sm:$0xff] %vm9487_vm1, %v5054_v33  ;;  %v449_v36 = vld [vmem:[%s14872_s8 + $0x7f8] sm:$0xff] }
 0x202   : > { %10137 = vst.msk [vmem:[%s15319_s11 + $0x1448] sm:$0xff] %vm9487_vm1, %v7614_v34  ;;  %9624 = vst.msk [vmem:[%s15319_s11 + $0x440] sm:$0xff] %vm9487_vm1, %v5049_v37  ;;  %v13276_v43 = vpop.f32.mrb[138].mxu0  ;;  %v961_v37 = vld [vmem:[%s14872_s8 + $0x17f8] sm:$0xff] }
 0x203   : > { %10136 = vst.msk [vmem:[%s15319_s11 + $0x1440] sm:$0xff] %vm9487_vm1, %v7609_v38  ;;  %v14044_v44 = vpop.f32.mrb[138].mxu1  ;;  %v5064_v45 = vadd.f32 %v16333_v16, %v13276_v43  ;;  %v5058_v47 = vpop.f32.mrb[139].mxu0  ;;  %13434 = vmatmul.mubr.msk.f32.gmra.mrb[244].mxu0 %vm1229_vm0, %v439_v39  ;;  %v450_v38 = vld [vmem:[%s14872_s8 + $0x800] sm:$0xff] }
 0x204   : > { %v7624_v46 = vadd.f32 %v16333_v16, %v14044_v44  ;;  %v7618_v48 = vpop.f32.mrb[139].mxu1  ;;  %14202 = vmatmul.mubr.msk.f32.gmra.mrb[244].mxu1 %vm1229_vm0, %v951_v40  ;;  %v5059_v49 = vadd.f32 %v16333_v16, %v5058_v47  ;;  %13436 = vmatprep.mubr.msk.f32.mxu0 %vm1229_vm0, %v440_v41  ;;  %v962_v39 = vld [vmem:[%s14872_s8 + $0x1800] sm:$0xff] }
 0x205   : > { %v7619_v50 = vadd.f32 %v16333_v16, %v7618_v48  ;;  %14204 = vmatprep.mubr.msk.f32.mxu1 %vm1229_vm0, %v952_v42  ;;  %9627 = vst.msk [vmem:[%s15319_s11 + $0x458] sm:$0xff] %vm9487_vm1, %v5064_v45  ;;  %v451_v48 = vld [vmem:[%s14872_s8 + $0x808] sm:$0xff] }
 0x206   : > { %10139 = vst.msk [vmem:[%s15319_s11 + $0x1458] sm:$0xff] %vm9487_vm1, %v7624_v46  ;;  %9626 = vst.msk [vmem:[%s15319_s11 + $0x450] sm:$0xff] %vm9487_vm1, %v5059_v49  ;;  %v13279_v55 = vpop.f32.mrb[140].mxu0  ;;  %v963_v49 = vld [vmem:[%s14872_s8 + $0x1808] sm:$0xff] }
 0x207   : > { %10138 = vst.msk [vmem:[%s15319_s11 + $0x1450] sm:$0xff] %vm9487_vm1, %v7619_v50  ;;  %v14047_v56 = vpop.f32.mrb[140].mxu1  ;;  %v5074_v57 = vadd.f32 %v16333_v16, %v13279_v55  ;;  %v5068_v59 = vpop.f32.mrb[141].mxu0  ;;  %13437 = vmatmul.mubr.msk.f32.gmra.mrb[246].mxu0 %vm1229_vm0, %v441_v51  ;;  %v452_v50 = vld [vmem:[%s14872_s8 + $0x810] sm:$0xff] }
 0x208   : > { %v7634_v58 = vadd.f32 %v16333_v16, %v14047_v56  ;;  %v7628_v60 = vpop.f32.mrb[141].mxu1  ;;  %14205 = vmatmul.mubr.msk.f32.gmra.mrb[246].mxu1 %vm1229_vm0, %v953_v52  ;;  %v5069_v61 = vadd.f32 %v16333_v16, %v5068_v59  ;;  %13439 = vmatprep.mubr.msk.f32.mxu0 %vm1229_vm0, %v442_v53  ;;  %v964_v51 = vld [vmem:[%s14872_s8 + $0x1810] sm:$0xff] }
 0x209   : > { %v7629_v62 = vadd.f32 %v16333_v16, %v7628_v60  ;;  %14207 = vmatprep.mubr.msk.f32.mxu1 %vm1229_vm0, %v954_v54  ;;  %9629 = vst.msk [vmem:[%s15319_s11 + $0x468] sm:$0xff] %vm9487_vm1, %v5074_v57  ;;  %v453_v60 = vld [vmem:[%s14872_s8 + $0x818] sm:$0xff] }
 0x20a   : > { %10141 = vst.msk [vmem:[%s15319_s11 + $0x1468] sm:$0xff] %vm9487_vm1, %v7634_v58  ;;  %9628 = vst.msk [vmem:[%s15319_s11 + $0x460] sm:$0xff] %vm9487_vm1, %v5069_v61  ;;  %v13282_v3 = vpop.f32.mrb[142].mxu0  ;;  %v965_v61 = vld [vmem:[%s14872_s8 + $0x1818] sm:$0xff] }
 0x20b   : > { %10140 = vst.msk [vmem:[%s15319_s11 + $0x1460] sm:$0xff] %vm9487_vm1, %v7629_v62  ;;  %v14050_v4 = vpop.f32.mrb[142].mxu1  ;;  %v5084_v5 = vadd.f32 %v16333_v16, %v13282_v3  ;;  %v5078_v7 = vpop.f32.mrb[143].mxu0  ;;  %13440 = vmatmul.mubr.msk.f32.gmra.mrb[248].mxu0 %vm1229_vm0, %v443_v63  ;;  %v454_v62 = vld [vmem:[%s14872_s8 + $0x820] sm:$0xff] }
 0x20c   : > { %v7644_v6 = vadd.f32 %v16333_v16, %v14050_v4  ;;  %v7638_v8 = vpop.f32.mrb[143].mxu1  ;;  %14208 = vmatmul.mubr.msk.f32.gmra.mrb[248].mxu1 %vm1229_vm0, %v955_v0  ;;  %v5079_v9 = vadd.f32 %v16333_v16, %v5078_v7  ;;  %13442 = vmatprep.mubr.msk.f32.mxu0 %vm1229_vm0, %v444_v1  ;;  %v966_v63 = vld [vmem:[%s14872_s8 + $0x1820] sm:$0xff] }
 0x20d   : > { %v7639_v10 = vadd.f32 %v16333_v16, %v7638_v8  ;;  %14210 = vmatprep.mubr.msk.f32.mxu1 %vm1229_vm0, %v956_v2  ;;  %9631 = vst.msk [vmem:[%s15319_s11 + $0x478] sm:$0xff] %vm9487_vm1, %v5084_v5  ;;  %v455_v8 = vld [vmem:[%s14872_s8 + $0x828] sm:$0xff] }
 0x20e   : > { %10143 = vst.msk [vmem:[%s15319_s11 + $0x1478] sm:$0xff] %vm9487_vm1, %v7644_v6  ;;  %9630 = vst.msk [vmem:[%s15319_s11 + $0x470] sm:$0xff] %vm9487_vm1, %v5079_v9  ;;  %v13285_v21 = vpop.f32.mrb[144].mxu0  ;;  %v967_v9 = vld [vmem:[%s14872_s8 + $0x1828] sm:$0xff] }
 0x20f   : > { %10142 = vst.msk [vmem:[%s15319_s11 + $0x1470] sm:$0xff] %vm9487_vm1, %v7639_v10  ;;  %v14053_v15 = vpop.f32.mrb[144].mxu1  ;;  %v5094_v17 = vadd.f32 %v16333_v16, %v13285_v21  ;;  %v5088_v19 = vpop.f32.mrb[145].mxu0  ;;  %13443 = vmatmul.mubr.msk.f32.gmra.mrb[250].mxu0 %vm1229_vm0, %v445_v11  ;;  %v456_v10 = vld [vmem:[%s14872_s8 + $0x830] sm:$0xff] }
 0x210   : > { %v7654_v18 = vadd.f32 %v16333_v16, %v14053_v15  ;;  %v7648_v20 = vpop.f32.mrb[145].mxu1  ;;  %14211 = vmatmul.mubr.msk.f32.gmra.mrb[250].mxu1 %vm1229_vm0, %v957_v12  ;;  %v5089_v22 = vadd.f32 %v16333_v16, %v5088_v19  ;;  %13445 = vmatprep.mubr.msk.f32.mxu0 %vm1229_vm0, %v446_v13  ;;  %v968_v11 = vld [vmem:[%s14872_s8 + $0x1830] sm:$0xff]  ;;  %v16855_v13 = vld [vmem:[#allocation2] ss:$0 sm:$0xff] }
 0x211   : > { %v7649_v23 = vadd.f32 %v16333_v16, %v7648_v20  ;;  %14213 = vmatprep.mubr.msk.f32.mxu1 %vm1229_vm0, %v958_v14  ;;  %9633 = vst.msk [vmem:[%s15319_s11 + $0x488] sm:$0xff] %vm9487_vm1, %v5094_v17  ;;  %v457_v20 = vld [vmem:[%s14872_s8 + $0x838] sm:$0xff] }
 0x212   : > { %10145 = vst.msk [vmem:[%s15319_s11 + $0x1488] sm:$0xff] %vm9487_vm1, %v7654_v18  ;;  %9632 = vst.msk [vmem:[%s15319_s11 + $0x480] sm:$0xff] %vm9487_vm1, %v5089_v22  ;;  %v13288_v27 = vpop.f32.mrb[146].mxu0  ;;  %v969_v22 = vld [vmem:[%s14872_s8 + $0x1838] sm:$0xff] }
 0x213   : > { %10144 = vst.msk [vmem:[%s15319_s11 + $0x1480] sm:$0xff] %vm9487_vm1, %v7649_v23  ;;  %v14056_v28 = vpop.f32.mrb[146].mxu1  ;;  %v5104_v30 = vadd.f32 %v16333_v16, %v13288_v27  ;;  %v5098_v32 = vpop.f32.mrb[147].mxu0  ;;  %13446 = vmatmul.mubr.msk.f32.gmra.mrb[252].mxu0 %vm1229_vm0, %v447_v24  ;;  %v458_v23 = vld [vmem:[%s14872_s8 + $0x840] sm:$0xff] }
 0x214   : > { %v7664_v31 = vadd.f32 %v16333_v16, %v14056_v28  ;;  %v7658_v33 = vpop.f32.mrb[147].mxu1  ;;  %14214 = vmatmul.mubr.msk.f32.gmra.mrb[252].mxu1 %vm1229_vm0, %v959_v25  ;;  %v5099_v34 = vadd.f32 %v16333_v16, %v5098_v32  ;;  %13448 = vmatprep.mubr.msk.f32.mxu0 %vm1229_vm0, %v448_v26  ;;  %v970_v24 = vld [vmem:[%s14872_s8 + $0x1840] sm:$0xff] }
 0x215   : > { %v7659_v35 = vadd.f32 %v16333_v16, %v7658_v33  ;;  %14216 = vmatprep.mubr.msk.f32.mxu1 %vm1229_vm0, %v960_v29  ;;  %9635 = vst.msk [vmem:[%s15319_s11 + $0x498] sm:$0xff] %vm9487_vm1, %v5104_v30  ;;  %v459_v33 = vld [vmem:[%s14872_s8 + $0x848] sm:$0xff] }
 0x216   : > { %10147 = vst.msk [vmem:[%s15319_s11 + $0x1498] sm:$0xff] %vm9487_vm1, %v7664_v31  ;;  %9634 = vst.msk [vmem:[%s15319_s11 + $0x490] sm:$0xff] %vm9487_vm1, %v5099_v34  ;;  %v13291_v40 = vpop.f32.mrb[148].mxu0  ;;  %v971_v34 = vld [vmem:[%s14872_s8 + $0x1848] sm:$0xff] }
 0x217   : > { %10146 = vst.msk [vmem:[%s15319_s11 + $0x1490] sm:$0xff] %vm9487_vm1, %v7659_v35  ;;  %v14059_v41 = vpop.f32.mrb[148].mxu1  ;;  %v5114_v42 = vadd.f32 %v16333_v16, %v13291_v40  ;;  %v5108_v44 = vpop.f32.mrb[149].mxu0  ;;  %13449 = vmatmul.mubr.msk.f32.gmra.mrb[254].mxu0 %vm1229_vm0, %v449_v36  ;;  %v460_v35 = vld [vmem:[%s14872_s8 + $0x850] sm:$0xff] }
 0x218   : > { %v7674_v43 = vadd.f32 %v16333_v16, %v14059_v41  ;;  %v7668_v45 = vpop.f32.mrb[149].mxu1  ;;  %14217 = vmatmul.mubr.msk.f32.gmra.mrb[254].mxu1 %vm1229_vm0, %v961_v37  ;;  %v5109_v46 = vadd.f32 %v16333_v16, %v5108_v44  ;;  %13451 = vmatprep.mubr.msk.f32.mxu0 %vm1229_vm0, %v450_v38  ;;  %v972_v36 = vld [vmem:[%s14872_s8 + $0x1850] sm:$0xff] }
 0x219   : > { %v7669_v47 = vadd.f32 %v16333_v16, %v7668_v45  ;;  %14219 = vmatprep.mubr.msk.f32.mxu1 %vm1229_vm0, %v962_v39  ;;  %9637 = vst.msk [vmem:[%s15319_s11 + $0x4a8] sm:$0xff] %vm9487_vm1, %v5114_v42  ;;  %v461_v45 = vld [vmem:[%s14872_s8 + $0x858] sm:$0xff] }
 0x21a   : > { %10149 = vst.msk [vmem:[%s15319_s11 + $0x14a8] sm:$0xff] %vm9487_vm1, %v7674_v43  ;;  %9636 = vst.msk [vmem:[%s15319_s11 + $0x4a0] sm:$0xff] %vm9487_vm1, %v5109_v46  ;;  %v13294_v52 = vpop.f32.mrb[150].mxu0  ;;  %v973_v46 = vld [vmem:[%s14872_s8 + $0x1858] sm:$0xff] }
 0x21b   : > { %10148 = vst.msk [vmem:[%s15319_s11 + $0x14a0] sm:$0xff] %vm9487_vm1, %v7669_v47  ;;  %v14062_v53 = vpop.f32.mrb[150].mxu1  ;;  %v5124_v54 = vadd.f32 %v16333_v16, %v13294_v52  ;;  %v5118_v56 = vpop.f32.mrb[151].mxu0  ;;  %13452 = vmatmul.mubr.msk.f32.gmra.mrb[0].mxu0 %vm1229_vm0, %v451_v48  ;;  %v462_v47 = vld [vmem:[%s14872_s8 + $0x860] sm:$0xff] }
 0x21c   : > { %v7684_v55 = vadd.f32 %v16333_v16, %v14062_v53  ;;  %v7678_v57 = vpop.f32.mrb[151].mxu1  ;;  %14220 = vmatmul.mubr.msk.f32.gmra.mrb[0].mxu1 %vm1229_vm0, %v963_v49  ;;  %v5119_v58 = vadd.f32 %v16333_v16, %v5118_v56  ;;  %13454 = vmatprep.mubr.msk.f32.mxu0 %vm1229_vm0, %v452_v50  ;;  %v974_v48 = vld [vmem:[%s14872_s8 + $0x1860] sm:$0xff] }
 0x21d   : > { %v7679_v59 = vadd.f32 %v16333_v16, %v7678_v57  ;;  %14222 = vmatprep.mubr.msk.f32.mxu1 %vm1229_vm0, %v964_v51  ;;  %9639 = vst.msk [vmem:[%s15319_s11 + $0x4b8] sm:$0xff] %vm9487_vm1, %v5124_v54  ;;  %v463_v57 = vld [vmem:[%s14872_s8 + $0x868] sm:$0xff] }
 0x21e   : > { %10151 = vst.msk [vmem:[%s15319_s11 + $0x14b8] sm:$0xff] %vm9487_vm1, %v7684_v55  ;;  %9638 = vst.msk [vmem:[%s15319_s11 + $0x4b0] sm:$0xff] %vm9487_vm1, %v5119_v58  ;;  %v13297_v0 = vpop.f32.mrb[152].mxu0  ;;  %v975_v58 = vld [vmem:[%s14872_s8 + $0x1868] sm:$0xff] }
 0x21f   : > { %10150 = vst.msk [vmem:[%s15319_s11 + $0x14b0] sm:$0xff] %vm9487_vm1, %v7679_v59  ;;  %v14065_v1 = vpop.f32.mrb[152].mxu1  ;;  %v5134_v2 = vadd.f32 %v16333_v16, %v13297_v0  ;;  %v5128_v4 = vpop.f32.mrb[153].mxu0  ;;  %13455 = vmatmul.mubr.msk.f32.gmra.mrb[2].mxu0 %vm1229_vm0, %v453_v60  ;;  %v464_v59 = vld [vmem:[%s14872_s8 + $0x870] sm:$0xff] }
 0x220   : > { %v7694_v3 = vadd.f32 %v16333_v16, %v14065_v1  ;;  %v7688_v5 = vpop.f32.mrb[153].mxu1  ;;  %14223 = vmatmul.mubr.msk.f32.gmra.mrb[2].mxu1 %vm1229_vm0, %v965_v61  ;;  %v5129_v6 = vadd.f32 %v16333_v16, %v5128_v4  ;;  %13457 = vmatprep.mubr.msk.f32.mxu0 %vm1229_vm0, %v454_v62  ;;  %v976_v60 = vld [vmem:[%s14872_s8 + $0x1870] sm:$0xff] }
 0x221   : > { %v7689_v7 = vadd.f32 %v16333_v16, %v7688_v5  ;;  %14225 = vmatprep.mubr.msk.f32.mxu1 %vm1229_vm0, %v966_v63  ;;  %9641 = vst.msk [vmem:[%s15319_s11 + $0x4c8] sm:$0xff] %vm9487_vm1, %v5134_v2  ;;  %v465_v5 = vld [vmem:[%s14872_s8 + $0x878] sm:$0xff] }
 0x222   : > { %10153 = vst.msk [vmem:[%s15319_s11 + $0x14c8] sm:$0xff] %vm9487_vm1, %v7694_v3  ;;  %9640 = vst.msk [vmem:[%s15319_s11 + $0x4c0] sm:$0xff] %vm9487_vm1, %v5129_v6  ;;  %v13300_v16 = vpop.f32.mrb[154].mxu0  ;;  %v977_v6 = vld [vmem:[%s14872_s8 + $0x1878] sm:$0xff] }
 0x223   : > { %10152 = vst.msk [vmem:[%s15319_s11 + $0x14c0] sm:$0xff] %vm9487_vm1, %v7689_v7  ;;  %v14068_v12 = vpop.f32.mrb[154].mxu1  ;;  %v5144_v14 = vadd.f32 %v16855_v13, %v13300_v16  ;;  %v5138_v15 = vpop.f32.mrb[155].mxu0  ;;  %13458 = vmatmul.mubr.msk.f32.gmra.mrb[4].mxu0 %vm1229_vm0, %v455_v8  ;;  %v466_v7 = vld [vmem:[%s14872_s8 + $0x880] sm:$0xff] }
 0x224   : > { %v7704_v21 = vadd.f32 %v16855_v13, %v14068_v12  ;;  %v7698_v17 = vpop.f32.mrb[155].mxu1  ;;  %14226 = vmatmul.mubr.msk.f32.gmra.mrb[4].mxu1 %vm1229_vm0, %v967_v9  ;;  %v5139_v18 = vadd.f32 %v16855_v13, %v5138_v15  ;;  %13460 = vmatprep.mubr.msk.f32.mxu0 %vm1229_vm0, %v456_v10  ;;  %v978_v8 = vld [vmem:[%s14872_s8 + $0x1880] sm:$0xff] }
 0x225   : > { %v7699_v19 = vadd.f32 %v16855_v13, %v7698_v17  ;;  %14228 = vmatprep.mubr.msk.f32.mxu1 %vm1229_vm0, %v968_v11  ;;  %9643 = vst.msk [vmem:[%s15319_s11 + $0x4d8] sm:$0xff] %vm9487_vm1, %v5144_v14  ;;  %v467_v17 = vld [vmem:[%s14872_s8 + $0x888] sm:$0xff] }
 0x226   : > { %10155 = vst.msk [vmem:[%s15319_s11 + $0x14d8] sm:$0xff] %vm9487_vm1, %v7704_v21  ;;  %9642 = vst.msk [vmem:[%s15319_s11 + $0x4d0] sm:$0xff] %vm9487_vm1, %v5139_v18  ;;  %v13303_v25 = vpop.f32.mrb[156].mxu0  ;;  %v979_v18 = vld [vmem:[%s14872_s8 + $0x1888] sm:$0xff] }
 0x227   : > { %10154 = vst.msk [vmem:[%s15319_s11 + $0x14d0] sm:$0xff] %vm9487_vm1, %v7699_v19  ;;  %v14071_v26 = vpop.f32.mrb[156].mxu1  ;;  %v5154_v29 = vadd.f32 %v16855_v13, %v13303_v25  ;;  %v5148_v28 = vpop.f32.mrb[157].mxu0  ;;  %13461 = vmatmul.mubr.msk.f32.gmra.mrb[6].mxu0 %vm1229_vm0, %v457_v20  ;;  %v468_v19 = vld [vmem:[%s14872_s8 + $0x890] sm:$0xff] }
 0x228   : > { %v7714_v27 = vadd.f32 %v16855_v13, %v14071_v26  ;;  %v7708_v30 = vpop.f32.mrb[157].mxu1  ;;  %14229 = vmatmul.mubr.msk.f32.gmra.mrb[6].mxu1 %vm1229_vm0, %v969_v22  ;;  %v5149_v31 = vadd.f32 %v16855_v13, %v5148_v28  ;;  %13463 = vmatprep.mubr.msk.f32.mxu0 %vm1229_vm0, %v458_v23  ;;  %v980_v20 = vld [vmem:[%s14872_s8 + $0x1890] sm:$0xff] }
 0x229   : > { %v7709_v32 = vadd.f32 %v16855_v13, %v7708_v30  ;;  %14231 = vmatprep.mubr.msk.f32.mxu1 %vm1229_vm0, %v970_v24  ;;  %9645 = vst.msk [vmem:[%s15319_s11 + $0x4e8] sm:$0xff] %vm9487_vm1, %v5154_v29  ;;  %v469_v30 = vld [vmem:[%s14872_s8 + $0x898] sm:$0xff] }
 0x22a   : > { %10157 = vst.msk [vmem:[%s15319_s11 + $0x14e8] sm:$0xff] %vm9487_vm1, %v7714_v27  ;;  %9644 = vst.msk [vmem:[%s15319_s11 + $0x4e0] sm:$0xff] %vm9487_vm1, %v5149_v31  ;;  %v13306_v37 = vpop.f32.mrb[158].mxu0  ;;  %v981_v31 = vld [vmem:[%s14872_s8 + $0x1898] sm:$0xff] }
 0x22b   : > { %10156 = vst.msk [vmem:[%s15319_s11 + $0x14e0] sm:$0xff] %vm9487_vm1, %v7709_v32  ;;  %v14074_v38 = vpop.f32.mrb[158].mxu1  ;;  %v5164_v39 = vadd.f32 %v16855_v13, %v13306_v37  ;;  %v5158_v41 = vpop.f32.mrb[159].mxu0  ;;  %13464 = vmatmul.mubr.msk.f32.gmra.mrb[8].mxu0 %vm1229_vm0, %v459_v33  ;;  %v470_v32 = vld [vmem:[%s14872_s8 + $0x8a0] sm:$0xff] }
 0x22c   : > { %v7724_v40 = vadd.f32 %v16855_v13, %v14074_v38  ;;  %v7718_v42 = vpop.f32.mrb[159].mxu1  ;;  %14232 = vmatmul.mubr.msk.f32.gmra.mrb[8].mxu1 %vm1229_vm0, %v971_v34  ;;  %v5159_v43 = vadd.f32 %v16855_v13, %v5158_v41  ;;  %13466 = vmatprep.mubr.msk.f32.mxu0 %vm1229_vm0, %v460_v35  ;;  %v982_v33 = vld [vmem:[%s14872_s8 + $0x18a0] sm:$0xff] }
 0x22d   : > { %v7719_v44 = vadd.f32 %v16855_v13, %v7718_v42  ;;  %14234 = vmatprep.mubr.msk.f32.mxu1 %vm1229_vm0, %v972_v36  ;;  %9647 = vst.msk [vmem:[%s15319_s11 + $0x4f8] sm:$0xff] %vm9487_vm1, %v5164_v39  ;;  %v471_v42 = vld [vmem:[%s14872_s8 + $0x8a8] sm:$0xff] }
 0x22e   : > { %10159 = vst.msk [vmem:[%s15319_s11 + $0x14f8] sm:$0xff] %vm9487_vm1, %v7724_v40  ;;  %9646 = vst.msk [vmem:[%s15319_s11 + $0x4f0] sm:$0xff] %vm9487_vm1, %v5159_v43  ;;  %v13309_v49 = vpop.f32.mrb[160].mxu0  ;;  %v983_v43 = vld [vmem:[%s14872_s8 + $0x18a8] sm:$0xff] }
 0x22f   : > { %10158 = vst.msk [vmem:[%s15319_s11 + $0x14f0] sm:$0xff] %vm9487_vm1, %v7719_v44  ;;  %v14077_v50 = vpop.f32.mrb[160].mxu1  ;;  %v5174_v51 = vadd.f32 %v16855_v13, %v13309_v49  ;;  %v5168_v53 = vpop.f32.mrb[161].mxu0  ;;  %13467 = vmatmul.mubr.msk.f32.gmra.mrb[10].mxu0 %vm1229_vm0, %v461_v45  ;;  %v472_v44 = vld [vmem:[%s14872_s8 + $0x8b0] sm:$0xff] }
 0x230   : > { %v7734_v52 = vadd.f32 %v16855_v13, %v14077_v50  ;;  %v7728_v54 = vpop.f32.mrb[161].mxu1  ;;  %14235 = vmatmul.mubr.msk.f32.gmra.mrb[10].mxu1 %vm1229_vm0, %v973_v46  ;;  %v5169_v55 = vadd.f32 %v16855_v13, %v5168_v53  ;;  %13469 = vmatprep.mubr.msk.f32.mxu0 %vm1229_vm0, %v462_v47  ;;  %v984_v45 = vld [vmem:[%s14872_s8 + $0x18b0] sm:$0xff] }
 0x231   : > { %v7729_v56 = vadd.f32 %v16855_v13, %v7728_v54  ;;  %14237 = vmatprep.mubr.msk.f32.mxu1 %vm1229_vm0, %v974_v48  ;;  %9649 = vst.msk [vmem:[%s15319_s11 + $0x508] sm:$0xff] %vm9487_vm1, %v5174_v51  ;;  %v473_v54 = vld [vmem:[%s14872_s8 + $0x8b8] sm:$0xff] }
 0x232   : > { %10161 = vst.msk [vmem:[%s15319_s11 + $0x1508] sm:$0xff] %vm9487_vm1, %v7734_v52  ;;  %9648 = vst.msk [vmem:[%s15319_s11 + $0x500] sm:$0xff] %vm9487_vm1, %v5169_v55  ;;  %v13312_v61 = vpop.f32.mrb[162].mxu0  ;;  %v985_v55 = vld [vmem:[%s14872_s8 + $0x18b8] sm:$0xff] }
 0x233   : > { %10160 = vst.msk [vmem:[%s15319_s11 + $0x1500] sm:$0xff] %vm9487_vm1, %v7729_v56  ;;  %v14080_v62 = vpop.f32.mrb[162].mxu1  ;;  %v5184_v63 = vadd.f32 %v16855_v13, %v13312_v61  ;;  %v5178_v1 = vpop.f32.mrb[163].mxu0  ;;  %13470 = vmatmul.mubr.msk.f32.gmra.mrb[12].mxu0 %vm1229_vm0, %v463_v57  ;;  %v474_v56 = vld [vmem:[%s14872_s8 + $0x8c0] sm:$0xff] }
 0x234   : > { %v7744_v0 = vadd.f32 %v16855_v13, %v14080_v62  ;;  %v7738_v2 = vpop.f32.mrb[163].mxu1  ;;  %14238 = vmatmul.mubr.msk.f32.gmra.mrb[12].mxu1 %vm1229_vm0, %v975_v58  ;;  %v5179_v3 = vadd.f32 %v16855_v13, %v5178_v1  ;;  %13472 = vmatprep.mubr.msk.f32.mxu0 %vm1229_vm0, %v464_v59  ;;  %v986_v57 = vld [vmem:[%s14872_s8 + $0x18c0] sm:$0xff] }
 0x235   : > { %v7739_v4 = vadd.f32 %v16855_v13, %v7738_v2  ;;  %14240 = vmatprep.mubr.msk.f32.mxu1 %vm1229_vm0, %v976_v60  ;;  %9651 = vst.msk [vmem:[%s15319_s11 + $0x518] sm:$0xff] %vm9487_vm1, %v5184_v63  ;;  %v475_v2 = vld [vmem:[%s14872_s8 + $0x8c8] sm:$0xff] }
 0x236   : > { %10163 = vst.msk [vmem:[%s15319_s11 + $0x1518] sm:$0xff] %vm9487_vm1, %v7744_v0  ;;  %9650 = vst.msk [vmem:[%s15319_s11 + $0x510] sm:$0xff] %vm9487_vm1, %v5179_v3  ;;  %v13315_v9 = vpop.f32.mrb[164].mxu0  ;;  %v987_v3 = vld [vmem:[%s14872_s8 + $0x18c8] sm:$0xff] }
 0x237   : > { %10162 = vst.msk [vmem:[%s15319_s11 + $0x1510] sm:$0xff] %vm9487_vm1, %v7739_v4  ;;  %v14083_v10 = vpop.f32.mrb[164].mxu1  ;;  %v5194_v11 = vadd.f32 %v16855_v13, %v13315_v9  ;;  %v5188_v12 = vpop.f32.mrb[165].mxu0  ;;  %13473 = vmatmul.mubr.msk.f32.gmra.mrb[14].mxu0 %vm1229_vm0, %v465_v5  ;;  %v476_v4 = vld [vmem:[%s14872_s8 + $0x8d0] sm:$0xff] }
 0x238   : > { %v7754_v16 = vadd.f32 %v16855_v13, %v14083_v10  ;;  %v7748_v14 = vpop.f32.mrb[165].mxu1  ;;  %14241 = vmatmul.mubr.msk.f32.gmra.mrb[14].mxu1 %vm1229_vm0, %v977_v6  ;;  %v5189_v21 = vadd.f32 %v16855_v13, %v5188_v12  ;;  %13475 = vmatprep.mubr.msk.f32.mxu0 %vm1229_vm0, %v466_v7  ;;  %v988_v5 = vld [vmem:[%s14872_s8 + $0x18d0] sm:$0xff] }
 0x239   : > { %v7749_v15 = vadd.f32 %v16855_v13, %v7748_v14  ;;  %14243 = vmatprep.mubr.msk.f32.mxu1 %vm1229_vm0, %v978_v8  ;;  %9653 = vst.msk [vmem:[%s15319_s11 + $0x528] sm:$0xff] %vm9487_vm1, %v5194_v11  ;;  %v477_v14 = vld [vmem:[%s14872_s8 + $0x8d8] sm:$0xff] }
 0x23a   : > { %10165 = vst.msk [vmem:[%s15319_s11 + $0x1528] sm:$0xff] %vm9487_vm1, %v7754_v16  ;;  %9652 = vst.msk [vmem:[%s15319_s11 + $0x520] sm:$0xff] %vm9487_vm1, %v5189_v21  ;;  %v13318_v22 = vpop.f32.mrb[166].mxu0  ;;  %v989_v21 = vld [vmem:[%s14872_s8 + $0x18d8] sm:$0xff] }
 0x23b   : > { %10164 = vst.msk [vmem:[%s15319_s11 + $0x1520] sm:$0xff] %vm9487_vm1, %v7749_v15  ;;  %v14086_v23 = vpop.f32.mrb[166].mxu1  ;;  %v5204_v24 = vadd.f32 %v16855_v13, %v13318_v22  ;;  %v5198_v26 = vpop.f32.mrb[167].mxu0  ;;  %13476 = vmatmul.mubr.msk.f32.gmra.mrb[16].mxu0 %vm1229_vm0, %v467_v17  ;;  %v478_v15 = vld [vmem:[%s14872_s8 + $0x8e0] sm:$0xff] }
 0x23c   : > { %v7764_v25 = vadd.f32 %v16855_v13, %v14086_v23  ;;  %v7758_v29 = vpop.f32.mrb[167].mxu1  ;;  %14244 = vmatmul.mubr.msk.f32.gmra.mrb[16].mxu1 %vm1229_vm0, %v979_v18  ;;  %v5199_v27 = vadd.f32 %v16855_v13, %v5198_v26  ;;  %13478 = vmatprep.mubr.msk.f32.mxu0 %vm1229_vm0, %v468_v19  ;;  %v990_v17 = vld [vmem:[%s14872_s8 + $0x18e0] sm:$0xff] }
 0x23d   : > { %v7759_v28 = vadd.f32 %v16855_v13, %v7758_v29  ;;  %14246 = vmatprep.mubr.msk.f32.mxu1 %vm1229_vm0, %v980_v20  ;;  %9655 = vst.msk [vmem:[%s15319_s11 + $0x538] sm:$0xff] %vm9487_vm1, %v5204_v24  ;;  %v479_v29 = vld [vmem:[%s14872_s8 + $0x8e8] sm:$0xff] }
 0x23e   : > { %10167 = vst.msk [vmem:[%s15319_s11 + $0x1538] sm:$0xff] %vm9487_vm1, %v7764_v25  ;;  %9654 = vst.msk [vmem:[%s15319_s11 + $0x530] sm:$0xff] %vm9487_vm1, %v5199_v27  ;;  %v13321_v34 = vpop.f32.mrb[168].mxu0  ;;  %v991_v27 = vld [vmem:[%s14872_s8 + $0x18e8] sm:$0xff] }
 0x23f   : > { %10166 = vst.msk [vmem:[%s15319_s11 + $0x1530] sm:$0xff] %vm9487_vm1, %v7759_v28  ;;  %v14089_v35 = vpop.f32.mrb[168].mxu1  ;;  %v5214_v36 = vadd.f32 %v16855_v13, %v13321_v34  ;;  %v5208_v38 = vpop.f32.mrb[169].mxu0  ;;  %13479 = vmatmul.mubr.msk.f32.gmra.mrb[18].mxu0 %vm1229_vm0, %v469_v30  ;;  %v480_v28 = vld [vmem:[%s14872_s8 + $0x8f0] sm:$0xff] }
 0x240   : > { %v7774_v37 = vadd.f32 %v16855_v13, %v14089_v35  ;;  %v7768_v39 = vpop.f32.mrb[169].mxu1  ;;  %14247 = vmatmul.mubr.msk.f32.gmra.mrb[18].mxu1 %vm1229_vm0, %v981_v31  ;;  %v5209_v40 = vadd.f32 %v16855_v13, %v5208_v38  ;;  %13481 = vmatprep.mubr.msk.f32.mxu0 %vm1229_vm0, %v470_v32  ;;  %v992_v30 = vld [vmem:[%s14872_s8 + $0x18f0] sm:$0xff] }
 0x241   : > { %v7769_v41 = vadd.f32 %v16855_v13, %v7768_v39  ;;  %14249 = vmatprep.mubr.msk.f32.mxu1 %vm1229_vm0, %v982_v33  ;;  %9657 = vst.msk [vmem:[%s15319_s11 + $0x548] sm:$0xff] %vm9487_vm1, %v5214_v36  ;;  %v481_v39 = vld [vmem:[%s14872_s8 + $0x8f8] sm:$0xff] }
 0x242   : > { %10169 = vst.msk [vmem:[%s15319_s11 + $0x1548] sm:$0xff] %vm9487_vm1, %v7774_v37  ;;  %9656 = vst.msk [vmem:[%s15319_s11 + $0x540] sm:$0xff] %vm9487_vm1, %v5209_v40  ;;  %v13324_v46 = vpop.f32.mrb[170].mxu0  ;;  %v993_v40 = vld [vmem:[%s14872_s8 + $0x18f8] sm:$0xff] }
 0x243   : > { %10168 = vst.msk [vmem:[%s15319_s11 + $0x1540] sm:$0xff] %vm9487_vm1, %v7769_v41  ;;  %v14092_v47 = vpop.f32.mrb[170].mxu1  ;;  %v5224_v48 = vadd.f32 %v16855_v13, %v13324_v46  ;;  %v5218_v50 = vpop.f32.mrb[171].mxu0  ;;  %13482 = vmatmul.mubr.msk.f32.gmra.mrb[20].mxu0 %vm1229_vm0, %v471_v42  ;;  %v482_v41 = vld [vmem:[%s14872_s8 + $0x900] sm:$0xff] }
 0x244   : > { %v7784_v49 = vadd.f32 %v16855_v13, %v14092_v47  ;;  %v7778_v51 = vpop.f32.mrb[171].mxu1  ;;  %14250 = vmatmul.mubr.msk.f32.gmra.mrb[20].mxu1 %vm1229_vm0, %v983_v43  ;;  %v5219_v52 = vadd.f32 %v16855_v13, %v5218_v50  ;;  %13484 = vmatprep.mubr.msk.f32.mxu0 %vm1229_vm0, %v472_v44  ;;  %v994_v42 = vld [vmem:[%s14872_s8 + $0x1900] sm:$0xff] }
 0x245   : > { %v7779_v53 = vadd.f32 %v16855_v13, %v7778_v51  ;;  %14252 = vmatprep.mubr.msk.f32.mxu1 %vm1229_vm0, %v984_v45  ;;  %9659 = vst.msk [vmem:[%s15319_s11 + $0x558] sm:$0xff] %vm9487_vm1, %v5224_v48  ;;  %v483_v51 = vld [vmem:[%s14872_s8 + $0x908] sm:$0xff] }
 0x246   : > { %10171 = vst.msk [vmem:[%s15319_s11 + $0x1558] sm:$0xff] %vm9487_vm1, %v7784_v49  ;;  %9658 = vst.msk [vmem:[%s15319_s11 + $0x550] sm:$0xff] %vm9487_vm1, %v5219_v52  ;;  %v13327_v58 = vpop.f32.mrb[172].mxu0  ;;  %v995_v52 = vld [vmem:[%s14872_s8 + $0x1908] sm:$0xff] }
 0x247   : > { %10170 = vst.msk [vmem:[%s15319_s11 + $0x1550] sm:$0xff] %vm9487_vm1, %v7779_v53  ;;  %v14095_v59 = vpop.f32.mrb[172].mxu1  ;;  %v5234_v60 = vadd.f32 %v16855_v13, %v13327_v58  ;;  %v5228_v62 = vpop.f32.mrb[173].mxu0  ;;  %13485 = vmatmul.mubr.msk.f32.gmra.mrb[22].mxu0 %vm1229_vm0, %v473_v54  ;;  %v484_v53 = vld [vmem:[%s14872_s8 + $0x910] sm:$0xff] }
 0x248   : > { %v7794_v61 = vadd.f32 %v16855_v13, %v14095_v59  ;;  %v7788_v63 = vpop.f32.mrb[173].mxu1  ;;  %14253 = vmatmul.mubr.msk.f32.gmra.mrb[22].mxu1 %vm1229_vm0, %v985_v55  ;;  %v5229_v0 = vadd.f32 %v16855_v13, %v5228_v62  ;;  %13487 = vmatprep.mubr.msk.f32.mxu0 %vm1229_vm0, %v474_v56  ;;  %v996_v54 = vld [vmem:[%s14872_s8 + $0x1910] sm:$0xff] }
 0x249   : > { %v7789_v1 = vadd.f32 %v16855_v13, %v7788_v63  ;;  %14255 = vmatprep.mubr.msk.f32.mxu1 %vm1229_vm0, %v986_v57  ;;  %9661 = vst.msk [vmem:[%s15319_s11 + $0x568] sm:$0xff] %vm9487_vm1, %v5234_v60  ;;  %v485_v63 = vld [vmem:[%s14872_s8 + $0x918] sm:$0xff] }
 0x24a   : > { %10173 = vst.msk [vmem:[%s15319_s11 + $0x1568] sm:$0xff] %vm9487_vm1, %v7794_v61  ;;  %9660 = vst.msk [vmem:[%s15319_s11 + $0x560] sm:$0xff] %vm9487_vm1, %v5229_v0  ;;  %v13330_v6 = vpop.f32.mrb[174].mxu0  ;;  %v997_v0 = vld [vmem:[%s14872_s8 + $0x1918] sm:$0xff] }
 0x24b   : > { %10172 = vst.msk [vmem:[%s15319_s11 + $0x1560] sm:$0xff] %vm9487_vm1, %v7789_v1  ;;  %v14098_v7 = vpop.f32.mrb[174].mxu1  ;;  %v5244_v8 = vadd.f32 %v16855_v13, %v13330_v6  ;;  %v5238_v10 = vpop.f32.mrb[175].mxu0  ;;  %13488 = vmatmul.mubr.msk.f32.gmra.mrb[24].mxu0 %vm1229_vm0, %v475_v2  ;;  %v486_v1 = vld [vmem:[%s14872_s8 + $0x920] sm:$0xff] }
 0x24c   : > { %v7804_v9 = vadd.f32 %v16855_v13, %v14098_v7  ;;  %v7798_v11 = vpop.f32.mrb[175].mxu1  ;;  %14256 = vmatmul.mubr.msk.f32.gmra.mrb[24].mxu1 %vm1229_vm0, %v987_v3  ;;  %v5239_v16 = vadd.f32 %v16855_v13, %v5238_v10  ;;  %13490 = vmatprep.mubr.msk.f32.mxu0 %vm1229_vm0, %v476_v4  ;;  %v998_v2 = vld [vmem:[%s14872_s8 + $0x1920] sm:$0xff] }
 0x24d   : > { %v7799_v12 = vadd.f32 %v16855_v13, %v7798_v11  ;;  %14258 = vmatprep.mubr.msk.f32.mxu1 %vm1229_vm0, %v988_v5  ;;  %9663 = vst.msk [vmem:[%s15319_s11 + $0x578] sm:$0xff] %vm9487_vm1, %v5244_v8  ;;  %v487_v11 = vld [vmem:[%s14872_s8 + $0x928] sm:$0xff] }
 0x24e   : > { %10175 = vst.msk [vmem:[%s15319_s11 + $0x1578] sm:$0xff] %vm9487_vm1, %v7804_v9  ;;  %9662 = vst.msk [vmem:[%s15319_s11 + $0x570] sm:$0xff] %vm9487_vm1, %v5239_v16  ;;  %v13333_v18 = vpop.f32.mrb[176].mxu0  ;;  %v999_v16 = vld [vmem:[%s14872_s8 + $0x1928] sm:$0xff] }
 0x24f   : > { %10174 = vst.msk [vmem:[%s15319_s11 + $0x1570] sm:$0xff] %vm9487_vm1, %v7799_v12  ;;  %v14101_v19 = vpop.f32.mrb[176].mxu1  ;;  %v5254_v20 = vadd.f32 %v16855_v13, %v13333_v18  ;;  %v5248_v23 = vpop.f32.mrb[177].mxu0  ;;  %13491 = vmatmul.mubr.msk.f32.gmra.mrb[26].mxu0 %vm1229_vm0, %v477_v14  ;;  %v488_v12 = vld [vmem:[%s14872_s8 + $0x930] sm:$0xff] }
 0x250   : > { %v7814_v22 = vadd.f32 %v16855_v13, %v14101_v19  ;;  %v7808_v24 = vpop.f32.mrb[177].mxu1  ;;  %14259 = vmatmul.mubr.msk.f32.gmra.mrb[26].mxu1 %vm1229_vm0, %v989_v21  ;;  %v5249_v25 = vadd.f32 %v16855_v13, %v5248_v23  ;;  %13493 = vmatprep.mubr.msk.f32.mxu0 %vm1229_vm0, %v478_v15  ;;  %v1000_v14 = vld [vmem:[%s14872_s8 + $0x1930] sm:$0xff] }
 0x251   : > { %v7809_v26 = vadd.f32 %v16855_v13, %v7808_v24  ;;  %14261 = vmatprep.mubr.msk.f32.mxu1 %vm1229_vm0, %v990_v17  ;;  %9665 = vst.msk [vmem:[%s15319_s11 + $0x588] sm:$0xff] %vm9487_vm1, %v5254_v20  ;;  %v489_v24 = vld [vmem:[%s14872_s8 + $0x938] sm:$0xff] }
 0x252   : > { %10177 = vst.msk [vmem:[%s15319_s11 + $0x1588] sm:$0xff] %vm9487_vm1, %v7814_v22  ;;  %9664 = vst.msk [vmem:[%s15319_s11 + $0x580] sm:$0xff] %vm9487_vm1, %v5249_v25  ;;  %v13336_v31 = vpop.f32.mrb[178].mxu0  ;;  %v1001_v25 = vld [vmem:[%s14872_s8 + $0x1938] sm:$0xff] }
 0x253   : > { %10176 = vst.msk [vmem:[%s15319_s11 + $0x1580] sm:$0xff] %vm9487_vm1, %v7809_v26  ;;  %v14104_v32 = vpop.f32.mrb[178].mxu1  ;;  %v5264_v33 = vadd.f32 %v16855_v13, %v13336_v31  ;;  %v5258_v35 = vpop.f32.mrb[179].mxu0  ;;  %13494 = vmatmul.mubr.msk.f32.gmra.mrb[28].mxu0 %vm1229_vm0, %v479_v29  ;;  %v490_v26 = vld [vmem:[%s14872_s8 + $0x940] sm:$0xff] }
 0x254   : > { %v7824_v34 = vadd.f32 %v16855_v13, %v14104_v32  ;;  %v7818_v36 = vpop.f32.mrb[179].mxu1  ;;  %14262 = vmatmul.mubr.msk.f32.gmra.mrb[28].mxu1 %vm1229_vm0, %v991_v27  ;;  %v5259_v37 = vadd.f32 %v16855_v13, %v5258_v35  ;;  %13496 = vmatprep.mubr.msk.f32.mxu0 %vm1229_vm0, %v480_v28  ;;  %v1002_v29 = vld [vmem:[%s14872_s8 + $0x1940] sm:$0xff] }
 0x255   : > { %v7819_v38 = vadd.f32 %v16855_v13, %v7818_v36  ;;  %14264 = vmatprep.mubr.msk.f32.mxu1 %vm1229_vm0, %v992_v30  ;;  %9667 = vst.msk [vmem:[%s15319_s11 + $0x598] sm:$0xff] %vm9487_vm1, %v5264_v33  ;;  %v491_v36 = vld [vmem:[%s14872_s8 + $0x948] sm:$0xff] }
 0x256   : > { %10179 = vst.msk [vmem:[%s15319_s11 + $0x1598] sm:$0xff] %vm9487_vm1, %v7824_v34  ;;  %9666 = vst.msk [vmem:[%s15319_s11 + $0x590] sm:$0xff] %vm9487_vm1, %v5259_v37  ;;  %v13339_v43 = vpop.f32.mrb[180].mxu0  ;;  %v1003_v37 = vld [vmem:[%s14872_s8 + $0x1948] sm:$0xff] }
 0x257   : > { %10178 = vst.msk [vmem:[%s15319_s11 + $0x1590] sm:$0xff] %vm9487_vm1, %v7819_v38  ;;  %v14107_v44 = vpop.f32.mrb[180].mxu1  ;;  %v5274_v45 = vadd.f32 %v16855_v13, %v13339_v43  ;;  %v5268_v47 = vpop.f32.mrb[181].mxu0  ;;  %13497 = vmatmul.mubr.msk.f32.gmra.mrb[30].mxu0 %vm1229_vm0, %v481_v39  ;;  %v492_v38 = vld [vmem:[%s14872_s8 + $0x950] sm:$0xff] }
 0x258   : > { %v7834_v46 = vadd.f32 %v16855_v13, %v14107_v44  ;;  %v7828_v48 = vpop.f32.mrb[181].mxu1  ;;  %14265 = vmatmul.mubr.msk.f32.gmra.mrb[30].mxu1 %vm1229_vm0, %v993_v40  ;;  %v5269_v49 = vadd.f32 %v16855_v13, %v5268_v47  ;;  %13499 = vmatprep.mubr.msk.f32.mxu0 %vm1229_vm0, %v482_v41  ;;  %v1004_v39 = vld [vmem:[%s14872_s8 + $0x1950] sm:$0xff] }
 0x259   : > { %v7829_v50 = vadd.f32 %v16855_v13, %v7828_v48  ;;  %14267 = vmatprep.mubr.msk.f32.mxu1 %vm1229_vm0, %v994_v42  ;;  %9669 = vst.msk [vmem:[%s15319_s11 + $0x5a8] sm:$0xff] %vm9487_vm1, %v5274_v45  ;;  %v493_v48 = vld [vmem:[%s14872_s8 + $0x958] sm:$0xff] }
 0x25a   : > { %10181 = vst.msk [vmem:[%s15319_s11 + $0x15a8] sm:$0xff] %vm9487_vm1, %v7834_v46  ;;  %9668 = vst.msk [vmem:[%s15319_s11 + $0x5a0] sm:$0xff] %vm9487_vm1, %v5269_v49  ;;  %v13342_v55 = vpop.f32.mrb[182].mxu0  ;;  %v1005_v49 = vld [vmem:[%s14872_s8 + $0x1958] sm:$0xff] }
 0x25b   : > { %10180 = vst.msk [vmem:[%s15319_s11 + $0x15a0] sm:$0xff] %vm9487_vm1, %v7829_v50  ;;  %v14110_v56 = vpop.f32.mrb[182].mxu1  ;;  %v5284_v57 = vadd.f32 %v16855_v13, %v13342_v55  ;;  %v5278_v59 = vpop.f32.mrb[183].mxu0  ;;  %13500 = vmatmul.mubr.msk.f32.gmra.mrb[32].mxu0 %vm1229_vm0, %v483_v51  ;;  %v494_v50 = vld [vmem:[%s14872_s8 + $0x960] sm:$0xff] }
 0x25c   : > { %v7844_v58 = vadd.f32 %v16855_v13, %v14110_v56  ;;  %v7838_v60 = vpop.f32.mrb[183].mxu1  ;;  %14268 = vmatmul.mubr.msk.f32.gmra.mrb[32].mxu1 %vm1229_vm0, %v995_v52  ;;  %v5279_v61 = vadd.f32 %v16855_v13, %v5278_v59  ;;  %13502 = vmatprep.mubr.msk.f32.mxu0 %vm1229_vm0, %v484_v53  ;;  %v1006_v51 = vld [vmem:[%s14872_s8 + $0x1960] sm:$0xff] }
 0x25d   : > { %v7839_v62 = vadd.f32 %v16855_v13, %v7838_v60  ;;  %14270 = vmatprep.mubr.msk.f32.mxu1 %vm1229_vm0, %v996_v54  ;;  %9671 = vst.msk [vmem:[%s15319_s11 + $0x5b8] sm:$0xff] %vm9487_vm1, %v5284_v57  ;;  %v495_v60 = vld [vmem:[%s14872_s8 + $0x968] sm:$0xff] }
 0x25e   : > { %10183 = vst.msk [vmem:[%s15319_s11 + $0x15b8] sm:$0xff] %vm9487_vm1, %v7844_v58  ;;  %9670 = vst.msk [vmem:[%s15319_s11 + $0x5b0] sm:$0xff] %vm9487_vm1, %v5279_v61  ;;  %v13345_v3 = vpop.f32.mrb[184].mxu0  ;;  %v1007_v61 = vld [vmem:[%s14872_s8 + $0x1968] sm:$0xff] }
 0x25f   : > { %10182 = vst.msk [vmem:[%s15319_s11 + $0x15b0] sm:$0xff] %vm9487_vm1, %v7839_v62  ;;  %v14113_v4 = vpop.f32.mrb[184].mxu1  ;;  %v5294_v5 = vadd.f32 %v16855_v13, %v13345_v3  ;;  %v5288_v7 = vpop.f32.mrb[185].mxu0  ;;  %13503 = vmatmul.mubr.msk.f32.gmra.mrb[34].mxu0 %vm1229_vm0, %v485_v63  ;;  %v496_v62 = vld [vmem:[%s14872_s8 + $0x970] sm:$0xff] }
 0x260   : > { %v7854_v6 = vadd.f32 %v16855_v13, %v14113_v4  ;;  %v7848_v8 = vpop.f32.mrb[185].mxu1  ;;  %14271 = vmatmul.mubr.msk.f32.gmra.mrb[34].mxu1 %vm1229_vm0, %v997_v0  ;;  %v5289_v9 = vadd.f32 %v16855_v13, %v5288_v7  ;;  %13505 = vmatprep.mubr.msk.f32.mxu0 %vm1229_vm0, %v486_v1  ;;  %v1008_v63 = vld [vmem:[%s14872_s8 + $0x1970] sm:$0xff] }
 0x261   : > { %v7849_v10 = vadd.f32 %v16855_v13, %v7848_v8  ;;  %14273 = vmatprep.mubr.msk.f32.mxu1 %vm1229_vm0, %v998_v2  ;;  %9673 = vst.msk [vmem:[%s15319_s11 + $0x5c8] sm:$0xff] %vm9487_vm1, %v5294_v5  ;;  %v497_v8 = vld [vmem:[%s14872_s8 + $0x978] sm:$0xff] }
 0x262   : > { %10185 = vst.msk [vmem:[%s15319_s11 + $0x15c8] sm:$0xff] %vm9487_vm1, %v7854_v6  ;;  %9672 = vst.msk [vmem:[%s15319_s11 + $0x5c0] sm:$0xff] %vm9487_vm1, %v5289_v9  ;;  %v13348_v21 = vpop.f32.mrb[186].mxu0  ;;  %v1009_v9 = vld [vmem:[%s14872_s8 + $0x1978] sm:$0xff] }
 0x263   : > { %10184 = vst.msk [vmem:[%s15319_s11 + $0x15c0] sm:$0xff] %vm9487_vm1, %v7849_v10  ;;  %v14116_v15 = vpop.f32.mrb[186].mxu1  ;;  %v5304_v17 = vadd.f32 %v16855_v13, %v13348_v21  ;;  %v5298_v19 = vpop.f32.mrb[187].mxu0  ;;  %13506 = vmatmul.mubr.msk.f32.gmra.mrb[36].mxu0 %vm1229_vm0, %v487_v11  ;;  %v498_v10 = vld [vmem:[%s14872_s8 + $0x980] sm:$0xff] }
 0x264   : > { %v7864_v18 = vadd.f32 %v16855_v13, %v14116_v15  ;;  %v7858_v20 = vpop.f32.mrb[187].mxu1  ;;  %14274 = vmatmul.mubr.msk.f32.gmra.mrb[36].mxu1 %vm1229_vm0, %v999_v16  ;;  %v5299_v22 = vadd.f32 %v16855_v13, %v5298_v19  ;;  %13508 = vmatprep.mubr.msk.f32.mxu0 %vm1229_vm0, %v488_v12  ;;  %v1010_v11 = vld [vmem:[%s14872_s8 + $0x1980] sm:$0xff] }
 0x265   : > { %v7859_v23 = vadd.f32 %v16855_v13, %v7858_v20  ;;  %14276 = vmatprep.mubr.msk.f32.mxu1 %vm1229_vm0, %v1000_v14  ;;  %9675 = vst.msk [vmem:[%s15319_s11 + $0x5d8] sm:$0xff] %vm9487_vm1, %v5304_v17  ;;  %v499_v20 = vld [vmem:[%s14872_s8 + $0x988] sm:$0xff] }
 0x266   : > { %10187 = vst.msk [vmem:[%s15319_s11 + $0x15d8] sm:$0xff] %vm9487_vm1, %v7864_v18  ;;  %9674 = vst.msk [vmem:[%s15319_s11 + $0x5d0] sm:$0xff] %vm9487_vm1, %v5299_v22  ;;  %v13351_v27 = vpop.f32.mrb[188].mxu0  ;;  %v1011_v22 = vld [vmem:[%s14872_s8 + $0x1988] sm:$0xff] }
 0x267   : > { %10186 = vst.msk [vmem:[%s15319_s11 + $0x15d0] sm:$0xff] %vm9487_vm1, %v7859_v23  ;;  %v14119_v28 = vpop.f32.mrb[188].mxu1  ;;  %v5314_v30 = vadd.f32 %v16855_v13, %v13351_v27  ;;  %v5308_v32 = vpop.f32.mrb[189].mxu0  ;;  %13509 = vmatmul.mubr.msk.f32.gmra.mrb[38].mxu0 %vm1229_vm0, %v489_v24  ;;  %v500_v23 = vld [vmem:[%s14872_s8 + $0x990] sm:$0xff] }
 0x268   : > { %v7874_v31 = vadd.f32 %v16855_v13, %v14119_v28  ;;  %v7868_v33 = vpop.f32.mrb[189].mxu1  ;;  %14277 = vmatmul.mubr.msk.f32.gmra.mrb[38].mxu1 %vm1229_vm0, %v1001_v25  ;;  %v5309_v34 = vadd.f32 %v16855_v13, %v5308_v32  ;;  %13511 = vmatprep.mubr.msk.f32.mxu0 %vm1229_vm0, %v490_v26  ;;  %v1012_v24 = vld [vmem:[%s14872_s8 + $0x1990] sm:$0xff] }
 0x269   : > { %v7869_v35 = vadd.f32 %v16855_v13, %v7868_v33  ;;  %14279 = vmatprep.mubr.msk.f32.mxu1 %vm1229_vm0, %v1002_v29  ;;  %9677 = vst.msk [vmem:[%s15319_s11 + $0x5e8] sm:$0xff] %vm9487_vm1, %v5314_v30  ;;  %v501_v33 = vld [vmem:[%s14872_s8 + $0x998] sm:$0xff] }
 0x26a   : > { %10189 = vst.msk [vmem:[%s15319_s11 + $0x15e8] sm:$0xff] %vm9487_vm1, %v7874_v31  ;;  %9676 = vst.msk [vmem:[%s15319_s11 + $0x5e0] sm:$0xff] %vm9487_vm1, %v5309_v34  ;;  %v13354_v40 = vpop.f32.mrb[190].mxu0  ;;  %v1013_v34 = vld [vmem:[%s14872_s8 + $0x1998] sm:$0xff] }
 0x26b   : > { %10188 = vst.msk [vmem:[%s15319_s11 + $0x15e0] sm:$0xff] %vm9487_vm1, %v7869_v35  ;;  %v14122_v41 = vpop.f32.mrb[190].mxu1  ;;  %v5324_v42 = vadd.f32 %v16855_v13, %v13354_v40  ;;  %v5318_v44 = vpop.f32.mrb[191].mxu0  ;;  %13512 = vmatmul.mubr.msk.f32.gmra.mrb[40].mxu0 %vm1229_vm0, %v491_v36  ;;  %v502_v35 = vld [vmem:[%s14872_s8 + $0x9a0] sm:$0xff] }
 0x26c   : > { %v7884_v43 = vadd.f32 %v16855_v13, %v14122_v41  ;;  %v7878_v45 = vpop.f32.mrb[191].mxu1  ;;  %14280 = vmatmul.mubr.msk.f32.gmra.mrb[40].mxu1 %vm1229_vm0, %v1003_v37  ;;  %v5319_v46 = vadd.f32 %v16855_v13, %v5318_v44  ;;  %13514 = vmatprep.mubr.msk.f32.mxu0 %vm1229_vm0, %v492_v38  ;;  %v1014_v36 = vld [vmem:[%s14872_s8 + $0x19a0] sm:$0xff] }
 0x26d   : > { %v7879_v47 = vadd.f32 %v16855_v13, %v7878_v45  ;;  %14282 = vmatprep.mubr.msk.f32.mxu1 %vm1229_vm0, %v1004_v39  ;;  %9679 = vst.msk [vmem:[%s15319_s11 + $0x5f8] sm:$0xff] %vm9487_vm1, %v5324_v42  ;;  %v503_v45 = vld [vmem:[%s14872_s8 + $0x9a8] sm:$0xff] }
 0x26e   : > { %10191 = vst.msk [vmem:[%s15319_s11 + $0x15f8] sm:$0xff] %vm9487_vm1, %v7884_v43  ;;  %9678 = vst.msk [vmem:[%s15319_s11 + $0x5f0] sm:$0xff] %vm9487_vm1, %v5319_v46  ;;  %v13357_v52 = vpop.f32.mrb[192].mxu0  ;;  %v1015_v46 = vld [vmem:[%s14872_s8 + $0x19a8] sm:$0xff] }
 0x26f   : > { %10190 = vst.msk [vmem:[%s15319_s11 + $0x15f0] sm:$0xff] %vm9487_vm1, %v7879_v47  ;;  %v14125_v53 = vpop.f32.mrb[192].mxu1  ;;  %v5334_v54 = vadd.f32 %v16855_v13, %v13357_v52  ;;  %v5328_v56 = vpop.f32.mrb[193].mxu0  ;;  %13515 = vmatmul.mubr.msk.f32.gmra.mrb[42].mxu0 %vm1229_vm0, %v493_v48  ;;  %v504_v47 = vld [vmem:[%s14872_s8 + $0x9b0] sm:$0xff] }
 0x270   : > { %v7894_v55 = vadd.f32 %v16855_v13, %v14125_v53  ;;  %v7888_v57 = vpop.f32.mrb[193].mxu1  ;;  %14283 = vmatmul.mubr.msk.f32.gmra.mrb[42].mxu1 %vm1229_vm0, %v1005_v49  ;;  %v5329_v58 = vadd.f32 %v16855_v13, %v5328_v56  ;;  %13517 = vmatprep.mubr.msk.f32.mxu0 %vm1229_vm0, %v494_v50  ;;  %v1016_v48 = vld [vmem:[%s14872_s8 + $0x19b0] sm:$0xff] }
 0x271   : > { %v7889_v59 = vadd.f32 %v16855_v13, %v7888_v57  ;;  %14285 = vmatprep.mubr.msk.f32.mxu1 %vm1229_vm0, %v1006_v51  ;;  %9681 = vst.msk [vmem:[%s15319_s11 + $0x608] sm:$0xff] %vm9487_vm1, %v5334_v54  ;;  %v505_v57 = vld [vmem:[%s14872_s8 + $0x9b8] sm:$0xff] }
 0x272   : > { %10193 = vst.msk [vmem:[%s15319_s11 + $0x1608] sm:$0xff] %vm9487_vm1, %v7894_v55  ;;  %9680 = vst.msk [vmem:[%s15319_s11 + $0x600] sm:$0xff] %vm9487_vm1, %v5329_v58  ;;  %v13360_v0 = vpop.f32.mrb[194].mxu0  ;;  %v1017_v58 = vld [vmem:[%s14872_s8 + $0x19b8] sm:$0xff] }
 0x273   : > { %10192 = vst.msk [vmem:[%s15319_s11 + $0x1600] sm:$0xff] %vm9487_vm1, %v7889_v59  ;;  %v14128_v1 = vpop.f32.mrb[194].mxu1  ;;  %v5344_v2 = vadd.f32 %v16855_v13, %v13360_v0  ;;  %v5338_v4 = vpop.f32.mrb[195].mxu0  ;;  %13518 = vmatmul.mubr.msk.f32.gmra.mrb[44].mxu0 %vm1229_vm0, %v495_v60  ;;  %v506_v59 = vld [vmem:[%s14872_s8 + $0x9c0] sm:$0xff] }
 0x274   : > { %v7904_v3 = vadd.f32 %v16855_v13, %v14128_v1  ;;  %v7898_v5 = vpop.f32.mrb[195].mxu1  ;;  %14286 = vmatmul.mubr.msk.f32.gmra.mrb[44].mxu1 %vm1229_vm0, %v1007_v61  ;;  %v5339_v6 = vadd.f32 %v16855_v13, %v5338_v4  ;;  %13520 = vmatprep.mubr.msk.f32.mxu0 %vm1229_vm0, %v496_v62  ;;  %v1018_v60 = vld [vmem:[%s14872_s8 + $0x19c0] sm:$0xff] }
 0x275   : > { %v7899_v7 = vadd.f32 %v16855_v13, %v7898_v5  ;;  %14288 = vmatprep.mubr.msk.f32.mxu1 %vm1229_vm0, %v1008_v63  ;;  %9683 = vst.msk [vmem:[%s15319_s11 + $0x618] sm:$0xff] %vm9487_vm1, %v5344_v2  ;;  %v507_v5 = vld [vmem:[%s14872_s8 + $0x9c8] sm:$0xff] }
 0x276   : > { %10195 = vst.msk [vmem:[%s15319_s11 + $0x1618] sm:$0xff] %vm9487_vm1, %v7904_v3  ;;  %9682 = vst.msk [vmem:[%s15319_s11 + $0x610] sm:$0xff] %vm9487_vm1, %v5339_v6  ;;  %v13363_v16 = vpop.f32.mrb[196].mxu0  ;;  %v1019_v6 = vld [vmem:[%s14872_s8 + $0x19c8] sm:$0xff] }
 0x277   : > { %10194 = vst.msk [vmem:[%s15319_s11 + $0x1610] sm:$0xff] %vm9487_vm1, %v7899_v7  ;;  %v14131_v12 = vpop.f32.mrb[196].mxu1  ;;  %v5354_v14 = vadd.f32 %v16855_v13, %v13363_v16  ;;  %v5348_v15 = vpop.f32.mrb[197].mxu0  ;;  %13521 = vmatmul.mubr.msk.f32.gmra.mrb[46].mxu0 %vm1229_vm0, %v497_v8  ;;  %v508_v7 = vld [vmem:[%s14872_s8 + $0x9d0] sm:$0xff] }
 0x278   : > { %v7914_v21 = vadd.f32 %v16855_v13, %v14131_v12  ;;  %v7908_v17 = vpop.f32.mrb[197].mxu1  ;;  %14289 = vmatmul.mubr.msk.f32.gmra.mrb[46].mxu1 %vm1229_vm0, %v1009_v9  ;;  %v5349_v18 = vadd.f32 %v16855_v13, %v5348_v15  ;;  %13523 = vmatprep.mubr.msk.f32.mxu0 %vm1229_vm0, %v498_v10  ;;  %v1020_v8 = vld [vmem:[%s14872_s8 + $0x19d0] sm:$0xff]  ;;  %v17377_v10 = vld [vmem:[#allocation2] ss:$0 sm:$0xff] }
 0x279   : > { %v7909_v19 = vadd.f32 %v16855_v13, %v7908_v17  ;;  %14291 = vmatprep.mubr.msk.f32.mxu1 %vm1229_vm0, %v1010_v11  ;;  %9685 = vst.msk [vmem:[%s15319_s11 + $0x628] sm:$0xff] %vm9487_vm1, %v5354_v14  ;;  %v509_v17 = vld [vmem:[%s14872_s8 + $0x9d8] sm:$0xff] }
 0x27a   : > { %10197 = vst.msk [vmem:[%s15319_s11 + $0x1628] sm:$0xff] %vm9487_vm1, %v7914_v21  ;;  %9684 = vst.msk [vmem:[%s15319_s11 + $0x620] sm:$0xff] %vm9487_vm1, %v5349_v18  ;;  %v13366_v25 = vpop.f32.mrb[198].mxu0  ;;  %v1021_v18 = vld [vmem:[%s14872_s8 + $0x19d8] sm:$0xff] }
 0x27b   : > { %10196 = vst.msk [vmem:[%s15319_s11 + $0x1620] sm:$0xff] %vm9487_vm1, %v7909_v19  ;;  %v14134_v26 = vpop.f32.mrb[198].mxu1  ;;  %v5364_v29 = vadd.f32 %v16855_v13, %v13366_v25  ;;  %v5358_v28 = vpop.f32.mrb[199].mxu0  ;;  %13524 = vmatmul.mubr.msk.f32.gmra.mrb[48].mxu0 %vm1229_vm0, %v499_v20  ;;  %v510_v19 = vld [vmem:[%s14872_s8 + $0x9e0] sm:$0xff] }
 0x27c   : > { %v7924_v27 = vadd.f32 %v16855_v13, %v14134_v26  ;;  %v7918_v30 = vpop.f32.mrb[199].mxu1  ;;  %14292 = vmatmul.mubr.msk.f32.gmra.mrb[48].mxu1 %vm1229_vm0, %v1011_v22  ;;  %v5359_v31 = vadd.f32 %v16855_v13, %v5358_v28  ;;  %13526 = vmatprep.mubr.msk.f32.mxu0 %vm1229_vm0, %v500_v23  ;;  %v1022_v20 = vld [vmem:[%s14872_s8 + $0x19e0] sm:$0xff] }
 0x27d   : > { %v7919_v32 = vadd.f32 %v16855_v13, %v7918_v30  ;;  %14294 = vmatprep.mubr.msk.f32.mxu1 %vm1229_vm0, %v1012_v24  ;;  %9687 = vst.msk [vmem:[%s15319_s11 + $0x638] sm:$0xff] %vm9487_vm1, %v5364_v29  ;;  %v511_v30 = vld [vmem:[%s14872_s8 + $0x9e8] sm:$0xff] }
 0x27e   : > { %10199 = vst.msk [vmem:[%s15319_s11 + $0x1638] sm:$0xff] %vm9487_vm1, %v7924_v27  ;;  %9686 = vst.msk [vmem:[%s15319_s11 + $0x630] sm:$0xff] %vm9487_vm1, %v5359_v31  ;;  %v13369_v37 = vpop.f32.mrb[200].mxu0  ;;  %v1023_v31 = vld [vmem:[%s14872_s8 + $0x19e8] sm:$0xff] }
 0x27f   : > { %10198 = vst.msk [vmem:[%s15319_s11 + $0x1630] sm:$0xff] %vm9487_vm1, %v7919_v32  ;;  %v14137_v38 = vpop.f32.mrb[200].mxu1  ;;  %v5374_v39 = vadd.f32 %v16855_v13, %v13369_v37  ;;  %v5368_v41 = vpop.f32.mrb[201].mxu0  ;;  %13527 = vmatmul.mubr.msk.f32.gmra.mrb[50].mxu0 %vm1229_vm0, %v501_v33  ;;  %v512_v32 = vld [vmem:[%s14872_s8 + $0x9f0] sm:$0xff] }
 0x280   : > { %v7934_v40 = vadd.f32 %v16855_v13, %v14137_v38  ;;  %v7928_v42 = vpop.f32.mrb[201].mxu1  ;;  %14295 = vmatmul.mubr.msk.f32.gmra.mrb[50].mxu1 %vm1229_vm0, %v1013_v34  ;;  %v5369_v43 = vadd.f32 %v16855_v13, %v5368_v41  ;;  %13529 = vmatprep.mubr.msk.f32.mxu0 %vm1229_vm0, %v502_v35  ;;  %v1024_v33 = vld [vmem:[%s14872_s8 + $0x19f0] sm:$0xff] }
 0x281   : > { %v7929_v44 = vadd.f32 %v16855_v13, %v7928_v42  ;;  %14297 = vmatprep.mubr.msk.f32.mxu1 %vm1229_vm0, %v1014_v36  ;;  %9689 = vst.msk [vmem:[%s15319_s11 + $0x648] sm:$0xff] %vm9487_vm1, %v5374_v39  ;;  %v513_v42 = vld [vmem:[%s14872_s8 + $0x9f8] sm:$0xff] }
 0x282   : > { %10201 = vst.msk [vmem:[%s15319_s11 + $0x1648] sm:$0xff] %vm9487_vm1, %v7934_v40  ;;  %9688 = vst.msk [vmem:[%s15319_s11 + $0x640] sm:$0xff] %vm9487_vm1, %v5369_v43  ;;  %v13372_v49 = vpop.f32.mrb[202].mxu0  ;;  %v1025_v43 = vld [vmem:[%s14872_s8 + $0x19f8] sm:$0xff] }
 0x283   : > { %10200 = vst.msk [vmem:[%s15319_s11 + $0x1640] sm:$0xff] %vm9487_vm1, %v7929_v44  ;;  %v14140_v50 = vpop.f32.mrb[202].mxu1  ;;  %v5384_v51 = vadd.f32 %v16855_v13, %v13372_v49  ;;  %v5378_v53 = vpop.f32.mrb[203].mxu0  ;;  %13530 = vmatmul.mubr.msk.f32.gmra.mrb[52].mxu0 %vm1229_vm0, %v503_v45  ;;  %v514_v44 = vld [vmem:[%s14872_s8 + $0xa00] sm:$0xff] }
 0x284   : > { %v7944_v52 = vadd.f32 %v16855_v13, %v14140_v50  ;;  %v7938_v54 = vpop.f32.mrb[203].mxu1  ;;  %14298 = vmatmul.mubr.msk.f32.gmra.mrb[52].mxu1 %vm1229_vm0, %v1015_v46  ;;  %v5379_v55 = vadd.f32 %v16855_v13, %v5378_v53  ;;  %13532 = vmatprep.mubr.msk.f32.mxu0 %vm1229_vm0, %v504_v47  ;;  %v1026_v45 = vld [vmem:[%s14872_s8 + $0x1a00] sm:$0xff] }
 0x285   : > { %v7939_v56 = vadd.f32 %v16855_v13, %v7938_v54  ;;  %14300 = vmatprep.mubr.msk.f32.mxu1 %vm1229_vm0, %v1016_v48  ;;  %9691 = vst.msk [vmem:[%s15319_s11 + $0x658] sm:$0xff] %vm9487_vm1, %v5384_v51  ;;  %v515_v54 = vld [vmem:[%s14872_s8 + $0xa08] sm:$0xff] }
 0x286   : > { %10203 = vst.msk [vmem:[%s15319_s11 + $0x1658] sm:$0xff] %vm9487_vm1, %v7944_v52  ;;  %9690 = vst.msk [vmem:[%s15319_s11 + $0x650] sm:$0xff] %vm9487_vm1, %v5379_v55  ;;  %v13375_v61 = vpop.f32.mrb[204].mxu0  ;;  %v1027_v55 = vld [vmem:[%s14872_s8 + $0x1a08] sm:$0xff] }
 0x287   : > { %10202 = vst.msk [vmem:[%s15319_s11 + $0x1650] sm:$0xff] %vm9487_vm1, %v7939_v56  ;;  %v14143_v62 = vpop.f32.mrb[204].mxu1  ;;  %v5394_v63 = vadd.f32 %v16855_v13, %v13375_v61  ;;  %v5388_v1 = vpop.f32.mrb[205].mxu0  ;;  %13533 = vmatmul.mubr.msk.f32.gmra.mrb[54].mxu0 %vm1229_vm0, %v505_v57  ;;  %v516_v56 = vld [vmem:[%s14872_s8 + $0xa10] sm:$0xff] }
 0x288   : > { %v7954_v0 = vadd.f32 %v16855_v13, %v14143_v62  ;;  %v7948_v2 = vpop.f32.mrb[205].mxu1  ;;  %14301 = vmatmul.mubr.msk.f32.gmra.mrb[54].mxu1 %vm1229_vm0, %v1017_v58  ;;  %v5389_v3 = vadd.f32 %v16855_v13, %v5388_v1  ;;  %13535 = vmatprep.mubr.msk.f32.mxu0 %vm1229_vm0, %v506_v59  ;;  %v1028_v57 = vld [vmem:[%s14872_s8 + $0x1a10] sm:$0xff] }
 0x289   : > { %v7949_v4 = vadd.f32 %v16855_v13, %v7948_v2  ;;  %14303 = vmatprep.mubr.msk.f32.mxu1 %vm1229_vm0, %v1018_v60  ;;  %9693 = vst.msk [vmem:[%s15319_s11 + $0x668] sm:$0xff] %vm9487_vm1, %v5394_v63  ;;  %v517_v2 = vld [vmem:[%s14872_s8 + $0xa18] sm:$0xff] }
 0x28a   : > { %10205 = vst.msk [vmem:[%s15319_s11 + $0x1668] sm:$0xff] %vm9487_vm1, %v7954_v0  ;;  %9692 = vst.msk [vmem:[%s15319_s11 + $0x660] sm:$0xff] %vm9487_vm1, %v5389_v3  ;;  %v13378_v13 = vpop.f32.mrb[206].mxu0  ;;  %v1029_v3 = vld [vmem:[%s14872_s8 + $0x1a18] sm:$0xff] }
 0x28b   : > { %10204 = vst.msk [vmem:[%s15319_s11 + $0x1660] sm:$0xff] %vm9487_vm1, %v7949_v4  ;;  %v14146_v9 = vpop.f32.mrb[206].mxu1  ;;  %v5404_v11 = vadd.f32 %v17377_v10, %v13378_v13  ;;  %v5398_v12 = vpop.f32.mrb[207].mxu0  ;;  %13536 = vmatmul.mubr.msk.f32.gmra.mrb[56].mxu0 %vm1229_vm0, %v507_v5  ;;  %v518_v4 = vld [vmem:[%s14872_s8 + $0xa20] sm:$0xff] }
 0x28c   : > { %v7964_v16 = vadd.f32 %v17377_v10, %v14146_v9  ;;  %v7958_v14 = vpop.f32.mrb[207].mxu1  ;;  %14304 = vmatmul.mubr.msk.f32.gmra.mrb[56].mxu1 %vm1229_vm0, %v1019_v6  ;;  %v5399_v21 = vadd.f32 %v17377_v10, %v5398_v12  ;;  %13538 = vmatprep.mubr.msk.f32.mxu0 %vm1229_vm0, %v508_v7  ;;  %v1030_v5 = vld [vmem:[%s14872_s8 + $0x1a20] sm:$0xff] }
 0x28d   : > { %v7959_v15 = vadd.f32 %v17377_v10, %v7958_v14  ;;  %14306 = vmatprep.mubr.msk.f32.mxu1 %vm1229_vm0, %v1020_v8  ;;  %9695 = vst.msk [vmem:[%s15319_s11 + $0x678] sm:$0xff] %vm9487_vm1, %v5404_v11  ;;  %v519_v14 = vld [vmem:[%s14872_s8 + $0xa28] sm:$0xff] }
 0x28e   : > { %10207 = vst.msk [vmem:[%s15319_s11 + $0x1678] sm:$0xff] %vm9487_vm1, %v7964_v16  ;;  %9694 = vst.msk [vmem:[%s15319_s11 + $0x670] sm:$0xff] %vm9487_vm1, %v5399_v21  ;;  %v13381_v22 = vpop.f32.mrb[208].mxu0  ;;  %v1031_v21 = vld [vmem:[%s14872_s8 + $0x1a28] sm:$0xff] }
 0x28f   : > { %10206 = vst.msk [vmem:[%s15319_s11 + $0x1670] sm:$0xff] %vm9487_vm1, %v7959_v15  ;;  %v14149_v23 = vpop.f32.mrb[208].mxu1  ;;  %v5414_v24 = vadd.f32 %v17377_v10, %v13381_v22  ;;  %v5408_v26 = vpop.f32.mrb[209].mxu0  ;;  %13539 = vmatmul.mubr.msk.f32.gmra.mrb[58].mxu0 %vm1229_vm0, %v509_v17  ;;  %v520_v15 = vld [vmem:[%s14872_s8 + $0xa30] sm:$0xff] }
 0x290   : > { %v7974_v25 = vadd.f32 %v17377_v10, %v14149_v23  ;;  %v7968_v29 = vpop.f32.mrb[209].mxu1  ;;  %14307 = vmatmul.mubr.msk.f32.gmra.mrb[58].mxu1 %vm1229_vm0, %v1021_v18  ;;  %v5409_v27 = vadd.f32 %v17377_v10, %v5408_v26  ;;  %13541 = vmatprep.mubr.msk.f32.mxu0 %vm1229_vm0, %v510_v19  ;;  %v1032_v17 = vld [vmem:[%s14872_s8 + $0x1a30] sm:$0xff] }
 0x291   : > { %v7969_v28 = vadd.f32 %v17377_v10, %v7968_v29  ;;  %14309 = vmatprep.mubr.msk.f32.mxu1 %vm1229_vm0, %v1022_v20  ;;  %9697 = vst.msk [vmem:[%s15319_s11 + $0x688] sm:$0xff] %vm9487_vm1, %v5414_v24  ;;  %v521_v29 = vld [vmem:[%s14872_s8 + $0xa38] sm:$0xff] }
 0x292   : > { %10209 = vst.msk [vmem:[%s15319_s11 + $0x1688] sm:$0xff] %vm9487_vm1, %v7974_v25  ;;  %9696 = vst.msk [vmem:[%s15319_s11 + $0x680] sm:$0xff] %vm9487_vm1, %v5409_v27  ;;  %v13384_v34 = vpop.f32.mrb[210].mxu0  ;;  %v1033_v27 = vld [vmem:[%s14872_s8 + $0x1a38] sm:$0xff] }
 0x293   : > { %10208 = vst.msk [vmem:[%s15319_s11 + $0x1680] sm:$0xff] %vm9487_vm1, %v7969_v28  ;;  %v14152_v35 = vpop.f32.mrb[210].mxu1  ;;  %v5424_v36 = vadd.f32 %v17377_v10, %v13384_v34  ;;  %v5418_v38 = vpop.f32.mrb[211].mxu0  ;;  %13542 = vmatmul.mubr.msk.f32.gmra.mrb[60].mxu0 %vm1229_vm0, %v511_v30  ;;  %v522_v28 = vld [vmem:[%s14872_s8 + $0xa40] sm:$0xff] }
 0x294   : > { %v7984_v37 = vadd.f32 %v17377_v10, %v14152_v35  ;;  %v7978_v39 = vpop.f32.mrb[211].mxu1  ;;  %14310 = vmatmul.mubr.msk.f32.gmra.mrb[60].mxu1 %vm1229_vm0, %v1023_v31  ;;  %v5419_v40 = vadd.f32 %v17377_v10, %v5418_v38  ;;  %13544 = vmatprep.mubr.msk.f32.mxu0 %vm1229_vm0, %v512_v32  ;;  %v1034_v30 = vld [vmem:[%s14872_s8 + $0x1a40] sm:$0xff] }
 0x295   : > { %v7979_v41 = vadd.f32 %v17377_v10, %v7978_v39  ;;  %14312 = vmatprep.mubr.msk.f32.mxu1 %vm1229_vm0, %v1024_v33  ;;  %9699 = vst.msk [vmem:[%s15319_s11 + $0x698] sm:$0xff] %vm9487_vm1, %v5424_v36  ;;  %v523_v39 = vld [vmem:[%s14872_s8 + $0xa48] sm:$0xff] }
 0x296   : > { %10211 = vst.msk [vmem:[%s15319_s11 + $0x1698] sm:$0xff] %vm9487_vm1, %v7984_v37  ;;  %9698 = vst.msk [vmem:[%s15319_s11 + $0x690] sm:$0xff] %vm9487_vm1, %v5419_v40  ;;  %v13387_v46 = vpop.f32.mrb[212].mxu0  ;;  %v1035_v40 = vld [vmem:[%s14872_s8 + $0x1a48] sm:$0xff] }
 0x297   : > { %10210 = vst.msk [vmem:[%s15319_s11 + $0x1690] sm:$0xff] %vm9487_vm1, %v7979_v41  ;;  %v14155_v47 = vpop.f32.mrb[212].mxu1  ;;  %v5434_v48 = vadd.f32 %v17377_v10, %v13387_v46  ;;  %v5428_v50 = vpop.f32.mrb[213].mxu0  ;;  %13545 = vmatmul.mubr.msk.f32.gmra.mrb[62].mxu0 %vm1229_vm0, %v513_v42  ;;  %v524_v41 = vld [vmem:[%s14872_s8 + $0xa50] sm:$0xff] }
 0x298   : > { %v7994_v49 = vadd.f32 %v17377_v10, %v14155_v47  ;;  %v7988_v51 = vpop.f32.mrb[213].mxu1  ;;  %14313 = vmatmul.mubr.msk.f32.gmra.mrb[62].mxu1 %vm1229_vm0, %v1025_v43  ;;  %v5429_v52 = vadd.f32 %v17377_v10, %v5428_v50  ;;  %13547 = vmatprep.mubr.msk.f32.mxu0 %vm1229_vm0, %v514_v44  ;;  %v1036_v42 = vld [vmem:[%s14872_s8 + $0x1a50] sm:$0xff] }
 0x299   : > { %v7989_v53 = vadd.f32 %v17377_v10, %v7988_v51  ;;  %14315 = vmatprep.mubr.msk.f32.mxu1 %vm1229_vm0, %v1026_v45  ;;  %9701 = vst.msk [vmem:[%s15319_s11 + $0x6a8] sm:$0xff] %vm9487_vm1, %v5434_v48  ;;  %v525_v51 = vld [vmem:[%s14872_s8 + $0xa58] sm:$0xff] }
 0x29a   : > { %10213 = vst.msk [vmem:[%s15319_s11 + $0x16a8] sm:$0xff] %vm9487_vm1, %v7994_v49  ;;  %9700 = vst.msk [vmem:[%s15319_s11 + $0x6a0] sm:$0xff] %vm9487_vm1, %v5429_v52  ;;  %v13390_v58 = vpop.f32.mrb[214].mxu0  ;;  %v1037_v52 = vld [vmem:[%s14872_s8 + $0x1a58] sm:$0xff] }
 0x29b   : > { %10212 = vst.msk [vmem:[%s15319_s11 + $0x16a0] sm:$0xff] %vm9487_vm1, %v7989_v53  ;;  %v14158_v59 = vpop.f32.mrb[214].mxu1  ;;  %v5444_v60 = vadd.f32 %v17377_v10, %v13390_v58  ;;  %v5438_v62 = vpop.f32.mrb[215].mxu0  ;;  %13548 = vmatmul.mubr.msk.f32.gmra.mrb[64].mxu0 %vm1229_vm0, %v515_v54  ;;  %v526_v53 = vld [vmem:[%s14872_s8 + $0xa60] sm:$0xff] }
 0x29c   : > { %v8004_v61 = vadd.f32 %v17377_v10, %v14158_v59  ;;  %v7998_v63 = vpop.f32.mrb[215].mxu1  ;;  %14316 = vmatmul.mubr.msk.f32.gmra.mrb[64].mxu1 %vm1229_vm0, %v1027_v55  ;;  %v5439_v0 = vadd.f32 %v17377_v10, %v5438_v62  ;;  %13550 = vmatprep.mubr.msk.f32.mxu0 %vm1229_vm0, %v516_v56  ;;  %v1038_v54 = vld [vmem:[%s14872_s8 + $0x1a60] sm:$0xff] }
 0x29d   : > { %v7999_v1 = vadd.f32 %v17377_v10, %v7998_v63  ;;  %14318 = vmatprep.mubr.msk.f32.mxu1 %vm1229_vm0, %v1028_v57  ;;  %9703 = vst.msk [vmem:[%s15319_s11 + $0x6b8] sm:$0xff] %vm9487_vm1, %v5444_v60  ;;  %v527_v63 = vld [vmem:[%s14872_s8 + $0xa68] sm:$0xff] }
 0x29e   : > { %10215 = vst.msk [vmem:[%s15319_s11 + $0x16b8] sm:$0xff] %vm9487_vm1, %v8004_v61  ;;  %9702 = vst.msk [vmem:[%s15319_s11 + $0x6b0] sm:$0xff] %vm9487_vm1, %v5439_v0  ;;  %v13393_v6 = vpop.f32.mrb[216].mxu0  ;;  %v1039_v0 = vld [vmem:[%s14872_s8 + $0x1a68] sm:$0xff] }
 0x29f   : > { %10214 = vst.msk [vmem:[%s15319_s11 + $0x16b0] sm:$0xff] %vm9487_vm1, %v7999_v1  ;;  %v14161_v7 = vpop.f32.mrb[216].mxu1  ;;  %v5454_v8 = vadd.f32 %v17377_v10, %v13393_v6  ;;  %v5448_v9 = vpop.f32.mrb[217].mxu0  ;;  %13551 = vmatmul.mubr.msk.f32.gmra.mrb[66].mxu0 %vm1229_vm0, %v517_v2  ;;  %v528_v1 = vld [vmem:[%s14872_s8 + $0xa70] sm:$0xff] }
 0x2a0   : > { %v8014_v13 = vadd.f32 %v17377_v10, %v14161_v7  ;;  %v8008_v11 = vpop.f32.mrb[217].mxu1  ;;  %14319 = vmatmul.mubr.msk.f32.gmra.mrb[66].mxu1 %vm1229_vm0, %v1029_v3  ;;  %v5449_v16 = vadd.f32 %v17377_v10, %v5448_v9  ;;  %13553 = vmatprep.mubr.msk.f32.mxu0 %vm1229_vm0, %v518_v4  ;;  %v1040_v2 = vld [vmem:[%s14872_s8 + $0x1a70] sm:$0xff] }
 0x2a1   : > { %v8009_v12 = vadd.f32 %v17377_v10, %v8008_v11  ;;  %14321 = vmatprep.mubr.msk.f32.mxu1 %vm1229_vm0, %v1030_v5  ;;  %9705 = vst.msk [vmem:[%s15319_s11 + $0x6c8] sm:$0xff] %vm9487_vm1, %v5454_v8  ;;  %v529_v11 = vld [vmem:[%s14872_s8 + $0xa78] sm:$0xff] }
 0x2a2   : > { %10217 = vst.msk [vmem:[%s15319_s11 + $0x16c8] sm:$0xff] %vm9487_vm1, %v8014_v13  ;;  %9704 = vst.msk [vmem:[%s15319_s11 + $0x6c0] sm:$0xff] %vm9487_vm1, %v5449_v16  ;;  %v13396_v18 = vpop.f32.mrb[218].mxu0  ;;  %v1041_v16 = vld [vmem:[%s14872_s8 + $0x1a78] sm:$0xff] }
 0x2a3   : > { %10216 = vst.msk [vmem:[%s15319_s11 + $0x16c0] sm:$0xff] %vm9487_vm1, %v8009_v12  ;;  %v14164_v19 = vpop.f32.mrb[218].mxu1  ;;  %v5464_v20 = vadd.f32 %v17377_v10, %v13396_v18  ;;  %v5458_v23 = vpop.f32.mrb[219].mxu0  ;;  %13554 = vmatmul.mubr.msk.f32.gmra.mrb[68].mxu0 %vm1229_vm0, %v519_v14  ;;  %v530_v12 = vld [vmem:[%s14872_s8 + $0xa80] sm:$0xff] }
 0x2a4   : > { %v8024_v22 = vadd.f32 %v17377_v10, %v14164_v19  ;;  %v8018_v24 = vpop.f32.mrb[219].mxu1  ;;  %14322 = vmatmul.mubr.msk.f32.gmra.mrb[68].mxu1 %vm1229_vm0, %v1031_v21  ;;  %v5459_v25 = vadd.f32 %v17377_v10, %v5458_v23  ;;  %13556 = vmatprep.mubr.msk.f32.mxu0 %vm1229_vm0, %v520_v15  ;;  %v1042_v14 = vld [vmem:[%s14872_s8 + $0x1a80] sm:$0xff] }
 0x2a5   : > { %v8019_v26 = vadd.f32 %v17377_v10, %v8018_v24  ;;  %14324 = vmatprep.mubr.msk.f32.mxu1 %vm1229_vm0, %v1032_v17  ;;  %9707 = vst.msk [vmem:[%s15319_s11 + $0x6d8] sm:$0xff] %vm9487_vm1, %v5464_v20  ;;  %v531_v24 = vld [vmem:[%s14872_s8 + $0xa88] sm:$0xff] }
 0x2a6   : > { %10219 = vst.msk [vmem:[%s15319_s11 + $0x16d8] sm:$0xff] %vm9487_vm1, %v8024_v22  ;;  %9706 = vst.msk [vmem:[%s15319_s11 + $0x6d0] sm:$0xff] %vm9487_vm1, %v5459_v25  ;;  %v13399_v31 = vpop.f32.mrb[220].mxu0  ;;  %v1043_v25 = vld [vmem:[%s14872_s8 + $0x1a88] sm:$0xff] }
 0x2a7   : > { %10218 = vst.msk [vmem:[%s15319_s11 + $0x16d0] sm:$0xff] %vm9487_vm1, %v8019_v26  ;;  %v14167_v32 = vpop.f32.mrb[220].mxu1  ;;  %v5474_v33 = vadd.f32 %v17377_v10, %v13399_v31  ;;  %v5468_v35 = vpop.f32.mrb[221].mxu0  ;;  %13557 = vmatmul.mubr.msk.f32.gmra.mrb[70].mxu0 %vm1229_vm0, %v521_v29  ;;  %v532_v26 = vld [vmem:[%s14872_s8 + $0xa90] sm:$0xff] }
 0x2a8   : > { %v8034_v34 = vadd.f32 %v17377_v10, %v14167_v32  ;;  %v8028_v36 = vpop.f32.mrb[221].mxu1  ;;  %14325 = vmatmul.mubr.msk.f32.gmra.mrb[70].mxu1 %vm1229_vm0, %v1033_v27  ;;  %v5469_v37 = vadd.f32 %v17377_v10, %v5468_v35  ;;  %13559 = vmatprep.mubr.msk.f32.mxu0 %vm1229_vm0, %v522_v28  ;;  %v1044_v29 = vld [vmem:[%s14872_s8 + $0x1a90] sm:$0xff] }
 0x2a9   : > { %v8029_v38 = vadd.f32 %v17377_v10, %v8028_v36  ;;  %14327 = vmatprep.mubr.msk.f32.mxu1 %vm1229_vm0, %v1034_v30  ;;  %9709 = vst.msk [vmem:[%s15319_s11 + $0x6e8] sm:$0xff] %vm9487_vm1, %v5474_v33  ;;  %v533_v36 = vld [vmem:[%s14872_s8 + $0xa98] sm:$0xff] }
 0x2aa   : > { %10221 = vst.msk [vmem:[%s15319_s11 + $0x16e8] sm:$0xff] %vm9487_vm1, %v8034_v34  ;;  %9708 = vst.msk [vmem:[%s15319_s11 + $0x6e0] sm:$0xff] %vm9487_vm1, %v5469_v37  ;;  %v13402_v43 = vpop.f32.mrb[222].mxu0  ;;  %v1045_v37 = vld [vmem:[%s14872_s8 + $0x1a98] sm:$0xff] }
 0x2ab   : > { %10220 = vst.msk [vmem:[%s15319_s11 + $0x16e0] sm:$0xff] %vm9487_vm1, %v8029_v38  ;;  %v14170_v44 = vpop.f32.mrb[222].mxu1  ;;  %v5484_v45 = vadd.f32 %v17377_v10, %v13402_v43  ;;  %v5478_v47 = vpop.f32.mrb[223].mxu0  ;;  %13560 = vmatmul.mubr.msk.f32.gmra.mrb[72].mxu0 %vm1229_vm0, %v523_v39  ;;  %v534_v38 = vld [vmem:[%s14872_s8 + $0xaa0] sm:$0xff] }
 0x2ac   : > { %v8044_v46 = vadd.f32 %v17377_v10, %v14170_v44  ;;  %v8038_v48 = vpop.f32.mrb[223].mxu1  ;;  %14328 = vmatmul.mubr.msk.f32.gmra.mrb[72].mxu1 %vm1229_vm0, %v1035_v40  ;;  %v5479_v49 = vadd.f32 %v17377_v10, %v5478_v47  ;;  %13562 = vmatprep.mubr.msk.f32.mxu0 %vm1229_vm0, %v524_v41  ;;  %v1046_v39 = vld [vmem:[%s14872_s8 + $0x1aa0] sm:$0xff] }
 0x2ad   : > { %v8039_v50 = vadd.f32 %v17377_v10, %v8038_v48  ;;  %14330 = vmatprep.mubr.msk.f32.mxu1 %vm1229_vm0, %v1036_v42  ;;  %9711 = vst.msk [vmem:[%s15319_s11 + $0x6f8] sm:$0xff] %vm9487_vm1, %v5484_v45  ;;  %v535_v48 = vld [vmem:[%s14872_s8 + $0xaa8] sm:$0xff] }
 0x2ae   : > { %10223 = vst.msk [vmem:[%s15319_s11 + $0x16f8] sm:$0xff] %vm9487_vm1, %v8044_v46  ;;  %9710 = vst.msk [vmem:[%s15319_s11 + $0x6f0] sm:$0xff] %vm9487_vm1, %v5479_v49  ;;  %v13405_v55 = vpop.f32.mrb[224].mxu0  ;;  %v1047_v49 = vld [vmem:[%s14872_s8 + $0x1aa8] sm:$0xff] }
 0x2af   : > { %10222 = vst.msk [vmem:[%s15319_s11 + $0x16f0] sm:$0xff] %vm9487_vm1, %v8039_v50  ;;  %v14173_v56 = vpop.f32.mrb[224].mxu1  ;;  %v5494_v57 = vadd.f32 %v17377_v10, %v13405_v55  ;;  %v5488_v59 = vpop.f32.mrb[225].mxu0  ;;  %13563 = vmatmul.mubr.msk.f32.gmra.mrb[74].mxu0 %vm1229_vm0, %v525_v51  ;;  %v536_v50 = vld [vmem:[%s14872_s8 + $0xab0] sm:$0xff] }
 0x2b0   : > { %v8054_v58 = vadd.f32 %v17377_v10, %v14173_v56  ;;  %v8048_v60 = vpop.f32.mrb[225].mxu1  ;;  %14331 = vmatmul.mubr.msk.f32.gmra.mrb[74].mxu1 %vm1229_vm0, %v1037_v52  ;;  %v5489_v61 = vadd.f32 %v17377_v10, %v5488_v59  ;;  %13565 = vmatprep.mubr.msk.f32.mxu0 %vm1229_vm0, %v526_v53  ;;  %v1048_v51 = vld [vmem:[%s14872_s8 + $0x1ab0] sm:$0xff] }
 0x2b1   : > { %v8049_v62 = vadd.f32 %v17377_v10, %v8048_v60  ;;  %14333 = vmatprep.mubr.msk.f32.mxu1 %vm1229_vm0, %v1038_v54  ;;  %9713 = vst.msk [vmem:[%s15319_s11 + $0x708] sm:$0xff] %vm9487_vm1, %v5494_v57  ;;  %v537_v60 = vld [vmem:[%s14872_s8 + $0xab8] sm:$0xff] }
 0x2b2   : > { %10225 = vst.msk [vmem:[%s15319_s11 + $0x1708] sm:$0xff] %vm9487_vm1, %v8054_v58  ;;  %9712 = vst.msk [vmem:[%s15319_s11 + $0x700] sm:$0xff] %vm9487_vm1, %v5489_v61  ;;  %v13408_v3 = vpop.f32.mrb[226].mxu0  ;;  %v1049_v61 = vld [vmem:[%s14872_s8 + $0x1ab8] sm:$0xff] }
 0x2b3   : > { %10224 = vst.msk [vmem:[%s15319_s11 + $0x1700] sm:$0xff] %vm9487_vm1, %v8049_v62  ;;  %v14176_v4 = vpop.f32.mrb[226].mxu1  ;;  %v5504_v5 = vadd.f32 %v17377_v10, %v13408_v3  ;;  %v5498_v7 = vpop.f32.mrb[227].mxu0  ;;  %13566 = vmatmul.mubr.msk.f32.gmra.mrb[76].mxu0 %vm1229_vm0, %v527_v63  ;;  %v538_v62 = vld [vmem:[%s14872_s8 + $0xac0] sm:$0xff] }
 0x2b4   : > { %v8064_v6 = vadd.f32 %v17377_v10, %v14176_v4  ;;  %v8058_v8 = vpop.f32.mrb[227].mxu1  ;;  %14334 = vmatmul.mubr.msk.f32.gmra.mrb[76].mxu1 %vm1229_vm0, %v1039_v0  ;;  %v5499_v13 = vadd.f32 %v17377_v10, %v5498_v7  ;;  %13568 = vmatprep.mubr.msk.f32.mxu0 %vm1229_vm0, %v528_v1  ;;  %v1050_v63 = vld [vmem:[%s14872_s8 + $0x1ac0] sm:$0xff] }
 0x2b5   : > { %v8059_v9 = vadd.f32 %v17377_v10, %v8058_v8  ;;  %14336 = vmatprep.mubr.msk.f32.mxu1 %vm1229_vm0, %v1040_v2  ;;  %9715 = vst.msk [vmem:[%s15319_s11 + $0x718] sm:$0xff] %vm9487_vm1, %v5504_v5  ;;  %v539_v8 = vld [vmem:[%s14872_s8 + $0xac8] sm:$0xff] }
 0x2b6   : > { %10227 = vst.msk [vmem:[%s15319_s11 + $0x1718] sm:$0xff] %vm9487_vm1, %v8064_v6  ;;  %9714 = vst.msk [vmem:[%s15319_s11 + $0x710] sm:$0xff] %vm9487_vm1, %v5499_v13  ;;  %v13411_v21 = vpop.f32.mrb[228].mxu0  ;;  %v1051_v13 = vld [vmem:[%s14872_s8 + $0x1ac8] sm:$0xff] }
 0x2b7   : > { %10226 = vst.msk [vmem:[%s15319_s11 + $0x1710] sm:$0xff] %vm9487_vm1, %v8059_v9  ;;  %v14179_v15 = vpop.f32.mrb[228].mxu1  ;;  %v5514_v17 = vadd.f32 %v17377_v10, %v13411_v21  ;;  %v5508_v19 = vpop.f32.mrb[229].mxu0  ;;  %13569 = vmatmul.mubr.msk.f32.gmra.mrb[78].mxu0 %vm1229_vm0, %v529_v11  ;;  %v540_v9 = vld [vmem:[%s14872_s8 + $0xad0] sm:$0xff] }
 0x2b8   : > { %v8074_v18 = vadd.f32 %v17377_v10, %v14179_v15  ;;  %v8068_v20 = vpop.f32.mrb[229].mxu1  ;;  %14337 = vmatmul.mubr.msk.f32.gmra.mrb[78].mxu1 %vm1229_vm0, %v1041_v16  ;;  %v5509_v22 = vadd.f32 %v17377_v10, %v5508_v19  ;;  %13571 = vmatprep.mubr.msk.f32.mxu0 %vm1229_vm0, %v530_v12  ;;  %v1052_v11 = vld [vmem:[%s14872_s8 + $0x1ad0] sm:$0xff] }
 0x2b9   : > { %v8069_v23 = vadd.f32 %v17377_v10, %v8068_v20  ;;  %14339 = vmatprep.mubr.msk.f32.mxu1 %vm1229_vm0, %v1042_v14  ;;  %9717 = vst.msk [vmem:[%s15319_s11 + $0x728] sm:$0xff] %vm9487_vm1, %v5514_v17  ;;  %v541_v20 = vld [vmem:[%s14872_s8 + $0xad8] sm:$0xff] }
 0x2ba   : > { %10229 = vst.msk [vmem:[%s15319_s11 + $0x1728] sm:$0xff] %vm9487_vm1, %v8074_v18  ;;  %9716 = vst.msk [vmem:[%s15319_s11 + $0x720] sm:$0xff] %vm9487_vm1, %v5509_v22  ;;  %v13414_v27 = vpop.f32.mrb[230].mxu0  ;;  %v1053_v22 = vld [vmem:[%s14872_s8 + $0x1ad8] sm:$0xff] }
 0x2bb   : > { %10228 = vst.msk [vmem:[%s15319_s11 + $0x1720] sm:$0xff] %vm9487_vm1, %v8069_v23  ;;  %v14182_v28 = vpop.f32.mrb[230].mxu1  ;;  %v5524_v30 = vadd.f32 %v17377_v10, %v13414_v27  ;;  %v5518_v32 = vpop.f32.mrb[231].mxu0  ;;  %13572 = vmatmul.mubr.msk.f32.gmra.mrb[80].mxu0 %vm1229_vm0, %v531_v24  ;;  %v542_v23 = vld [vmem:[%s14872_s8 + $0xae0] sm:$0xff] }
 0x2bc   : > { %v8084_v31 = vadd.f32 %v17377_v10, %v14182_v28  ;;  %v8078_v33 = vpop.f32.mrb[231].mxu1  ;;  %14340 = vmatmul.mubr.msk.f32.gmra.mrb[80].mxu1 %vm1229_vm0, %v1043_v25  ;;  %v5519_v34 = vadd.f32 %v17377_v10, %v5518_v32  ;;  %13574 = vmatprep.mubr.msk.f32.mxu0 %vm1229_vm0, %v532_v26  ;;  %v1054_v24 = vld [vmem:[%s14872_s8 + $0x1ae0] sm:$0xff] }
 0x2bd   : > { %v8079_v35 = vadd.f32 %v17377_v10, %v8078_v33  ;;  %14342 = vmatprep.mubr.msk.f32.mxu1 %vm1229_vm0, %v1044_v29  ;;  %9719 = vst.msk [vmem:[%s15319_s11 + $0x738] sm:$0xff] %vm9487_vm1, %v5524_v30  ;;  %v543_v33 = vld [vmem:[%s14872_s8 + $0xae8] sm:$0xff] }
 0x2be   : > { %10231 = vst.msk [vmem:[%s15319_s11 + $0x1738] sm:$0xff] %vm9487_vm1, %v8084_v31  ;;  %9718 = vst.msk [vmem:[%s15319_s11 + $0x730] sm:$0xff] %vm9487_vm1, %v5519_v34  ;;  %v13417_v40 = vpop.f32.mrb[232].mxu0  ;;  %v1055_v34 = vld [vmem:[%s14872_s8 + $0x1ae8] sm:$0xff] }
 0x2bf   : > { %10230 = vst.msk [vmem:[%s15319_s11 + $0x1730] sm:$0xff] %vm9487_vm1, %v8079_v35  ;;  %v14185_v41 = vpop.f32.mrb[232].mxu1  ;;  %v5534_v42 = vadd.f32 %v17377_v10, %v13417_v40  ;;  %v5528_v44 = vpop.f32.mrb[233].mxu0  ;;  %13575 = vmatmul.mubr.msk.f32.gmra.mrb[82].mxu0 %vm1229_vm0, %v533_v36  ;;  %v544_v35 = vld [vmem:[%s14872_s8 + $0xaf0] sm:$0xff] }
 0x2c0   : > { %v8094_v43 = vadd.f32 %v17377_v10, %v14185_v41  ;;  %v8088_v45 = vpop.f32.mrb[233].mxu1  ;;  %14343 = vmatmul.mubr.msk.f32.gmra.mrb[82].mxu1 %vm1229_vm0, %v1045_v37  ;;  %v5529_v46 = vadd.f32 %v17377_v10, %v5528_v44  ;;  %13577 = vmatprep.mubr.msk.f32.mxu0 %vm1229_vm0, %v534_v38  ;;  %v1056_v36 = vld [vmem:[%s14872_s8 + $0x1af0] sm:$0xff] }
 0x2c1   : > { %v8089_v47 = vadd.f32 %v17377_v10, %v8088_v45  ;;  %14345 = vmatprep.mubr.msk.f32.mxu1 %vm1229_vm0, %v1046_v39  ;;  %9721 = vst.msk [vmem:[%s15319_s11 + $0x748] sm:$0xff] %vm9487_vm1, %v5534_v42  ;;  %v545_v45 = vld [vmem:[%s14872_s8 + $0xaf8] sm:$0xff] }
 0x2c2   : > { %10233 = vst.msk [vmem:[%s15319_s11 + $0x1748] sm:$0xff] %vm9487_vm1, %v8094_v43  ;;  %9720 = vst.msk [vmem:[%s15319_s11 + $0x740] sm:$0xff] %vm9487_vm1, %v5529_v46  ;;  %v13420_v52 = vpop.f32.mrb[234].mxu0  ;;  %v1057_v46 = vld [vmem:[%s14872_s8 + $0x1af8] sm:$0xff] }
 0x2c3   : > { %10232 = vst.msk [vmem:[%s15319_s11 + $0x1740] sm:$0xff] %vm9487_vm1, %v8089_v47  ;;  %v14188_v53 = vpop.f32.mrb[234].mxu1  ;;  %v5544_v54 = vadd.f32 %v17377_v10, %v13420_v52  ;;  %v5538_v56 = vpop.f32.mrb[235].mxu0  ;;  %13578 = vmatmul.mubr.msk.f32.gmra.mrb[84].mxu0 %vm1229_vm0, %v535_v48  ;;  %v546_v47 = vld [vmem:[%s14872_s8 + $0xb00] sm:$0xff] }
 0x2c4   : > { %v8104_v55 = vadd.f32 %v17377_v10, %v14188_v53  ;;  %v8098_v57 = vpop.f32.mrb[235].mxu1  ;;  %14346 = vmatmul.mubr.msk.f32.gmra.mrb[84].mxu1 %vm1229_vm0, %v1047_v49  ;;  %v5539_v58 = vadd.f32 %v17377_v10, %v5538_v56  ;;  %13580 = vmatprep.mubr.msk.f32.mxu0 %vm1229_vm0, %v536_v50  ;;  %v1058_v48 = vld [vmem:[%s14872_s8 + $0x1b00] sm:$0xff] }
 0x2c5   : > { %v8099_v59 = vadd.f32 %v17377_v10, %v8098_v57  ;;  %14348 = vmatprep.mubr.msk.f32.mxu1 %vm1229_vm0, %v1048_v51  ;;  %9723 = vst.msk [vmem:[%s15319_s11 + $0x758] sm:$0xff] %vm9487_vm1, %v5544_v54  ;;  %v547_v57 = vld [vmem:[%s14872_s8 + $0xb08] sm:$0xff] }
 0x2c6   : > { %10235 = vst.msk [vmem:[%s15319_s11 + $0x1758] sm:$0xff] %vm9487_vm1, %v8104_v55  ;;  %9722 = vst.msk [vmem:[%s15319_s11 + $0x750] sm:$0xff] %vm9487_vm1, %v5539_v58  ;;  %v13423_v0 = vpop.f32.mrb[236].mxu0  ;;  %v1059_v58 = vld [vmem:[%s14872_s8 + $0x1b08] sm:$0xff] }
 0x2c7   : > { %10234 = vst.msk [vmem:[%s15319_s11 + $0x1750] sm:$0xff] %vm9487_vm1, %v8099_v59  ;;  %v14191_v1 = vpop.f32.mrb[236].mxu1  ;;  %v5554_v2 = vadd.f32 %v17377_v10, %v13423_v0  ;;  %v5548_v4 = vpop.f32.mrb[237].mxu0  ;;  %13581 = vmatmul.mubr.msk.f32.gmra.mrb[86].mxu0 %vm1229_vm0, %v537_v60  ;;  %v548_v59 = vld [vmem:[%s14872_s8 + $0xb10] sm:$0xff] }
 0x2c8   : > { %v8114_v3 = vadd.f32 %v17377_v10, %v14191_v1  ;;  %v8108_v5 = vpop.f32.mrb[237].mxu1  ;;  %14349 = vmatmul.mubr.msk.f32.gmra.mrb[86].mxu1 %vm1229_vm0, %v1049_v61  ;;  %v5549_v6 = vadd.f32 %v17377_v10, %v5548_v4  ;;  %13583 = vmatprep.mubr.msk.f32.mxu0 %vm1229_vm0, %v538_v62  ;;  %v1060_v60 = vld [vmem:[%s14872_s8 + $0x1b10] sm:$0xff] }
 0x2c9   : > { %v8109_v7 = vadd.f32 %v17377_v10, %v8108_v5  ;;  %14351 = vmatprep.mubr.msk.f32.mxu1 %vm1229_vm0, %v1050_v63  ;;  %9725 = vst.msk [vmem:[%s15319_s11 + $0x768] sm:$0xff] %vm9487_vm1, %v5554_v2  ;;  %v549_v5 = vld [vmem:[%s14872_s8 + $0xb18] sm:$0xff] }
 0x2ca   : > { %10237 = vst.msk [vmem:[%s15319_s11 + $0x1768] sm:$0xff] %vm9487_vm1, %v8114_v3  ;;  %9724 = vst.msk [vmem:[%s15319_s11 + $0x760] sm:$0xff] %vm9487_vm1, %v5549_v6  ;;  %v13426_v16 = vpop.f32.mrb[238].mxu0  ;;  %v1061_v6 = vld [vmem:[%s14872_s8 + $0x1b18] sm:$0xff] }
 0x2cb   : > { %10236 = vst.msk [vmem:[%s15319_s11 + $0x1760] sm:$0xff] %vm9487_vm1, %v8109_v7  ;;  %v14194_v12 = vpop.f32.mrb[238].mxu1  ;;  %v5564_v14 = vadd.f32 %v17377_v10, %v13426_v16  ;;  %v5558_v15 = vpop.f32.mrb[239].mxu0  ;;  %13584 = vmatmul.mubr.msk.f32.gmra.mrb[88].mxu0 %vm1229_vm0, %v539_v8  ;;  %v550_v7 = vld [vmem:[%s14872_s8 + $0xb20] sm:$0xff] }
 0x2cc   : > { %v8124_v21 = vadd.f32 %v17377_v10, %v14194_v12  ;;  %v8118_v17 = vpop.f32.mrb[239].mxu1  ;;  %14352 = vmatmul.mubr.msk.f32.gmra.mrb[88].mxu1 %vm1229_vm0, %v1051_v13  ;;  %v5559_v18 = vadd.f32 %v17377_v10, %v5558_v15  ;;  %13586 = vmatprep.mubr.msk.f32.mxu0 %vm1229_vm0, %v540_v9  ;;  %v1062_v8 = vld [vmem:[%s14872_s8 + $0x1b20] sm:$0xff] }
 0x2cd   : > { %v8119_v19 = vadd.f32 %v17377_v10, %v8118_v17  ;;  %14354 = vmatprep.mubr.msk.f32.mxu1 %vm1229_vm0, %v1052_v11  ;;  %9727 = vst.msk [vmem:[%s15319_s11 + $0x778] sm:$0xff] %vm9487_vm1, %v5564_v14  ;;  %v551_v17 = vld [vmem:[%s14872_s8 + $0xb28] sm:$0xff] }
 0x2ce   : > { %10239 = vst.msk [vmem:[%s15319_s11 + $0x1778] sm:$0xff] %vm9487_vm1, %v8124_v21  ;;  %9726 = vst.msk [vmem:[%s15319_s11 + $0x770] sm:$0xff] %vm9487_vm1, %v5559_v18  ;;  %v13429_v25 = vpop.f32.mrb[240].mxu0  ;;  %v1063_v18 = vld [vmem:[%s14872_s8 + $0x1b28] sm:$0xff] }
 0x2cf   : > { %10238 = vst.msk [vmem:[%s15319_s11 + $0x1770] sm:$0xff] %vm9487_vm1, %v8119_v19  ;;  %v14197_v26 = vpop.f32.mrb[240].mxu1  ;;  %v5574_v29 = vadd.f32 %v17377_v10, %v13429_v25  ;;  %v5568_v28 = vpop.f32.mrb[241].mxu0  ;;  %13587 = vmatmul.mubr.msk.f32.gmra.mrb[90].mxu0 %vm1229_vm0, %v541_v20  ;;  %v552_v19 = vld [vmem:[%s14872_s8 + $0xb30] sm:$0xff] }
 0x2d0   : > { %v8134_v27 = vadd.f32 %v17377_v10, %v14197_v26  ;;  %v8128_v30 = vpop.f32.mrb[241].mxu1  ;;  %14355 = vmatmul.mubr.msk.f32.gmra.mrb[90].mxu1 %vm1229_vm0, %v1053_v22  ;;  %v5569_v31 = vadd.f32 %v17377_v10, %v5568_v28  ;;  %13589 = vmatprep.mubr.msk.f32.mxu0 %vm1229_vm0, %v542_v23  ;;  %v1064_v20 = vld [vmem:[%s14872_s8 + $0x1b30] sm:$0xff] }
 0x2d1   : > { %v8129_v32 = vadd.f32 %v17377_v10, %v8128_v30  ;;  %14357 = vmatprep.mubr.msk.f32.mxu1 %vm1229_vm0, %v1054_v24  ;;  %9729 = vst.msk [vmem:[%s15319_s11 + $0x788] sm:$0xff] %vm9487_vm1, %v5574_v29  ;;  %v553_v30 = vld [vmem:[%s14872_s8 + $0xb38] sm:$0xff] }
 0x2d2   : > { %10241 = vst.msk [vmem:[%s15319_s11 + $0x1788] sm:$0xff] %vm9487_vm1, %v8134_v27  ;;  %9728 = vst.msk [vmem:[%s15319_s11 + $0x780] sm:$0xff] %vm9487_vm1, %v5569_v31  ;;  %v13432_v37 = vpop.f32.mrb[242].mxu0  ;;  %v1065_v31 = vld [vmem:[%s14872_s8 + $0x1b38] sm:$0xff] }
 0x2d3   : > { %10240 = vst.msk [vmem:[%s15319_s11 + $0x1780] sm:$0xff] %vm9487_vm1, %v8129_v32  ;;  %v14200_v38 = vpop.f32.mrb[242].mxu1  ;;  %v5584_v39 = vadd.f32 %v17377_v10, %v13432_v37  ;;  %v5578_v41 = vpop.f32.mrb[243].mxu0  ;;  %13590 = vmatmul.mubr.msk.f32.gmra.mrb[92].mxu0 %vm1229_vm0, %v543_v33  ;;  %v554_v32 = vld [vmem:[%s14872_s8 + $0xb40] sm:$0xff] }
 0x2d4   : > { %v8144_v40 = vadd.f32 %v17377_v10, %v14200_v38  ;;  %v8138_v42 = vpop.f32.mrb[243].mxu1  ;;  %14358 = vmatmul.mubr.msk.f32.gmra.mrb[92].mxu1 %vm1229_vm0, %v1055_v34  ;;  %v5579_v43 = vadd.f32 %v17377_v10, %v5578_v41  ;;  %13592 = vmatprep.mubr.msk.f32.mxu0 %vm1229_vm0, %v544_v35  ;;  %v1066_v33 = vld [vmem:[%s14872_s8 + $0x1b40] sm:$0xff] }
 0x2d5   : > { %v8139_v44 = vadd.f32 %v17377_v10, %v8138_v42  ;;  %14360 = vmatprep.mubr.msk.f32.mxu1 %vm1229_vm0, %v1056_v36  ;;  %9731 = vst.msk [vmem:[%s15319_s11 + $0x798] sm:$0xff] %vm9487_vm1, %v5584_v39  ;;  %v555_v42 = vld [vmem:[%s14872_s8 + $0xb48] sm:$0xff] }
 0x2d6   : > { %10243 = vst.msk [vmem:[%s15319_s11 + $0x1798] sm:$0xff] %vm9487_vm1, %v8144_v40  ;;  %9730 = vst.msk [vmem:[%s15319_s11 + $0x790] sm:$0xff] %vm9487_vm1, %v5579_v43  ;;  %v13435_v49 = vpop.f32.mrb[244].mxu0  ;;  %v1067_v43 = vld [vmem:[%s14872_s8 + $0x1b48] sm:$0xff] }
 0x2d7   : > { %10242 = vst.msk [vmem:[%s15319_s11 + $0x1790] sm:$0xff] %vm9487_vm1, %v8139_v44  ;;  %v14203_v50 = vpop.f32.mrb[244].mxu1  ;;  %v5594_v51 = vadd.f32 %v17377_v10, %v13435_v49  ;;  %v5588_v53 = vpop.f32.mrb[245].mxu0  ;;  %13593 = vmatmul.mubr.msk.f32.gmra.mrb[94].mxu0 %vm1229_vm0, %v545_v45  ;;  %v556_v44 = vld [vmem:[%s14872_s8 + $0xb50] sm:$0xff] }
 0x2d8   : > { %v8154_v52 = vadd.f32 %v17377_v10, %v14203_v50  ;;  %v8148_v54 = vpop.f32.mrb[245].mxu1  ;;  %14361 = vmatmul.mubr.msk.f32.gmra.mrb[94].mxu1 %vm1229_vm0, %v1057_v46  ;;  %v5589_v55 = vadd.f32 %v17377_v10, %v5588_v53  ;;  %13595 = vmatprep.mubr.msk.f32.mxu0 %vm1229_vm0, %v546_v47  ;;  %v1068_v45 = vld [vmem:[%s14872_s8 + $0x1b50] sm:$0xff] }
 0x2d9   : > { %v8149_v56 = vadd.f32 %v17377_v10, %v8148_v54  ;;  %14363 = vmatprep.mubr.msk.f32.mxu1 %vm1229_vm0, %v1058_v48  ;;  %9733 = vst.msk [vmem:[%s15319_s11 + $0x7a8] sm:$0xff] %vm9487_vm1, %v5594_v51  ;;  %v557_v54 = vld [vmem:[%s14872_s8 + $0xb58] sm:$0xff] }
 0x2da   : > { %10245 = vst.msk [vmem:[%s15319_s11 + $0x17a8] sm:$0xff] %vm9487_vm1, %v8154_v52  ;;  %9732 = vst.msk [vmem:[%s15319_s11 + $0x7a0] sm:$0xff] %vm9487_vm1, %v5589_v55  ;;  %v13438_v61 = vpop.f32.mrb[246].mxu0  ;;  %v1069_v55 = vld [vmem:[%s14872_s8 + $0x1b58] sm:$0xff] }
 0x2db   : > { %10244 = vst.msk [vmem:[%s15319_s11 + $0x17a0] sm:$0xff] %vm9487_vm1, %v8149_v56  ;;  %v14206_v62 = vpop.f32.mrb[246].mxu1  ;;  %v5604_v63 = vadd.f32 %v17377_v10, %v13438_v61  ;;  %v5598_v1 = vpop.f32.mrb[247].mxu0  ;;  %13596 = vmatmul.mubr.msk.f32.gmra.mrb[96].mxu0 %vm1229_vm0, %v547_v57  ;;  %v558_v56 = vld [vmem:[%s14872_s8 + $0xb60] sm:$0xff] }
 0x2dc   : > { %v8164_v0 = vadd.f32 %v17377_v10, %v14206_v62  ;;  %v8158_v2 = vpop.f32.mrb[247].mxu1  ;;  %14364 = vmatmul.mubr.msk.f32.gmra.mrb[96].mxu1 %vm1229_vm0, %v1059_v58  ;;  %v5599_v3 = vadd.f32 %v17377_v10, %v5598_v1  ;;  %13598 = vmatprep.mubr.msk.f32.mxu0 %vm1229_vm0, %v548_v59  ;;  %v1070_v57 = vld [vmem:[%s14872_s8 + $0x1b60] sm:$0xff] }
 0x2dd   : > { %v8159_v4 = vadd.f32 %v17377_v10, %v8158_v2  ;;  %14366 = vmatprep.mubr.msk.f32.mxu1 %vm1229_vm0, %v1060_v60  ;;  %9735 = vst.msk [vmem:[%s15319_s11 + $0x7b8] sm:$0xff] %vm9487_vm1, %v5604_v63  ;;  %v559_v2 = vld [vmem:[%s14872_s8 + $0xb68] sm:$0xff] }
 0x2de   : > { %10247 = vst.msk [vmem:[%s15319_s11 + $0x17b8] sm:$0xff] %vm9487_vm1, %v8164_v0  ;;  %9734 = vst.msk [vmem:[%s15319_s11 + $0x7b0] sm:$0xff] %vm9487_vm1, %v5599_v3  ;;  %v13441_v13 = vpop.f32.mrb[248].mxu0  ;;  %v1071_v3 = vld [vmem:[%s14872_s8 + $0x1b68] sm:$0xff] }
 0x2df   : > { %10246 = vst.msk [vmem:[%s15319_s11 + $0x17b0] sm:$0xff] %vm9487_vm1, %v8159_v4  ;;  %v14209_v9 = vpop.f32.mrb[248].mxu1  ;;  %v5614_v11 = vadd.f32 %v17377_v10, %v13441_v13  ;;  %v5608_v12 = vpop.f32.mrb[249].mxu0  ;;  %13599 = vmatmul.mubr.msk.f32.gmra.mrb[98].mxu0 %vm1229_vm0, %v549_v5  ;;  %v560_v4 = vld [vmem:[%s14872_s8 + $0xb70] sm:$0xff] }
 0x2e0   : > { %v8174_v16 = vadd.f32 %v17377_v10, %v14209_v9  ;;  %v8168_v14 = vpop.f32.mrb[249].mxu1  ;;  %14367 = vmatmul.mubr.msk.f32.gmra.mrb[98].mxu1 %vm1229_vm0, %v1061_v6  ;;  %v5609_v21 = vadd.f32 %v17377_v10, %v5608_v12  ;;  %13601 = vmatprep.mubr.msk.f32.mxu0 %vm1229_vm0, %v550_v7  ;;  %v1072_v5 = vld [vmem:[%s14872_s8 + $0x1b70] sm:$0xff]  ;;  %v17899_v7 = vld [vmem:[#allocation2] ss:$0 sm:$0xff] }
 0x2e1   : > { %v8169_v15 = vadd.f32 %v17377_v10, %v8168_v14  ;;  %14369 = vmatprep.mubr.msk.f32.mxu1 %vm1229_vm0, %v1062_v8  ;;  %9737 = vst.msk [vmem:[%s15319_s11 + $0x7c8] sm:$0xff] %vm9487_vm1, %v5614_v11  ;;  %v561_v14 = vld [vmem:[%s14872_s8 + $0xb78] sm:$0xff] }
 0x2e2   : > { %10249 = vst.msk [vmem:[%s15319_s11 + $0x17c8] sm:$0xff] %vm9487_vm1, %v8174_v16  ;;  %9736 = vst.msk [vmem:[%s15319_s11 + $0x7c0] sm:$0xff] %vm9487_vm1, %v5609_v21  ;;  %v13444_v22 = vpop.f32.mrb[250].mxu0  ;;  %v1073_v21 = vld [vmem:[%s14872_s8 + $0x1b78] sm:$0xff] }
 0x2e3   : > { %10248 = vst.msk [vmem:[%s15319_s11 + $0x17c0] sm:$0xff] %vm9487_vm1, %v8169_v15  ;;  %v14212_v23 = vpop.f32.mrb[250].mxu1  ;;  %v5624_v24 = vadd.f32 %v17377_v10, %v13444_v22  ;;  %v5618_v26 = vpop.f32.mrb[251].mxu0  ;;  %13602 = vmatmul.mubr.msk.f32.gmra.mrb[100].mxu0 %vm1229_vm0, %v551_v17  ;;  %v562_v15 = vld [vmem:[%s14872_s8 + $0xb80] sm:$0xff] }
 0x2e4   : > { %v8184_v25 = vadd.f32 %v17377_v10, %v14212_v23  ;;  %v8178_v29 = vpop.f32.mrb[251].mxu1  ;;  %14370 = vmatmul.mubr.msk.f32.gmra.mrb[100].mxu1 %vm1229_vm0, %v1063_v18  ;;  %v5619_v27 = vadd.f32 %v17377_v10, %v5618_v26  ;;  %13604 = vmatprep.mubr.msk.f32.mxu0 %vm1229_vm0, %v552_v19  ;;  %v1074_v17 = vld [vmem:[%s14872_s8 + $0x1b80] sm:$0xff] }
 0x2e5   : > { %v8179_v28 = vadd.f32 %v17377_v10, %v8178_v29  ;;  %14372 = vmatprep.mubr.msk.f32.mxu1 %vm1229_vm0, %v1064_v20  ;;  %9739 = vst.msk [vmem:[%s15319_s11 + $0x7d8] sm:$0xff] %vm9487_vm1, %v5624_v24  ;;  %v563_v29 = vld [vmem:[%s14872_s8 + $0xb88] sm:$0xff] }
 0x2e6   : > { %10251 = vst.msk [vmem:[%s15319_s11 + $0x17d8] sm:$0xff] %vm9487_vm1, %v8184_v25  ;;  %9738 = vst.msk [vmem:[%s15319_s11 + $0x7d0] sm:$0xff] %vm9487_vm1, %v5619_v27  ;;  %v13447_v34 = vpop.f32.mrb[252].mxu0  ;;  %v1075_v27 = vld [vmem:[%s14872_s8 + $0x1b88] sm:$0xff] }
 0x2e7   : > { %10250 = vst.msk [vmem:[%s15319_s11 + $0x17d0] sm:$0xff] %vm9487_vm1, %v8179_v28  ;;  %v14215_v35 = vpop.f32.mrb[252].mxu1  ;;  %v5634_v36 = vadd.f32 %v17377_v10, %v13447_v34  ;;  %v5628_v38 = vpop.f32.mrb[253].mxu0  ;;  %13605 = vmatmul.mubr.msk.f32.gmra.mrb[102].mxu0 %vm1229_vm0, %v553_v30  ;;  %v564_v28 = vld [vmem:[%s14872_s8 + $0xb90] sm:$0xff] }
 0x2e8   : > { %v8194_v37 = vadd.f32 %v17377_v10, %v14215_v35  ;;  %v8188_v39 = vpop.f32.mrb[253].mxu1  ;;  %14373 = vmatmul.mubr.msk.f32.gmra.mrb[102].mxu1 %vm1229_vm0, %v1065_v31  ;;  %v5629_v40 = vadd.f32 %v17377_v10, %v5628_v38  ;;  %13607 = vmatprep.mubr.msk.f32.mxu0 %vm1229_vm0, %v554_v32  ;;  %v1076_v30 = vld [vmem:[%s14872_s8 + $0x1b90] sm:$0xff] }
 0x2e9   : > { %v8189_v41 = vadd.f32 %v17377_v10, %v8188_v39  ;;  %14375 = vmatprep.mubr.msk.f32.mxu1 %vm1229_vm0, %v1066_v33  ;;  %9741 = vst.msk [vmem:[%s15319_s11 + $0x7e8] sm:$0xff] %vm9487_vm1, %v5634_v36  ;;  %v565_v39 = vld [vmem:[%s14872_s8 + $0xb98] sm:$0xff] }
 0x2ea   : > { %10253 = vst.msk [vmem:[%s15319_s11 + $0x17e8] sm:$0xff] %vm9487_vm1, %v8194_v37  ;;  %9740 = vst.msk [vmem:[%s15319_s11 + $0x7e0] sm:$0xff] %vm9487_vm1, %v5629_v40  ;;  %v13450_v46 = vpop.f32.mrb[254].mxu0  ;;  %v1077_v40 = vld [vmem:[%s14872_s8 + $0x1b98] sm:$0xff] }
 0x2eb   : > { %10252 = vst.msk [vmem:[%s15319_s11 + $0x17e0] sm:$0xff] %vm9487_vm1, %v8189_v41  ;;  %v14218_v47 = vpop.f32.mrb[254].mxu1  ;;  %v5644_v48 = vadd.f32 %v17377_v10, %v13450_v46  ;;  %v5638_v50 = vpop.f32.mrb[255].mxu0  ;;  %13608 = vmatmul.mubr.msk.f32.gmra.mrb[104].mxu0 %vm1229_vm0, %v555_v42  ;;  %v566_v41 = vld [vmem:[%s14872_s8 + $0xba0] sm:$0xff] }
 0x2ec   : > { %v8204_v49 = vadd.f32 %v17377_v10, %v14218_v47  ;;  %v8198_v51 = vpop.f32.mrb[255].mxu1  ;;  %14376 = vmatmul.mubr.msk.f32.gmra.mrb[104].mxu1 %vm1229_vm0, %v1067_v43  ;;  %v5639_v52 = vadd.f32 %v17377_v10, %v5638_v50  ;;  %13610 = vmatprep.mubr.msk.f32.mxu0 %vm1229_vm0, %v556_v44  ;;  %v1078_v42 = vld [vmem:[%s14872_s8 + $0x1ba0] sm:$0xff] }
 0x2ed   : > { %v8199_v53 = vadd.f32 %v17377_v10, %v8198_v51  ;;  %14378 = vmatprep.mubr.msk.f32.mxu1 %vm1229_vm0, %v1068_v45  ;;  %9743 = vst.msk [vmem:[%s15319_s11 + $0x7f8] sm:$0xff] %vm9487_vm1, %v5644_v48  ;;  %v567_v51 = vld [vmem:[%s14872_s8 + $0xba8] sm:$0xff] }
 0x2ee   : > { %10255 = vst.msk [vmem:[%s15319_s11 + $0x17f8] sm:$0xff] %vm9487_vm1, %v8204_v49  ;;  %9742 = vst.msk [vmem:[%s15319_s11 + $0x7f0] sm:$0xff] %vm9487_vm1, %v5639_v52  ;;  %v13453_v58 = vpop.f32.mrb[0].mxu0  ;;  %v1079_v52 = vld [vmem:[%s14872_s8 + $0x1ba8] sm:$0xff] }
 0x2ef   : > { %10254 = vst.msk [vmem:[%s15319_s11 + $0x17f0] sm:$0xff] %vm9487_vm1, %v8199_v53  ;;  %v14221_v59 = vpop.f32.mrb[0].mxu1  ;;  %v5654_v60 = vadd.f32 %v17377_v10, %v13453_v58  ;;  %v5648_v62 = vpop.f32.mrb[1].mxu0  ;;  %13611 = vmatmul.mubr.msk.f32.gmra.mrb[106].mxu0 %vm1229_vm0, %v557_v54  ;;  %v568_v53 = vld [vmem:[%s14872_s8 + $0xbb0] sm:$0xff] }
 0x2f0   : > { %v8214_v61 = vadd.f32 %v17377_v10, %v14221_v59  ;;  %v8208_v63 = vpop.f32.mrb[1].mxu1  ;;  %14379 = vmatmul.mubr.msk.f32.gmra.mrb[106].mxu1 %vm1229_vm0, %v1069_v55  ;;  %v5649_v0 = vadd.f32 %v17377_v10, %v5648_v62  ;;  %13613 = vmatprep.mubr.msk.f32.mxu0 %vm1229_vm0, %v558_v56  ;;  %v1080_v54 = vld [vmem:[%s14872_s8 + $0x1bb0] sm:$0xff] }
 0x2f1   : > { %v8209_v1 = vadd.f32 %v17377_v10, %v8208_v63  ;;  %14381 = vmatprep.mubr.msk.f32.mxu1 %vm1229_vm0, %v1070_v57  ;;  %9745 = vst.msk [vmem:[%s15319_s11 + $0x808] sm:$0xff] %vm9487_vm1, %v5654_v60  ;;  %v569_v63 = vld [vmem:[%s14872_s8 + $0xbb8] sm:$0xff] }
 0x2f2   : > { %10257 = vst.msk [vmem:[%s15319_s11 + $0x1808] sm:$0xff] %vm9487_vm1, %v8214_v61  ;;  %9744 = vst.msk [vmem:[%s15319_s11 + $0x800] sm:$0xff] %vm9487_vm1, %v5649_v0  ;;  %v13456_v10 = vpop.f32.mrb[2].mxu0  ;;  %v1081_v0 = vld [vmem:[%s14872_s8 + $0x1bb8] sm:$0xff] }
 0x2f3   : > { %10256 = vst.msk [vmem:[%s15319_s11 + $0x1800] sm:$0xff] %vm9487_vm1, %v8209_v1  ;;  %v14224_v6 = vpop.f32.mrb[2].mxu1  ;;  %v5664_v8 = vadd.f32 %v17899_v7, %v13456_v10  ;;  %v5658_v9 = vpop.f32.mrb[3].mxu0  ;;  %13614 = vmatmul.mubr.msk.f32.gmra.mrb[108].mxu0 %vm1229_vm0, %v559_v2  ;;  %v570_v1 = vld [vmem:[%s14872_s8 + $0xbc0] sm:$0xff] }
 0x2f4   : > { %v8224_v13 = vadd.f32 %v17899_v7, %v14224_v6  ;;  %v8218_v11 = vpop.f32.mrb[3].mxu1  ;;  %14382 = vmatmul.mubr.msk.f32.gmra.mrb[108].mxu1 %vm1229_vm0, %v1071_v3  ;;  %v5659_v16 = vadd.f32 %v17899_v7, %v5658_v9  ;;  %13616 = vmatprep.mubr.msk.f32.mxu0 %vm1229_vm0, %v560_v4  ;;  %v1082_v2 = vld [vmem:[%s14872_s8 + $0x1bc0] sm:$0xff] }
 0x2f5   : > { %v8219_v12 = vadd.f32 %v17899_v7, %v8218_v11  ;;  %14384 = vmatprep.mubr.msk.f32.mxu1 %vm1229_vm0, %v1072_v5  ;;  %9747 = vst.msk [vmem:[%s15319_s11 + $0x818] sm:$0xff] %vm9487_vm1, %v5664_v8  ;;  %v571_v11 = vld [vmem:[%s14872_s8 + $0xbc8] sm:$0xff] }
 0x2f6   : > { %10259 = vst.msk [vmem:[%s15319_s11 + $0x1818] sm:$0xff] %vm9487_vm1, %v8224_v13  ;;  %9746 = vst.msk [vmem:[%s15319_s11 + $0x810] sm:$0xff] %vm9487_vm1, %v5659_v16  ;;  %v13459_v18 = vpop.f32.mrb[4].mxu0  ;;  %v1083_v16 = vld [vmem:[%s14872_s8 + $0x1bc8] sm:$0xff] }
 0x2f7   : > { %10258 = vst.msk [vmem:[%s15319_s11 + $0x1810] sm:$0xff] %vm9487_vm1, %v8219_v12  ;;  %v14227_v19 = vpop.f32.mrb[4].mxu1  ;;  %v5674_v20 = vadd.f32 %v17899_v7, %v13459_v18  ;;  %v5668_v23 = vpop.f32.mrb[5].mxu0  ;;  %13617 = vmatmul.mubr.msk.f32.gmra.mrb[110].mxu0 %vm1229_vm0, %v561_v14  ;;  %v572_v12 = vld [vmem:[%s14872_s8 + $0xbd0] sm:$0xff] }
 0x2f8   : > { %v8234_v22 = vadd.f32 %v17899_v7, %v14227_v19  ;;  %v8228_v24 = vpop.f32.mrb[5].mxu1  ;;  %14385 = vmatmul.mubr.msk.f32.gmra.mrb[110].mxu1 %vm1229_vm0, %v1073_v21  ;;  %v5669_v25 = vadd.f32 %v17899_v7, %v5668_v23  ;;  %13619 = vmatprep.mubr.msk.f32.mxu0 %vm1229_vm0, %v562_v15  ;;  %v1084_v14 = vld [vmem:[%s14872_s8 + $0x1bd0] sm:$0xff] }
 0x2f9   : > { %v8229_v26 = vadd.f32 %v17899_v7, %v8228_v24  ;;  %14387 = vmatprep.mubr.msk.f32.mxu1 %vm1229_vm0, %v1074_v17  ;;  %9749 = vst.msk [vmem:[%s15319_s11 + $0x828] sm:$0xff] %vm9487_vm1, %v5674_v20  ;;  %v573_v24 = vld [vmem:[%s14872_s8 + $0xbd8] sm:$0xff] }
 0x2fa   : > { %10261 = vst.msk [vmem:[%s15319_s11 + $0x1828] sm:$0xff] %vm9487_vm1, %v8234_v22  ;;  %9748 = vst.msk [vmem:[%s15319_s11 + $0x820] sm:$0xff] %vm9487_vm1, %v5669_v25  ;;  %v13462_v31 = vpop.f32.mrb[6].mxu0  ;;  %v1085_v25 = vld [vmem:[%s14872_s8 + $0x1bd8] sm:$0xff] }
 0x2fb   : > { %10260 = vst.msk [vmem:[%s15319_s11 + $0x1820] sm:$0xff] %vm9487_vm1, %v8229_v26  ;;  %v14230_v32 = vpop.f32.mrb[6].mxu1  ;;  %v5684_v33 = vadd.f32 %v17899_v7, %v13462_v31  ;;  %v5678_v35 = vpop.f32.mrb[7].mxu0  ;;  %13620 = vmatmul.mubr.msk.f32.gmra.mrb[112].mxu0 %vm1229_vm0, %v563_v29  ;;  %v574_v26 = vld [vmem:[%s14872_s8 + $0xbe0] sm:$0xff] }
 0x2fc   : > { %v8244_v34 = vadd.f32 %v17899_v7, %v14230_v32  ;;  %v8238_v36 = vpop.f32.mrb[7].mxu1  ;;  %14388 = vmatmul.mubr.msk.f32.gmra.mrb[112].mxu1 %vm1229_vm0, %v1075_v27  ;;  %v5679_v37 = vadd.f32 %v17899_v7, %v5678_v35  ;;  %13622 = vmatprep.mubr.msk.f32.mxu0 %vm1229_vm0, %v564_v28  ;;  %v1086_v29 = vld [vmem:[%s14872_s8 + $0x1be0] sm:$0xff] }
 0x2fd   : > { %v8239_v38 = vadd.f32 %v17899_v7, %v8238_v36  ;;  %14390 = vmatprep.mubr.msk.f32.mxu1 %vm1229_vm0, %v1076_v30  ;;  %9751 = vst.msk [vmem:[%s15319_s11 + $0x838] sm:$0xff] %vm9487_vm1, %v5684_v33  ;;  %v575_v36 = vld [vmem:[%s14872_s8 + $0xbe8] sm:$0xff] }
 0x2fe   : > { %10263 = vst.msk [vmem:[%s15319_s11 + $0x1838] sm:$0xff] %vm9487_vm1, %v8244_v34  ;;  %9750 = vst.msk [vmem:[%s15319_s11 + $0x830] sm:$0xff] %vm9487_vm1, %v5679_v37  ;;  %v13465_v43 = vpop.f32.mrb[8].mxu0  ;;  %v1087_v37 = vld [vmem:[%s14872_s8 + $0x1be8] sm:$0xff] }
 0x2ff   : > { %10262 = vst.msk [vmem:[%s15319_s11 + $0x1830] sm:$0xff] %vm9487_vm1, %v8239_v38  ;;  %v14233_v44 = vpop.f32.mrb[8].mxu1  ;;  %v5694_v45 = vadd.f32 %v17899_v7, %v13465_v43  ;;  %v5688_v47 = vpop.f32.mrb[9].mxu0  ;;  %13623 = vmatmul.mubr.msk.f32.gmra.mrb[114].mxu0 %vm1229_vm0, %v565_v39  ;;  %v576_v38 = vld [vmem:[%s14872_s8 + $0xbf0] sm:$0xff] }
 0x300   : > { %v8254_v46 = vadd.f32 %v17899_v7, %v14233_v44  ;;  %v8248_v48 = vpop.f32.mrb[9].mxu1  ;;  %14391 = vmatmul.mubr.msk.f32.gmra.mrb[114].mxu1 %vm1229_vm0, %v1077_v40  ;;  %v5689_v49 = vadd.f32 %v17899_v7, %v5688_v47  ;;  %13625 = vmatprep.mubr.msk.f32.mxu0 %vm1229_vm0, %v566_v41  ;;  %v1088_v39 = vld [vmem:[%s14872_s8 + $0x1bf0] sm:$0xff] }
 0x301   : > { %v8249_v50 = vadd.f32 %v17899_v7, %v8248_v48  ;;  %14393 = vmatprep.mubr.msk.f32.mxu1 %vm1229_vm0, %v1078_v42  ;;  %9753 = vst.msk [vmem:[%s15319_s11 + $0x848] sm:$0xff] %vm9487_vm1, %v5694_v45  ;;  %v577_v48 = vld [vmem:[%s14872_s8 + $0xbf8] sm:$0xff] }
 0x302   : > { %10265 = vst.msk [vmem:[%s15319_s11 + $0x1848] sm:$0xff] %vm9487_vm1, %v8254_v46  ;;  %9752 = vst.msk [vmem:[%s15319_s11 + $0x840] sm:$0xff] %vm9487_vm1, %v5689_v49  ;;  %v13468_v55 = vpop.f32.mrb[10].mxu0  ;;  %v1089_v49 = vld [vmem:[%s14872_s8 + $0x1bf8] sm:$0xff] }
 0x303   : > { %10264 = vst.msk [vmem:[%s15319_s11 + $0x1840] sm:$0xff] %vm9487_vm1, %v8249_v50  ;;  %v14236_v56 = vpop.f32.mrb[10].mxu1  ;;  %v5704_v57 = vadd.f32 %v17899_v7, %v13468_v55  ;;  %v5698_v59 = vpop.f32.mrb[11].mxu0  ;;  %13626 = vmatmul.mubr.msk.f32.gmra.mrb[116].mxu0 %vm1229_vm0, %v567_v51  ;;  %v578_v50 = vld [vmem:[%s14872_s8 + $0xc00] sm:$0xff] }
 0x304   : > { %v8264_v58 = vadd.f32 %v17899_v7, %v14236_v56  ;;  %v8258_v60 = vpop.f32.mrb[11].mxu1  ;;  %14394 = vmatmul.mubr.msk.f32.gmra.mrb[116].mxu1 %vm1229_vm0, %v1079_v52  ;;  %v5699_v61 = vadd.f32 %v17899_v7, %v5698_v59  ;;  %13628 = vmatprep.mubr.msk.f32.mxu0 %vm1229_vm0, %v568_v53  ;;  %v1090_v51 = vld [vmem:[%s14872_s8 + $0x1c00] sm:$0xff] }
 0x305   : > { %v8259_v62 = vadd.f32 %v17899_v7, %v8258_v60  ;;  %14396 = vmatprep.mubr.msk.f32.mxu1 %vm1229_vm0, %v1080_v54  ;;  %9755 = vst.msk [vmem:[%s15319_s11 + $0x858] sm:$0xff] %vm9487_vm1, %v5704_v57  ;;  %v579_v60 = vld [vmem:[%s14872_s8 + $0xc08] sm:$0xff] }
 0x306   : > { %10267 = vst.msk [vmem:[%s15319_s11 + $0x1858] sm:$0xff] %vm9487_vm1, %v8264_v58  ;;  %9754 = vst.msk [vmem:[%s15319_s11 + $0x850] sm:$0xff] %vm9487_vm1, %v5699_v61  ;;  %v13471_v3 = vpop.f32.mrb[12].mxu0  ;;  %v1091_v61 = vld [vmem:[%s14872_s8 + $0x1c08] sm:$0xff] }
 0x307   : > { %10266 = vst.msk [vmem:[%s15319_s11 + $0x1850] sm:$0xff] %vm9487_vm1, %v8259_v62  ;;  %v14239_v4 = vpop.f32.mrb[12].mxu1  ;;  %v5714_v5 = vadd.f32 %v17899_v7, %v13471_v3  ;;  %v5708_v6 = vpop.f32.mrb[13].mxu0  ;;  %13629 = vmatmul.mubr.msk.f32.gmra.mrb[118].mxu0 %vm1229_vm0, %v569_v63  ;;  %v580_v62 = vld [vmem:[%s14872_s8 + $0xc10] sm:$0xff] }
 0x308   : > { %v8274_v10 = vadd.f32 %v17899_v7, %v14239_v4  ;;  %v8268_v8 = vpop.f32.mrb[13].mxu1  ;;  %14397 = vmatmul.mubr.msk.f32.gmra.mrb[118].mxu1 %vm1229_vm0, %v1081_v0  ;;  %v5709_v13 = vadd.f32 %v17899_v7, %v5708_v6  ;;  %13631 = vmatprep.mubr.msk.f32.mxu0 %vm1229_vm0, %v570_v1  ;;  %v1092_v63 = vld [vmem:[%s14872_s8 + $0x1c10] sm:$0xff] }
 0x309   : > { %v8269_v9 = vadd.f32 %v17899_v7, %v8268_v8  ;;  %14399 = vmatprep.mubr.msk.f32.mxu1 %vm1229_vm0, %v1082_v2  ;;  %9757 = vst.msk [vmem:[%s15319_s11 + $0x868] sm:$0xff] %vm9487_vm1, %v5714_v5  ;;  %v581_v8 = vld [vmem:[%s14872_s8 + $0xc18] sm:$0xff] }
 0x30a   : > { %10269 = vst.msk [vmem:[%s15319_s11 + $0x1868] sm:$0xff] %vm9487_vm1, %v8274_v10  ;;  %9756 = vst.msk [vmem:[%s15319_s11 + $0x860] sm:$0xff] %vm9487_vm1, %v5709_v13  ;;  %v13474_v21 = vpop.f32.mrb[14].mxu0  ;;  %v1093_v13 = vld [vmem:[%s14872_s8 + $0x1c18] sm:$0xff] }
 0x30b   : > { %10268 = vst.msk [vmem:[%s15319_s11 + $0x1860] sm:$0xff] %vm9487_vm1, %v8269_v9  ;;  %v14242_v15 = vpop.f32.mrb[14].mxu1  ;;  %v5724_v17 = vadd.f32 %v17899_v7, %v13474_v21  ;;  %v5718_v19 = vpop.f32.mrb[15].mxu0  ;;  %13632 = vmatmul.mubr.msk.f32.gmra.mrb[120].mxu0 %vm1229_vm0, %v571_v11  ;;  %v582_v9 = vld [vmem:[%s14872_s8 + $0xc20] sm:$0xff] }
 0x30c   : > { %v8284_v18 = vadd.f32 %v17899_v7, %v14242_v15  ;;  %v8278_v20 = vpop.f32.mrb[15].mxu1  ;;  %14400 = vmatmul.mubr.msk.f32.gmra.mrb[120].mxu1 %vm1229_vm0, %v1083_v16  ;;  %v5719_v22 = vadd.f32 %v17899_v7, %v5718_v19  ;;  %13634 = vmatprep.mubr.msk.f32.mxu0 %vm1229_vm0, %v572_v12  ;;  %v1094_v11 = vld [vmem:[%s14872_s8 + $0x1c20] sm:$0xff] }
 0x30d   : > { %v8279_v23 = vadd.f32 %v17899_v7, %v8278_v20  ;;  %14402 = vmatprep.mubr.msk.f32.mxu1 %vm1229_vm0, %v1084_v14  ;;  %9759 = vst.msk [vmem:[%s15319_s11 + $0x878] sm:$0xff] %vm9487_vm1, %v5724_v17  ;;  %v583_v20 = vld [vmem:[%s14872_s8 + $0xc28] sm:$0xff] }
 0x30e   : > { %10271 = vst.msk [vmem:[%s15319_s11 + $0x1878] sm:$0xff] %vm9487_vm1, %v8284_v18  ;;  %9758 = vst.msk [vmem:[%s15319_s11 + $0x870] sm:$0xff] %vm9487_vm1, %v5719_v22  ;;  %v13477_v27 = vpop.f32.mrb[16].mxu0  ;;  %v1095_v22 = vld [vmem:[%s14872_s8 + $0x1c28] sm:$0xff] }
 0x30f   : > { %10270 = vst.msk [vmem:[%s15319_s11 + $0x1870] sm:$0xff] %vm9487_vm1, %v8279_v23  ;;  %v14245_v28 = vpop.f32.mrb[16].mxu1  ;;  %v5734_v30 = vadd.f32 %v17899_v7, %v13477_v27  ;;  %v5728_v32 = vpop.f32.mrb[17].mxu0  ;;  %13635 = vmatmul.mubr.msk.f32.gmra.mrb[122].mxu0 %vm1229_vm0, %v573_v24  ;;  %v584_v23 = vld [vmem:[%s14872_s8 + $0xc30] sm:$0xff] }
 0x310   : > { %v8294_v31 = vadd.f32 %v17899_v7, %v14245_v28  ;;  %v8288_v33 = vpop.f32.mrb[17].mxu1  ;;  %14403 = vmatmul.mubr.msk.f32.gmra.mrb[122].mxu1 %vm1229_vm0, %v1085_v25  ;;  %v5729_v34 = vadd.f32 %v17899_v7, %v5728_v32  ;;  %13637 = vmatprep.mubr.msk.f32.mxu0 %vm1229_vm0, %v574_v26  ;;  %v1096_v24 = vld [vmem:[%s14872_s8 + $0x1c30] sm:$0xff] }
 0x311   : > { %v8289_v35 = vadd.f32 %v17899_v7, %v8288_v33  ;;  %14405 = vmatprep.mubr.msk.f32.mxu1 %vm1229_vm0, %v1086_v29  ;;  %9761 = vst.msk [vmem:[%s15319_s11 + $0x888] sm:$0xff] %vm9487_vm1, %v5734_v30  ;;  %v585_v33 = vld [vmem:[%s14872_s8 + $0xc38] sm:$0xff] }
 0x312   : > { %10273 = vst.msk [vmem:[%s15319_s11 + $0x1888] sm:$0xff] %vm9487_vm1, %v8294_v31  ;;  %9760 = vst.msk [vmem:[%s15319_s11 + $0x880] sm:$0xff] %vm9487_vm1, %v5729_v34  ;;  %v13480_v40 = vpop.f32.mrb[18].mxu0  ;;  %v1097_v34 = vld [vmem:[%s14872_s8 + $0x1c38] sm:$0xff] }
 0x313   : > { %10272 = vst.msk [vmem:[%s15319_s11 + $0x1880] sm:$0xff] %vm9487_vm1, %v8289_v35  ;;  %v14248_v41 = vpop.f32.mrb[18].mxu1  ;;  %v5744_v42 = vadd.f32 %v17899_v7, %v13480_v40  ;;  %v5738_v44 = vpop.f32.mrb[19].mxu0  ;;  %13638 = vmatmul.mubr.msk.f32.gmra.mrb[124].mxu0 %vm1229_vm0, %v575_v36  ;;  %v586_v35 = vld [vmem:[%s14872_s8 + $0xc40] sm:$0xff] }
 0x314   : > { %v8304_v43 = vadd.f32 %v17899_v7, %v14248_v41  ;;  %v8298_v45 = vpop.f32.mrb[19].mxu1  ;;  %14406 = vmatmul.mubr.msk.f32.gmra.mrb[124].mxu1 %vm1229_vm0, %v1087_v37  ;;  %v5739_v46 = vadd.f32 %v17899_v7, %v5738_v44  ;;  %13640 = vmatprep.mubr.msk.f32.mxu0 %vm1229_vm0, %v576_v38  ;;  %v1098_v36 = vld [vmem:[%s14872_s8 + $0x1c40] sm:$0xff] }
 0x315   : > { %v8299_v47 = vadd.f32 %v17899_v7, %v8298_v45  ;;  %14408 = vmatprep.mubr.msk.f32.mxu1 %vm1229_vm0, %v1088_v39  ;;  %9763 = vst.msk [vmem:[%s15319_s11 + $0x898] sm:$0xff] %vm9487_vm1, %v5744_v42  ;;  %v587_v45 = vld [vmem:[%s14872_s8 + $0xc48] sm:$0xff] }
 0x316   : > { %10275 = vst.msk [vmem:[%s15319_s11 + $0x1898] sm:$0xff] %vm9487_vm1, %v8304_v43  ;;  %9762 = vst.msk [vmem:[%s15319_s11 + $0x890] sm:$0xff] %vm9487_vm1, %v5739_v46  ;;  %v13483_v52 = vpop.f32.mrb[20].mxu0  ;;  %v1099_v46 = vld [vmem:[%s14872_s8 + $0x1c48] sm:$0xff] }
 0x317   : > { %10274 = vst.msk [vmem:[%s15319_s11 + $0x1890] sm:$0xff] %vm9487_vm1, %v8299_v47  ;;  %v14251_v53 = vpop.f32.mrb[20].mxu1  ;;  %v5754_v54 = vadd.f32 %v17899_v7, %v13483_v52  ;;  %v5748_v56 = vpop.f32.mrb[21].mxu0  ;;  %13641 = vmatmul.mubr.msk.f32.gmra.mrb[126].mxu0 %vm1229_vm0, %v577_v48  ;;  %v588_v47 = vld [vmem:[%s14872_s8 + $0xc50] sm:$0xff] }
 0x318   : > { %v8314_v55 = vadd.f32 %v17899_v7, %v14251_v53  ;;  %v8308_v57 = vpop.f32.mrb[21].mxu1  ;;  %14409 = vmatmul.mubr.msk.f32.gmra.mrb[126].mxu1 %vm1229_vm0, %v1089_v49  ;;  %v5749_v58 = vadd.f32 %v17899_v7, %v5748_v56  ;;  %13643 = vmatprep.mubr.msk.f32.mxu0 %vm1229_vm0, %v578_v50  ;;  %v1100_v48 = vld [vmem:[%s14872_s8 + $0x1c50] sm:$0xff] }
 0x319   : > { %v8309_v59 = vadd.f32 %v17899_v7, %v8308_v57  ;;  %14411 = vmatprep.mubr.msk.f32.mxu1 %vm1229_vm0, %v1090_v51  ;;  %9765 = vst.msk [vmem:[%s15319_s11 + $0x8a8] sm:$0xff] %vm9487_vm1, %v5754_v54  ;;  %v589_v57 = vld [vmem:[%s14872_s8 + $0xc58] sm:$0xff] }
 0x31a   : > { %10277 = vst.msk [vmem:[%s15319_s11 + $0x18a8] sm:$0xff] %vm9487_vm1, %v8314_v55  ;;  %9764 = vst.msk [vmem:[%s15319_s11 + $0x8a0] sm:$0xff] %vm9487_vm1, %v5749_v58  ;;  %v13486_v0 = vpop.f32.mrb[22].mxu0  ;;  %v1101_v58 = vld [vmem:[%s14872_s8 + $0x1c58] sm:$0xff] }
 0x31b   : > { %10276 = vst.msk [vmem:[%s15319_s11 + $0x18a0] sm:$0xff] %vm9487_vm1, %v8309_v59  ;;  %v14254_v1 = vpop.f32.mrb[22].mxu1  ;;  %v5764_v2 = vadd.f32 %v17899_v7, %v13486_v0  ;;  %v5758_v4 = vpop.f32.mrb[23].mxu0  ;;  %13644 = vmatmul.mubr.msk.f32.gmra.mrb[128].mxu0 %vm1229_vm0, %v579_v60  ;;  %v590_v59 = vld [vmem:[%s14872_s8 + $0xc60] sm:$0xff] }
 0x31c   : > { %v8324_v3 = vadd.f32 %v17899_v7, %v14254_v1  ;;  %v8318_v5 = vpop.f32.mrb[23].mxu1  ;;  %14412 = vmatmul.mubr.msk.f32.gmra.mrb[128].mxu1 %vm1229_vm0, %v1091_v61  ;;  %v5759_v10 = vadd.f32 %v17899_v7, %v5758_v4  ;;  %13646 = vmatprep.mubr.msk.f32.mxu0 %vm1229_vm0, %v580_v62  ;;  %v1102_v60 = vld [vmem:[%s14872_s8 + $0x1c60] sm:$0xff] }
 0x31d   : > { %v8319_v6 = vadd.f32 %v17899_v7, %v8318_v5  ;;  %14414 = vmatprep.mubr.msk.f32.mxu1 %vm1229_vm0, %v1092_v63  ;;  %9767 = vst.msk [vmem:[%s15319_s11 + $0x8b8] sm:$0xff] %vm9487_vm1, %v5764_v2  ;;  %v591_v5 = vld [vmem:[%s14872_s8 + $0xc68] sm:$0xff] }
 0x31e   : > { %10279 = vst.msk [vmem:[%s15319_s11 + $0x18b8] sm:$0xff] %vm9487_vm1, %v8324_v3  ;;  %9766 = vst.msk [vmem:[%s15319_s11 + $0x8b0] sm:$0xff] %vm9487_vm1, %v5759_v10  ;;  %v13489_v16 = vpop.f32.mrb[24].mxu0  ;;  %v1103_v10 = vld [vmem:[%s14872_s8 + $0x1c68] sm:$0xff] }
 0x31f   : > { %10278 = vst.msk [vmem:[%s15319_s11 + $0x18b0] sm:$0xff] %vm9487_vm1, %v8319_v6  ;;  %v14257_v12 = vpop.f32.mrb[24].mxu1  ;;  %v5774_v14 = vadd.f32 %v17899_v7, %v13489_v16  ;;  %v5768_v15 = vpop.f32.mrb[25].mxu0  ;;  %13647 = vmatmul.mubr.msk.f32.gmra.mrb[130].mxu0 %vm1229_vm0, %v581_v8  ;;  %v592_v6 = vld [vmem:[%s14872_s8 + $0xc70] sm:$0xff] }
 0x320   : > { %v8334_v21 = vadd.f32 %v17899_v7, %v14257_v12  ;;  %v8328_v17 = vpop.f32.mrb[25].mxu1  ;;  %14415 = vmatmul.mubr.msk.f32.gmra.mrb[130].mxu1 %vm1229_vm0, %v1093_v13  ;;  %v5769_v18 = vadd.f32 %v17899_v7, %v5768_v15  ;;  %13649 = vmatprep.mubr.msk.f32.mxu0 %vm1229_vm0, %v582_v9  ;;  %v1104_v8 = vld [vmem:[%s14872_s8 + $0x1c70] sm:$0xff] }
 0x321   : > { %v8329_v19 = vadd.f32 %v17899_v7, %v8328_v17  ;;  %14417 = vmatprep.mubr.msk.f32.mxu1 %vm1229_vm0, %v1094_v11  ;;  %9769 = vst.msk [vmem:[%s15319_s11 + $0x8c8] sm:$0xff] %vm9487_vm1, %v5774_v14  ;;  %v593_v17 = vld [vmem:[%s14872_s8 + $0xc78] sm:$0xff] }
 0x322   : > { %10281 = vst.msk [vmem:[%s15319_s11 + $0x18c8] sm:$0xff] %vm9487_vm1, %v8334_v21  ;;  %9768 = vst.msk [vmem:[%s15319_s11 + $0x8c0] sm:$0xff] %vm9487_vm1, %v5769_v18  ;;  %v13492_v25 = vpop.f32.mrb[26].mxu0  ;;  %v1105_v18 = vld [vmem:[%s14872_s8 + $0x1c78] sm:$0xff] }
 0x323   : > { %10280 = vst.msk [vmem:[%s15319_s11 + $0x18c0] sm:$0xff] %vm9487_vm1, %v8329_v19  ;;  %v14260_v26 = vpop.f32.mrb[26].mxu1  ;;  %v5784_v29 = vadd.f32 %v17899_v7, %v13492_v25  ;;  %v5778_v28 = vpop.f32.mrb[27].mxu0  ;;  %13650 = vmatmul.mubr.msk.f32.gmra.mrb[132].mxu0 %vm1229_vm0, %v583_v20  ;;  %v594_v19 = vld [vmem:[%s14872_s8 + $0xc80] sm:$0xff] }
 0x324   : > { %v8344_v27 = vadd.f32 %v17899_v7, %v14260_v26  ;;  %v8338_v30 = vpop.f32.mrb[27].mxu1  ;;  %14418 = vmatmul.mubr.msk.f32.gmra.mrb[132].mxu1 %vm1229_vm0, %v1095_v22  ;;  %v5779_v31 = vadd.f32 %v17899_v7, %v5778_v28  ;;  %13652 = vmatprep.mubr.msk.f32.mxu0 %vm1229_vm0, %v584_v23  ;;  %v1106_v20 = vld [vmem:[%s14872_s8 + $0x1c80] sm:$0xff] }
 0x325   : > { %v8339_v32 = vadd.f32 %v17899_v7, %v8338_v30  ;;  %14420 = vmatprep.mubr.msk.f32.mxu1 %vm1229_vm0, %v1096_v24  ;;  %9771 = vst.msk [vmem:[%s15319_s11 + $0x8d8] sm:$0xff] %vm9487_vm1, %v5784_v29  ;;  %v595_v30 = vld [vmem:[%s14872_s8 + $0xc88] sm:$0xff] }
 0x326   : > { %10283 = vst.msk [vmem:[%s15319_s11 + $0x18d8] sm:$0xff] %vm9487_vm1, %v8344_v27  ;;  %9770 = vst.msk [vmem:[%s15319_s11 + $0x8d0] sm:$0xff] %vm9487_vm1, %v5779_v31  ;;  %v13495_v37 = vpop.f32.mrb[28].mxu0  ;;  %v1107_v31 = vld [vmem:[%s14872_s8 + $0x1c88] sm:$0xff] }
 0x327   : > { %10282 = vst.msk [vmem:[%s15319_s11 + $0x18d0] sm:$0xff] %vm9487_vm1, %v8339_v32  ;;  %v14263_v38 = vpop.f32.mrb[28].mxu1  ;;  %v5794_v39 = vadd.f32 %v17899_v7, %v13495_v37  ;;  %v5788_v41 = vpop.f32.mrb[29].mxu0  ;;  %13653 = vmatmul.mubr.msk.f32.gmra.mrb[134].mxu0 %vm1229_vm0, %v585_v33  ;;  %v596_v32 = vld [vmem:[%s14872_s8 + $0xc90] sm:$0xff] }
 0x328   : > { %v8354_v40 = vadd.f32 %v17899_v7, %v14263_v38  ;;  %v8348_v42 = vpop.f32.mrb[29].mxu1  ;;  %14421 = vmatmul.mubr.msk.f32.gmra.mrb[134].mxu1 %vm1229_vm0, %v1097_v34  ;;  %v5789_v43 = vadd.f32 %v17899_v7, %v5788_v41  ;;  %13655 = vmatprep.mubr.msk.f32.mxu0 %vm1229_vm0, %v586_v35  ;;  %v1108_v33 = vld [vmem:[%s14872_s8 + $0x1c90] sm:$0xff] }
 0x329   : > { %v8349_v44 = vadd.f32 %v17899_v7, %v8348_v42  ;;  %14423 = vmatprep.mubr.msk.f32.mxu1 %vm1229_vm0, %v1098_v36  ;;  %9773 = vst.msk [vmem:[%s15319_s11 + $0x8e8] sm:$0xff] %vm9487_vm1, %v5794_v39  ;;  %v597_v42 = vld [vmem:[%s14872_s8 + $0xc98] sm:$0xff] }
 0x32a   : > { %10285 = vst.msk [vmem:[%s15319_s11 + $0x18e8] sm:$0xff] %vm9487_vm1, %v8354_v40  ;;  %9772 = vst.msk [vmem:[%s15319_s11 + $0x8e0] sm:$0xff] %vm9487_vm1, %v5789_v43  ;;  %v13498_v49 = vpop.f32.mrb[30].mxu0  ;;  %v1109_v43 = vld [vmem:[%s14872_s8 + $0x1c98] sm:$0xff] }
 0x32b   : > { %10284 = vst.msk [vmem:[%s15319_s11 + $0x18e0] sm:$0xff] %vm9487_vm1, %v8349_v44  ;;  %v14266_v50 = vpop.f32.mrb[30].mxu1  ;;  %v5804_v51 = vadd.f32 %v17899_v7, %v13498_v49  ;;  %v5798_v53 = vpop.f32.mrb[31].mxu0  ;;  %13656 = vmatmul.mubr.msk.f32.gmra.mrb[136].mxu0 %vm1229_vm0, %v587_v45  ;;  %v598_v44 = vld [vmem:[%s14872_s8 + $0xca0] sm:$0xff] }
 0x32c   : > { %v8364_v52 = vadd.f32 %v17899_v7, %v14266_v50  ;;  %v8358_v54 = vpop.f32.mrb[31].mxu1  ;;  %14424 = vmatmul.mubr.msk.f32.gmra.mrb[136].mxu1 %vm1229_vm0, %v1099_v46  ;;  %v5799_v55 = vadd.f32 %v17899_v7, %v5798_v53  ;;  %13658 = vmatprep.mubr.msk.f32.mxu0 %vm1229_vm0, %v588_v47  ;;  %v1110_v45 = vld [vmem:[%s14872_s8 + $0x1ca0] sm:$0xff] }
 0x32d   : > { %v8359_v56 = vadd.f32 %v17899_v7, %v8358_v54  ;;  %14426 = vmatprep.mubr.msk.f32.mxu1 %vm1229_vm0, %v1100_v48  ;;  %9775 = vst.msk [vmem:[%s15319_s11 + $0x8f8] sm:$0xff] %vm9487_vm1, %v5804_v51  ;;  %v599_v54 = vld [vmem:[%s14872_s8 + $0xca8] sm:$0xff] }
 0x32e   : > { %10287 = vst.msk [vmem:[%s15319_s11 + $0x18f8] sm:$0xff] %vm9487_vm1, %v8364_v52  ;;  %9774 = vst.msk [vmem:[%s15319_s11 + $0x8f0] sm:$0xff] %vm9487_vm1, %v5799_v55  ;;  %v13501_v61 = vpop.f32.mrb[32].mxu0  ;;  %v1111_v55 = vld [vmem:[%s14872_s8 + $0x1ca8] sm:$0xff] }
 0x32f   : > { %10286 = vst.msk [vmem:[%s15319_s11 + $0x18f0] sm:$0xff] %vm9487_vm1, %v8359_v56  ;;  %v14269_v62 = vpop.f32.mrb[32].mxu1  ;;  %v5814_v63 = vadd.f32 %v17899_v7, %v13501_v61  ;;  %v5808_v1 = vpop.f32.mrb[33].mxu0  ;;  %13659 = vmatmul.mubr.msk.f32.gmra.mrb[138].mxu0 %vm1229_vm0, %v589_v57  ;;  %v600_v56 = vld [vmem:[%s14872_s8 + $0xcb0] sm:$0xff] }
 0x330   : > { %v8374_v0 = vadd.f32 %v17899_v7, %v14269_v62  ;;  %v8368_v2 = vpop.f32.mrb[33].mxu1  ;;  %14427 = vmatmul.mubr.msk.f32.gmra.mrb[138].mxu1 %vm1229_vm0, %v1101_v58  ;;  %v5809_v3 = vadd.f32 %v17899_v7, %v5808_v1  ;;  %13661 = vmatprep.mubr.msk.f32.mxu0 %vm1229_vm0, %v590_v59  ;;  %v1112_v57 = vld [vmem:[%s14872_s8 + $0x1cb0] sm:$0xff] }
 0x331   : > { %v8369_v4 = vadd.f32 %v17899_v7, %v8368_v2  ;;  %14429 = vmatprep.mubr.msk.f32.mxu1 %vm1229_vm0, %v1102_v60  ;;  %9777 = vst.msk [vmem:[%s15319_s11 + $0x908] sm:$0xff] %vm9487_vm1, %v5814_v63  ;;  %v601_v2 = vld [vmem:[%s14872_s8 + $0xcb8] sm:$0xff] }
 0x332   : > { %10289 = vst.msk [vmem:[%s15319_s11 + $0x1908] sm:$0xff] %vm9487_vm1, %v8374_v0  ;;  %9776 = vst.msk [vmem:[%s15319_s11 + $0x900] sm:$0xff] %vm9487_vm1, %v5809_v3  ;;  %v13504_v13 = vpop.f32.mrb[34].mxu0  ;;  %v1113_v3 = vld [vmem:[%s14872_s8 + $0x1cb8] sm:$0xff] }
 0x333   : > { %10288 = vst.msk [vmem:[%s15319_s11 + $0x1900] sm:$0xff] %vm9487_vm1, %v8369_v4  ;;  %v14272_v9 = vpop.f32.mrb[34].mxu1  ;;  %v5824_v11 = vadd.f32 %v17899_v7, %v13504_v13  ;;  %v5818_v12 = vpop.f32.mrb[35].mxu0  ;;  %13662 = vmatmul.mubr.msk.f32.gmra.mrb[140].mxu0 %vm1229_vm0, %v591_v5  ;;  %v602_v4 = vld [vmem:[%s14872_s8 + $0xcc0] sm:$0xff] }
 0x334   : > { %v8384_v16 = vadd.f32 %v17899_v7, %v14272_v9  ;;  %v8378_v14 = vpop.f32.mrb[35].mxu1  ;;  %14430 = vmatmul.mubr.msk.f32.gmra.mrb[140].mxu1 %vm1229_vm0, %v1103_v10  ;;  %v5819_v21 = vadd.f32 %v17899_v7, %v5818_v12  ;;  %13664 = vmatprep.mubr.msk.f32.mxu0 %vm1229_vm0, %v592_v6  ;;  %v1114_v5 = vld [vmem:[%s14872_s8 + $0x1cc0] sm:$0xff] }
 0x335   : > { %v8379_v15 = vadd.f32 %v17899_v7, %v8378_v14  ;;  %14432 = vmatprep.mubr.msk.f32.mxu1 %vm1229_vm0, %v1104_v8  ;;  %9779 = vst.msk [vmem:[%s15319_s11 + $0x918] sm:$0xff] %vm9487_vm1, %v5824_v11  ;;  %v603_v14 = vld [vmem:[%s14872_s8 + $0xcc8] sm:$0xff] }
 0x336   : > { %10291 = vst.msk [vmem:[%s15319_s11 + $0x1918] sm:$0xff] %vm9487_vm1, %v8384_v16  ;;  %9778 = vst.msk [vmem:[%s15319_s11 + $0x910] sm:$0xff] %vm9487_vm1, %v5819_v21  ;;  %v13507_v22 = vpop.f32.mrb[36].mxu0  ;;  %v1115_v21 = vld [vmem:[%s14872_s8 + $0x1cc8] sm:$0xff] }
 0x337   : > { %10290 = vst.msk [vmem:[%s15319_s11 + $0x1910] sm:$0xff] %vm9487_vm1, %v8379_v15  ;;  %v14275_v23 = vpop.f32.mrb[36].mxu1  ;;  %v5834_v24 = vadd.f32 %v17899_v7, %v13507_v22  ;;  %v5828_v26 = vpop.f32.mrb[37].mxu0  ;;  %13665 = vmatmul.mubr.msk.f32.gmra.mrb[142].mxu0 %vm1229_vm0, %v593_v17  ;;  %v604_v15 = vld [vmem:[%s14872_s8 + $0xcd0] sm:$0xff] }
 0x338   : > { %v8394_v25 = vadd.f32 %v17899_v7, %v14275_v23  ;;  %v8388_v29 = vpop.f32.mrb[37].mxu1  ;;  %14433 = vmatmul.mubr.msk.f32.gmra.mrb[142].mxu1 %vm1229_vm0, %v1105_v18  ;;  %v5829_v27 = vadd.f32 %v17899_v7, %v5828_v26  ;;  %13667 = vmatprep.mubr.msk.f32.mxu0 %vm1229_vm0, %v594_v19  ;;  %v1116_v17 = vld [vmem:[%s14872_s8 + $0x1cd0] sm:$0xff] }
 0x339   : > { %v8389_v28 = vadd.f32 %v17899_v7, %v8388_v29  ;;  %14435 = vmatprep.mubr.msk.f32.mxu1 %vm1229_vm0, %v1106_v20  ;;  %9781 = vst.msk [vmem:[%s15319_s11 + $0x928] sm:$0xff] %vm9487_vm1, %v5834_v24  ;;  %v605_v29 = vld [vmem:[%s14872_s8 + $0xcd8] sm:$0xff] }
 0x33a   : > { %10293 = vst.msk [vmem:[%s15319_s11 + $0x1928] sm:$0xff] %vm9487_vm1, %v8394_v25  ;;  %9780 = vst.msk [vmem:[%s15319_s11 + $0x920] sm:$0xff] %vm9487_vm1, %v5829_v27  ;;  %v13510_v34 = vpop.f32.mrb[38].mxu0  ;;  %v1117_v27 = vld [vmem:[%s14872_s8 + $0x1cd8] sm:$0xff] }
 0x33b   : > { %10292 = vst.msk [vmem:[%s15319_s11 + $0x1920] sm:$0xff] %vm9487_vm1, %v8389_v28  ;;  %v14278_v35 = vpop.f32.mrb[38].mxu1  ;;  %v5844_v36 = vadd.f32 %v17899_v7, %v13510_v34  ;;  %v5838_v38 = vpop.f32.mrb[39].mxu0  ;;  %13668 = vmatmul.mubr.msk.f32.gmra.mrb[144].mxu0 %vm1229_vm0, %v595_v30  ;;  %v606_v28 = vld [vmem:[%s14872_s8 + $0xce0] sm:$0xff] }
 0x33c   : > { %v8404_v37 = vadd.f32 %v17899_v7, %v14278_v35  ;;  %v8398_v39 = vpop.f32.mrb[39].mxu1  ;;  %14436 = vmatmul.mubr.msk.f32.gmra.mrb[144].mxu1 %vm1229_vm0, %v1107_v31  ;;  %v5839_v40 = vadd.f32 %v17899_v7, %v5838_v38  ;;  %13670 = vmatprep.mubr.msk.f32.mxu0 %vm1229_vm0, %v596_v32  ;;  %v1118_v30 = vld [vmem:[%s14872_s8 + $0x1ce0] sm:$0xff] }
 0x33d   : > { %v8399_v41 = vadd.f32 %v17899_v7, %v8398_v39  ;;  %14438 = vmatprep.mubr.msk.f32.mxu1 %vm1229_vm0, %v1108_v33  ;;  %9783 = vst.msk [vmem:[%s15319_s11 + $0x938] sm:$0xff] %vm9487_vm1, %v5844_v36  ;;  %v607_v39 = vld [vmem:[%s14872_s8 + $0xce8] sm:$0xff] }
 0x33e   : > { %10295 = vst.msk [vmem:[%s15319_s11 + $0x1938] sm:$0xff] %vm9487_vm1, %v8404_v37  ;;  %9782 = vst.msk [vmem:[%s15319_s11 + $0x930] sm:$0xff] %vm9487_vm1, %v5839_v40  ;;  %v13513_v46 = vpop.f32.mrb[40].mxu0  ;;  %v1119_v40 = vld [vmem:[%s14872_s8 + $0x1ce8] sm:$0xff] }
 0x33f   : > { %10294 = vst.msk [vmem:[%s15319_s11 + $0x1930] sm:$0xff] %vm9487_vm1, %v8399_v41  ;;  %v14281_v47 = vpop.f32.mrb[40].mxu1  ;;  %v5854_v48 = vadd.f32 %v17899_v7, %v13513_v46  ;;  %v5848_v50 = vpop.f32.mrb[41].mxu0  ;;  %13671 = vmatmul.mubr.msk.f32.gmra.mrb[146].mxu0 %vm1229_vm0, %v597_v42  ;;  %v608_v41 = vld [vmem:[%s14872_s8 + $0xcf0] sm:$0xff] }
 0x340   : > { %v8414_v49 = vadd.f32 %v17899_v7, %v14281_v47  ;;  %v8408_v51 = vpop.f32.mrb[41].mxu1  ;;  %14439 = vmatmul.mubr.msk.f32.gmra.mrb[146].mxu1 %vm1229_vm0, %v1109_v43  ;;  %v5849_v52 = vadd.f32 %v17899_v7, %v5848_v50  ;;  %13673 = vmatprep.mubr.msk.f32.mxu0 %vm1229_vm0, %v598_v44  ;;  %v1120_v42 = vld [vmem:[%s14872_s8 + $0x1cf0] sm:$0xff] }
 0x341   : > { %v8409_v53 = vadd.f32 %v17899_v7, %v8408_v51  ;;  %14441 = vmatprep.mubr.msk.f32.mxu1 %vm1229_vm0, %v1110_v45  ;;  %9785 = vst.msk [vmem:[%s15319_s11 + $0x948] sm:$0xff] %vm9487_vm1, %v5854_v48  ;;  %v609_v51 = vld [vmem:[%s14872_s8 + $0xcf8] sm:$0xff] }
 0x342   : > { %10297 = vst.msk [vmem:[%s15319_s11 + $0x1948] sm:$0xff] %vm9487_vm1, %v8414_v49  ;;  %9784 = vst.msk [vmem:[%s15319_s11 + $0x940] sm:$0xff] %vm9487_vm1, %v5849_v52  ;;  %v13516_v58 = vpop.f32.mrb[42].mxu0  ;;  %v1121_v52 = vld [vmem:[%s14872_s8 + $0x1cf8] sm:$0xff] }
 0x343   : > { %10296 = vst.msk [vmem:[%s15319_s11 + $0x1940] sm:$0xff] %vm9487_vm1, %v8409_v53  ;;  %v14284_v59 = vpop.f32.mrb[42].mxu1  ;;  %v5864_v60 = vadd.f32 %v17899_v7, %v13516_v58  ;;  %v5858_v62 = vpop.f32.mrb[43].mxu0  ;;  %13674 = vmatmul.mubr.msk.f32.gmra.mrb[148].mxu0 %vm1229_vm0, %v599_v54  ;;  %v610_v53 = vld [vmem:[%s14872_s8 + $0xd00] sm:$0xff] }
 0x344   : > { %v8424_v61 = vadd.f32 %v17899_v7, %v14284_v59  ;;  %v8418_v63 = vpop.f32.mrb[43].mxu1  ;;  %14442 = vmatmul.mubr.msk.f32.gmra.mrb[148].mxu1 %vm1229_vm0, %v1111_v55  ;;  %v5859_v0 = vadd.f32 %v17899_v7, %v5858_v62  ;;  %13676 = vmatprep.mubr.msk.f32.mxu0 %vm1229_vm0, %v600_v56  ;;  %v1122_v54 = vld [vmem:[%s14872_s8 + $0x1d00] sm:$0xff] }
 0x345   : > { %v8419_v1 = vadd.f32 %v17899_v7, %v8418_v63  ;;  %14444 = vmatprep.mubr.msk.f32.mxu1 %vm1229_vm0, %v1112_v57  ;;  %9787 = vst.msk [vmem:[%s15319_s11 + $0x958] sm:$0xff] %vm9487_vm1, %v5864_v60  ;;  %v611_v63 = vld [vmem:[%s14872_s8 + $0xd08] sm:$0xff] }
 0x346   : > { %10299 = vst.msk [vmem:[%s15319_s11 + $0x1958] sm:$0xff] %vm9487_vm1, %v8424_v61  ;;  %9786 = vst.msk [vmem:[%s15319_s11 + $0x950] sm:$0xff] %vm9487_vm1, %v5859_v0  ;;  %v13519_v10 = vpop.f32.mrb[44].mxu0  ;;  %v1123_v0 = vld [vmem:[%s14872_s8 + $0x1d08] sm:$0xff] }
 0x347   : > { %10298 = vst.msk [vmem:[%s15319_s11 + $0x1950] sm:$0xff] %vm9487_vm1, %v8419_v1  ;;  %v14287_v6 = vpop.f32.mrb[44].mxu1  ;;  %v5874_v8 = vadd.f32 %v17899_v7, %v13519_v10  ;;  %v5868_v9 = vpop.f32.mrb[45].mxu0  ;;  %13677 = vmatmul.mubr.msk.f32.gmra.mrb[150].mxu0 %vm1229_vm0, %v601_v2  ;;  %v612_v1 = vld [vmem:[%s14872_s8 + $0xd10] sm:$0xff] }
 0x348   : > { %v8434_v13 = vadd.f32 %v17899_v7, %v14287_v6  ;;  %v8428_v11 = vpop.f32.mrb[45].mxu1  ;;  %14445 = vmatmul.mubr.msk.f32.gmra.mrb[150].mxu1 %vm1229_vm0, %v1113_v3  ;;  %v5869_v16 = vadd.f32 %v17899_v7, %v5868_v9  ;;  %13679 = vmatprep.mubr.msk.f32.mxu0 %vm1229_vm0, %v602_v4  ;;  %v1124_v2 = vld [vmem:[%s14872_s8 + $0x1d10] sm:$0xff]  ;;  %v18421_v4 = vld [vmem:[#allocation2] ss:$0 sm:$0xff] }
 0x349   : > { %v8429_v12 = vadd.f32 %v17899_v7, %v8428_v11  ;;  %14447 = vmatprep.mubr.msk.f32.mxu1 %vm1229_vm0, %v1114_v5  ;;  %9789 = vst.msk [vmem:[%s15319_s11 + $0x968] sm:$0xff] %vm9487_vm1, %v5874_v8  ;;  %v613_v11 = vld [vmem:[%s14872_s8 + $0xd18] sm:$0xff] }
 0x34a   : > { %10301 = vst.msk [vmem:[%s15319_s11 + $0x1968] sm:$0xff] %vm9487_vm1, %v8434_v13  ;;  %9788 = vst.msk [vmem:[%s15319_s11 + $0x960] sm:$0xff] %vm9487_vm1, %v5869_v16  ;;  %v13522_v18 = vpop.f32.mrb[46].mxu0  ;;  %v1125_v16 = vld [vmem:[%s14872_s8 + $0x1d18] sm:$0xff] }
 0x34b   : > { %10300 = vst.msk [vmem:[%s15319_s11 + $0x1960] sm:$0xff] %vm9487_vm1, %v8429_v12  ;;  %v14290_v19 = vpop.f32.mrb[46].mxu1  ;;  %v5884_v20 = vadd.f32 %v17899_v7, %v13522_v18  ;;  %v5878_v23 = vpop.f32.mrb[47].mxu0  ;;  %13680 = vmatmul.mubr.msk.f32.gmra.mrb[152].mxu0 %vm1229_vm0, %v603_v14  ;;  %v614_v12 = vld [vmem:[%s14872_s8 + $0xd20] sm:$0xff] }
 0x34c   : > { %v8444_v22 = vadd.f32 %v17899_v7, %v14290_v19  ;;  %v8438_v24 = vpop.f32.mrb[47].mxu1  ;;  %14448 = vmatmul.mubr.msk.f32.gmra.mrb[152].mxu1 %vm1229_vm0, %v1115_v21  ;;  %v5879_v25 = vadd.f32 %v17899_v7, %v5878_v23  ;;  %13682 = vmatprep.mubr.msk.f32.mxu0 %vm1229_vm0, %v604_v15  ;;  %v1126_v14 = vld [vmem:[%s14872_s8 + $0x1d20] sm:$0xff] }
 0x34d   : > { %v8439_v26 = vadd.f32 %v17899_v7, %v8438_v24  ;;  %14450 = vmatprep.mubr.msk.f32.mxu1 %vm1229_vm0, %v1116_v17  ;;  %9791 = vst.msk [vmem:[%s15319_s11 + $0x978] sm:$0xff] %vm9487_vm1, %v5884_v20  ;;  %v615_v24 = vld [vmem:[%s14872_s8 + $0xd28] sm:$0xff] }
 0x34e   : > { %10303 = vst.msk [vmem:[%s15319_s11 + $0x1978] sm:$0xff] %vm9487_vm1, %v8444_v22  ;;  %9790 = vst.msk [vmem:[%s15319_s11 + $0x970] sm:$0xff] %vm9487_vm1, %v5879_v25  ;;  %v13525_v31 = vpop.f32.mrb[48].mxu0  ;;  %v1127_v25 = vld [vmem:[%s14872_s8 + $0x1d28] sm:$0xff] }
 0x34f   : > { %10302 = vst.msk [vmem:[%s15319_s11 + $0x1970] sm:$0xff] %vm9487_vm1, %v8439_v26  ;;  %v14293_v32 = vpop.f32.mrb[48].mxu1  ;;  %v5894_v33 = vadd.f32 %v17899_v7, %v13525_v31  ;;  %v5888_v35 = vpop.f32.mrb[49].mxu0  ;;  %13683 = vmatmul.mubr.msk.f32.gmra.mrb[154].mxu0 %vm1229_vm0, %v605_v29  ;;  %v616_v26 = vld [vmem:[%s14872_s8 + $0xd30] sm:$0xff] }
 0x350   : > { %v8454_v34 = vadd.f32 %v17899_v7, %v14293_v32  ;;  %v8448_v36 = vpop.f32.mrb[49].mxu1  ;;  %14451 = vmatmul.mubr.msk.f32.gmra.mrb[154].mxu1 %vm1229_vm0, %v1117_v27  ;;  %v5889_v37 = vadd.f32 %v17899_v7, %v5888_v35  ;;  %13685 = vmatprep.mubr.msk.f32.mxu0 %vm1229_vm0, %v606_v28  ;;  %v1128_v29 = vld [vmem:[%s14872_s8 + $0x1d30] sm:$0xff] }
 0x351   : > { %v8449_v38 = vadd.f32 %v17899_v7, %v8448_v36  ;;  %14453 = vmatprep.mubr.msk.f32.mxu1 %vm1229_vm0, %v1118_v30  ;;  %9793 = vst.msk [vmem:[%s15319_s11 + $0x988] sm:$0xff] %vm9487_vm1, %v5894_v33  ;;  %v617_v36 = vld [vmem:[%s14872_s8 + $0xd38] sm:$0xff] }
 0x352   : > { %10305 = vst.msk [vmem:[%s15319_s11 + $0x1988] sm:$0xff] %vm9487_vm1, %v8454_v34  ;;  %9792 = vst.msk [vmem:[%s15319_s11 + $0x980] sm:$0xff] %vm9487_vm1, %v5889_v37  ;;  %v13528_v43 = vpop.f32.mrb[50].mxu0  ;;  %v1129_v37 = vld [vmem:[%s14872_s8 + $0x1d38] sm:$0xff] }
 0x353   : > { %10304 = vst.msk [vmem:[%s15319_s11 + $0x1980] sm:$0xff] %vm9487_vm1, %v8449_v38  ;;  %v14296_v44 = vpop.f32.mrb[50].mxu1  ;;  %v5904_v45 = vadd.f32 %v17899_v7, %v13528_v43  ;;  %v5898_v47 = vpop.f32.mrb[51].mxu0  ;;  %13686 = vmatmul.mubr.msk.f32.gmra.mrb[156].mxu0 %vm1229_vm0, %v607_v39  ;;  %v618_v38 = vld [vmem:[%s14872_s8 + $0xd40] sm:$0xff] }
 0x354   : > { %v8464_v46 = vadd.f32 %v17899_v7, %v14296_v44  ;;  %v8458_v48 = vpop.f32.mrb[51].mxu1  ;;  %14454 = vmatmul.mubr.msk.f32.gmra.mrb[156].mxu1 %vm1229_vm0, %v1119_v40  ;;  %v5899_v49 = vadd.f32 %v17899_v7, %v5898_v47  ;;  %13688 = vmatprep.mubr.msk.f32.mxu0 %vm1229_vm0, %v608_v41  ;;  %v1130_v39 = vld [vmem:[%s14872_s8 + $0x1d40] sm:$0xff] }
 0x355   : > { %v8459_v50 = vadd.f32 %v17899_v7, %v8458_v48  ;;  %14456 = vmatprep.mubr.msk.f32.mxu1 %vm1229_vm0, %v1120_v42  ;;  %9795 = vst.msk [vmem:[%s15319_s11 + $0x998] sm:$0xff] %vm9487_vm1, %v5904_v45  ;;  %v619_v48 = vld [vmem:[%s14872_s8 + $0xd48] sm:$0xff] }
 0x356   : > { %10307 = vst.msk [vmem:[%s15319_s11 + $0x1998] sm:$0xff] %vm9487_vm1, %v8464_v46  ;;  %9794 = vst.msk [vmem:[%s15319_s11 + $0x990] sm:$0xff] %vm9487_vm1, %v5899_v49  ;;  %v13531_v55 = vpop.f32.mrb[52].mxu0  ;;  %v1131_v49 = vld [vmem:[%s14872_s8 + $0x1d48] sm:$0xff] }
 0x357   : > { %10306 = vst.msk [vmem:[%s15319_s11 + $0x1990] sm:$0xff] %vm9487_vm1, %v8459_v50  ;;  %v14299_v56 = vpop.f32.mrb[52].mxu1  ;;  %v5914_v57 = vadd.f32 %v17899_v7, %v13531_v55  ;;  %v5908_v59 = vpop.f32.mrb[53].mxu0  ;;  %13689 = vmatmul.mubr.msk.f32.gmra.mrb[158].mxu0 %vm1229_vm0, %v609_v51  ;;  %v620_v50 = vld [vmem:[%s14872_s8 + $0xd50] sm:$0xff] }
 0x358   : > { %v8474_v58 = vadd.f32 %v17899_v7, %v14299_v56  ;;  %v8468_v60 = vpop.f32.mrb[53].mxu1  ;;  %14457 = vmatmul.mubr.msk.f32.gmra.mrb[158].mxu1 %vm1229_vm0, %v1121_v52  ;;  %v5909_v61 = vadd.f32 %v17899_v7, %v5908_v59  ;;  %13691 = vmatprep.mubr.msk.f32.mxu0 %vm1229_vm0, %v610_v53  ;;  %v1132_v51 = vld [vmem:[%s14872_s8 + $0x1d50] sm:$0xff] }
 0x359   : > { %v8469_v62 = vadd.f32 %v17899_v7, %v8468_v60  ;;  %14459 = vmatprep.mubr.msk.f32.mxu1 %vm1229_vm0, %v1122_v54  ;;  %9797 = vst.msk [vmem:[%s15319_s11 + $0x9a8] sm:$0xff] %vm9487_vm1, %v5914_v57  ;;  %v621_v60 = vld [vmem:[%s14872_s8 + $0xd58] sm:$0xff] }
 0x35a   : > { %10309 = vst.msk [vmem:[%s15319_s11 + $0x19a8] sm:$0xff] %vm9487_vm1, %v8474_v58  ;;  %9796 = vst.msk [vmem:[%s15319_s11 + $0x9a0] sm:$0xff] %vm9487_vm1, %v5909_v61  ;;  %v13534_v7 = vpop.f32.mrb[54].mxu0  ;;  %v1133_v61 = vld [vmem:[%s14872_s8 + $0x1d58] sm:$0xff] }
 0x35b   : > { %10308 = vst.msk [vmem:[%s15319_s11 + $0x19a0] sm:$0xff] %vm9487_vm1, %v8469_v62  ;;  %v14302_v3 = vpop.f32.mrb[54].mxu1  ;;  %v5924_v5 = vadd.f32 %v18421_v4, %v13534_v7  ;;  %v5918_v6 = vpop.f32.mrb[55].mxu0  ;;  %13692 = vmatmul.mubr.msk.f32.gmra.mrb[160].mxu0 %vm1229_vm0, %v611_v63  ;;  %v622_v62 = vld [vmem:[%s14872_s8 + $0xd60] sm:$0xff] }
 0x35c   : > { %v8484_v10 = vadd.f32 %v18421_v4, %v14302_v3  ;;  %v8478_v8 = vpop.f32.mrb[55].mxu1  ;;  %14460 = vmatmul.mubr.msk.f32.gmra.mrb[160].mxu1 %vm1229_vm0, %v1123_v0  ;;  %v5919_v13 = vadd.f32 %v18421_v4, %v5918_v6  ;;  %13694 = vmatprep.mubr.msk.f32.mxu0 %vm1229_vm0, %v612_v1  ;;  %v1134_v63 = vld [vmem:[%s14872_s8 + $0x1d60] sm:$0xff] }
 0x35d   : > { %v8479_v9 = vadd.f32 %v18421_v4, %v8478_v8  ;;  %14462 = vmatprep.mubr.msk.f32.mxu1 %vm1229_vm0, %v1124_v2  ;;  %9799 = vst.msk [vmem:[%s15319_s11 + $0x9b8] sm:$0xff] %vm9487_vm1, %v5924_v5  ;;  %v623_v8 = vld [vmem:[%s14872_s8 + $0xd68] sm:$0xff] }
 0x35e   : > { %10311 = vst.msk [vmem:[%s15319_s11 + $0x19b8] sm:$0xff] %vm9487_vm1, %v8484_v10  ;;  %9798 = vst.msk [vmem:[%s15319_s11 + $0x9b0] sm:$0xff] %vm9487_vm1, %v5919_v13  ;;  %v13537_v21 = vpop.f32.mrb[56].mxu0  ;;  %v1135_v13 = vld [vmem:[%s14872_s8 + $0x1d68] sm:$0xff] }
 0x35f   : > { %10310 = vst.msk [vmem:[%s15319_s11 + $0x19b0] sm:$0xff] %vm9487_vm1, %v8479_v9  ;;  %v14305_v15 = vpop.f32.mrb[56].mxu1  ;;  %v5934_v17 = vadd.f32 %v18421_v4, %v13537_v21  ;;  %v5928_v19 = vpop.f32.mrb[57].mxu0  ;;  %13695 = vmatmul.mubr.msk.f32.gmra.mrb[162].mxu0 %vm1229_vm0, %v613_v11  ;;  %v624_v9 = vld [vmem:[%s14872_s8 + $0xd70] sm:$0xff] }
 0x360   : > { %v8494_v18 = vadd.f32 %v18421_v4, %v14305_v15  ;;  %v8488_v20 = vpop.f32.mrb[57].mxu1  ;;  %14463 = vmatmul.mubr.msk.f32.gmra.mrb[162].mxu1 %vm1229_vm0, %v1125_v16  ;;  %v5929_v22 = vadd.f32 %v18421_v4, %v5928_v19  ;;  %13697 = vmatprep.mubr.msk.f32.mxu0 %vm1229_vm0, %v614_v12  ;;  %v1136_v11 = vld [vmem:[%s14872_s8 + $0x1d70] sm:$0xff] }
 0x361   : > { %v8489_v23 = vadd.f32 %v18421_v4, %v8488_v20  ;;  %14465 = vmatprep.mubr.msk.f32.mxu1 %vm1229_vm0, %v1126_v14  ;;  %9801 = vst.msk [vmem:[%s15319_s11 + $0x9c8] sm:$0xff] %vm9487_vm1, %v5934_v17  ;;  %v625_v20 = vld [vmem:[%s14872_s8 + $0xd78] sm:$0xff] }
 0x362   : > { %10313 = vst.msk [vmem:[%s15319_s11 + $0x19c8] sm:$0xff] %vm9487_vm1, %v8494_v18  ;;  %9800 = vst.msk [vmem:[%s15319_s11 + $0x9c0] sm:$0xff] %vm9487_vm1, %v5929_v22  ;;  %v13540_v27 = vpop.f32.mrb[58].mxu0  ;;  %v1137_v22 = vld [vmem:[%s14872_s8 + $0x1d78] sm:$0xff] }
 0x363   : > { %10312 = vst.msk [vmem:[%s15319_s11 + $0x19c0] sm:$0xff] %vm9487_vm1, %v8489_v23  ;;  %v14308_v28 = vpop.f32.mrb[58].mxu1  ;;  %v5944_v30 = vadd.f32 %v18421_v4, %v13540_v27  ;;  %v5938_v32 = vpop.f32.mrb[59].mxu0  ;;  %13698 = vmatmul.mubr.msk.f32.gmra.mrb[164].mxu0 %vm1229_vm0, %v615_v24  ;;  %v626_v23 = vld [vmem:[%s14872_s8 + $0xd80] sm:$0xff] }
 0x364   : > { %v8504_v31 = vadd.f32 %v18421_v4, %v14308_v28  ;;  %v8498_v33 = vpop.f32.mrb[59].mxu1  ;;  %14466 = vmatmul.mubr.msk.f32.gmra.mrb[164].mxu1 %vm1229_vm0, %v1127_v25  ;;  %v5939_v34 = vadd.f32 %v18421_v4, %v5938_v32  ;;  %13700 = vmatprep.mubr.msk.f32.mxu0 %vm1229_vm0, %v616_v26  ;;  %v1138_v24 = vld [vmem:[%s14872_s8 + $0x1d80] sm:$0xff] }
 0x365   : > { %v8499_v35 = vadd.f32 %v18421_v4, %v8498_v33  ;;  %14468 = vmatprep.mubr.msk.f32.mxu1 %vm1229_vm0, %v1128_v29  ;;  %9803 = vst.msk [vmem:[%s15319_s11 + $0x9d8] sm:$0xff] %vm9487_vm1, %v5944_v30  ;;  %v627_v33 = vld [vmem:[%s14872_s8 + $0xd88] sm:$0xff] }
 0x366   : > { %10315 = vst.msk [vmem:[%s15319_s11 + $0x19d8] sm:$0xff] %vm9487_vm1, %v8504_v31  ;;  %9802 = vst.msk [vmem:[%s15319_s11 + $0x9d0] sm:$0xff] %vm9487_vm1, %v5939_v34  ;;  %v13543_v40 = vpop.f32.mrb[60].mxu0  ;;  %v1139_v34 = vld [vmem:[%s14872_s8 + $0x1d88] sm:$0xff] }
 0x367   : > { %10314 = vst.msk [vmem:[%s15319_s11 + $0x19d0] sm:$0xff] %vm9487_vm1, %v8499_v35  ;;  %v14311_v41 = vpop.f32.mrb[60].mxu1  ;;  %v5954_v42 = vadd.f32 %v18421_v4, %v13543_v40  ;;  %v5948_v44 = vpop.f32.mrb[61].mxu0  ;;  %13701 = vmatmul.mubr.msk.f32.gmra.mrb[166].mxu0 %vm1229_vm0, %v617_v36  ;;  %v628_v35 = vld [vmem:[%s14872_s8 + $0xd90] sm:$0xff] }
 0x368   : > { %v8514_v43 = vadd.f32 %v18421_v4, %v14311_v41  ;;  %v8508_v45 = vpop.f32.mrb[61].mxu1  ;;  %14469 = vmatmul.mubr.msk.f32.gmra.mrb[166].mxu1 %vm1229_vm0, %v1129_v37  ;;  %v5949_v46 = vadd.f32 %v18421_v4, %v5948_v44  ;;  %13703 = vmatprep.mubr.msk.f32.mxu0 %vm1229_vm0, %v618_v38  ;;  %v1140_v36 = vld [vmem:[%s14872_s8 + $0x1d90] sm:$0xff] }
 0x369   : > { %v8509_v47 = vadd.f32 %v18421_v4, %v8508_v45  ;;  %14471 = vmatprep.mubr.msk.f32.mxu1 %vm1229_vm0, %v1130_v39  ;;  %9805 = vst.msk [vmem:[%s15319_s11 + $0x9e8] sm:$0xff] %vm9487_vm1, %v5954_v42  ;;  %v629_v45 = vld [vmem:[%s14872_s8 + $0xd98] sm:$0xff] }
 0x36a   : > { %10317 = vst.msk [vmem:[%s15319_s11 + $0x19e8] sm:$0xff] %vm9487_vm1, %v8514_v43  ;;  %9804 = vst.msk [vmem:[%s15319_s11 + $0x9e0] sm:$0xff] %vm9487_vm1, %v5949_v46  ;;  %v13546_v52 = vpop.f32.mrb[62].mxu0  ;;  %v1141_v46 = vld [vmem:[%s14872_s8 + $0x1d98] sm:$0xff] }
 0x36b   : > { %10316 = vst.msk [vmem:[%s15319_s11 + $0x19e0] sm:$0xff] %vm9487_vm1, %v8509_v47  ;;  %v14314_v53 = vpop.f32.mrb[62].mxu1  ;;  %v5964_v54 = vadd.f32 %v18421_v4, %v13546_v52  ;;  %v5958_v56 = vpop.f32.mrb[63].mxu0  ;;  %13704 = vmatmul.mubr.msk.f32.gmra.mrb[168].mxu0 %vm1229_vm0, %v619_v48  ;;  %v630_v47 = vld [vmem:[%s14872_s8 + $0xda0] sm:$0xff] }
 0x36c   : > { %v8524_v55 = vadd.f32 %v18421_v4, %v14314_v53  ;;  %v8518_v57 = vpop.f32.mrb[63].mxu1  ;;  %14472 = vmatmul.mubr.msk.f32.gmra.mrb[168].mxu1 %vm1229_vm0, %v1131_v49  ;;  %v5959_v58 = vadd.f32 %v18421_v4, %v5958_v56  ;;  %13706 = vmatprep.mubr.msk.f32.mxu0 %vm1229_vm0, %v620_v50  ;;  %v1142_v48 = vld [vmem:[%s14872_s8 + $0x1da0] sm:$0xff] }
 0x36d   : > { %v8519_v59 = vadd.f32 %v18421_v4, %v8518_v57  ;;  %14474 = vmatprep.mubr.msk.f32.mxu1 %vm1229_vm0, %v1132_v51  ;;  %9807 = vst.msk [vmem:[%s15319_s11 + $0x9f8] sm:$0xff] %vm9487_vm1, %v5964_v54  ;;  %v631_v57 = vld [vmem:[%s14872_s8 + $0xda8] sm:$0xff] }
 0x36e   : > { %10319 = vst.msk [vmem:[%s15319_s11 + $0x19f8] sm:$0xff] %vm9487_vm1, %v8524_v55  ;;  %9806 = vst.msk [vmem:[%s15319_s11 + $0x9f0] sm:$0xff] %vm9487_vm1, %v5959_v58  ;;  %v13549_v0 = vpop.f32.mrb[64].mxu0  ;;  %v1143_v58 = vld [vmem:[%s14872_s8 + $0x1da8] sm:$0xff] }
 0x36f   : > { %10318 = vst.msk [vmem:[%s15319_s11 + $0x19f0] sm:$0xff] %vm9487_vm1, %v8519_v59  ;;  %v14317_v1 = vpop.f32.mrb[64].mxu1  ;;  %v5974_v2 = vadd.f32 %v18421_v4, %v13549_v0  ;;  %v5968_v3 = vpop.f32.mrb[65].mxu0  ;;  %13707 = vmatmul.mubr.msk.f32.gmra.mrb[170].mxu0 %vm1229_vm0, %v621_v60  ;;  %v632_v59 = vld [vmem:[%s14872_s8 + $0xdb0] sm:$0xff] }
 0x370   : > { %v8534_v7 = vadd.f32 %v18421_v4, %v14317_v1  ;;  %v8528_v5 = vpop.f32.mrb[65].mxu1  ;;  %14475 = vmatmul.mubr.msk.f32.gmra.mrb[170].mxu1 %vm1229_vm0, %v1133_v61  ;;  %v5969_v10 = vadd.f32 %v18421_v4, %v5968_v3  ;;  %13709 = vmatprep.mubr.msk.f32.mxu0 %vm1229_vm0, %v622_v62  ;;  %v1144_v60 = vld [vmem:[%s14872_s8 + $0x1db0] sm:$0xff] }
 0x371   : > { %v8529_v6 = vadd.f32 %v18421_v4, %v8528_v5  ;;  %14477 = vmatprep.mubr.msk.f32.mxu1 %vm1229_vm0, %v1134_v63  ;;  %9809 = vst.msk [vmem:[%s15319_s11 + $0xa08] sm:$0xff] %vm9487_vm1, %v5974_v2  ;;  %v633_v5 = vld [vmem:[%s14872_s8 + $0xdb8] sm:$0xff] }
 0x372   : > { %10321 = vst.msk [vmem:[%s15319_s11 + $0x1a08] sm:$0xff] %vm9487_vm1, %v8534_v7  ;;  %9808 = vst.msk [vmem:[%s15319_s11 + $0xa00] sm:$0xff] %vm9487_vm1, %v5969_v10  ;;  %v13552_v16 = vpop.f32.mrb[66].mxu0  ;;  %v1145_v10 = vld [vmem:[%s14872_s8 + $0x1db8] sm:$0xff] }
 0x373   : > { %10320 = vst.msk [vmem:[%s15319_s11 + $0x1a00] sm:$0xff] %vm9487_vm1, %v8529_v6  ;;  %v14320_v12 = vpop.f32.mrb[66].mxu1  ;;  %v5984_v14 = vadd.f32 %v18421_v4, %v13552_v16  ;;  %v5978_v15 = vpop.f32.mrb[67].mxu0  ;;  %13710 = vmatmul.mubr.msk.f32.gmra.mrb[172].mxu0 %vm1229_vm0, %v623_v8  ;;  %v634_v6 = vld [vmem:[%s14872_s8 + $0xdc0] sm:$0xff] }
 0x374   : > { %v8544_v21 = vadd.f32 %v18421_v4, %v14320_v12  ;;  %v8538_v17 = vpop.f32.mrb[67].mxu1  ;;  %14478 = vmatmul.mubr.msk.f32.gmra.mrb[172].mxu1 %vm1229_vm0, %v1135_v13  ;;  %v5979_v18 = vadd.f32 %v18421_v4, %v5978_v15  ;;  %13712 = vmatprep.mubr.msk.f32.mxu0 %vm1229_vm0, %v624_v9  ;;  %v1146_v8 = vld [vmem:[%s14872_s8 + $0x1dc0] sm:$0xff] }
 0x375   : > { %v8539_v19 = vadd.f32 %v18421_v4, %v8538_v17  ;;  %14480 = vmatprep.mubr.msk.f32.mxu1 %vm1229_vm0, %v1136_v11  ;;  %9811 = vst.msk [vmem:[%s15319_s11 + $0xa18] sm:$0xff] %vm9487_vm1, %v5984_v14  ;;  %v635_v17 = vld [vmem:[%s14872_s8 + $0xdc8] sm:$0xff] }
 0x376   : > { %10323 = vst.msk [vmem:[%s15319_s11 + $0x1a18] sm:$0xff] %vm9487_vm1, %v8544_v21  ;;  %9810 = vst.msk [vmem:[%s15319_s11 + $0xa10] sm:$0xff] %vm9487_vm1, %v5979_v18  ;;  %v13555_v25 = vpop.f32.mrb[68].mxu0  ;;  %v1147_v18 = vld [vmem:[%s14872_s8 + $0x1dc8] sm:$0xff] }
 0x377   : > { %10322 = vst.msk [vmem:[%s15319_s11 + $0x1a10] sm:$0xff] %vm9487_vm1, %v8539_v19  ;;  %v14323_v26 = vpop.f32.mrb[68].mxu1  ;;  %v5994_v29 = vadd.f32 %v18421_v4, %v13555_v25  ;;  %v5988_v28 = vpop.f32.mrb[69].mxu0  ;;  %13713 = vmatmul.mubr.msk.f32.gmra.mrb[174].mxu0 %vm1229_vm0, %v625_v20  ;;  %v636_v19 = vld [vmem:[%s14872_s8 + $0xdd0] sm:$0xff] }
 0x378   : > { %v8554_v27 = vadd.f32 %v18421_v4, %v14323_v26  ;;  %v8548_v30 = vpop.f32.mrb[69].mxu1  ;;  %14481 = vmatmul.mubr.msk.f32.gmra.mrb[174].mxu1 %vm1229_vm0, %v1137_v22  ;;  %v5989_v31 = vadd.f32 %v18421_v4, %v5988_v28  ;;  %13715 = vmatprep.mubr.msk.f32.mxu0 %vm1229_vm0, %v626_v23  ;;  %v1148_v20 = vld [vmem:[%s14872_s8 + $0x1dd0] sm:$0xff] }
 0x379   : > { %v8549_v32 = vadd.f32 %v18421_v4, %v8548_v30  ;;  %14483 = vmatprep.mubr.msk.f32.mxu1 %vm1229_vm0, %v1138_v24  ;;  %9813 = vst.msk [vmem:[%s15319_s11 + $0xa28] sm:$0xff] %vm9487_vm1, %v5994_v29  ;;  %v637_v30 = vld [vmem:[%s14872_s8 + $0xdd8] sm:$0xff] }
 0x37a   : > { %10325 = vst.msk [vmem:[%s15319_s11 + $0x1a28] sm:$0xff] %vm9487_vm1, %v8554_v27  ;;  %9812 = vst.msk [vmem:[%s15319_s11 + $0xa20] sm:$0xff] %vm9487_vm1, %v5989_v31  ;;  %v13558_v37 = vpop.f32.mrb[70].mxu0  ;;  %v1149_v31 = vld [vmem:[%s14872_s8 + $0x1dd8] sm:$0xff] }
 0x37b   : > { %10324 = vst.msk [vmem:[%s15319_s11 + $0x1a20] sm:$0xff] %vm9487_vm1, %v8549_v32  ;;  %v14326_v38 = vpop.f32.mrb[70].mxu1  ;;  %v6004_v39 = vadd.f32 %v18421_v4, %v13558_v37  ;;  %v5998_v41 = vpop.f32.mrb[71].mxu0  ;;  %13716 = vmatmul.mubr.msk.f32.gmra.mrb[176].mxu0 %vm1229_vm0, %v627_v33  ;;  %v638_v32 = vld [vmem:[%s14872_s8 + $0xde0] sm:$0xff] }
 0x37c   : > { %v8564_v40 = vadd.f32 %v18421_v4, %v14326_v38  ;;  %v8558_v42 = vpop.f32.mrb[71].mxu1  ;;  %14484 = vmatmul.mubr.msk.f32.gmra.mrb[176].mxu1 %vm1229_vm0, %v1139_v34  ;;  %v5999_v43 = vadd.f32 %v18421_v4, %v5998_v41  ;;  %13718 = vmatprep.mubr.msk.f32.mxu0 %vm1229_vm0, %v628_v35  ;;  %v1150_v33 = vld [vmem:[%s14872_s8 + $0x1de0] sm:$0xff] }
 0x37d   : > { %v8559_v44 = vadd.f32 %v18421_v4, %v8558_v42  ;;  %14486 = vmatprep.mubr.msk.f32.mxu1 %vm1229_vm0, %v1140_v36  ;;  %9815 = vst.msk [vmem:[%s15319_s11 + $0xa38] sm:$0xff] %vm9487_vm1, %v6004_v39  ;;  %v639_v42 = vld [vmem:[%s14872_s8 + $0xde8] sm:$0xff] }
 0x37e   : > { %10327 = vst.msk [vmem:[%s15319_s11 + $0x1a38] sm:$0xff] %vm9487_vm1, %v8564_v40  ;;  %9814 = vst.msk [vmem:[%s15319_s11 + $0xa30] sm:$0xff] %vm9487_vm1, %v5999_v43  ;;  %v13561_v49 = vpop.f32.mrb[72].mxu0  ;;  %v1151_v43 = vld [vmem:[%s14872_s8 + $0x1de8] sm:$0xff] }
 0x37f   : > { %10326 = vst.msk [vmem:[%s15319_s11 + $0x1a30] sm:$0xff] %vm9487_vm1, %v8559_v44  ;;  %v14329_v50 = vpop.f32.mrb[72].mxu1  ;;  %v6014_v51 = vadd.f32 %v18421_v4, %v13561_v49  ;;  %v6008_v53 = vpop.f32.mrb[73].mxu0  ;;  %13719 = vmatmul.mubr.msk.f32.gmra.mrb[178].mxu0 %vm1229_vm0, %v629_v45  ;;  %v640_v44 = vld [vmem:[%s14872_s8 + $0xdf0] sm:$0xff] }
 0x380   : > { %v8574_v52 = vadd.f32 %v18421_v4, %v14329_v50  ;;  %v8568_v54 = vpop.f32.mrb[73].mxu1  ;;  %14487 = vmatmul.mubr.msk.f32.gmra.mrb[178].mxu1 %vm1229_vm0, %v1141_v46  ;;  %v6009_v55 = vadd.f32 %v18421_v4, %v6008_v53  ;;  %13721 = vmatprep.mubr.msk.f32.mxu0 %vm1229_vm0, %v630_v47  ;;  %v1152_v45 = vld [vmem:[%s14872_s8 + $0x1df0] sm:$0xff] }
 0x381   : > { %v8569_v56 = vadd.f32 %v18421_v4, %v8568_v54  ;;  %14489 = vmatprep.mubr.msk.f32.mxu1 %vm1229_vm0, %v1142_v48  ;;  %9817 = vst.msk [vmem:[%s15319_s11 + $0xa48] sm:$0xff] %vm9487_vm1, %v6014_v51  ;;  %v641_v54 = vld [vmem:[%s14872_s8 + $0xdf8] sm:$0xff] }
 0x382   : > { %10329 = vst.msk [vmem:[%s15319_s11 + $0x1a48] sm:$0xff] %vm9487_vm1, %v8574_v52  ;;  %9816 = vst.msk [vmem:[%s15319_s11 + $0xa40] sm:$0xff] %vm9487_vm1, %v6009_v55  ;;  %v13564_v61 = vpop.f32.mrb[74].mxu0  ;;  %v1153_v55 = vld [vmem:[%s14872_s8 + $0x1df8] sm:$0xff] }
 0x383   : > { %10328 = vst.msk [vmem:[%s15319_s11 + $0x1a40] sm:$0xff] %vm9487_vm1, %v8569_v56  ;;  %v14332_v62 = vpop.f32.mrb[74].mxu1  ;;  %v6024_v63 = vadd.f32 %v18421_v4, %v13564_v61  ;;  %v6018_v1 = vpop.f32.mrb[75].mxu0  ;;  %13722 = vmatmul.mubr.msk.f32.gmra.mrb[180].mxu0 %vm1229_vm0, %v631_v57  ;;  %v642_v56 = vld [vmem:[%s14872_s8 + $0xe00] sm:$0xff] }
 0x384   : > { %v8584_v0 = vadd.f32 %v18421_v4, %v14332_v62  ;;  %v8578_v2 = vpop.f32.mrb[75].mxu1  ;;  %14490 = vmatmul.mubr.msk.f32.gmra.mrb[180].mxu1 %vm1229_vm0, %v1143_v58  ;;  %v6019_v7 = vadd.f32 %v18421_v4, %v6018_v1  ;;  %13724 = vmatprep.mubr.msk.f32.mxu0 %vm1229_vm0, %v632_v59  ;;  %v1154_v57 = vld [vmem:[%s14872_s8 + $0x1e00] sm:$0xff] }
 0x385   : > { %v8579_v3 = vadd.f32 %v18421_v4, %v8578_v2  ;;  %14492 = vmatprep.mubr.msk.f32.mxu1 %vm1229_vm0, %v1144_v60  ;;  %9819 = vst.msk [vmem:[%s15319_s11 + $0xa58] sm:$0xff] %vm9487_vm1, %v6024_v63  ;;  %v643_v2 = vld [vmem:[%s14872_s8 + $0xe08] sm:$0xff] }
 0x386   : > { %10331 = vst.msk [vmem:[%s15319_s11 + $0x1a58] sm:$0xff] %vm9487_vm1, %v8584_v0  ;;  %9818 = vst.msk [vmem:[%s15319_s11 + $0xa50] sm:$0xff] %vm9487_vm1, %v6019_v7  ;;  %v13567_v13 = vpop.f32.mrb[76].mxu0  ;;  %v1155_v7 = vld [vmem:[%s14872_s8 + $0x1e08] sm:$0xff] }
 0x387   : > { %10330 = vst.msk [vmem:[%s15319_s11 + $0x1a50] sm:$0xff] %vm9487_vm1, %v8579_v3  ;;  %v14335_v9 = vpop.f32.mrb[76].mxu1  ;;  %v6034_v11 = vadd.f32 %v18421_v4, %v13567_v13  ;;  %v6028_v12 = vpop.f32.mrb[77].mxu0  ;;  %13725 = vmatmul.mubr.msk.f32.gmra.mrb[182].mxu0 %vm1229_vm0, %v633_v5  ;;  %v644_v3 = vld [vmem:[%s14872_s8 + $0xe10] sm:$0xff] }
 0x388   : > { %v8594_v16 = vadd.f32 %v18421_v4, %v14335_v9  ;;  %v8588_v14 = vpop.f32.mrb[77].mxu1  ;;  %14493 = vmatmul.mubr.msk.f32.gmra.mrb[182].mxu1 %vm1229_vm0, %v1145_v10  ;;  %v6029_v21 = vadd.f32 %v18421_v4, %v6028_v12  ;;  %13727 = vmatprep.mubr.msk.f32.mxu0 %vm1229_vm0, %v634_v6  ;;  %v1156_v5 = vld [vmem:[%s14872_s8 + $0x1e10] sm:$0xff] }
 0x389   : > { %v8589_v15 = vadd.f32 %v18421_v4, %v8588_v14  ;;  %14495 = vmatprep.mubr.msk.f32.mxu1 %vm1229_vm0, %v1146_v8  ;;  %9821 = vst.msk [vmem:[%s15319_s11 + $0xa68] sm:$0xff] %vm9487_vm1, %v6034_v11  ;;  %v645_v14 = vld [vmem:[%s14872_s8 + $0xe18] sm:$0xff] }
 0x38a   : > { %10333 = vst.msk [vmem:[%s15319_s11 + $0x1a68] sm:$0xff] %vm9487_vm1, %v8594_v16  ;;  %9820 = vst.msk [vmem:[%s15319_s11 + $0xa60] sm:$0xff] %vm9487_vm1, %v6029_v21  ;;  %v13570_v22 = vpop.f32.mrb[78].mxu0  ;;  %v1157_v21 = vld [vmem:[%s14872_s8 + $0x1e18] sm:$0xff] }
 0x38b   : > { %10332 = vst.msk [vmem:[%s15319_s11 + $0x1a60] sm:$0xff] %vm9487_vm1, %v8589_v15  ;;  %v14338_v23 = vpop.f32.mrb[78].mxu1  ;;  %v6044_v24 = vadd.f32 %v18421_v4, %v13570_v22  ;;  %v6038_v26 = vpop.f32.mrb[79].mxu0  ;;  %13728 = vmatmul.mubr.msk.f32.gmra.mrb[184].mxu0 %vm1229_vm0, %v635_v17  ;;  %v646_v15 = vld [vmem:[%s14872_s8 + $0xe20] sm:$0xff] }
 0x38c   : > { %v8604_v25 = vadd.f32 %v18421_v4, %v14338_v23  ;;  %v8598_v29 = vpop.f32.mrb[79].mxu1  ;;  %14496 = vmatmul.mubr.msk.f32.gmra.mrb[184].mxu1 %vm1229_vm0, %v1147_v18  ;;  %v6039_v27 = vadd.f32 %v18421_v4, %v6038_v26  ;;  %13730 = vmatprep.mubr.msk.f32.mxu0 %vm1229_vm0, %v636_v19  ;;  %v1158_v17 = vld [vmem:[%s14872_s8 + $0x1e20] sm:$0xff] }
 0x38d   : > { %v8599_v28 = vadd.f32 %v18421_v4, %v8598_v29  ;;  %14498 = vmatprep.mubr.msk.f32.mxu1 %vm1229_vm0, %v1148_v20  ;;  %9823 = vst.msk [vmem:[%s15319_s11 + $0xa78] sm:$0xff] %vm9487_vm1, %v6044_v24  ;;  %v647_v29 = vld [vmem:[%s14872_s8 + $0xe28] sm:$0xff] }
 0x38e   : > { %10335 = vst.msk [vmem:[%s15319_s11 + $0x1a78] sm:$0xff] %vm9487_vm1, %v8604_v25  ;;  %9822 = vst.msk [vmem:[%s15319_s11 + $0xa70] sm:$0xff] %vm9487_vm1, %v6039_v27  ;;  %v13573_v34 = vpop.f32.mrb[80].mxu0  ;;  %v1159_v27 = vld [vmem:[%s14872_s8 + $0x1e28] sm:$0xff] }
 0x38f   : > { %10334 = vst.msk [vmem:[%s15319_s11 + $0x1a70] sm:$0xff] %vm9487_vm1, %v8599_v28  ;;  %v14341_v35 = vpop.f32.mrb[80].mxu1  ;;  %v6054_v36 = vadd.f32 %v18421_v4, %v13573_v34  ;;  %v6048_v38 = vpop.f32.mrb[81].mxu0  ;;  %13731 = vmatmul.mubr.msk.f32.gmra.mrb[186].mxu0 %vm1229_vm0, %v637_v30  ;;  %v648_v28 = vld [vmem:[%s14872_s8 + $0xe30] sm:$0xff] }
 0x390   : > { %v8614_v37 = vadd.f32 %v18421_v4, %v14341_v35  ;;  %v8608_v39 = vpop.f32.mrb[81].mxu1  ;;  %14499 = vmatmul.mubr.msk.f32.gmra.mrb[186].mxu1 %vm1229_vm0, %v1149_v31  ;;  %v6049_v40 = vadd.f32 %v18421_v4, %v6048_v38  ;;  %13733 = vmatprep.mubr.msk.f32.mxu0 %vm1229_vm0, %v638_v32  ;;  %v1160_v30 = vld [vmem:[%s14872_s8 + $0x1e30] sm:$0xff] }
 0x391   : > { %v8609_v41 = vadd.f32 %v18421_v4, %v8608_v39  ;;  %14501 = vmatprep.mubr.msk.f32.mxu1 %vm1229_vm0, %v1150_v33  ;;  %9825 = vst.msk [vmem:[%s15319_s11 + $0xa88] sm:$0xff] %vm9487_vm1, %v6054_v36  ;;  %v649_v39 = vld [vmem:[%s14872_s8 + $0xe38] sm:$0xff] }
 0x392   : > { %10337 = vst.msk [vmem:[%s15319_s11 + $0x1a88] sm:$0xff] %vm9487_vm1, %v8614_v37  ;;  %9824 = vst.msk [vmem:[%s15319_s11 + $0xa80] sm:$0xff] %vm9487_vm1, %v6049_v40  ;;  %v13576_v46 = vpop.f32.mrb[82].mxu0  ;;  %v1161_v40 = vld [vmem:[%s14872_s8 + $0x1e38] sm:$0xff] }
 0x393   : > { %10336 = vst.msk [vmem:[%s15319_s11 + $0x1a80] sm:$0xff] %vm9487_vm1, %v8609_v41  ;;  %v14344_v47 = vpop.f32.mrb[82].mxu1  ;;  %v6064_v48 = vadd.f32 %v18421_v4, %v13576_v46  ;;  %v6058_v50 = vpop.f32.mrb[83].mxu0  ;;  %13734 = vmatmul.mubr.msk.f32.gmra.mrb[188].mxu0 %vm1229_vm0, %v639_v42  ;;  %v650_v41 = vld [vmem:[%s14872_s8 + $0xe40] sm:$0xff] }
 0x394   : > { %v8624_v49 = vadd.f32 %v18421_v4, %v14344_v47  ;;  %v8618_v51 = vpop.f32.mrb[83].mxu1  ;;  %14502 = vmatmul.mubr.msk.f32.gmra.mrb[188].mxu1 %vm1229_vm0, %v1151_v43  ;;  %v6059_v52 = vadd.f32 %v18421_v4, %v6058_v50  ;;  %13736 = vmatprep.mubr.msk.f32.mxu0 %vm1229_vm0, %v640_v44  ;;  %v1162_v42 = vld [vmem:[%s14872_s8 + $0x1e40] sm:$0xff] }
 0x395   : > { %v8619_v53 = vadd.f32 %v18421_v4, %v8618_v51  ;;  %14504 = vmatprep.mubr.msk.f32.mxu1 %vm1229_vm0, %v1152_v45  ;;  %9827 = vst.msk [vmem:[%s15319_s11 + $0xa98] sm:$0xff] %vm9487_vm1, %v6064_v48  ;;  %v651_v51 = vld [vmem:[%s14872_s8 + $0xe48] sm:$0xff] }
 0x396   : > { %10339 = vst.msk [vmem:[%s15319_s11 + $0x1a98] sm:$0xff] %vm9487_vm1, %v8624_v49  ;;  %9826 = vst.msk [vmem:[%s15319_s11 + $0xa90] sm:$0xff] %vm9487_vm1, %v6059_v52  ;;  %v13579_v58 = vpop.f32.mrb[84].mxu0  ;;  %v1163_v52 = vld [vmem:[%s14872_s8 + $0x1e48] sm:$0xff] }
 0x397   : > { %10338 = vst.msk [vmem:[%s15319_s11 + $0x1a90] sm:$0xff] %vm9487_vm1, %v8619_v53  ;;  %v14347_v59 = vpop.f32.mrb[84].mxu1  ;;  %v6074_v60 = vadd.f32 %v18421_v4, %v13579_v58  ;;  %v6068_v62 = vpop.f32.mrb[85].mxu0  ;;  %13737 = vmatmul.mubr.msk.f32.gmra.mrb[190].mxu0 %vm1229_vm0, %v641_v54  ;;  %v652_v53 = vld [vmem:[%s14872_s8 + $0xe50] sm:$0xff] }
 0x398   : > { %v8634_v61 = vadd.f32 %v18421_v4, %v14347_v59  ;;  %v8628_v63 = vpop.f32.mrb[85].mxu1  ;;  %14505 = vmatmul.mubr.msk.f32.gmra.mrb[190].mxu1 %vm1229_vm0, %v1153_v55  ;;  %v6069_v0 = vadd.f32 %v18421_v4, %v6068_v62  ;;  %13739 = vmatprep.mubr.msk.f32.mxu0 %vm1229_vm0, %v642_v56  ;;  %v1164_v54 = vld [vmem:[%s14872_s8 + $0x1e50] sm:$0xff] }
 0x399   : > { %v8629_v1 = vadd.f32 %v18421_v4, %v8628_v63  ;;  %14507 = vmatprep.mubr.msk.f32.mxu1 %vm1229_vm0, %v1154_v57  ;;  %9829 = vst.msk [vmem:[%s15319_s11 + $0xaa8] sm:$0xff] %vm9487_vm1, %v6074_v60  ;;  %v653_v63 = vld [vmem:[%s14872_s8 + $0xe58] sm:$0xff] }
 0x39a   : > { %10341 = vst.msk [vmem:[%s15319_s11 + $0x1aa8] sm:$0xff] %vm9487_vm1, %v8634_v61  ;;  %9828 = vst.msk [vmem:[%s15319_s11 + $0xaa0] sm:$0xff] %vm9487_vm1, %v6069_v0  ;;  %v13582_v10 = vpop.f32.mrb[86].mxu0  ;;  %v1165_v0 = vld [vmem:[%s14872_s8 + $0x1e58] sm:$0xff] }
 0x39b   : > { %10340 = vst.msk [vmem:[%s15319_s11 + $0x1aa0] sm:$0xff] %vm9487_vm1, %v8629_v1  ;;  %v14350_v6 = vpop.f32.mrb[86].mxu1  ;;  %v6084_v8 = vadd.f32 %v18421_v4, %v13582_v10  ;;  %v6078_v9 = vpop.f32.mrb[87].mxu0  ;;  %13740 = vmatmul.mubr.msk.f32.gmra.mrb[192].mxu0 %vm1229_vm0, %v643_v2  ;;  %v654_v1 = vld [vmem:[%s14872_s8 + $0xe60] sm:$0xff] }
 0x39c   : > { %v8644_v13 = vadd.f32 %v18421_v4, %v14350_v6  ;;  %v8638_v11 = vpop.f32.mrb[87].mxu1  ;;  %14508 = vmatmul.mubr.msk.f32.gmra.mrb[192].mxu1 %vm1229_vm0, %v1155_v7  ;;  %v6079_v16 = vadd.f32 %v18421_v4, %v6078_v9  ;;  %13742 = vmatprep.mubr.msk.f32.mxu0 %vm1229_vm0, %v644_v3  ;;  %v1166_v2 = vld [vmem:[%s14872_s8 + $0x1e60] sm:$0xff] }
 0x39d   : > { %v8639_v12 = vadd.f32 %v18421_v4, %v8638_v11  ;;  %14510 = vmatprep.mubr.msk.f32.mxu1 %vm1229_vm0, %v1156_v5  ;;  %9831 = vst.msk [vmem:[%s15319_s11 + $0xab8] sm:$0xff] %vm9487_vm1, %v6084_v8  ;;  %v655_v11 = vld [vmem:[%s14872_s8 + $0xe68] sm:$0xff] }
 0x39e   : > { %10343 = vst.msk [vmem:[%s15319_s11 + $0x1ab8] sm:$0xff] %vm9487_vm1, %v8644_v13  ;;  %9830 = vst.msk [vmem:[%s15319_s11 + $0xab0] sm:$0xff] %vm9487_vm1, %v6079_v16  ;;  %v13585_v18 = vpop.f32.mrb[88].mxu0  ;;  %v1167_v16 = vld [vmem:[%s14872_s8 + $0x1e68] sm:$0xff] }
 0x39f   : > { %10342 = vst.msk [vmem:[%s15319_s11 + $0x1ab0] sm:$0xff] %vm9487_vm1, %v8639_v12  ;;  %v14353_v19 = vpop.f32.mrb[88].mxu1  ;;  %v6094_v20 = vadd.f32 %v18421_v4, %v13585_v18  ;;  %v6088_v23 = vpop.f32.mrb[89].mxu0  ;;  %13743 = vmatmul.mubr.msk.f32.gmra.mrb[194].mxu0 %vm1229_vm0, %v645_v14  ;;  %v656_v12 = vld [vmem:[%s14872_s8 + $0xe70] sm:$0xff] }
 0x3a0   : > { %v8654_v22 = vadd.f32 %v18421_v4, %v14353_v19  ;;  %v8648_v24 = vpop.f32.mrb[89].mxu1  ;;  %14511 = vmatmul.mubr.msk.f32.gmra.mrb[194].mxu1 %vm1229_vm0, %v1157_v21  ;;  %v6089_v25 = vadd.f32 %v18421_v4, %v6088_v23  ;;  %13745 = vmatprep.mubr.msk.f32.mxu0 %vm1229_vm0, %v646_v15  ;;  %v1168_v14 = vld [vmem:[%s14872_s8 + $0x1e70] sm:$0xff] }
 0x3a1   : > { %v8649_v26 = vadd.f32 %v18421_v4, %v8648_v24  ;;  %14513 = vmatprep.mubr.msk.f32.mxu1 %vm1229_vm0, %v1158_v17  ;;  %9833 = vst.msk [vmem:[%s15319_s11 + $0xac8] sm:$0xff] %vm9487_vm1, %v6094_v20  ;;  %v657_v24 = vld [vmem:[%s14872_s8 + $0xe78] sm:$0xff] }
 0x3a2   : > { %10345 = vst.msk [vmem:[%s15319_s11 + $0x1ac8] sm:$0xff] %vm9487_vm1, %v8654_v22  ;;  %9832 = vst.msk [vmem:[%s15319_s11 + $0xac0] sm:$0xff] %vm9487_vm1, %v6089_v25  ;;  %v13588_v31 = vpop.f32.mrb[90].mxu0  ;;  %v1169_v25 = vld [vmem:[%s14872_s8 + $0x1e78] sm:$0xff] }
 0x3a3   : > { %10344 = vst.msk [vmem:[%s15319_s11 + $0x1ac0] sm:$0xff] %vm9487_vm1, %v8649_v26  ;;  %v14356_v32 = vpop.f32.mrb[90].mxu1  ;;  %v6104_v33 = vadd.f32 %v18421_v4, %v13588_v31  ;;  %v6098_v35 = vpop.f32.mrb[91].mxu0  ;;  %13746 = vmatmul.mubr.msk.f32.gmra.mrb[196].mxu0 %vm1229_vm0, %v647_v29  ;;  %v658_v26 = vld [vmem:[%s14872_s8 + $0xe80] sm:$0xff] }
 0x3a4   : > { %v8664_v34 = vadd.f32 %v18421_v4, %v14356_v32  ;;  %v8658_v36 = vpop.f32.mrb[91].mxu1  ;;  %14514 = vmatmul.mubr.msk.f32.gmra.mrb[196].mxu1 %vm1229_vm0, %v1159_v27  ;;  %v6099_v37 = vadd.f32 %v18421_v4, %v6098_v35  ;;  %13748 = vmatprep.mubr.msk.f32.mxu0 %vm1229_vm0, %v648_v28  ;;  %v1170_v29 = vld [vmem:[%s14872_s8 + $0x1e80] sm:$0xff] }
 0x3a5   : > { %v8659_v38 = vadd.f32 %v18421_v4, %v8658_v36  ;;  %14516 = vmatprep.mubr.msk.f32.mxu1 %vm1229_vm0, %v1160_v30  ;;  %9835 = vst.msk [vmem:[%s15319_s11 + $0xad8] sm:$0xff] %vm9487_vm1, %v6104_v33  ;;  %v659_v36 = vld [vmem:[%s14872_s8 + $0xe88] sm:$0xff] }
 0x3a6   : > { %10347 = vst.msk [vmem:[%s15319_s11 + $0x1ad8] sm:$0xff] %vm9487_vm1, %v8664_v34  ;;  %9834 = vst.msk [vmem:[%s15319_s11 + $0xad0] sm:$0xff] %vm9487_vm1, %v6099_v37  ;;  %v13591_v43 = vpop.f32.mrb[92].mxu0  ;;  %v1171_v37 = vld [vmem:[%s14872_s8 + $0x1e88] sm:$0xff] }
 0x3a7   : > { %10346 = vst.msk [vmem:[%s15319_s11 + $0x1ad0] sm:$0xff] %vm9487_vm1, %v8659_v38  ;;  %v14359_v44 = vpop.f32.mrb[92].mxu1  ;;  %v6114_v45 = vadd.f32 %v18421_v4, %v13591_v43  ;;  %v6108_v47 = vpop.f32.mrb[93].mxu0  ;;  %13749 = vmatmul.mubr.msk.f32.gmra.mrb[198].mxu0 %vm1229_vm0, %v649_v39  ;;  %v660_v38 = vld [vmem:[%s14872_s8 + $0xe90] sm:$0xff] }
 0x3a8   : > { %v8674_v46 = vadd.f32 %v18421_v4, %v14359_v44  ;;  %v8668_v48 = vpop.f32.mrb[93].mxu1  ;;  %14517 = vmatmul.mubr.msk.f32.gmra.mrb[198].mxu1 %vm1229_vm0, %v1161_v40  ;;  %v6109_v49 = vadd.f32 %v18421_v4, %v6108_v47  ;;  %13751 = vmatprep.mubr.msk.f32.mxu0 %vm1229_vm0, %v650_v41  ;;  %v1172_v39 = vld [vmem:[%s14872_s8 + $0x1e90] sm:$0xff] }
 0x3a9   : > { %v8669_v50 = vadd.f32 %v18421_v4, %v8668_v48  ;;  %14519 = vmatprep.mubr.msk.f32.mxu1 %vm1229_vm0, %v1162_v42  ;;  %9837 = vst.msk [vmem:[%s15319_s11 + $0xae8] sm:$0xff] %vm9487_vm1, %v6114_v45  ;;  %v661_v48 = vld [vmem:[%s14872_s8 + $0xe98] sm:$0xff] }
 0x3aa   : > { %10349 = vst.msk [vmem:[%s15319_s11 + $0x1ae8] sm:$0xff] %vm9487_vm1, %v8674_v46  ;;  %9836 = vst.msk [vmem:[%s15319_s11 + $0xae0] sm:$0xff] %vm9487_vm1, %v6109_v49  ;;  %v13594_v55 = vpop.f32.mrb[94].mxu0  ;;  %v1173_v49 = vld [vmem:[%s14872_s8 + $0x1e98] sm:$0xff] }
 0x3ab   : > { %10348 = vst.msk [vmem:[%s15319_s11 + $0x1ae0] sm:$0xff] %vm9487_vm1, %v8669_v50  ;;  %v14362_v56 = vpop.f32.mrb[94].mxu1  ;;  %v6124_v57 = vadd.f32 %v18421_v4, %v13594_v55  ;;  %v6118_v59 = vpop.f32.mrb[95].mxu0  ;;  %13752 = vmatmul.mubr.msk.f32.gmra.mrb[200].mxu0 %vm1229_vm0, %v651_v51  ;;  %v662_v50 = vld [vmem:[%s14872_s8 + $0xea0] sm:$0xff] }
 0x3ac   : > { %v8684_v58 = vadd.f32 %v18421_v4, %v14362_v56  ;;  %v8678_v60 = vpop.f32.mrb[95].mxu1  ;;  %14520 = vmatmul.mubr.msk.f32.gmra.mrb[200].mxu1 %vm1229_vm0, %v1163_v52  ;;  %v6119_v61 = vadd.f32 %v18421_v4, %v6118_v59  ;;  %13754 = vmatprep.mubr.msk.f32.mxu0 %vm1229_vm0, %v652_v53  ;;  %v1174_v51 = vld [vmem:[%s14872_s8 + $0x1ea0] sm:$0xff] }
 0x3ad   : > { %v8679_v62 = vadd.f32 %v18421_v4, %v8678_v60  ;;  %14522 = vmatprep.mubr.msk.f32.mxu1 %vm1229_vm0, %v1164_v54  ;;  %9839 = vst.msk [vmem:[%s15319_s11 + $0xaf8] sm:$0xff] %vm9487_vm1, %v6124_v57  ;;  %v663_v60 = vld [vmem:[%s14872_s8 + $0xea8] sm:$0xff] }
 0x3ae   : > { %10351 = vst.msk [vmem:[%s15319_s11 + $0x1af8] sm:$0xff] %vm9487_vm1, %v8684_v58  ;;  %9838 = vst.msk [vmem:[%s15319_s11 + $0xaf0] sm:$0xff] %vm9487_vm1, %v6119_v61  ;;  %v13597_v7 = vpop.f32.mrb[96].mxu0  ;;  %v1175_v61 = vld [vmem:[%s14872_s8 + $0x1ea8] sm:$0xff] }
 0x3af   : > { %10350 = vst.msk [vmem:[%s15319_s11 + $0x1af0] sm:$0xff] %vm9487_vm1, %v8679_v62  ;;  %v14365_v3 = vpop.f32.mrb[96].mxu1  ;;  %v6134_v5 = vadd.f32 %v18421_v4, %v13597_v7  ;;  %v6128_v6 = vpop.f32.mrb[97].mxu0  ;;  %13755 = vmatmul.mubr.msk.f32.gmra.mrb[202].mxu0 %vm1229_vm0, %v653_v63  ;;  %v664_v62 = vld [vmem:[%s14872_s8 + $0xeb0] sm:$0xff] }
 0x3b0   : > { %v8694_v10 = vadd.f32 %v18421_v4, %v14365_v3  ;;  %v8688_v8 = vpop.f32.mrb[97].mxu1  ;;  %14523 = vmatmul.mubr.msk.f32.gmra.mrb[202].mxu1 %vm1229_vm0, %v1165_v0  ;;  %v6129_v13 = vadd.f32 %v18421_v4, %v6128_v6  ;;  %13757 = vmatprep.mubr.msk.f32.mxu0 %vm1229_vm0, %v654_v1  ;;  %v1176_v63 = vld [vmem:[%s14872_s8 + $0x1eb0] sm:$0xff]  ;;  %v18943_v1 = vld [vmem:[#allocation2] ss:$0 sm:$0xff] }
 0x3b1   : > { %v8689_v9 = vadd.f32 %v18421_v4, %v8688_v8  ;;  %14525 = vmatprep.mubr.msk.f32.mxu1 %vm1229_vm0, %v1166_v2  ;;  %9841 = vst.msk [vmem:[%s15319_s11 + $0xb08] sm:$0xff] %vm9487_vm1, %v6134_v5  ;;  %v665_v8 = vld [vmem:[%s14872_s8 + $0xeb8] sm:$0xff] }
 0x3b2   : > { %10353 = vst.msk [vmem:[%s15319_s11 + $0x1b08] sm:$0xff] %vm9487_vm1, %v8694_v10  ;;  %9840 = vst.msk [vmem:[%s15319_s11 + $0xb00] sm:$0xff] %vm9487_vm1, %v6129_v13  ;;  %v13600_v21 = vpop.f32.mrb[98].mxu0  ;;  %v1177_v13 = vld [vmem:[%s14872_s8 + $0x1eb8] sm:$0xff] }
 0x3b3   : > { %10352 = vst.msk [vmem:[%s15319_s11 + $0x1b00] sm:$0xff] %vm9487_vm1, %v8689_v9  ;;  %v14368_v15 = vpop.f32.mrb[98].mxu1  ;;  %v6144_v17 = vadd.f32 %v18421_v4, %v13600_v21  ;;  %v6138_v19 = vpop.f32.mrb[99].mxu0  ;;  %13758 = vmatmul.mubr.msk.f32.gmra.mrb[204].mxu0 %vm1229_vm0, %v655_v11  ;;  %v666_v9 = vld [vmem:[%s14872_s8 + $0xec0] sm:$0xff] }
 0x3b4   : > { %v8704_v18 = vadd.f32 %v18421_v4, %v14368_v15  ;;  %v8698_v20 = vpop.f32.mrb[99].mxu1  ;;  %14526 = vmatmul.mubr.msk.f32.gmra.mrb[204].mxu1 %vm1229_vm0, %v1167_v16  ;;  %v6139_v22 = vadd.f32 %v18421_v4, %v6138_v19  ;;  %13760 = vmatprep.mubr.msk.f32.mxu0 %vm1229_vm0, %v656_v12  ;;  %v1178_v11 = vld [vmem:[%s14872_s8 + $0x1ec0] sm:$0xff] }
 0x3b5   : > { %v8699_v23 = vadd.f32 %v18421_v4, %v8698_v20  ;;  %14528 = vmatprep.mubr.msk.f32.mxu1 %vm1229_vm0, %v1168_v14  ;;  %9843 = vst.msk [vmem:[%s15319_s11 + $0xb18] sm:$0xff] %vm9487_vm1, %v6144_v17  ;;  %v667_v20 = vld [vmem:[%s14872_s8 + $0xec8] sm:$0xff] }
 0x3b6   : > { %10355 = vst.msk [vmem:[%s15319_s11 + $0x1b18] sm:$0xff] %vm9487_vm1, %v8704_v18  ;;  %9842 = vst.msk [vmem:[%s15319_s11 + $0xb10] sm:$0xff] %vm9487_vm1, %v6139_v22  ;;  %v13603_v27 = vpop.f32.mrb[100].mxu0  ;;  %v1179_v22 = vld [vmem:[%s14872_s8 + $0x1ec8] sm:$0xff] }
 0x3b7   : > { %10354 = vst.msk [vmem:[%s15319_s11 + $0x1b10] sm:$0xff] %vm9487_vm1, %v8699_v23  ;;  %v14371_v28 = vpop.f32.mrb[100].mxu1  ;;  %v6154_v30 = vadd.f32 %v18421_v4, %v13603_v27  ;;  %v6148_v32 = vpop.f32.mrb[101].mxu0  ;;  %13761 = vmatmul.mubr.msk.f32.gmra.mrb[206].mxu0 %vm1229_vm0, %v657_v24  ;;  %v668_v23 = vld [vmem:[%s14872_s8 + $0xed0] sm:$0xff] }
 0x3b8   : > { %v8714_v31 = vadd.f32 %v18421_v4, %v14371_v28  ;;  %v8708_v33 = vpop.f32.mrb[101].mxu1  ;;  %14529 = vmatmul.mubr.msk.f32.gmra.mrb[206].mxu1 %vm1229_vm0, %v1169_v25  ;;  %v6149_v34 = vadd.f32 %v18421_v4, %v6148_v32  ;;  %13763 = vmatprep.mubr.msk.f32.mxu0 %vm1229_vm0, %v658_v26  ;;  %v1180_v24 = vld [vmem:[%s14872_s8 + $0x1ed0] sm:$0xff] }
 0x3b9   : > { %v8709_v35 = vadd.f32 %v18421_v4, %v8708_v33  ;;  %14531 = vmatprep.mubr.msk.f32.mxu1 %vm1229_vm0, %v1170_v29  ;;  %9845 = vst.msk [vmem:[%s15319_s11 + $0xb28] sm:$0xff] %vm9487_vm1, %v6154_v30  ;;  %v669_v33 = vld [vmem:[%s14872_s8 + $0xed8] sm:$0xff] }
 0x3ba   : > { %10357 = vst.msk [vmem:[%s15319_s11 + $0x1b28] sm:$0xff] %vm9487_vm1, %v8714_v31  ;;  %9844 = vst.msk [vmem:[%s15319_s11 + $0xb20] sm:$0xff] %vm9487_vm1, %v6149_v34  ;;  %v13606_v40 = vpop.f32.mrb[102].mxu0  ;;  %v1181_v34 = vld [vmem:[%s14872_s8 + $0x1ed8] sm:$0xff] }
 0x3bb   : > { %10356 = vst.msk [vmem:[%s15319_s11 + $0x1b20] sm:$0xff] %vm9487_vm1, %v8709_v35  ;;  %v14374_v41 = vpop.f32.mrb[102].mxu1  ;;  %v6164_v42 = vadd.f32 %v18421_v4, %v13606_v40  ;;  %v6158_v44 = vpop.f32.mrb[103].mxu0  ;;  %13764 = vmatmul.mubr.msk.f32.gmra.mrb[208].mxu0 %vm1229_vm0, %v659_v36  ;;  %v670_v35 = vld [vmem:[%s14872_s8 + $0xee0] sm:$0xff] }
 0x3bc   : > { %v8724_v43 = vadd.f32 %v18421_v4, %v14374_v41  ;;  %v8718_v45 = vpop.f32.mrb[103].mxu1  ;;  %14532 = vmatmul.mubr.msk.f32.gmra.mrb[208].mxu1 %vm1229_vm0, %v1171_v37  ;;  %v6159_v46 = vadd.f32 %v18421_v4, %v6158_v44  ;;  %13766 = vmatprep.mubr.msk.f32.mxu0 %vm1229_vm0, %v660_v38  ;;  %v1182_v36 = vld [vmem:[%s14872_s8 + $0x1ee0] sm:$0xff] }
 0x3bd   : > { %v8719_v47 = vadd.f32 %v18421_v4, %v8718_v45  ;;  %14534 = vmatprep.mubr.msk.f32.mxu1 %vm1229_vm0, %v1172_v39  ;;  %9847 = vst.msk [vmem:[%s15319_s11 + $0xb38] sm:$0xff] %vm9487_vm1, %v6164_v42  ;;  %v671_v45 = vld [vmem:[%s14872_s8 + $0xee8] sm:$0xff] }
 0x3be   : > { %10359 = vst.msk [vmem:[%s15319_s11 + $0x1b38] sm:$0xff] %vm9487_vm1, %v8724_v43  ;;  %9846 = vst.msk [vmem:[%s15319_s11 + $0xb30] sm:$0xff] %vm9487_vm1, %v6159_v46  ;;  %v13609_v52 = vpop.f32.mrb[104].mxu0  ;;  %v1183_v46 = vld [vmem:[%s14872_s8 + $0x1ee8] sm:$0xff] }
 0x3bf   : > { %10358 = vst.msk [vmem:[%s15319_s11 + $0x1b30] sm:$0xff] %vm9487_vm1, %v8719_v47  ;;  %v14377_v53 = vpop.f32.mrb[104].mxu1  ;;  %v6174_v54 = vadd.f32 %v18421_v4, %v13609_v52  ;;  %v6168_v56 = vpop.f32.mrb[105].mxu0  ;;  %13767 = vmatmul.mubr.msk.f32.gmra.mrb[210].mxu0 %vm1229_vm0, %v661_v48  ;;  %v672_v47 = vld [vmem:[%s14872_s8 + $0xef0] sm:$0xff] }
 0x3c0   : > { %v8734_v55 = vadd.f32 %v18421_v4, %v14377_v53  ;;  %v8728_v57 = vpop.f32.mrb[105].mxu1  ;;  %14535 = vmatmul.mubr.msk.f32.gmra.mrb[210].mxu1 %vm1229_vm0, %v1173_v49  ;;  %v6169_v58 = vadd.f32 %v18421_v4, %v6168_v56  ;;  %13769 = vmatprep.mubr.msk.f32.mxu0 %vm1229_vm0, %v662_v50  ;;  %v1184_v48 = vld [vmem:[%s14872_s8 + $0x1ef0] sm:$0xff] }
 0x3c1   : > { %v8729_v59 = vadd.f32 %v18421_v4, %v8728_v57  ;;  %14537 = vmatprep.mubr.msk.f32.mxu1 %vm1229_vm0, %v1174_v51  ;;  %9849 = vst.msk [vmem:[%s15319_s11 + $0xb48] sm:$0xff] %vm9487_vm1, %v6174_v54  ;;  %v673_v57 = vld [vmem:[%s14872_s8 + $0xef8] sm:$0xff] }
 0x3c2   : > { %10361 = vst.msk [vmem:[%s15319_s11 + $0x1b48] sm:$0xff] %vm9487_vm1, %v8734_v55  ;;  %9848 = vst.msk [vmem:[%s15319_s11 + $0xb40] sm:$0xff] %vm9487_vm1, %v6169_v58  ;;  %v13612_v4 = vpop.f32.mrb[106].mxu0  ;;  %v1185_v58 = vld [vmem:[%s14872_s8 + $0x1ef8] sm:$0xff] }
 0x3c3   : > { %10360 = vst.msk [vmem:[%s15319_s11 + $0x1b40] sm:$0xff] %vm9487_vm1, %v8729_v59  ;;  %v14380_v0 = vpop.f32.mrb[106].mxu1  ;;  %v6184_v2 = vadd.f32 %v18943_v1, %v13612_v4  ;;  %v6178_v3 = vpop.f32.mrb[107].mxu0  ;;  %13770 = vmatmul.mubr.msk.f32.gmra.mrb[212].mxu0 %vm1229_vm0, %v663_v60  ;;  %v674_v59 = vld [vmem:[%s14872_s8 + $0xf00] sm:$0xff] }
 0x3c4   : > { %v8744_v7 = vadd.f32 %v18943_v1, %v14380_v0  ;;  %v8738_v5 = vpop.f32.mrb[107].mxu1  ;;  %14538 = vmatmul.mubr.msk.f32.gmra.mrb[212].mxu1 %vm1229_vm0, %v1175_v61  ;;  %v6179_v10 = vadd.f32 %v18943_v1, %v6178_v3  ;;  %13772 = vmatprep.mubr.msk.f32.mxu0 %vm1229_vm0, %v664_v62  ;;  %v1186_v60 = vld [vmem:[%s14872_s8 + $0x1f00] sm:$0xff] }
 0x3c5   : > { %v8739_v6 = vadd.f32 %v18943_v1, %v8738_v5  ;;  %14540 = vmatprep.mubr.msk.f32.mxu1 %vm1229_vm0, %v1176_v63  ;;  %9851 = vst.msk [vmem:[%s15319_s11 + $0xb58] sm:$0xff] %vm9487_vm1, %v6184_v2  ;;  %v675_v5 = vld [vmem:[%s14872_s8 + $0xf08] sm:$0xff] }
 0x3c6   : > { %10363 = vst.msk [vmem:[%s15319_s11 + $0x1b58] sm:$0xff] %vm9487_vm1, %v8744_v7  ;;  %9850 = vst.msk [vmem:[%s15319_s11 + $0xb50] sm:$0xff] %vm9487_vm1, %v6179_v10  ;;  %v13615_v16 = vpop.f32.mrb[108].mxu0  ;;  %v1187_v10 = vld [vmem:[%s14872_s8 + $0x1f08] sm:$0xff] }
 0x3c7   : > { %10362 = vst.msk [vmem:[%s15319_s11 + $0x1b50] sm:$0xff] %vm9487_vm1, %v8739_v6  ;;  %v14383_v12 = vpop.f32.mrb[108].mxu1  ;;  %v6194_v14 = vadd.f32 %v18943_v1, %v13615_v16  ;;  %v6188_v15 = vpop.f32.mrb[109].mxu0  ;;  %13773 = vmatmul.mubr.msk.f32.gmra.mrb[214].mxu0 %vm1229_vm0, %v665_v8  ;;  %v676_v6 = vld [vmem:[%s14872_s8 + $0xf10] sm:$0xff] }
 0x3c8   : > { %v8754_v21 = vadd.f32 %v18943_v1, %v14383_v12  ;;  %v8748_v17 = vpop.f32.mrb[109].mxu1  ;;  %14541 = vmatmul.mubr.msk.f32.gmra.mrb[214].mxu1 %vm1229_vm0, %v1177_v13  ;;  %v6189_v18 = vadd.f32 %v18943_v1, %v6188_v15  ;;  %13775 = vmatprep.mubr.msk.f32.mxu0 %vm1229_vm0, %v666_v9  ;;  %v1188_v8 = vld [vmem:[%s14872_s8 + $0x1f10] sm:$0xff] }
 0x3c9   : > { %v8749_v19 = vadd.f32 %v18943_v1, %v8748_v17  ;;  %14543 = vmatprep.mubr.msk.f32.mxu1 %vm1229_vm0, %v1178_v11  ;;  %9853 = vst.msk [vmem:[%s15319_s11 + $0xb68] sm:$0xff] %vm9487_vm1, %v6194_v14  ;;  %v677_v17 = vld [vmem:[%s14872_s8 + $0xf18] sm:$0xff] }
 0x3ca   : > { %10365 = vst.msk [vmem:[%s15319_s11 + $0x1b68] sm:$0xff] %vm9487_vm1, %v8754_v21  ;;  %9852 = vst.msk [vmem:[%s15319_s11 + $0xb60] sm:$0xff] %vm9487_vm1, %v6189_v18  ;;  %v13618_v25 = vpop.f32.mrb[110].mxu0  ;;  %v1189_v18 = vld [vmem:[%s14872_s8 + $0x1f18] sm:$0xff] }
 0x3cb   : > { %10364 = vst.msk [vmem:[%s15319_s11 + $0x1b60] sm:$0xff] %vm9487_vm1, %v8749_v19  ;;  %v14386_v26 = vpop.f32.mrb[110].mxu1  ;;  %v6204_v29 = vadd.f32 %v18943_v1, %v13618_v25  ;;  %v6198_v28 = vpop.f32.mrb[111].mxu0  ;;  %13776 = vmatmul.mubr.msk.f32.gmra.mrb[216].mxu0 %vm1229_vm0, %v667_v20  ;;  %v678_v19 = vld [vmem:[%s14872_s8 + $0xf20] sm:$0xff] }
 0x3cc   : > { %v8764_v27 = vadd.f32 %v18943_v1, %v14386_v26  ;;  %v8758_v30 = vpop.f32.mrb[111].mxu1  ;;  %14544 = vmatmul.mubr.msk.f32.gmra.mrb[216].mxu1 %vm1229_vm0, %v1179_v22  ;;  %v6199_v31 = vadd.f32 %v18943_v1, %v6198_v28  ;;  %13778 = vmatprep.mubr.msk.f32.mxu0 %vm1229_vm0, %v668_v23  ;;  %v1190_v20 = vld [vmem:[%s14872_s8 + $0x1f20] sm:$0xff] }
 0x3cd   : > { %v8759_v32 = vadd.f32 %v18943_v1, %v8758_v30  ;;  %14546 = vmatprep.mubr.msk.f32.mxu1 %vm1229_vm0, %v1180_v24  ;;  %9855 = vst.msk [vmem:[%s15319_s11 + $0xb78] sm:$0xff] %vm9487_vm1, %v6204_v29  ;;  %v679_v30 = vld [vmem:[%s14872_s8 + $0xf28] sm:$0xff] }
 0x3ce   : > { %10367 = vst.msk [vmem:[%s15319_s11 + $0x1b78] sm:$0xff] %vm9487_vm1, %v8764_v27  ;;  %9854 = vst.msk [vmem:[%s15319_s11 + $0xb70] sm:$0xff] %vm9487_vm1, %v6199_v31  ;;  %v13621_v37 = vpop.f32.mrb[112].mxu0  ;;  %v1191_v31 = vld [vmem:[%s14872_s8 + $0x1f28] sm:$0xff] }
 0x3cf   : > { %10366 = vst.msk [vmem:[%s15319_s11 + $0x1b70] sm:$0xff] %vm9487_vm1, %v8759_v32  ;;  %v14389_v38 = vpop.f32.mrb[112].mxu1  ;;  %v6214_v39 = vadd.f32 %v18943_v1, %v13621_v37  ;;  %v6208_v41 = vpop.f32.mrb[113].mxu0  ;;  %13779 = vmatmul.mubr.msk.f32.gmra.mrb[218].mxu0 %vm1229_vm0, %v669_v33  ;;  %v680_v32 = vld [vmem:[%s14872_s8 + $0xf30] sm:$0xff] }
 0x3d0   : > { %v8774_v40 = vadd.f32 %v18943_v1, %v14389_v38  ;;  %v8768_v42 = vpop.f32.mrb[113].mxu1  ;;  %14547 = vmatmul.mubr.msk.f32.gmra.mrb[218].mxu1 %vm1229_vm0, %v1181_v34  ;;  %v6209_v43 = vadd.f32 %v18943_v1, %v6208_v41  ;;  %13781 = vmatprep.mubr.msk.f32.mxu0 %vm1229_vm0, %v670_v35  ;;  %v1192_v33 = vld [vmem:[%s14872_s8 + $0x1f30] sm:$0xff] }
 0x3d1   : > { %v8769_v44 = vadd.f32 %v18943_v1, %v8768_v42  ;;  %14549 = vmatprep.mubr.msk.f32.mxu1 %vm1229_vm0, %v1182_v36  ;;  %9857 = vst.msk [vmem:[%s15319_s11 + $0xb88] sm:$0xff] %vm9487_vm1, %v6214_v39  ;;  %v681_v42 = vld [vmem:[%s14872_s8 + $0xf38] sm:$0xff] }
 0x3d2   : > { %10369 = vst.msk [vmem:[%s15319_s11 + $0x1b88] sm:$0xff] %vm9487_vm1, %v8774_v40  ;;  %9856 = vst.msk [vmem:[%s15319_s11 + $0xb80] sm:$0xff] %vm9487_vm1, %v6209_v43  ;;  %v13624_v49 = vpop.f32.mrb[114].mxu0  ;;  %v1193_v43 = vld [vmem:[%s14872_s8 + $0x1f38] sm:$0xff] }
 0x3d3   : > { %10368 = vst.msk [vmem:[%s15319_s11 + $0x1b80] sm:$0xff] %vm9487_vm1, %v8769_v44  ;;  %v14392_v50 = vpop.f32.mrb[114].mxu1  ;;  %v6224_v51 = vadd.f32 %v18943_v1, %v13624_v49  ;;  %v6218_v53 = vpop.f32.mrb[115].mxu0  ;;  %13782 = vmatmul.mubr.msk.f32.gmra.mrb[220].mxu0 %vm1229_vm0, %v671_v45  ;;  %v682_v44 = vld [vmem:[%s14872_s8 + $0xf40] sm:$0xff] }
 0x3d4   : > { %v8784_v52 = vadd.f32 %v18943_v1, %v14392_v50  ;;  %v8778_v54 = vpop.f32.mrb[115].mxu1  ;;  %14550 = vmatmul.mubr.msk.f32.gmra.mrb[220].mxu1 %vm1229_vm0, %v1183_v46  ;;  %v6219_v55 = vadd.f32 %v18943_v1, %v6218_v53  ;;  %13784 = vmatprep.mubr.msk.f32.mxu0 %vm1229_vm0, %v672_v47  ;;  %v1194_v45 = vld [vmem:[%s14872_s8 + $0x1f40] sm:$0xff] }
 0x3d5   : > { %v8779_v56 = vadd.f32 %v18943_v1, %v8778_v54  ;;  %14552 = vmatprep.mubr.msk.f32.mxu1 %vm1229_vm0, %v1184_v48  ;;  %9859 = vst.msk [vmem:[%s15319_s11 + $0xb98] sm:$0xff] %vm9487_vm1, %v6224_v51  ;;  %v683_v54 = vld [vmem:[%s14872_s8 + $0xf48] sm:$0xff] }
 0x3d6   : > { %10371 = vst.msk [vmem:[%s15319_s11 + $0x1b98] sm:$0xff] %vm9487_vm1, %v8784_v52  ;;  %9858 = vst.msk [vmem:[%s15319_s11 + $0xb90] sm:$0xff] %vm9487_vm1, %v6219_v55  ;;  %v13627_v61 = vpop.f32.mrb[116].mxu0  ;;  %v1195_v55 = vld [vmem:[%s14872_s8 + $0x1f48] sm:$0xff] }
 0x3d7   : > { %10370 = vst.msk [vmem:[%s15319_s11 + $0x1b90] sm:$0xff] %vm9487_vm1, %v8779_v56  ;;  %v14395_v62 = vpop.f32.mrb[116].mxu1  ;;  %v6234_v63 = vadd.f32 %v18943_v1, %v13627_v61  ;;  %v6228_v0 = vpop.f32.mrb[117].mxu0  ;;  %13785 = vmatmul.mubr.msk.f32.gmra.mrb[222].mxu0 %vm1229_vm0, %v673_v57  ;;  %v684_v56 = vld [vmem:[%s14872_s8 + $0xf50] sm:$0xff] }
 0x3d8   : > { %v8794_v4 = vadd.f32 %v18943_v1, %v14395_v62  ;;  %v8788_v2 = vpop.f32.mrb[117].mxu1  ;;  %14553 = vmatmul.mubr.msk.f32.gmra.mrb[222].mxu1 %vm1229_vm0, %v1185_v58  ;;  %v6229_v7 = vadd.f32 %v18943_v1, %v6228_v0  ;;  %13787 = vmatprep.mubr.msk.f32.mxu0 %vm1229_vm0, %v674_v59  ;;  %v1196_v57 = vld [vmem:[%s14872_s8 + $0x1f50] sm:$0xff] }
 0x3d9   : > { %v8789_v3 = vadd.f32 %v18943_v1, %v8788_v2  ;;  %14555 = vmatprep.mubr.msk.f32.mxu1 %vm1229_vm0, %v1186_v60  ;;  %9861 = vst.msk [vmem:[%s15319_s11 + $0xba8] sm:$0xff] %vm9487_vm1, %v6234_v63  ;;  %v685_v2 = vld [vmem:[%s14872_s8 + $0xf58] sm:$0xff] }
 0x3da   : > { %10373 = vst.msk [vmem:[%s15319_s11 + $0x1ba8] sm:$0xff] %vm9487_vm1, %v8794_v4  ;;  %9860 = vst.msk [vmem:[%s15319_s11 + $0xba0] sm:$0xff] %vm9487_vm1, %v6229_v7  ;;  %v13630_v13 = vpop.f32.mrb[118].mxu0  ;;  %v1197_v7 = vld [vmem:[%s14872_s8 + $0x1f58] sm:$0xff] }
 0x3db   : > { %10372 = vst.msk [vmem:[%s15319_s11 + $0x1ba0] sm:$0xff] %vm9487_vm1, %v8789_v3  ;;  %v14398_v9 = vpop.f32.mrb[118].mxu1  ;;  %v6244_v11 = vadd.f32 %v18943_v1, %v13630_v13  ;;  %v6238_v12 = vpop.f32.mrb[119].mxu0  ;;  %13788 = vmatmul.mubr.msk.f32.gmra.mrb[224].mxu0 %vm1229_vm0, %v675_v5  ;;  %v686_v3 = vld [vmem:[%s14872_s8 + $0xf60] sm:$0xff] }
 0x3dc   : > { %v8804_v16 = vadd.f32 %v18943_v1, %v14398_v9  ;;  %v8798_v14 = vpop.f32.mrb[119].mxu1  ;;  %14556 = vmatmul.mubr.msk.f32.gmra.mrb[224].mxu1 %vm1229_vm0, %v1187_v10  ;;  %v6239_v21 = vadd.f32 %v18943_v1, %v6238_v12  ;;  %13790 = vmatprep.mubr.msk.f32.mxu0 %vm1229_vm0, %v676_v6  ;;  %v1198_v5 = vld [vmem:[%s14872_s8 + $0x1f60] sm:$0xff] }
 0x3dd   : > { %v8799_v15 = vadd.f32 %v18943_v1, %v8798_v14  ;;  %14558 = vmatprep.mubr.msk.f32.mxu1 %vm1229_vm0, %v1188_v8  ;;  %9863 = vst.msk [vmem:[%s15319_s11 + $0xbb8] sm:$0xff] %vm9487_vm1, %v6244_v11  ;;  %v687_v14 = vld [vmem:[%s14872_s8 + $0xf68] sm:$0xff] }
 0x3de   : > { %10375 = vst.msk [vmem:[%s15319_s11 + $0x1bb8] sm:$0xff] %vm9487_vm1, %v8804_v16  ;;  %9862 = vst.msk [vmem:[%s15319_s11 + $0xbb0] sm:$0xff] %vm9487_vm1, %v6239_v21  ;;  %v13633_v22 = vpop.f32.mrb[120].mxu0  ;;  %v1199_v21 = vld [vmem:[%s14872_s8 + $0x1f68] sm:$0xff] }
 0x3df   : > { %10374 = vst.msk [vmem:[%s15319_s11 + $0x1bb0] sm:$0xff] %vm9487_vm1, %v8799_v15  ;;  %v14401_v23 = vpop.f32.mrb[120].mxu1  ;;  %v6254_v24 = vadd.f32 %v18943_v1, %v13633_v22  ;;  %v6248_v26 = vpop.f32.mrb[121].mxu0  ;;  %13791 = vmatmul.mubr.msk.f32.gmra.mrb[226].mxu0 %vm1229_vm0, %v677_v17  ;;  %v688_v15 = vld [vmem:[%s14872_s8 + $0xf70] sm:$0xff] }
 0x3e0   : > { %v8814_v25 = vadd.f32 %v18943_v1, %v14401_v23  ;;  %v8808_v29 = vpop.f32.mrb[121].mxu1  ;;  %14559 = vmatmul.mubr.msk.f32.gmra.mrb[226].mxu1 %vm1229_vm0, %v1189_v18  ;;  %v6249_v27 = vadd.f32 %v18943_v1, %v6248_v26  ;;  %13793 = vmatprep.mubr.msk.f32.mxu0 %vm1229_vm0, %v678_v19  ;;  %v1200_v17 = vld [vmem:[%s14872_s8 + $0x1f70] sm:$0xff] }
 0x3e1   : > { %v8809_v28 = vadd.f32 %v18943_v1, %v8808_v29  ;;  %14561 = vmatprep.mubr.msk.f32.mxu1 %vm1229_vm0, %v1190_v20  ;;  %9865 = vst.msk [vmem:[%s15319_s11 + $0xbc8] sm:$0xff] %vm9487_vm1, %v6254_v24  ;;  %v689_v29 = vld [vmem:[%s14872_s8 + $0xf78] sm:$0xff] }
 0x3e2   : > { %10377 = vst.msk [vmem:[%s15319_s11 + $0x1bc8] sm:$0xff] %vm9487_vm1, %v8814_v25  ;;  %9864 = vst.msk [vmem:[%s15319_s11 + $0xbc0] sm:$0xff] %vm9487_vm1, %v6249_v27  ;;  %v13636_v34 = vpop.f32.mrb[122].mxu0  ;;  %v1201_v27 = vld [vmem:[%s14872_s8 + $0x1f78] sm:$0xff] }
 0x3e3   : > { %10376 = vst.msk [vmem:[%s15319_s11 + $0x1bc0] sm:$0xff] %vm9487_vm1, %v8809_v28  ;;  %v14404_v35 = vpop.f32.mrb[122].mxu1  ;;  %v6264_v36 = vadd.f32 %v18943_v1, %v13636_v34  ;;  %v6258_v38 = vpop.f32.mrb[123].mxu0  ;;  %13794 = vmatmul.mubr.msk.f32.gmra.mrb[228].mxu0 %vm1229_vm0, %v679_v30  ;;  %v690_v28 = vld [vmem:[%s14872_s8 + $0xf80] sm:$0xff] }
 0x3e4   : > { %v8824_v37 = vadd.f32 %v18943_v1, %v14404_v35  ;;  %v8818_v39 = vpop.f32.mrb[123].mxu1  ;;  %14562 = vmatmul.mubr.msk.f32.gmra.mrb[228].mxu1 %vm1229_vm0, %v1191_v31  ;;  %v6259_v40 = vadd.f32 %v18943_v1, %v6258_v38  ;;  %13796 = vmatprep.mubr.msk.f32.mxu0 %vm1229_vm0, %v680_v32  ;;  %v1202_v30 = vld [vmem:[%s14872_s8 + $0x1f80] sm:$0xff] }
 0x3e5   : > { %v8819_v41 = vadd.f32 %v18943_v1, %v8818_v39  ;;  %14564 = vmatprep.mubr.msk.f32.mxu1 %vm1229_vm0, %v1192_v33  ;;  %9867 = vst.msk [vmem:[%s15319_s11 + $0xbd8] sm:$0xff] %vm9487_vm1, %v6264_v36  ;;  %v691_v39 = vld [vmem:[%s14872_s8 + $0xf88] sm:$0xff] }
 0x3e6   : > { %10379 = vst.msk [vmem:[%s15319_s11 + $0x1bd8] sm:$0xff] %vm9487_vm1, %v8824_v37  ;;  %9866 = vst.msk [vmem:[%s15319_s11 + $0xbd0] sm:$0xff] %vm9487_vm1, %v6259_v40  ;;  %v13639_v46 = vpop.f32.mrb[124].mxu0  ;;  %v1203_v40 = vld [vmem:[%s14872_s8 + $0x1f88] sm:$0xff] }
 0x3e7   : > { %10378 = vst.msk [vmem:[%s15319_s11 + $0x1bd0] sm:$0xff] %vm9487_vm1, %v8819_v41  ;;  %v14407_v47 = vpop.f32.mrb[124].mxu1  ;;  %v6274_v48 = vadd.f32 %v18943_v1, %v13639_v46  ;;  %v6268_v50 = vpop.f32.mrb[125].mxu0  ;;  %13797 = vmatmul.mubr.msk.f32.gmra.mrb[230].mxu0 %vm1229_vm0, %v681_v42  ;;  %v692_v41 = vld [vmem:[%s14872_s8 + $0xf90] sm:$0xff] }
 0x3e8   : > { %v8834_v49 = vadd.f32 %v18943_v1, %v14407_v47  ;;  %v8828_v51 = vpop.f32.mrb[125].mxu1  ;;  %14565 = vmatmul.mubr.msk.f32.gmra.mrb[230].mxu1 %vm1229_vm0, %v1193_v43  ;;  %v6269_v52 = vadd.f32 %v18943_v1, %v6268_v50  ;;  %13799 = vmatprep.mubr.msk.f32.mxu0 %vm1229_vm0, %v682_v44  ;;  %v1204_v42 = vld [vmem:[%s14872_s8 + $0x1f90] sm:$0xff] }
 0x3e9   : > { %v8829_v53 = vadd.f32 %v18943_v1, %v8828_v51  ;;  %14567 = vmatprep.mubr.msk.f32.mxu1 %vm1229_vm0, %v1194_v45  ;;  %9869 = vst.msk [vmem:[%s15319_s11 + $0xbe8] sm:$0xff] %vm9487_vm1, %v6274_v48  ;;  %v693_v51 = vld [vmem:[%s14872_s8 + $0xf98] sm:$0xff] }
 0x3ea   : > { %10381 = vst.msk [vmem:[%s15319_s11 + $0x1be8] sm:$0xff] %vm9487_vm1, %v8834_v49  ;;  %9868 = vst.msk [vmem:[%s15319_s11 + $0xbe0] sm:$0xff] %vm9487_vm1, %v6269_v52  ;;  %v13642_v58 = vpop.f32.mrb[126].mxu0  ;;  %v1205_v52 = vld [vmem:[%s14872_s8 + $0x1f98] sm:$0xff] }
 0x3eb   : > { %10380 = vst.msk [vmem:[%s15319_s11 + $0x1be0] sm:$0xff] %vm9487_vm1, %v8829_v53  ;;  %v14410_v59 = vpop.f32.mrb[126].mxu1  ;;  %v6284_v60 = vadd.f32 %v18943_v1, %v13642_v58  ;;  %v6278_v62 = vpop.f32.mrb[127].mxu0  ;;  %13800 = vmatmul.mubr.msk.f32.gmra.mrb[232].mxu0 %vm1229_vm0, %v683_v54  ;;  %v694_v53 = vld [vmem:[%s14872_s8 + $0xfa0] sm:$0xff] }
 0x3ec   : > { %v8844_v61 = vadd.f32 %v18943_v1, %v14410_v59  ;;  %v8838_v63 = vpop.f32.mrb[127].mxu1  ;;  %14568 = vmatmul.mubr.msk.f32.gmra.mrb[232].mxu1 %vm1229_vm0, %v1195_v55  ;;  %v6279_v4 = vadd.f32 %v18943_v1, %v6278_v62  ;;  %13802 = vmatprep.mubr.msk.f32.mxu0 %vm1229_vm0, %v684_v56  ;;  %v1206_v54 = vld [vmem:[%s14872_s8 + $0x1fa0] sm:$0xff] }
 0x3ed   : > { %v8839_v0 = vadd.f32 %v18943_v1, %v8838_v63  ;;  %14570 = vmatprep.mubr.msk.f32.mxu1 %vm1229_vm0, %v1196_v57  ;;  %9871 = vst.msk [vmem:[%s15319_s11 + $0xbf8] sm:$0xff] %vm9487_vm1, %v6284_v60  ;;  %v695_v63 = vld [vmem:[%s14872_s8 + $0xfa8] sm:$0xff] }
 0x3ee   : > { %10383 = vst.msk [vmem:[%s15319_s11 + $0x1bf8] sm:$0xff] %vm9487_vm1, %v8844_v61  ;;  %9870 = vst.msk [vmem:[%s15319_s11 + $0xbf0] sm:$0xff] %vm9487_vm1, %v6279_v4  ;;  %v13645_v10 = vpop.f32.mrb[128].mxu0  ;;  %v1207_v4 = vld [vmem:[%s14872_s8 + $0x1fa8] sm:$0xff] }
 0x3ef   : > { %10382 = vst.msk [vmem:[%s15319_s11 + $0x1bf0] sm:$0xff] %vm9487_vm1, %v8839_v0  ;;  %v14413_v6 = vpop.f32.mrb[128].mxu1  ;;  %v6294_v8 = vadd.f32 %v18943_v1, %v13645_v10  ;;  %v6288_v9 = vpop.f32.mrb[129].mxu0  ;;  %13803 = vmatmul.mubr.msk.f32.gmra.mrb[234].mxu0 %vm1229_vm0, %v685_v2  ;;  %v696_v0 = vld [vmem:[%s14872_s8 + $0xfb0] sm:$0xff] }
 0x3f0   : > { %v8854_v13 = vadd.f32 %v18943_v1, %v14413_v6  ;;  %v8848_v11 = vpop.f32.mrb[129].mxu1  ;;  %14571 = vmatmul.mubr.msk.f32.gmra.mrb[234].mxu1 %vm1229_vm0, %v1197_v7  ;;  %v6289_v16 = vadd.f32 %v18943_v1, %v6288_v9  ;;  %13805 = vmatprep.mubr.msk.f32.mxu0 %vm1229_vm0, %v686_v3  ;;  %v1208_v2 = vld [vmem:[%s14872_s8 + $0x1fb0] sm:$0xff] }
 0x3f1   : > { %v8849_v12 = vadd.f32 %v18943_v1, %v8848_v11  ;;  %14573 = vmatprep.mubr.msk.f32.mxu1 %vm1229_vm0, %v1198_v5  ;;  %9873 = vst.msk [vmem:[%s15319_s11 + $0xc08] sm:$0xff] %vm9487_vm1, %v6294_v8  ;;  %v697_v11 = vld [vmem:[%s14872_s8 + $0xfb8] sm:$0xff] }
 0x3f2   : > { %10385 = vst.msk [vmem:[%s15319_s11 + $0x1c08] sm:$0xff] %vm9487_vm1, %v8854_v13  ;;  %9872 = vst.msk [vmem:[%s15319_s11 + $0xc00] sm:$0xff] %vm9487_vm1, %v6289_v16  ;;  %v13648_v18 = vpop.f32.mrb[130].mxu0  ;;  %v1209_v16 = vld [vmem:[%s14872_s8 + $0x1fb8] sm:$0xff] }
 0x3f3   : > { %10384 = vst.msk [vmem:[%s15319_s11 + $0x1c00] sm:$0xff] %vm9487_vm1, %v8849_v12  ;;  %v14416_v19 = vpop.f32.mrb[130].mxu1  ;;  %v6304_v20 = vadd.f32 %v18943_v1, %v13648_v18  ;;  %v6298_v23 = vpop.f32.mrb[131].mxu0  ;;  %13806 = vmatmul.mubr.msk.f32.gmra.mrb[236].mxu0 %vm1229_vm0, %v687_v14  ;;  %v698_v12 = vld [vmem:[%s14872_s8 + $0xfc0] sm:$0xff] }
 0x3f4   : > { %v8864_v22 = vadd.f32 %v18943_v1, %v14416_v19  ;;  %v8858_v24 = vpop.f32.mrb[131].mxu1  ;;  %14574 = vmatmul.mubr.msk.f32.gmra.mrb[236].mxu1 %vm1229_vm0, %v1199_v21  ;;  %v6299_v25 = vadd.f32 %v18943_v1, %v6298_v23  ;;  %13808 = vmatprep.mubr.msk.f32.mxu0 %vm1229_vm0, %v688_v15  ;;  %v1210_v14 = vld [vmem:[%s14872_s8 + $0x1fc0] sm:$0xff] }
 0x3f5   : > { %v8859_v26 = vadd.f32 %v18943_v1, %v8858_v24  ;;  %14576 = vmatprep.mubr.msk.f32.mxu1 %vm1229_vm0, %v1200_v17  ;;  %9875 = vst.msk [vmem:[%s15319_s11 + $0xc18] sm:$0xff] %vm9487_vm1, %v6304_v20  ;;  %v699_v24 = vld [vmem:[%s14872_s8 + $0xfc8] sm:$0xff] }
 0x3f6   : > { %10387 = vst.msk [vmem:[%s15319_s11 + $0x1c18] sm:$0xff] %vm9487_vm1, %v8864_v22  ;;  %9874 = vst.msk [vmem:[%s15319_s11 + $0xc10] sm:$0xff] %vm9487_vm1, %v6299_v25  ;;  %v13651_v31 = vpop.f32.mrb[132].mxu0  ;;  %v1211_v25 = vld [vmem:[%s14872_s8 + $0x1fc8] sm:$0xff] }
 0x3f7   : > { %10386 = vst.msk [vmem:[%s15319_s11 + $0x1c10] sm:$0xff] %vm9487_vm1, %v8859_v26  ;;  %v14419_v32 = vpop.f32.mrb[132].mxu1  ;;  %v6314_v33 = vadd.f32 %v18943_v1, %v13651_v31  ;;  %v6308_v35 = vpop.f32.mrb[133].mxu0  ;;  %13809 = vmatmul.mubr.msk.f32.gmra.mrb[238].mxu0 %vm1229_vm0, %v689_v29  ;;  %v700_v26 = vld [vmem:[%s14872_s8 + $0xfd0] sm:$0xff] }
 0x3f8   : > { %v8874_v34 = vadd.f32 %v18943_v1, %v14419_v32  ;;  %v8868_v36 = vpop.f32.mrb[133].mxu1  ;;  %14577 = vmatmul.mubr.msk.f32.gmra.mrb[238].mxu1 %vm1229_vm0, %v1201_v27  ;;  %v6309_v37 = vadd.f32 %v18943_v1, %v6308_v35  ;;  %13811 = vmatprep.mubr.msk.f32.mxu0 %vm1229_vm0, %v690_v28  ;;  %v1212_v29 = vld [vmem:[%s14872_s8 + $0x1fd0] sm:$0xff] }
 0x3f9   : > { %v8869_v38 = vadd.f32 %v18943_v1, %v8868_v36  ;;  %14579 = vmatprep.mubr.msk.f32.mxu1 %vm1229_vm0, %v1202_v30  ;;  %9877 = vst.msk [vmem:[%s15319_s11 + $0xc28] sm:$0xff] %vm9487_vm1, %v6314_v33  ;;  %v701_v36 = vld [vmem:[%s14872_s8 + $0xfd8] sm:$0xff] }
 0x3fa   : > { %10389 = vst.msk [vmem:[%s15319_s11 + $0x1c28] sm:$0xff] %vm9487_vm1, %v8874_v34  ;;  %9876 = vst.msk [vmem:[%s15319_s11 + $0xc20] sm:$0xff] %vm9487_vm1, %v6309_v37  ;;  %v13654_v43 = vpop.f32.mrb[134].mxu0  ;;  %v1213_v37 = vld [vmem:[%s14872_s8 + $0x1fd8] sm:$0xff] }
 0x3fb   : > { %10388 = vst.msk [vmem:[%s15319_s11 + $0x1c20] sm:$0xff] %vm9487_vm1, %v8869_v38  ;;  %v14422_v44 = vpop.f32.mrb[134].mxu1  ;;  %v6324_v45 = vadd.f32 %v18943_v1, %v13654_v43  ;;  %v6318_v47 = vpop.f32.mrb[135].mxu0  ;;  %13812 = vmatmul.mubr.msk.f32.gmra.mrb[240].mxu0 %vm1229_vm0, %v691_v39  ;;  %v702_v38 = vld [vmem:[%s14872_s8 + $0xfe0] sm:$0xff] }
 0x3fc   : > { %v8884_v46 = vadd.f32 %v18943_v1, %v14422_v44  ;;  %v8878_v48 = vpop.f32.mrb[135].mxu1  ;;  %14580 = vmatmul.mubr.msk.f32.gmra.mrb[240].mxu1 %vm1229_vm0, %v1203_v40  ;;  %v6319_v49 = vadd.f32 %v18943_v1, %v6318_v47  ;;  %13814 = vmatprep.mubr.msk.f32.mxu0 %vm1229_vm0, %v692_v41  ;;  %v1214_v39 = vld [vmem:[%s14872_s8 + $0x1fe0] sm:$0xff] }
 0x3fd   : > { %v8879_v50 = vadd.f32 %v18943_v1, %v8878_v48  ;;  %14582 = vmatprep.mubr.msk.f32.mxu1 %vm1229_vm0, %v1204_v42  ;;  %9879 = vst.msk [vmem:[%s15319_s11 + $0xc38] sm:$0xff] %vm9487_vm1, %v6324_v45  ;;  %v703_v48 = vld [vmem:[%s14872_s8 + $0xfe8] sm:$0xff] }
 0x3fe   : > { %10391 = vst.msk [vmem:[%s15319_s11 + $0x1c38] sm:$0xff] %vm9487_vm1, %v8884_v46  ;;  %9878 = vst.msk [vmem:[%s15319_s11 + $0xc30] sm:$0xff] %vm9487_vm1, %v6319_v49  ;;  %v13657_v55 = vpop.f32.mrb[136].mxu0  ;;  %v1215_v49 = vld [vmem:[%s14872_s8 + $0x1fe8] sm:$0xff] }
 0x3ff   : > { %10390 = vst.msk [vmem:[%s15319_s11 + $0x1c30] sm:$0xff] %vm9487_vm1, %v8879_v50  ;;  %v14425_v56 = vpop.f32.mrb[136].mxu1  ;;  %v6334_v57 = vadd.f32 %v18943_v1, %v13657_v55  ;;  %v6328_v59 = vpop.f32.mrb[137].mxu0  ;;  %13815 = vmatmul.mubr.msk.f32.gmra.mrb[242].mxu0 %vm1229_vm0, %v693_v51  ;;  %v704_v50 = vld [vmem:[%s14872_s8 + $0xff0] sm:$0xff] }
 0x400   : > { %v8894_v58 = vadd.f32 %v18943_v1, %v14425_v56  ;;  %v8888_v60 = vpop.f32.mrb[137].mxu1  ;;  %14583 = vmatmul.mubr.msk.f32.gmra.mrb[242].mxu1 %vm1229_vm0, %v1205_v52  ;;  %v6329_v61 = vadd.f32 %v18943_v1, %v6328_v59  ;;  %13817 = vmatprep.mubr.msk.f32.mxu0 %vm1229_vm0, %v694_v53  ;;  %v1216_v51 = vld [vmem:[%s14872_s8 + $0x1ff0] sm:$0xff] }
 0x401   : > { %v8889_v62 = vadd.f32 %v18943_v1, %v8888_v60  ;;  %14585 = vmatprep.mubr.msk.f32.mxu1 %vm1229_vm0, %v1206_v54  ;;  %9881 = vst.msk [vmem:[%s15319_s11 + $0xc48] sm:$0xff] %vm9487_vm1, %v6334_v57  ;;  %v705_v60 = vld [vmem:[%s14872_s8 + $0xff8] sm:$0xff] }
 0x402   : > { %10393 = vst.msk [vmem:[%s15319_s11 + $0x1c48] sm:$0xff] %vm9487_vm1, %v8894_v58  ;;  %9880 = vst.msk [vmem:[%s15319_s11 + $0xc40] sm:$0xff] %vm9487_vm1, %v6329_v61  ;;  %v13660_v7 = vpop.f32.mrb[138].mxu0  ;;  %v1217_v61 = vld [vmem:[%s14872_s8 + $0x1ff8] sm:$0xff] }
 0x403   : > { %10392 = vst.msk [vmem:[%s15319_s11 + $0x1c40] sm:$0xff] %vm9487_vm1, %v8889_v62  ;;  %v14428_v3 = vpop.f32.mrb[138].mxu1  ;;  %v6344_v5 = vadd.f32 %v18943_v1, %v13660_v7  ;;  %v6338_v6 = vpop.f32.mrb[139].mxu0  ;;  %13818 = vmatmul.mubr.msk.f32.gmra.mrb[244].mxu0 %vm1229_vm0, %v695_v63 }
 0x404   : > { %v8904_v10 = vadd.f32 %v18943_v1, %v14428_v3  ;;  %v8898_v8 = vpop.f32.mrb[139].mxu1  ;;  %14586 = vmatmul.mubr.msk.f32.gmra.mrb[244].mxu1 %vm1229_vm0, %v1207_v4  ;;  %v6339_v13 = vadd.f32 %v18943_v1, %v6338_v6  ;;  %13820 = vmatprep.mubr.msk.f32.mxu0 %vm1229_vm0, %v696_v0 }
 0x405   : > { %v8899_v9 = vadd.f32 %v18943_v1, %v8898_v8  ;;  %14588 = vmatprep.mubr.msk.f32.mxu1 %vm1229_vm0, %v1208_v2  ;;  %9883 = vst.msk [vmem:[%s15319_s11 + $0xc58] sm:$0xff] %vm9487_vm1, %v6344_v5 }
 0x406   : > { %10395 = vst.msk [vmem:[%s15319_s11 + $0x1c58] sm:$0xff] %vm9487_vm1, %v8904_v10  ;;  %9882 = vst.msk [vmem:[%s15319_s11 + $0xc50] sm:$0xff] %vm9487_vm1, %v6339_v13  ;;  %v13663_v21 = vpop.f32.mrb[140].mxu0 }
 0x407   : > { %10394 = vst.msk [vmem:[%s15319_s11 + $0x1c50] sm:$0xff] %vm9487_vm1, %v8899_v9  ;;  %v14431_v15 = vpop.f32.mrb[140].mxu1  ;;  %v6354_v17 = vadd.f32 %v18943_v1, %v13663_v21  ;;  %v6348_v19 = vpop.f32.mrb[141].mxu0  ;;  %13821 = vmatmul.mubr.msk.f32.gmra.mrb[246].mxu0 %vm1229_vm0, %v697_v11 }
 0x408   : > { %v8914_v18 = vadd.f32 %v18943_v1, %v14431_v15  ;;  %v8908_v20 = vpop.f32.mrb[141].mxu1  ;;  %14589 = vmatmul.mubr.msk.f32.gmra.mrb[246].mxu1 %vm1229_vm0, %v1209_v16  ;;  %v6349_v22 = vadd.f32 %v18943_v1, %v6348_v19  ;;  %13823 = vmatprep.mubr.msk.f32.mxu0 %vm1229_vm0, %v698_v12 }
 0x409   : > { %v8909_v23 = vadd.f32 %v18943_v1, %v8908_v20  ;;  %14591 = vmatprep.mubr.msk.f32.mxu1 %vm1229_vm0, %v1210_v14  ;;  %9885 = vst.msk [vmem:[%s15319_s11 + $0xc68] sm:$0xff] %vm9487_vm1, %v6354_v17 }
 0x40a   : > { %10397 = vst.msk [vmem:[%s15319_s11 + $0x1c68] sm:$0xff] %vm9487_vm1, %v8914_v18  ;;  %9884 = vst.msk [vmem:[%s15319_s11 + $0xc60] sm:$0xff] %vm9487_vm1, %v6349_v22  ;;  %v13666_v27 = vpop.f32.mrb[142].mxu0 }
 0x40b   : > { %10396 = vst.msk [vmem:[%s15319_s11 + $0x1c60] sm:$0xff] %vm9487_vm1, %v8909_v23  ;;  %v14434_v28 = vpop.f32.mrb[142].mxu1  ;;  %v6364_v30 = vadd.f32 %v18943_v1, %v13666_v27  ;;  %v6358_v32 = vpop.f32.mrb[143].mxu0  ;;  %13824 = vmatmul.mubr.msk.f32.gmra.mrb[248].mxu0 %vm1229_vm0, %v699_v24 }
 0x40c   : > { %v8924_v31 = vadd.f32 %v18943_v1, %v14434_v28  ;;  %v8918_v33 = vpop.f32.mrb[143].mxu1  ;;  %14592 = vmatmul.mubr.msk.f32.gmra.mrb[248].mxu1 %vm1229_vm0, %v1211_v25  ;;  %v6359_v34 = vadd.f32 %v18943_v1, %v6358_v32  ;;  %13826 = vmatprep.mubr.msk.f32.mxu0 %vm1229_vm0, %v700_v26 }
 0x40d   : > { %v8919_v35 = vadd.f32 %v18943_v1, %v8918_v33  ;;  %14594 = vmatprep.mubr.msk.f32.mxu1 %vm1229_vm0, %v1212_v29  ;;  %9887 = vst.msk [vmem:[%s15319_s11 + $0xc78] sm:$0xff] %vm9487_vm1, %v6364_v30 }
 0x40e   : > { %10399 = vst.msk [vmem:[%s15319_s11 + $0x1c78] sm:$0xff] %vm9487_vm1, %v8924_v31  ;;  %9886 = vst.msk [vmem:[%s15319_s11 + $0xc70] sm:$0xff] %vm9487_vm1, %v6359_v34  ;;  %v13669_v40 = vpop.f32.mrb[144].mxu0 }
 0x40f   : > { %10398 = vst.msk [vmem:[%s15319_s11 + $0x1c70] sm:$0xff] %vm9487_vm1, %v8919_v35  ;;  %v14437_v41 = vpop.f32.mrb[144].mxu1  ;;  %v6374_v42 = vadd.f32 %v18943_v1, %v13669_v40  ;;  %v6368_v44 = vpop.f32.mrb[145].mxu0  ;;  %13827 = vmatmul.mubr.msk.f32.gmra.mrb[250].mxu0 %vm1229_vm0, %v701_v36 }
 0x410   : > { %v8934_v43 = vadd.f32 %v18943_v1, %v14437_v41  ;;  %v8928_v45 = vpop.f32.mrb[145].mxu1  ;;  %14595 = vmatmul.mubr.msk.f32.gmra.mrb[250].mxu1 %vm1229_vm0, %v1213_v37  ;;  %v6369_v46 = vadd.f32 %v18943_v1, %v6368_v44  ;;  %13829 = vmatprep.mubr.msk.f32.mxu0 %vm1229_vm0, %v702_v38 }
 0x411   : > { %v8929_v47 = vadd.f32 %v18943_v1, %v8928_v45  ;;  %14597 = vmatprep.mubr.msk.f32.mxu1 %vm1229_vm0, %v1214_v39  ;;  %9889 = vst.msk [vmem:[%s15319_s11 + $0xc88] sm:$0xff] %vm9487_vm1, %v6374_v42 }
 0x412   : > { %10401 = vst.msk [vmem:[%s15319_s11 + $0x1c88] sm:$0xff] %vm9487_vm1, %v8934_v43  ;;  %9888 = vst.msk [vmem:[%s15319_s11 + $0xc80] sm:$0xff] %vm9487_vm1, %v6369_v46  ;;  %v13672_v52 = vpop.f32.mrb[146].mxu0 }
 0x413   : > { %10400 = vst.msk [vmem:[%s15319_s11 + $0x1c80] sm:$0xff] %vm9487_vm1, %v8929_v47  ;;  %v14440_v53 = vpop.f32.mrb[146].mxu1  ;;  %v6384_v54 = vadd.f32 %v18943_v1, %v13672_v52  ;;  %v6378_v56 = vpop.f32.mrb[147].mxu0  ;;  %13830 = vmatmul.mubr.msk.f32.gmra.mrb[252].mxu0 %vm1229_vm0, %v703_v48 }
 0x414   : > { %v8944_v55 = vadd.f32 %v18943_v1, %v14440_v53  ;;  %v8938_v57 = vpop.f32.mrb[147].mxu1  ;;  %14598 = vmatmul.mubr.msk.f32.gmra.mrb[252].mxu1 %vm1229_vm0, %v1215_v49  ;;  %v6379_v58 = vadd.f32 %v18943_v1, %v6378_v56  ;;  %13832 = vmatprep.mubr.msk.f32.mxu0 %vm1229_vm0, %v704_v50 }
 0x415   : > { %v8939_v59 = vadd.f32 %v18943_v1, %v8938_v57  ;;  %14600 = vmatprep.mubr.msk.f32.mxu1 %vm1229_vm0, %v1216_v51  ;;  %9891 = vst.msk [vmem:[%s15319_s11 + $0xc98] sm:$0xff] %vm9487_vm1, %v6384_v54 }
 0x416   : > { %10403 = vst.msk [vmem:[%s15319_s11 + $0x1c98] sm:$0xff] %vm9487_vm1, %v8944_v55  ;;  %9890 = vst.msk [vmem:[%s15319_s11 + $0xc90] sm:$0xff] %vm9487_vm1, %v6379_v58  ;;  %v13675_v62 = vpop.f32.mrb[148].mxu0 }
 0x417   : > { %10402 = vst.msk [vmem:[%s15319_s11 + $0x1c90] sm:$0xff] %vm9487_vm1, %v8939_v59  ;;  %v14443_v63 = vpop.f32.mrb[148].mxu1  ;;  %v6394_v4 = vadd.f32 %v18943_v1, %v13675_v62  ;;  %v6388_v2 = vpop.f32.mrb[149].mxu0  ;;  %13833 = vmatmul.mubr.msk.f32.gmra.mrb[254].mxu0 %vm1229_vm0, %v705_v60 }
 0x418   : > { %v8954_v0 = vadd.f32 %v18943_v1, %v14443_v63  ;;  %v8948_v7 = vpop.f32.mrb[149].mxu1  ;;  %14601 = vmatmul.mubr.msk.f32.gmra.mrb[254].mxu1 %vm1229_vm0, %v1217_v61  ;;  %v6389_v3 = vadd.f32 %v18943_v1, %v6388_v2 }
 0x419   : > { %v8949_v5 = vadd.f32 %v18943_v1, %v8948_v7  ;;  %9893 = vst.msk [vmem:[%s15319_s11 + $0xca8] sm:$0xff] %vm9487_vm1, %v6394_v4 }
 0x41a   : > { %10405 = vst.msk [vmem:[%s15319_s11 + $0x1ca8] sm:$0xff] %vm9487_vm1, %v8954_v0  ;;  %9892 = vst.msk [vmem:[%s15319_s11 + $0xca0] sm:$0xff] %vm9487_vm1, %v6389_v3  ;;  %v13678_v10 = vpop.f32.mrb[150].mxu0  ;;  %v19461_v0 = vld [vmem:[#allocation2] ss:$0 sm:$0xff] }
 0x41b   : > { %10404 = vst.msk [vmem:[%s15319_s11 + $0x1ca0] sm:$0xff] %vm9487_vm1, %v8949_v5  ;;  %v14446_v6 = vpop.f32.mrb[150].mxu1  ;;  %v6404_v8 = vadd.f32 %v18943_v1, %v13678_v10  ;;  %v6398_v9 = vpop.f32.mrb[151].mxu0 }
 0x41c   : > { %v8964_v13 = vadd.f32 %v18943_v1, %v14446_v6  ;;  %v8958_v11 = vpop.f32.mrb[151].mxu1  ;;  %v6399_v16 = vadd.f32 %v18943_v1, %v6398_v9 }
 0x41d   : > { %v8959_v12 = vadd.f32 %v18943_v1, %v8958_v11  ;;  %9895 = vst.msk [vmem:[%s15319_s11 + $0xcb8] sm:$0xff] %vm9487_vm1, %v6404_v8 }
 0x41e   : > { %10407 = vst.msk [vmem:[%s15319_s11 + $0x1cb8] sm:$0xff] %vm9487_vm1, %v8964_v13  ;;  %9894 = vst.msk [vmem:[%s15319_s11 + $0xcb0] sm:$0xff] %vm9487_vm1, %v6399_v16  ;;  %v13681_v14 = vpop.f32.mrb[152].mxu0 }
 0x41f   : > { %10406 = vst.msk [vmem:[%s15319_s11 + $0x1cb0] sm:$0xff] %vm9487_vm1, %v8959_v12  ;;  %v14449_v21 = vpop.f32.mrb[152].mxu1  ;;  %v6414_v15 = vadd.f32 %v18943_v1, %v13681_v14  ;;  %v6408_v18 = vpop.f32.mrb[153].mxu0 }
 0x420   : > { %v8974_v17 = vadd.f32 %v18943_v1, %v14449_v21  ;;  %v8968_v19 = vpop.f32.mrb[153].mxu1  ;;  %v6409_v20 = vadd.f32 %v18943_v1, %v6408_v18 }
 0x421   : > { %v8969_v22 = vadd.f32 %v18943_v1, %v8968_v19  ;;  %9897 = vst.msk [vmem:[%s15319_s11 + $0xcc8] sm:$0xff] %vm9487_vm1, %v6414_v15 }
 0x422   : > { %10409 = vst.msk [vmem:[%s15319_s11 + $0x1cc8] sm:$0xff] %vm9487_vm1, %v8974_v17  ;;  %9896 = vst.msk [vmem:[%s15319_s11 + $0xcc0] sm:$0xff] %vm9487_vm1, %v6409_v20  ;;  %v13684_v23 = vpop.f32.mrb[154].mxu0 }
 0x423   : > { %10408 = vst.msk [vmem:[%s15319_s11 + $0x1cc0] sm:$0xff] %vm9487_vm1, %v8969_v22  ;;  %v14452_v24 = vpop.f32.mrb[154].mxu1  ;;  %v6424_v25 = vadd.f32 %v18943_v1, %v13684_v23  ;;  %v6418_v29 = vpop.f32.mrb[155].mxu0 }
 0x424   : > { %v8984_v26 = vadd.f32 %v18943_v1, %v14452_v24  ;;  %v8978_v27 = vpop.f32.mrb[155].mxu1  ;;  %v6419_v28 = vadd.f32 %v18943_v1, %v6418_v29 }
 0x425   : > { %v8979_v30 = vadd.f32 %v18943_v1, %v8978_v27  ;;  %9899 = vst.msk [vmem:[%s15319_s11 + $0xcd8] sm:$0xff] %vm9487_vm1, %v6424_v25 }
 0x426   : > { %10411 = vst.msk [vmem:[%s15319_s11 + $0x1cd8] sm:$0xff] %vm9487_vm1, %v8984_v26  ;;  %9898 = vst.msk [vmem:[%s15319_s11 + $0xcd0] sm:$0xff] %vm9487_vm1, %v6419_v28  ;;  %v13687_v31 = vpop.f32.mrb[156].mxu0 }
 0x427   : > { %10410 = vst.msk [vmem:[%s15319_s11 + $0x1cd0] sm:$0xff] %vm9487_vm1, %v8979_v30  ;;  %v14455_v32 = vpop.f32.mrb[156].mxu1  ;;  %v6434_v33 = vadd.f32 %v18943_v1, %v13687_v31  ;;  %v6428_v35 = vpop.f32.mrb[157].mxu0 }
 0x428   : > { %v8994_v34 = vadd.f32 %v18943_v1, %v14455_v32  ;;  %v8988_v36 = vpop.f32.mrb[157].mxu1  ;;  %v6429_v37 = vadd.f32 %v18943_v1, %v6428_v35 }
 0x429   : > { %v8989_v38 = vadd.f32 %v18943_v1, %v8988_v36  ;;  %9901 = vst.msk [vmem:[%s15319_s11 + $0xce8] sm:$0xff] %vm9487_vm1, %v6434_v33 }
 0x42a   : > { %10413 = vst.msk [vmem:[%s15319_s11 + $0x1ce8] sm:$0xff] %vm9487_vm1, %v8994_v34  ;;  %9900 = vst.msk [vmem:[%s15319_s11 + $0xce0] sm:$0xff] %vm9487_vm1, %v6429_v37  ;;  %v13690_v39 = vpop.f32.mrb[158].mxu0 }
 0x42b   : > { %10412 = vst.msk [vmem:[%s15319_s11 + $0x1ce0] sm:$0xff] %vm9487_vm1, %v8989_v38  ;;  %v14458_v40 = vpop.f32.mrb[158].mxu1  ;;  %v6444_v41 = vadd.f32 %v18943_v1, %v13690_v39  ;;  %v6438_v43 = vpop.f32.mrb[159].mxu0 }
 0x42c   : > { %v9004_v42 = vadd.f32 %v18943_v1, %v14458_v40  ;;  %v8998_v44 = vpop.f32.mrb[159].mxu1  ;;  %v6439_v45 = vadd.f32 %v18943_v1, %v6438_v43 }
 0x42d   : > { %v8999_v46 = vadd.f32 %v18943_v1, %v8998_v44  ;;  %9903 = vst.msk [vmem:[%s15319_s11 + $0xcf8] sm:$0xff] %vm9487_vm1, %v6444_v41 }
 0x42e   : > { %10415 = vst.msk [vmem:[%s15319_s11 + $0x1cf8] sm:$0xff] %vm9487_vm1, %v9004_v42  ;;  %9902 = vst.msk [vmem:[%s15319_s11 + $0xcf0] sm:$0xff] %vm9487_vm1, %v6439_v45  ;;  %v13693_v47 = vpop.f32.mrb[160].mxu0 }
 0x42f   : > { %10414 = vst.msk [vmem:[%s15319_s11 + $0x1cf0] sm:$0xff] %vm9487_vm1, %v8999_v46  ;;  %v14461_v48 = vpop.f32.mrb[160].mxu1  ;;  %v6454_v49 = vadd.f32 %v18943_v1, %v13693_v47  ;;  %v6448_v51 = vpop.f32.mrb[161].mxu0 }
 0x430   : > { %v9014_v50 = vadd.f32 %v18943_v1, %v14461_v48  ;;  %v9008_v52 = vpop.f32.mrb[161].mxu1  ;;  %v6449_v53 = vadd.f32 %v18943_v1, %v6448_v51 }
 0x431   : > { %v9009_v54 = vadd.f32 %v18943_v1, %v9008_v52  ;;  %9905 = vst.msk [vmem:[%s15319_s11 + $0xd08] sm:$0xff] %vm9487_vm1, %v6454_v49 }
 0x432   : > { %10417 = vst.msk [vmem:[%s15319_s11 + $0x1d08] sm:$0xff] %vm9487_vm1, %v9014_v50  ;;  %9904 = vst.msk [vmem:[%s15319_s11 + $0xd00] sm:$0xff] %vm9487_vm1, %v6449_v53  ;;  %v13696_v55 = vpop.f32.mrb[162].mxu0 }
 0x433   : > { %10416 = vst.msk [vmem:[%s15319_s11 + $0x1d00] sm:$0xff] %vm9487_vm1, %v9009_v54  ;;  %v14464_v56 = vpop.f32.mrb[162].mxu1  ;;  %v6464_v57 = vadd.f32 %v18943_v1, %v13696_v55  ;;  %v6458_v59 = vpop.f32.mrb[163].mxu0 }
 0x434   : > { %v9024_v58 = vadd.f32 %v18943_v1, %v14464_v56  ;;  %v9018_v60 = vpop.f32.mrb[163].mxu1  ;;  %v6459_v61 = vadd.f32 %v18943_v1, %v6458_v59 }
 0x435   : > { %v9019_v62 = vadd.f32 %v18943_v1, %v9018_v60  ;;  %9907 = vst.msk [vmem:[%s15319_s11 + $0xd18] sm:$0xff] %vm9487_vm1, %v6464_v57 }
 0x436   : > { %10419 = vst.msk [vmem:[%s15319_s11 + $0x1d18] sm:$0xff] %vm9487_vm1, %v9024_v58  ;;  %9906 = vst.msk [vmem:[%s15319_s11 + $0xd10] sm:$0xff] %vm9487_vm1, %v6459_v61  ;;  %v13699_v63 = vpop.f32.mrb[164].mxu0 }
 0x437   : > { %10418 = vst.msk [vmem:[%s15319_s11 + $0x1d10] sm:$0xff] %vm9487_vm1, %v9019_v62  ;;  %v14467_v4 = vpop.f32.mrb[164].mxu1  ;;  %v6474_v2 = vadd.f32 %v19461_v0, %v13699_v63  ;;  %v6468_v3 = vpop.f32.mrb[165].mxu0 }
 0x438   : > { %v9034_v7 = vadd.f32 %v19461_v0, %v14467_v4  ;;  %v9028_v1 = vpop.f32.mrb[165].mxu1  ;;  %v6469_v5 = vadd.f32 %v19461_v0, %v6468_v3 }
 0x439   : > { %v9029_v10 = vadd.f32 %v19461_v0, %v9028_v1  ;;  %9909 = vst.msk [vmem:[%s15319_s11 + $0xd28] sm:$0xff] %vm9487_vm1, %v6474_v2 }
 0x43a   : > { %10421 = vst.msk [vmem:[%s15319_s11 + $0x1d28] sm:$0xff] %vm9487_vm1, %v9034_v7  ;;  %9908 = vst.msk [vmem:[%s15319_s11 + $0xd20] sm:$0xff] %vm9487_vm1, %v6469_v5  ;;  %v13702_v6 = vpop.f32.mrb[166].mxu0 }
 0x43b   : > { %10420 = vst.msk [vmem:[%s15319_s11 + $0x1d20] sm:$0xff] %vm9487_vm1, %v9029_v10  ;;  %v14470_v8 = vpop.f32.mrb[166].mxu1  ;;  %v6484_v13 = vadd.f32 %v19461_v0, %v13702_v6  ;;  %v6478_v11 = vpop.f32.mrb[167].mxu0 }
 0x43c   : > { %v9044_v9 = vadd.f32 %v19461_v0, %v14470_v8  ;;  %v9038_v16 = vpop.f32.mrb[167].mxu1  ;;  %v6479_v12 = vadd.f32 %v19461_v0, %v6478_v11 }
 0x43d   : > { %v9039_v14 = vadd.f32 %v19461_v0, %v9038_v16  ;;  %9911 = vst.msk [vmem:[%s15319_s11 + $0xd38] sm:$0xff] %vm9487_vm1, %v6484_v13 }
 0x43e   : > { %10423 = vst.msk [vmem:[%s15319_s11 + $0x1d38] sm:$0xff] %vm9487_vm1, %v9044_v9  ;;  %9910 = vst.msk [vmem:[%s15319_s11 + $0xd30] sm:$0xff] %vm9487_vm1, %v6479_v12  ;;  %v13705_v21 = vpop.f32.mrb[168].mxu0 }
 0x43f   : > { %10422 = vst.msk [vmem:[%s15319_s11 + $0x1d30] sm:$0xff] %vm9487_vm1, %v9039_v14  ;;  %v14473_v15 = vpop.f32.mrb[168].mxu1  ;;  %v6494_v17 = vadd.f32 %v19461_v0, %v13705_v21  ;;  %v6488_v19 = vpop.f32.mrb[169].mxu0 }
 0x440   : > { %v9054_v18 = vadd.f32 %v19461_v0, %v14473_v15  ;;  %v9048_v20 = vpop.f32.mrb[169].mxu1  ;;  %v6489_v22 = vadd.f32 %v19461_v0, %v6488_v19 }
 0x441   : > { %v9049_v23 = vadd.f32 %v19461_v0, %v9048_v20  ;;  %9913 = vst.msk [vmem:[%s15319_s11 + $0xd48] sm:$0xff] %vm9487_vm1, %v6494_v17 }
 0x442   : > { %10425 = vst.msk [vmem:[%s15319_s11 + $0x1d48] sm:$0xff] %vm9487_vm1, %v9054_v18  ;;  %9912 = vst.msk [vmem:[%s15319_s11 + $0xd40] sm:$0xff] %vm9487_vm1, %v6489_v22  ;;  %v13708_v24 = vpop.f32.mrb[170].mxu0 }
 0x443   : > { %10424 = vst.msk [vmem:[%s15319_s11 + $0x1d40] sm:$0xff] %vm9487_vm1, %v9049_v23  ;;  %v14476_v25 = vpop.f32.mrb[170].mxu1  ;;  %v6504_v26 = vadd.f32 %v19461_v0, %v13708_v24  ;;  %v6498_v27 = vpop.f32.mrb[171].mxu0 }
 0x444   : > { %v9064_v29 = vadd.f32 %v19461_v0, %v14476_v25  ;;  %v9058_v28 = vpop.f32.mrb[171].mxu1  ;;  %v6499_v30 = vadd.f32 %v19461_v0, %v6498_v27 }
 0x445   : > { %v9059_v31 = vadd.f32 %v19461_v0, %v9058_v28  ;;  %9915 = vst.msk [vmem:[%s15319_s11 + $0xd58] sm:$0xff] %vm9487_vm1, %v6504_v26 }
 0x446   : > { %10427 = vst.msk [vmem:[%s15319_s11 + $0x1d58] sm:$0xff] %vm9487_vm1, %v9064_v29  ;;  %9914 = vst.msk [vmem:[%s15319_s11 + $0xd50] sm:$0xff] %vm9487_vm1, %v6499_v30  ;;  %v13711_v32 = vpop.f32.mrb[172].mxu0 }
 0x447   : > { %10426 = vst.msk [vmem:[%s15319_s11 + $0x1d50] sm:$0xff] %vm9487_vm1, %v9059_v31  ;;  %v14479_v33 = vpop.f32.mrb[172].mxu1  ;;  %v6514_v34 = vadd.f32 %v19461_v0, %v13711_v32  ;;  %v6508_v36 = vpop.f32.mrb[173].mxu0 }
 0x448   : > { %v9074_v35 = vadd.f32 %v19461_v0, %v14479_v33  ;;  %v9068_v37 = vpop.f32.mrb[173].mxu1  ;;  %v6509_v38 = vadd.f32 %v19461_v0, %v6508_v36 }
 0x449   : > { %v9069_v39 = vadd.f32 %v19461_v0, %v9068_v37  ;;  %9917 = vst.msk [vmem:[%s15319_s11 + $0xd68] sm:$0xff] %vm9487_vm1, %v6514_v34 }
 0x44a   : > { %10429 = vst.msk [vmem:[%s15319_s11 + $0x1d68] sm:$0xff] %vm9487_vm1, %v9074_v35  ;;  %9916 = vst.msk [vmem:[%s15319_s11 + $0xd60] sm:$0xff] %vm9487_vm1, %v6509_v38  ;;  %v13714_v40 = vpop.f32.mrb[174].mxu0 }
 0x44b   : > { %10428 = vst.msk [vmem:[%s15319_s11 + $0x1d60] sm:$0xff] %vm9487_vm1, %v9069_v39  ;;  %v14482_v41 = vpop.f32.mrb[174].mxu1  ;;  %v6524_v42 = vadd.f32 %v19461_v0, %v13714_v40  ;;  %v6518_v44 = vpop.f32.mrb[175].mxu0 }
 0x44c   : > { %v9084_v43 = vadd.f32 %v19461_v0, %v14482_v41  ;;  %v9078_v45 = vpop.f32.mrb[175].mxu1  ;;  %v6519_v46 = vadd.f32 %v19461_v0, %v6518_v44 }
 0x44d   : > { %v9079_v47 = vadd.f32 %v19461_v0, %v9078_v45  ;;  %9919 = vst.msk [vmem:[%s15319_s11 + $0xd78] sm:$0xff] %vm9487_vm1, %v6524_v42 }
 0x44e   : > { %10431 = vst.msk [vmem:[%s15319_s11 + $0x1d78] sm:$0xff] %vm9487_vm1, %v9084_v43  ;;  %9918 = vst.msk [vmem:[%s15319_s11 + $0xd70] sm:$0xff] %vm9487_vm1, %v6519_v46  ;;  %v13717_v48 = vpop.f32.mrb[176].mxu0 }
 0x44f   : > { %10430 = vst.msk [vmem:[%s15319_s11 + $0x1d70] sm:$0xff] %vm9487_vm1, %v9079_v47  ;;  %v14485_v49 = vpop.f32.mrb[176].mxu1  ;;  %v6534_v50 = vadd.f32 %v19461_v0, %v13717_v48  ;;  %v6528_v52 = vpop.f32.mrb[177].mxu0 }
 0x450   : > { %v9094_v51 = vadd.f32 %v19461_v0, %v14485_v49  ;;  %v9088_v53 = vpop.f32.mrb[177].mxu1  ;;  %v6529_v54 = vadd.f32 %v19461_v0, %v6528_v52 }
 0x451   : > { %v9089_v55 = vadd.f32 %v19461_v0, %v9088_v53  ;;  %9921 = vst.msk [vmem:[%s15319_s11 + $0xd88] sm:$0xff] %vm9487_vm1, %v6534_v50 }
 0x452   : > { %10433 = vst.msk [vmem:[%s15319_s11 + $0x1d88] sm:$0xff] %vm9487_vm1, %v9094_v51  ;;  %9920 = vst.msk [vmem:[%s15319_s11 + $0xd80] sm:$0xff] %vm9487_vm1, %v6529_v54  ;;  %v13720_v56 = vpop.f32.mrb[178].mxu0 }
 0x453   : > { %10432 = vst.msk [vmem:[%s15319_s11 + $0x1d80] sm:$0xff] %vm9487_vm1, %v9089_v55  ;;  %v14488_v57 = vpop.f32.mrb[178].mxu1  ;;  %v6544_v58 = vadd.f32 %v19461_v0, %v13720_v56  ;;  %v6538_v60 = vpop.f32.mrb[179].mxu0 }
 0x454   : > { %v9104_v59 = vadd.f32 %v19461_v0, %v14488_v57  ;;  %v9098_v61 = vpop.f32.mrb[179].mxu1  ;;  %v6539_v62 = vadd.f32 %v19461_v0, %v6538_v60 }
 0x455   : > { %v9099_v63 = vadd.f32 %v19461_v0, %v9098_v61  ;;  %9923 = vst.msk [vmem:[%s15319_s11 + $0xd98] sm:$0xff] %vm9487_vm1, %v6544_v58 }
 0x456   : > { %10435 = vst.msk [vmem:[%s15319_s11 + $0x1d98] sm:$0xff] %vm9487_vm1, %v9104_v59  ;;  %9922 = vst.msk [vmem:[%s15319_s11 + $0xd90] sm:$0xff] %vm9487_vm1, %v6539_v62  ;;  %v13723_v4 = vpop.f32.mrb[180].mxu0 }
 0x457   : > { %10434 = vst.msk [vmem:[%s15319_s11 + $0x1d90] sm:$0xff] %vm9487_vm1, %v9099_v63  ;;  %v14491_v2 = vpop.f32.mrb[180].mxu1  ;;  %v6554_v7 = vadd.f32 %v19461_v0, %v13723_v4  ;;  %v6548_v1 = vpop.f32.mrb[181].mxu0 }
 0x458   : > { %v9114_v3 = vadd.f32 %v19461_v0, %v14491_v2  ;;  %v9108_v5 = vpop.f32.mrb[181].mxu1  ;;  %v6549_v10 = vadd.f32 %v19461_v0, %v6548_v1 }
 0x459   : > { %v9109_v6 = vadd.f32 %v19461_v0, %v9108_v5  ;;  %9925 = vst.msk [vmem:[%s15319_s11 + $0xda8] sm:$0xff] %vm9487_vm1, %v6554_v7 }
 0x45a   : > { %10437 = vst.msk [vmem:[%s15319_s11 + $0x1da8] sm:$0xff] %vm9487_vm1, %v9114_v3  ;;  %9924 = vst.msk [vmem:[%s15319_s11 + $0xda0] sm:$0xff] %vm9487_vm1, %v6549_v10  ;;  %v13726_v8 = vpop.f32.mrb[182].mxu0 }
 0x45b   : > { %10436 = vst.msk [vmem:[%s15319_s11 + $0x1da0] sm:$0xff] %vm9487_vm1, %v9109_v6  ;;  %v14494_v13 = vpop.f32.mrb[182].mxu1  ;;  %v6564_v9 = vadd.f32 %v19461_v0, %v13726_v8  ;;  %v6558_v16 = vpop.f32.mrb[183].mxu0 }
 0x45c   : > { %v9124_v11 = vadd.f32 %v19461_v0, %v14494_v13  ;;  %v9118_v12 = vpop.f32.mrb[183].mxu1  ;;  %v6559_v14 = vadd.f32 %v19461_v0, %v6558_v16 }
 0x45d   : > { %v9119_v21 = vadd.f32 %v19461_v0, %v9118_v12  ;;  %9927 = vst.msk [vmem:[%s15319_s11 + $0xdb8] sm:$0xff] %vm9487_vm1, %v6564_v9 }
 0x45e   : > { %10439 = vst.msk [vmem:[%s15319_s11 + $0x1db8] sm:$0xff] %vm9487_vm1, %v9124_v11  ;;  %9926 = vst.msk [vmem:[%s15319_s11 + $0xdb0] sm:$0xff] %vm9487_vm1, %v6559_v14  ;;  %v13729_v15 = vpop.f32.mrb[184].mxu0 }
 0x45f   : > { %10438 = vst.msk [vmem:[%s15319_s11 + $0x1db0] sm:$0xff] %vm9487_vm1, %v9119_v21  ;;  %v14497_v17 = vpop.f32.mrb[184].mxu1  ;;  %v6574_v18 = vadd.f32 %v19461_v0, %v13729_v15  ;;  %v6568_v20 = vpop.f32.mrb[185].mxu0 }
 0x460   : > { %v9134_v19 = vadd.f32 %v19461_v0, %v14497_v17  ;;  %v9128_v22 = vpop.f32.mrb[185].mxu1  ;;  %v6569_v23 = vadd.f32 %v19461_v0, %v6568_v20 }
 0x461   : > { %v9129_v24 = vadd.f32 %v19461_v0, %v9128_v22  ;;  %9929 = vst.msk [vmem:[%s15319_s11 + $0xdc8] sm:$0xff] %vm9487_vm1, %v6574_v18 }
 0x462   : > { %10441 = vst.msk [vmem:[%s15319_s11 + $0x1dc8] sm:$0xff] %vm9487_vm1, %v9134_v19  ;;  %9928 = vst.msk [vmem:[%s15319_s11 + $0xdc0] sm:$0xff] %vm9487_vm1, %v6569_v23  ;;  %v13732_v25 = vpop.f32.mrb[186].mxu0 }
 0x463   : > { %10440 = vst.msk [vmem:[%s15319_s11 + $0x1dc0] sm:$0xff] %vm9487_vm1, %v9129_v24  ;;  %v14500_v26 = vpop.f32.mrb[186].mxu1  ;;  %v6584_v29 = vadd.f32 %v19461_v0, %v13732_v25  ;;  %v6578_v28 = vpop.f32.mrb[187].mxu0 }
 0x464   : > { %v9144_v27 = vadd.f32 %v19461_v0, %v14500_v26  ;;  %v9138_v30 = vpop.f32.mrb[187].mxu1  ;;  %v6579_v31 = vadd.f32 %v19461_v0, %v6578_v28 }
 0x465   : > { %v9139_v32 = vadd.f32 %v19461_v0, %v9138_v30  ;;  %9931 = vst.msk [vmem:[%s15319_s11 + $0xdd8] sm:$0xff] %vm9487_vm1, %v6584_v29 }
 0x466   : > { %10443 = vst.msk [vmem:[%s15319_s11 + $0x1dd8] sm:$0xff] %vm9487_vm1, %v9144_v27  ;;  %9930 = vst.msk [vmem:[%s15319_s11 + $0xdd0] sm:$0xff] %vm9487_vm1, %v6579_v31  ;;  %v13735_v33 = vpop.f32.mrb[188].mxu0 }
 0x467   : > { %10442 = vst.msk [vmem:[%s15319_s11 + $0x1dd0] sm:$0xff] %vm9487_vm1, %v9139_v32  ;;  %v14503_v34 = vpop.f32.mrb[188].mxu1  ;;  %v6594_v35 = vadd.f32 %v19461_v0, %v13735_v33  ;;  %v6588_v37 = vpop.f32.mrb[189].mxu0 }
 0x468   : > { %v9154_v36 = vadd.f32 %v19461_v0, %v14503_v34  ;;  %v9148_v38 = vpop.f32.mrb[189].mxu1  ;;  %v6589_v39 = vadd.f32 %v19461_v0, %v6588_v37 }
 0x469   : > { %v9149_v40 = vadd.f32 %v19461_v0, %v9148_v38  ;;  %9933 = vst.msk [vmem:[%s15319_s11 + $0xde8] sm:$0xff] %vm9487_vm1, %v6594_v35 }
 0x46a   : > { %10445 = vst.msk [vmem:[%s15319_s11 + $0x1de8] sm:$0xff] %vm9487_vm1, %v9154_v36  ;;  %9932 = vst.msk [vmem:[%s15319_s11 + $0xde0] sm:$0xff] %vm9487_vm1, %v6589_v39  ;;  %v13738_v41 = vpop.f32.mrb[190].mxu0 }
 0x46b   : > { %10444 = vst.msk [vmem:[%s15319_s11 + $0x1de0] sm:$0xff] %vm9487_vm1, %v9149_v40  ;;  %v14506_v42 = vpop.f32.mrb[190].mxu1  ;;  %v6604_v43 = vadd.f32 %v19461_v0, %v13738_v41  ;;  %v6598_v45 = vpop.f32.mrb[191].mxu0 }
 0x46c   : > { %v9164_v44 = vadd.f32 %v19461_v0, %v14506_v42  ;;  %v9158_v46 = vpop.f32.mrb[191].mxu1  ;;  %v6599_v47 = vadd.f32 %v19461_v0, %v6598_v45 }
 0x46d   : > { %v9159_v48 = vadd.f32 %v19461_v0, %v9158_v46  ;;  %9935 = vst.msk [vmem:[%s15319_s11 + $0xdf8] sm:$0xff] %vm9487_vm1, %v6604_v43 }
 0x46e   : > { %10447 = vst.msk [vmem:[%s15319_s11 + $0x1df8] sm:$0xff] %vm9487_vm1, %v9164_v44  ;;  %9934 = vst.msk [vmem:[%s15319_s11 + $0xdf0] sm:$0xff] %vm9487_vm1, %v6599_v47  ;;  %v13741_v49 = vpop.f32.mrb[192].mxu0 }
 0x46f   : > { %10446 = vst.msk [vmem:[%s15319_s11 + $0x1df0] sm:$0xff] %vm9487_vm1, %v9159_v48  ;;  %v14509_v50 = vpop.f32.mrb[192].mxu1  ;;  %v6614_v51 = vadd.f32 %v19461_v0, %v13741_v49  ;;  %v6608_v53 = vpop.f32.mrb[193].mxu0 }
 0x470   : > { %v9174_v52 = vadd.f32 %v19461_v0, %v14509_v50  ;;  %v9168_v54 = vpop.f32.mrb[193].mxu1  ;;  %v6609_v55 = vadd.f32 %v19461_v0, %v6608_v53 }
 0x471   : > { %v9169_v56 = vadd.f32 %v19461_v0, %v9168_v54  ;;  %9937 = vst.msk [vmem:[%s15319_s11 + $0xe08] sm:$0xff] %vm9487_vm1, %v6614_v51 }
 0x472   : > { %10449 = vst.msk [vmem:[%s15319_s11 + $0x1e08] sm:$0xff] %vm9487_vm1, %v9174_v52  ;;  %9936 = vst.msk [vmem:[%s15319_s11 + $0xe00] sm:$0xff] %vm9487_vm1, %v6609_v55  ;;  %v13744_v57 = vpop.f32.mrb[194].mxu0 }
 0x473   : > { %10448 = vst.msk [vmem:[%s15319_s11 + $0x1e00] sm:$0xff] %vm9487_vm1, %v9169_v56  ;;  %v14512_v58 = vpop.f32.mrb[194].mxu1  ;;  %v6624_v59 = vadd.f32 %v19461_v0, %v13744_v57  ;;  %v6618_v61 = vpop.f32.mrb[195].mxu0 }
 0x474   : > { %v9184_v60 = vadd.f32 %v19461_v0, %v14512_v58  ;;  %v9178_v62 = vpop.f32.mrb[195].mxu1  ;;  %v6619_v63 = vadd.f32 %v19461_v0, %v6618_v61 }
 0x475   : > { %v9179_v4 = vadd.f32 %v19461_v0, %v9178_v62  ;;  %9939 = vst.msk [vmem:[%s15319_s11 + $0xe18] sm:$0xff] %vm9487_vm1, %v6624_v59 }
 0x476   : > { %10451 = vst.msk [vmem:[%s15319_s11 + $0x1e18] sm:$0xff] %vm9487_vm1, %v9184_v60  ;;  %9938 = vst.msk [vmem:[%s15319_s11 + $0xe10] sm:$0xff] %vm9487_vm1, %v6619_v63  ;;  %v13747_v2 = vpop.f32.mrb[196].mxu0 }
 0x477   : > { %10450 = vst.msk [vmem:[%s15319_s11 + $0x1e10] sm:$0xff] %vm9487_vm1, %v9179_v4  ;;  %v14515_v7 = vpop.f32.mrb[196].mxu1  ;;  %v6634_v3 = vadd.f32 %v19461_v0, %v13747_v2  ;;  %v6628_v5 = vpop.f32.mrb[197].mxu0 }
 0x478   : > { %v9194_v1 = vadd.f32 %v19461_v0, %v14515_v7  ;;  %v9188_v10 = vpop.f32.mrb[197].mxu1  ;;  %v6629_v6 = vadd.f32 %v19461_v0, %v6628_v5 }
 0x479   : > { %v9189_v8 = vadd.f32 %v19461_v0, %v9188_v10  ;;  %9941 = vst.msk [vmem:[%s15319_s11 + $0xe28] sm:$0xff] %vm9487_vm1, %v6634_v3 }
 0x47a   : > { %10453 = vst.msk [vmem:[%s15319_s11 + $0x1e28] sm:$0xff] %vm9487_vm1, %v9194_v1  ;;  %9940 = vst.msk [vmem:[%s15319_s11 + $0xe20] sm:$0xff] %vm9487_vm1, %v6629_v6  ;;  %v13750_v13 = vpop.f32.mrb[198].mxu0 }
 0x47b   : > { %10452 = vst.msk [vmem:[%s15319_s11 + $0x1e20] sm:$0xff] %vm9487_vm1, %v9189_v8  ;;  %v14518_v9 = vpop.f32.mrb[198].mxu1  ;;  %v6644_v11 = vadd.f32 %v19461_v0, %v13750_v13  ;;  %v6638_v12 = vpop.f32.mrb[199].mxu0 }
 0x47c   : > { %v9204_v16 = vadd.f32 %v19461_v0, %v14518_v9  ;;  %v9198_v14 = vpop.f32.mrb[199].mxu1  ;;  %v6639_v21 = vadd.f32 %v19461_v0, %v6638_v12 }
 0x47d   : > { %v9199_v15 = vadd.f32 %v19461_v0, %v9198_v14  ;;  %9943 = vst.msk [vmem:[%s15319_s11 + $0xe38] sm:$0xff] %vm9487_vm1, %v6644_v11 }
 0x47e   : > { %10455 = vst.msk [vmem:[%s15319_s11 + $0x1e38] sm:$0xff] %vm9487_vm1, %v9204_v16  ;;  %9942 = vst.msk [vmem:[%s15319_s11 + $0xe30] sm:$0xff] %vm9487_vm1, %v6639_v21  ;;  %v13753_v17 = vpop.f32.mrb[200].mxu0 }
 0x47f   : > { %10454 = vst.msk [vmem:[%s15319_s11 + $0x1e30] sm:$0xff] %vm9487_vm1, %v9199_v15  ;;  %v14521_v18 = vpop.f32.mrb[200].mxu1  ;;  %v6654_v19 = vadd.f32 %v19461_v0, %v13753_v17  ;;  %v6648_v22 = vpop.f32.mrb[201].mxu0 }
 0x480   : > { %v9214_v20 = vadd.f32 %v19461_v0, %v14521_v18  ;;  %v9208_v23 = vpop.f32.mrb[201].mxu1  ;;  %v6649_v24 = vadd.f32 %v19461_v0, %v6648_v22 }
 0x481   : > { %v9209_v25 = vadd.f32 %v19461_v0, %v9208_v23  ;;  %9945 = vst.msk [vmem:[%s15319_s11 + $0xe48] sm:$0xff] %vm9487_vm1, %v6654_v19 }
 0x482   : > { %10457 = vst.msk [vmem:[%s15319_s11 + $0x1e48] sm:$0xff] %vm9487_vm1, %v9214_v20  ;;  %9944 = vst.msk [vmem:[%s15319_s11 + $0xe40] sm:$0xff] %vm9487_vm1, %v6649_v24  ;;  %v13756_v26 = vpop.f32.mrb[202].mxu0 }
 0x483   : > { %10456 = vst.msk [vmem:[%s15319_s11 + $0x1e40] sm:$0xff] %vm9487_vm1, %v9209_v25  ;;  %v14524_v29 = vpop.f32.mrb[202].mxu1  ;;  %v6664_v27 = vadd.f32 %v19461_v0, %v13756_v26  ;;  %v6658_v30 = vpop.f32.mrb[203].mxu0 }
 0x484   : > { %v9224_v28 = vadd.f32 %v19461_v0, %v14524_v29  ;;  %v9218_v31 = vpop.f32.mrb[203].mxu1  ;;  %v6659_v32 = vadd.f32 %v19461_v0, %v6658_v30 }
 0x485   : > { %v9219_v33 = vadd.f32 %v19461_v0, %v9218_v31  ;;  %9947 = vst.msk [vmem:[%s15319_s11 + $0xe58] sm:$0xff] %vm9487_vm1, %v6664_v27 }
 0x486   : > { %10459 = vst.msk [vmem:[%s15319_s11 + $0x1e58] sm:$0xff] %vm9487_vm1, %v9224_v28  ;;  %9946 = vst.msk [vmem:[%s15319_s11 + $0xe50] sm:$0xff] %vm9487_vm1, %v6659_v32  ;;  %v13759_v34 = vpop.f32.mrb[204].mxu0 }
 0x487   : > { %10458 = vst.msk [vmem:[%s15319_s11 + $0x1e50] sm:$0xff] %vm9487_vm1, %v9219_v33  ;;  %v14527_v35 = vpop.f32.mrb[204].mxu1  ;;  %v6674_v36 = vadd.f32 %v19461_v0, %v13759_v34  ;;  %v6668_v38 = vpop.f32.mrb[205].mxu0 }
 0x488   : > { %v9234_v37 = vadd.f32 %v19461_v0, %v14527_v35  ;;  %v9228_v39 = vpop.f32.mrb[205].mxu1  ;;  %v6669_v40 = vadd.f32 %v19461_v0, %v6668_v38 }
 0x489   : > { %v9229_v41 = vadd.f32 %v19461_v0, %v9228_v39  ;;  %9949 = vst.msk [vmem:[%s15319_s11 + $0xe68] sm:$0xff] %vm9487_vm1, %v6674_v36 }
 0x48a   : > { %10461 = vst.msk [vmem:[%s15319_s11 + $0x1e68] sm:$0xff] %vm9487_vm1, %v9234_v37  ;;  %9948 = vst.msk [vmem:[%s15319_s11 + $0xe60] sm:$0xff] %vm9487_vm1, %v6669_v40  ;;  %v13762_v42 = vpop.f32.mrb[206].mxu0 }
 0x48b   : > { %10460 = vst.msk [vmem:[%s15319_s11 + $0x1e60] sm:$0xff] %vm9487_vm1, %v9229_v41  ;;  %v14530_v43 = vpop.f32.mrb[206].mxu1  ;;  %v6684_v44 = vadd.f32 %v19461_v0, %v13762_v42  ;;  %v6678_v46 = vpop.f32.mrb[207].mxu0 }
 0x48c   : > { %v9244_v45 = vadd.f32 %v19461_v0, %v14530_v43  ;;  %v9238_v47 = vpop.f32.mrb[207].mxu1  ;;  %v6679_v48 = vadd.f32 %v19461_v0, %v6678_v46 }
 0x48d   : > { %v9239_v49 = vadd.f32 %v19461_v0, %v9238_v47  ;;  %9951 = vst.msk [vmem:[%s15319_s11 + $0xe78] sm:$0xff] %vm9487_vm1, %v6684_v44 }
 0x48e   : > { %10463 = vst.msk [vmem:[%s15319_s11 + $0x1e78] sm:$0xff] %vm9487_vm1, %v9244_v45  ;;  %9950 = vst.msk [vmem:[%s15319_s11 + $0xe70] sm:$0xff] %vm9487_vm1, %v6679_v48  ;;  %v13765_v50 = vpop.f32.mrb[208].mxu0 }
 0x48f   : > { %10462 = vst.msk [vmem:[%s15319_s11 + $0x1e70] sm:$0xff] %vm9487_vm1, %v9239_v49  ;;  %v14533_v51 = vpop.f32.mrb[208].mxu1  ;;  %v6694_v52 = vadd.f32 %v19461_v0, %v13765_v50  ;;  %v6688_v54 = vpop.f32.mrb[209].mxu0 }
 0x490   : > { %v9254_v53 = vadd.f32 %v19461_v0, %v14533_v51  ;;  %v9248_v55 = vpop.f32.mrb[209].mxu1  ;;  %v6689_v56 = vadd.f32 %v19461_v0, %v6688_v54 }
 0x491   : > { %v9249_v57 = vadd.f32 %v19461_v0, %v9248_v55  ;;  %9953 = vst.msk [vmem:[%s15319_s11 + $0xe88] sm:$0xff] %vm9487_vm1, %v6694_v52 }
 0x492   : > { %10465 = vst.msk [vmem:[%s15319_s11 + $0x1e88] sm:$0xff] %vm9487_vm1, %v9254_v53  ;;  %9952 = vst.msk [vmem:[%s15319_s11 + $0xe80] sm:$0xff] %vm9487_vm1, %v6689_v56  ;;  %v13768_v58 = vpop.f32.mrb[210].mxu0 }
 0x493   : > { %10464 = vst.msk [vmem:[%s15319_s11 + $0x1e80] sm:$0xff] %vm9487_vm1, %v9249_v57  ;;  %v14536_v59 = vpop.f32.mrb[210].mxu1  ;;  %v6704_v60 = vadd.f32 %v19461_v0, %v13768_v58  ;;  %v6698_v62 = vpop.f32.mrb[211].mxu0 }
 0x494   : > { %v9264_v61 = vadd.f32 %v19461_v0, %v14536_v59  ;;  %v9258_v63 = vpop.f32.mrb[211].mxu1  ;;  %v6699_v4 = vadd.f32 %v19461_v0, %v6698_v62 }
 0x495   : > { %v9259_v2 = vadd.f32 %v19461_v0, %v9258_v63  ;;  %9955 = vst.msk [vmem:[%s15319_s11 + $0xe98] sm:$0xff] %vm9487_vm1, %v6704_v60 }
 0x496   : > { %10467 = vst.msk [vmem:[%s15319_s11 + $0x1e98] sm:$0xff] %vm9487_vm1, %v9264_v61  ;;  %9954 = vst.msk [vmem:[%s15319_s11 + $0xe90] sm:$0xff] %vm9487_vm1, %v6699_v4  ;;  %v13771_v7 = vpop.f32.mrb[212].mxu0 }
 0x497   : > { %10466 = vst.msk [vmem:[%s15319_s11 + $0x1e90] sm:$0xff] %vm9487_vm1, %v9259_v2  ;;  %v14539_v3 = vpop.f32.mrb[212].mxu1  ;;  %v6714_v1 = vadd.f32 %v19461_v0, %v13771_v7  ;;  %v6708_v10 = vpop.f32.mrb[213].mxu0 }
 0x498   : > { %v9274_v5 = vadd.f32 %v19461_v0, %v14539_v3  ;;  %v9268_v6 = vpop.f32.mrb[213].mxu1  ;;  %v6709_v8 = vadd.f32 %v19461_v0, %v6708_v10 }
 0x499   : > { %v9269_v13 = vadd.f32 %v19461_v0, %v9268_v6  ;;  %9957 = vst.msk [vmem:[%s15319_s11 + $0xea8] sm:$0xff] %vm9487_vm1, %v6714_v1 }
 0x49a   : > { %10469 = vst.msk [vmem:[%s15319_s11 + $0x1ea8] sm:$0xff] %vm9487_vm1, %v9274_v5  ;;  %9956 = vst.msk [vmem:[%s15319_s11 + $0xea0] sm:$0xff] %vm9487_vm1, %v6709_v8  ;;  %v13774_v9 = vpop.f32.mrb[214].mxu0 }
 0x49b   : > { %10468 = vst.msk [vmem:[%s15319_s11 + $0x1ea0] sm:$0xff] %vm9487_vm1, %v9269_v13  ;;  %v14542_v11 = vpop.f32.mrb[214].mxu1  ;;  %v6724_v16 = vadd.f32 %v19461_v0, %v13774_v9  ;;  %v6718_v14 = vpop.f32.mrb[215].mxu0 }
 0x49c   : > { %v9284_v12 = vadd.f32 %v19461_v0, %v14542_v11  ;;  %v9278_v21 = vpop.f32.mrb[215].mxu1  ;;  %v6719_v15 = vadd.f32 %v19461_v0, %v6718_v14 }
 0x49d   : > { %v9279_v17 = vadd.f32 %v19461_v0, %v9278_v21  ;;  %9959 = vst.msk [vmem:[%s15319_s11 + $0xeb8] sm:$0xff] %vm9487_vm1, %v6724_v16 }
 0x49e   : > { %10471 = vst.msk [vmem:[%s15319_s11 + $0x1eb8] sm:$0xff] %vm9487_vm1, %v9284_v12  ;;  %9958 = vst.msk [vmem:[%s15319_s11 + $0xeb0] sm:$0xff] %vm9487_vm1, %v6719_v15  ;;  %v13777_v18 = vpop.f32.mrb[216].mxu0 }
 0x49f   : > { %10470 = vst.msk [vmem:[%s15319_s11 + $0x1eb0] sm:$0xff] %vm9487_vm1, %v9279_v17  ;;  %v14545_v19 = vpop.f32.mrb[216].mxu1  ;;  %v6734_v20 = vadd.f32 %v19461_v0, %v13777_v18  ;;  %v6728_v23 = vpop.f32.mrb[217].mxu0 }
 0x4a0   : > { %v9294_v22 = vadd.f32 %v19461_v0, %v14545_v19  ;;  %v9288_v24 = vpop.f32.mrb[217].mxu1  ;;  %v6729_v25 = vadd.f32 %v19461_v0, %v6728_v23 }
 0x4a1   : > { %v9289_v26 = vadd.f32 %v19461_v0, %v9288_v24  ;;  %9961 = vst.msk [vmem:[%s15319_s11 + $0xec8] sm:$0xff] %vm9487_vm1, %v6734_v20 }
 0x4a2   : > { %10473 = vst.msk [vmem:[%s15319_s11 + $0x1ec8] sm:$0xff] %vm9487_vm1, %v9294_v22  ;;  %9960 = vst.msk [vmem:[%s15319_s11 + $0xec0] sm:$0xff] %vm9487_vm1, %v6729_v25  ;;  %v13780_v29 = vpop.f32.mrb[218].mxu0 }
 0x4a3   : > { %10472 = vst.msk [vmem:[%s15319_s11 + $0x1ec0] sm:$0xff] %vm9487_vm1, %v9289_v26  ;;  %v14548_v27 = vpop.f32.mrb[218].mxu1  ;;  %v6744_v28 = vadd.f32 %v19461_v0, %v13780_v29  ;;  %v6738_v31 = vpop.f32.mrb[219].mxu0 }
 0x4a4   : > { %v9304_v30 = vadd.f32 %v19461_v0, %v14548_v27  ;;  %v9298_v32 = vpop.f32.mrb[219].mxu1  ;;  %v6739_v33 = vadd.f32 %v19461_v0, %v6738_v31 }
 0x4a5   : > { %v9299_v34 = vadd.f32 %v19461_v0, %v9298_v32  ;;  %9963 = vst.msk [vmem:[%s15319_s11 + $0xed8] sm:$0xff] %vm9487_vm1, %v6744_v28 }
 0x4a6   : > { %10475 = vst.msk [vmem:[%s15319_s11 + $0x1ed8] sm:$0xff] %vm9487_vm1, %v9304_v30  ;;  %9962 = vst.msk [vmem:[%s15319_s11 + $0xed0] sm:$0xff] %vm9487_vm1, %v6739_v33  ;;  %v13783_v35 = vpop.f32.mrb[220].mxu0 }
 0x4a7   : > { %10474 = vst.msk [vmem:[%s15319_s11 + $0x1ed0] sm:$0xff] %vm9487_vm1, %v9299_v34  ;;  %v14551_v36 = vpop.f32.mrb[220].mxu1  ;;  %v6754_v37 = vadd.f32 %v19461_v0, %v13783_v35  ;;  %v6748_v39 = vpop.f32.mrb[221].mxu0 }
 0x4a8   : > { %v9314_v38 = vadd.f32 %v19461_v0, %v14551_v36  ;;  %v9308_v40 = vpop.f32.mrb[221].mxu1  ;;  %v6749_v41 = vadd.f32 %v19461_v0, %v6748_v39 }
 0x4a9   : > { %v9309_v42 = vadd.f32 %v19461_v0, %v9308_v40  ;;  %9965 = vst.msk [vmem:[%s15319_s11 + $0xee8] sm:$0xff] %vm9487_vm1, %v6754_v37 }
 0x4aa   : > { %10477 = vst.msk [vmem:[%s15319_s11 + $0x1ee8] sm:$0xff] %vm9487_vm1, %v9314_v38  ;;  %9964 = vst.msk [vmem:[%s15319_s11 + $0xee0] sm:$0xff] %vm9487_vm1, %v6749_v41  ;;  %v13786_v43 = vpop.f32.mrb[222].mxu0 }
 0x4ab   : > { %10476 = vst.msk [vmem:[%s15319_s11 + $0x1ee0] sm:$0xff] %vm9487_vm1, %v9309_v42  ;;  %v14554_v44 = vpop.f32.mrb[222].mxu1  ;;  %v6764_v45 = vadd.f32 %v19461_v0, %v13786_v43  ;;  %v6758_v47 = vpop.f32.mrb[223].mxu0 }
 0x4ac   : > { %v9324_v46 = vadd.f32 %v19461_v0, %v14554_v44  ;;  %v9318_v48 = vpop.f32.mrb[223].mxu1  ;;  %v6759_v49 = vadd.f32 %v19461_v0, %v6758_v47 }
 0x4ad   : > { %v9319_v50 = vadd.f32 %v19461_v0, %v9318_v48  ;;  %9967 = vst.msk [vmem:[%s15319_s11 + $0xef8] sm:$0xff] %vm9487_vm1, %v6764_v45 }
 0x4ae   : > { %10479 = vst.msk [vmem:[%s15319_s11 + $0x1ef8] sm:$0xff] %vm9487_vm1, %v9324_v46  ;;  %9966 = vst.msk [vmem:[%s15319_s11 + $0xef0] sm:$0xff] %vm9487_vm1, %v6759_v49  ;;  %v13789_v51 = vpop.f32.mrb[224].mxu0 }
 0x4af   : > { %10478 = vst.msk [vmem:[%s15319_s11 + $0x1ef0] sm:$0xff] %vm9487_vm1, %v9319_v50  ;;  %v14557_v52 = vpop.f32.mrb[224].mxu1  ;;  %v6774_v53 = vadd.f32 %v19461_v0, %v13789_v51  ;;  %v6768_v55 = vpop.f32.mrb[225].mxu0 }
 0x4b0   : > { %v9334_v54 = vadd.f32 %v19461_v0, %v14557_v52  ;;  %v9328_v56 = vpop.f32.mrb[225].mxu1  ;;  %v6769_v57 = vadd.f32 %v19461_v0, %v6768_v55 }
 0x4b1   : > { %v9329_v58 = vadd.f32 %v19461_v0, %v9328_v56  ;;  %9969 = vst.msk [vmem:[%s15319_s11 + $0xf08] sm:$0xff] %vm9487_vm1, %v6774_v53 }
 0x4b2   : > { %10481 = vst.msk [vmem:[%s15319_s11 + $0x1f08] sm:$0xff] %vm9487_vm1, %v9334_v54  ;;  %9968 = vst.msk [vmem:[%s15319_s11 + $0xf00] sm:$0xff] %vm9487_vm1, %v6769_v57  ;;  %v13792_v59 = vpop.f32.mrb[226].mxu0 }
 0x4b3   : > { %10480 = vst.msk [vmem:[%s15319_s11 + $0x1f00] sm:$0xff] %vm9487_vm1, %v9329_v58  ;;  %v14560_v60 = vpop.f32.mrb[226].mxu1  ;;  %v6784_v61 = vadd.f32 %v19461_v0, %v13792_v59  ;;  %v6778_v63 = vpop.f32.mrb[227].mxu0 }
 0x4b4   : > { %v9344_v62 = vadd.f32 %v19461_v0, %v14560_v60  ;;  %v9338_v4 = vpop.f32.mrb[227].mxu1  ;;  %v6779_v2 = vadd.f32 %v19461_v0, %v6778_v63 }
 0x4b5   : > { %v9339_v7 = vadd.f32 %v19461_v0, %v9338_v4  ;;  %9971 = vst.msk [vmem:[%s15319_s11 + $0xf18] sm:$0xff] %vm9487_vm1, %v6784_v61 }
 0x4b6   : > { %10483 = vst.msk [vmem:[%s15319_s11 + $0x1f18] sm:$0xff] %vm9487_vm1, %v9344_v62  ;;  %9970 = vst.msk [vmem:[%s15319_s11 + $0xf10] sm:$0xff] %vm9487_vm1, %v6779_v2  ;;  %v13795_v3 = vpop.f32.mrb[228].mxu0 }
 0x4b7   : > { %10482 = vst.msk [vmem:[%s15319_s11 + $0x1f10] sm:$0xff] %vm9487_vm1, %v9339_v7  ;;  %v14563_v1 = vpop.f32.mrb[228].mxu1  ;;  %v6794_v5 = vadd.f32 %v19461_v0, %v13795_v3  ;;  %v6788_v6 = vpop.f32.mrb[229].mxu0 }
 0x4b8   : > { %v9354_v10 = vadd.f32 %v19461_v0, %v14563_v1  ;;  %v9348_v8 = vpop.f32.mrb[229].mxu1  ;;  %v6789_v13 = vadd.f32 %v19461_v0, %v6788_v6 }
 0x4b9   : > { %v9349_v9 = vadd.f32 %v19461_v0, %v9348_v8  ;;  %9973 = vst.msk [vmem:[%s15319_s11 + $0xf28] sm:$0xff] %vm9487_vm1, %v6794_v5 }
 0x4ba   : > { %10485 = vst.msk [vmem:[%s15319_s11 + $0x1f28] sm:$0xff] %vm9487_vm1, %v9354_v10  ;;  %9972 = vst.msk [vmem:[%s15319_s11 + $0xf20] sm:$0xff] %vm9487_vm1, %v6789_v13  ;;  %v13798_v11 = vpop.f32.mrb[230].mxu0 }
 0x4bb   : > { %10484 = vst.msk [vmem:[%s15319_s11 + $0x1f20] sm:$0xff] %vm9487_vm1, %v9349_v9  ;;  %v14566_v16 = vpop.f32.mrb[230].mxu1  ;;  %v6804_v12 = vadd.f32 %v19461_v0, %v13798_v11  ;;  %v6798_v21 = vpop.f32.mrb[231].mxu0 }
 0x4bc   : > { %v9364_v14 = vadd.f32 %v19461_v0, %v14566_v16  ;;  %v9358_v15 = vpop.f32.mrb[231].mxu1  ;;  %v6799_v17 = vadd.f32 %v19461_v0, %v6798_v21 }
 0x4bd   : > { %v9359_v18 = vadd.f32 %v19461_v0, %v9358_v15  ;;  %9975 = vst.msk [vmem:[%s15319_s11 + $0xf38] sm:$0xff] %vm9487_vm1, %v6804_v12 }
 0x4be   : > { %10487 = vst.msk [vmem:[%s15319_s11 + $0x1f38] sm:$0xff] %vm9487_vm1, %v9364_v14  ;;  %9974 = vst.msk [vmem:[%s15319_s11 + $0xf30] sm:$0xff] %vm9487_vm1, %v6799_v17  ;;  %v13801_v19 = vpop.f32.mrb[232].mxu0 }
 0x4bf   : > { %10486 = vst.msk [vmem:[%s15319_s11 + $0x1f30] sm:$0xff] %vm9487_vm1, %v9359_v18  ;;  %v14569_v20 = vpop.f32.mrb[232].mxu1  ;;  %v6814_v22 = vadd.f32 %v19461_v0, %v13801_v19  ;;  %v6808_v24 = vpop.f32.mrb[233].mxu0 }
 0x4c0   : > { %v9374_v23 = vadd.f32 %v19461_v0, %v14569_v20  ;;  %v9368_v25 = vpop.f32.mrb[233].mxu1  ;;  %v6809_v26 = vadd.f32 %v19461_v0, %v6808_v24 }
 0x4c1   : > { %v9369_v29 = vadd.f32 %v19461_v0, %v9368_v25  ;;  %9977 = vst.msk [vmem:[%s15319_s11 + $0xf48] sm:$0xff] %vm9487_vm1, %v6814_v22 }
 0x4c2   : > { %10489 = vst.msk [vmem:[%s15319_s11 + $0x1f48] sm:$0xff] %vm9487_vm1, %v9374_v23  ;;  %9976 = vst.msk [vmem:[%s15319_s11 + $0xf40] sm:$0xff] %vm9487_vm1, %v6809_v26  ;;  %v13804_v27 = vpop.f32.mrb[234].mxu0 }
 0x4c3   : > { %10488 = vst.msk [vmem:[%s15319_s11 + $0x1f40] sm:$0xff] %vm9487_vm1, %v9369_v29  ;;  %v14572_v28 = vpop.f32.mrb[234].mxu1  ;;  %v6824_v30 = vadd.f32 %v19461_v0, %v13804_v27  ;;  %v6818_v32 = vpop.f32.mrb[235].mxu0 }
 0x4c4   : > { %v9384_v31 = vadd.f32 %v19461_v0, %v14572_v28  ;;  %v9378_v33 = vpop.f32.mrb[235].mxu1  ;;  %v6819_v34 = vadd.f32 %v19461_v0, %v6818_v32 }
 0x4c5   : > { %v9379_v35 = vadd.f32 %v19461_v0, %v9378_v33  ;;  %9979 = vst.msk [vmem:[%s15319_s11 + $0xf58] sm:$0xff] %vm9487_vm1, %v6824_v30 }
 0x4c6   : > { %10491 = vst.msk [vmem:[%s15319_s11 + $0x1f58] sm:$0xff] %vm9487_vm1, %v9384_v31  ;;  %9978 = vst.msk [vmem:[%s15319_s11 + $0xf50] sm:$0xff] %vm9487_vm1, %v6819_v34  ;;  %v13807_v36 = vpop.f32.mrb[236].mxu0  ;;  %v14711_v31 = vld [vmem:[#allocation2] ss:$0 sm:$0xff] }
 0x4c7   : > { %10490 = vst.msk [vmem:[%s15319_s11 + $0x1f50] sm:$0xff] %vm9487_vm1, %v9379_v35  ;;  %v14575_v37 = vpop.f32.mrb[236].mxu1  ;;  %v6834_v38 = vadd.f32 %v19461_v0, %v13807_v36  ;;  %v6828_v40 = vpop.f32.mrb[237].mxu0 }
 0x4c8   : > { %v9394_v39 = vadd.f32 %v19461_v0, %v14575_v37  ;;  %v9388_v41 = vpop.f32.mrb[237].mxu1  ;;  %v6829_v42 = vadd.f32 %v19461_v0, %v6828_v40 }
 0x4c9   : > { %v9389_v43 = vadd.f32 %v19461_v0, %v9388_v41  ;;  %9981 = vst.msk [vmem:[%s15319_s11 + $0xf68] sm:$0xff] %vm9487_vm1, %v6834_v38 }
 0x4ca   : > { %10493 = vst.msk [vmem:[%s15319_s11 + $0x1f68] sm:$0xff] %vm9487_vm1, %v9394_v39  ;;  %9980 = vst.msk [vmem:[%s15319_s11 + $0xf60] sm:$0xff] %vm9487_vm1, %v6829_v42  ;;  %v13810_v44 = vpop.f32.mrb[238].mxu0 }
 0x4cb   : > { %10492 = vst.msk [vmem:[%s15319_s11 + $0x1f60] sm:$0xff] %vm9487_vm1, %v9389_v43  ;;  %v14578_v45 = vpop.f32.mrb[238].mxu1  ;;  %v6844_v46 = vadd.f32 %v19461_v0, %v13810_v44  ;;  %v6838_v48 = vpop.f32.mrb[239].mxu0 }
 0x4cc   : > { %v9404_v47 = vadd.f32 %v19461_v0, %v14578_v45  ;;  %v9398_v49 = vpop.f32.mrb[239].mxu1  ;;  %v6839_v50 = vadd.f32 %v19461_v0, %v6838_v48 }
 0x4cd   : > { %v9399_v51 = vadd.f32 %v19461_v0, %v9398_v49  ;;  %9983 = vst.msk [vmem:[%s15319_s11 + $0xf78] sm:$0xff] %vm9487_vm1, %v6844_v46 }
 0x4ce   : > { %10495 = vst.msk [vmem:[%s15319_s11 + $0x1f78] sm:$0xff] %vm9487_vm1, %v9404_v47  ;;  %9982 = vst.msk [vmem:[%s15319_s11 + $0xf70] sm:$0xff] %vm9487_vm1, %v6839_v50  ;;  %v13813_v52 = vpop.f32.mrb[240].mxu0 }
 0x4cf   : > { %10494 = vst.msk [vmem:[%s15319_s11 + $0x1f70] sm:$0xff] %vm9487_vm1, %v9399_v51  ;;  %v14581_v53 = vpop.f32.mrb[240].mxu1  ;;  %v6854_v54 = vadd.f32 %v19461_v0, %v13813_v52  ;;  %v6848_v56 = vpop.f32.mrb[241].mxu0 }
 0x4d0   : > { %v9414_v55 = vadd.f32 %v19461_v0, %v14581_v53  ;;  %v9408_v57 = vpop.f32.mrb[241].mxu1  ;;  %v6849_v58 = vadd.f32 %v19461_v0, %v6848_v56 }
 0x4d1   : > { %v9409_v59 = vadd.f32 %v19461_v0, %v9408_v57  ;;  %9985 = vst.msk [vmem:[%s15319_s11 + $0xf88] sm:$0xff] %vm9487_vm1, %v6854_v54 }
 0x4d2   : > { %10497 = vst.msk [vmem:[%s15319_s11 + $0x1f88] sm:$0xff] %vm9487_vm1, %v9414_v55  ;;  %9984 = vst.msk [vmem:[%s15319_s11 + $0xf80] sm:$0xff] %vm9487_vm1, %v6849_v58  ;;  %v13816_v60 = vpop.f32.mrb[242].mxu0 }
 0x4d3   : > { %10496 = vst.msk [vmem:[%s15319_s11 + $0x1f80] sm:$0xff] %vm9487_vm1, %v9409_v59  ;;  %v14584_v61 = vpop.f32.mrb[242].mxu1  ;;  %v6864_v62 = vadd.f32 %v19461_v0, %v13816_v60  ;;  %v6858_v4 = vpop.f32.mrb[243].mxu0 }
 0x4d4   : > { %v9424_v63 = vadd.f32 %v19461_v0, %v14584_v61  ;;  %v9418_v2 = vpop.f32.mrb[243].mxu1  ;;  %v6859_v7 = vadd.f32 %v19461_v0, %v6858_v4 }
 0x4d5   : > { %v9419_v3 = vadd.f32 %v19461_v0, %v9418_v2  ;;  %9987 = vst.msk [vmem:[%s15319_s11 + $0xf98] sm:$0xff] %vm9487_vm1, %v6864_v62 }
 0x4d6   : > { %10499 = vst.msk [vmem:[%s15319_s11 + $0x1f98] sm:$0xff] %vm9487_vm1, %v9424_v63  ;;  %9986 = vst.msk [vmem:[%s15319_s11 + $0xf90] sm:$0xff] %vm9487_vm1, %v6859_v7  ;;  %v13819_v1 = vpop.f32.mrb[244].mxu0 }
 0x4d7   : > { %10498 = vst.msk [vmem:[%s15319_s11 + $0x1f90] sm:$0xff] %vm9487_vm1, %v9419_v3  ;;  %v14587_v5 = vpop.f32.mrb[244].mxu1  ;;  %v6874_v10 = vadd.f32 %v19461_v0, %v13819_v1  ;;  %v6868_v8 = vpop.f32.mrb[245].mxu0 }
 0x4d8   : > { %v9434_v6 = vadd.f32 %v19461_v0, %v14587_v5  ;;  %v9428_v13 = vpop.f32.mrb[245].mxu1  ;;  %v6869_v9 = vadd.f32 %v19461_v0, %v6868_v8 }
 0x4d9   : > { %v9429_v11 = vadd.f32 %v19461_v0, %v9428_v13  ;;  %9989 = vst.msk [vmem:[%s15319_s11 + $0xfa8] sm:$0xff] %vm9487_vm1, %v6874_v10 }
 0x4da   : > { %10501 = vst.msk [vmem:[%s15319_s11 + $0x1fa8] sm:$0xff] %vm9487_vm1, %v9434_v6  ;;  %9988 = vst.msk [vmem:[%s15319_s11 + $0xfa0] sm:$0xff] %vm9487_vm1, %v6869_v9  ;;  %v13822_v16 = vpop.f32.mrb[246].mxu0 }
 0x4db   : > { %10500 = vst.msk [vmem:[%s15319_s11 + $0x1fa0] sm:$0xff] %vm9487_vm1, %v9429_v11  ;;  %v14590_v12 = vpop.f32.mrb[246].mxu1  ;;  %v6884_v14 = vadd.f32 %v19461_v0, %v13822_v16  ;;  %v6878_v15 = vpop.f32.mrb[247].mxu0 }
 0x4dc   : > { %v9444_v21 = vadd.f32 %v19461_v0, %v14590_v12  ;;  %v9438_v17 = vpop.f32.mrb[247].mxu1  ;;  %v6879_v18 = vadd.f32 %v19461_v0, %v6878_v15 }
 0x4dd   : > { %v9439_v19 = vadd.f32 %v19461_v0, %v9438_v17  ;;  %9991 = vst.msk [vmem:[%s15319_s11 + $0xfb8] sm:$0xff] %vm9487_vm1, %v6884_v14 }
 0x4de   : > { %10503 = vst.msk [vmem:[%s15319_s11 + $0x1fb8] sm:$0xff] %vm9487_vm1, %v9444_v21  ;;  %9990 = vst.msk [vmem:[%s15319_s11 + $0xfb0] sm:$0xff] %vm9487_vm1, %v6879_v18  ;;  %v13825_v20 = vpop.f32.mrb[248].mxu0 }
 0x4df   : > { %10502 = vst.msk [vmem:[%s15319_s11 + $0x1fb0] sm:$0xff] %vm9487_vm1, %v9439_v19  ;;  %v14593_v22 = vpop.f32.mrb[248].mxu1  ;;  %v6894_v23 = vadd.f32 %v19461_v0, %v13825_v20  ;;  %v6888_v25 = vpop.f32.mrb[249].mxu0 }
 0x4e0   : > { %v9454_v24 = vadd.f32 %v19461_v0, %v14593_v22  ;;  %v9448_v26 = vpop.f32.mrb[249].mxu1  ;;  %v6889_v29 = vadd.f32 %v19461_v0, %v6888_v25 }
 0x4e1   : > { %v9449_v27 = vadd.f32 %v19461_v0, %v9448_v26  ;;  %9993 = vst.msk [vmem:[%s15319_s11 + $0xfc8] sm:$0xff] %vm9487_vm1, %v6894_v23 }
 0x4e2   : > { %10505 = vst.msk [vmem:[%s15319_s11 + $0x1fc8] sm:$0xff] %vm9487_vm1, %v9454_v24  ;;  %9992 = vst.msk [vmem:[%s15319_s11 + $0xfc0] sm:$0xff] %vm9487_vm1, %v6889_v29  ;;  %v13828_v28 = vpop.f32.mrb[250].mxu0 }
 0x4e3   : > { %10504 = vst.msk [vmem:[%s15319_s11 + $0x1fc0] sm:$0xff] %vm9487_vm1, %v9449_v27  ;;  %v14596_v30 = vpop.f32.mrb[250].mxu1  ;;  %v6904_v32 = vadd.f32 %v14711_v31, %v13828_v28  ;;  %v6898_v34 = vpop.f32.mrb[251].mxu0 }
 0x4e4   : > { %v9464_v33 = vadd.f32 %v14711_v31, %v14596_v30  ;;  %v9458_v35 = vpop.f32.mrb[251].mxu1  ;;  %v6899_v0 = vadd.f32 %v14711_v31, %v6898_v34 }
 0x4e5   : > { %v9459_v36 = vadd.f32 %v14711_v31, %v9458_v35  ;;  %9995 = vst.msk [vmem:[%s15319_s11 + $0xfd8] sm:$0xff] %vm9487_vm1, %v6904_v32 }
 0x4e6   : > { %10507 = vst.msk [vmem:[%s15319_s11 + $0x1fd8] sm:$0xff] %vm9487_vm1, %v9464_v33  ;;  %9994 = vst.msk [vmem:[%s15319_s11 + $0xfd0] sm:$0xff] %vm9487_vm1, %v6899_v0  ;;  %v13831_v37 = vpop.f32.mrb[252].mxu0 }
 0x4e7   : > { %10506 = vst.msk [vmem:[%s15319_s11 + $0x1fd0] sm:$0xff] %vm9487_vm1, %v9459_v36  ;;  %v14599_v38 = vpop.f32.mrb[252].mxu1  ;;  %v6914_v39 = vadd.f32 %v14711_v31, %v13831_v37  ;;  %v6908_v41 = vpop.f32.mrb[253].mxu0 }
 0x4e8   : > { %v9474_v40 = vadd.f32 %v14711_v31, %v14599_v38  ;;  %v9468_v42 = vpop.f32.mrb[253].mxu1  ;;  %v6909_v43 = vadd.f32 %v14711_v31, %v6908_v41 }
 0x4e9   : > { %v9469_v44 = vadd.f32 %v14711_v31, %v9468_v42  ;;  %9997 = vst.msk [vmem:[%s15319_s11 + $0xfe8] sm:$0xff] %vm9487_vm1, %v6914_v39  ;;  %10518 = sbr.rel (!%p14848_p4) target bundleno = 1336 (0x538), region = 36 }
 0x4ea   : > { %10509 = vst.msk [vmem:[%s15319_s11 + $0x1fe8] sm:$0xff] %vm9487_vm1, %v9474_v40  ;;  %9996 = vst.msk [vmem:[%s15319_s11 + $0xfe0] sm:$0xff] %vm9487_vm1, %v6909_v43  ;;  %v13834_v45 = vpop.f32.mrb[254].mxu0 }
 0x4eb   : > { %10508 = vst.msk [vmem:[%s15319_s11 + $0x1fe0] sm:$0xff] %vm9487_vm1, %v9469_v44  ;;  %v14602_v46 = vpop.f32.mrb[254].mxu1  ;;  %v6924_v47 = vadd.f32 %v14711_v31, %v13834_v45  ;;  %v6918_v49 = vpop.f32.mrb[255].mxu0 }
 0x4ec   : > { %v9484_v48 = vadd.f32 %v14711_v31, %v14602_v46  ;;  %v9478_v50 = vpop.f32.mrb[255].mxu1  ;;  %v6919_v51 = vadd.f32 %v14711_v31, %v6918_v49 }
 0x4ed   : > { %v9479_v52 = vadd.f32 %v14711_v31, %v9478_v50  ;;  %9999 = vst.msk [vmem:[%s15319_s11 + $0xff8] sm:$0xff] %vm9487_vm1, %v6924_v47 }
 0x4ee   : > { %10511 = vst.msk [vmem:[%s15319_s11 + $0x1ff8] sm:$0xff] %vm9487_vm1, %v9484_v48  ;;  %9998 = vst.msk [vmem:[%s15319_s11 + $0xff0] sm:$0xff] %vm9487_vm1, %v6919_v51 }
 0x4ef   : > { %10510 = vst.msk [vmem:[%s15319_s11 + $0x1ff0] sm:$0xff] %vm9487_vm1, %v9479_v52 }
 0x4f0   : > { %s20223_s12 = smov (!%p10521_p8, %s10520_s12), 1024 }
 0x4f1   : > { %s12013_s19 = sshll.u32 %s20223_s12, 7 }
 0x4f2   : > { %p12016_p9 = scmp.eq.s32.totalorder %s12013_s19, 0 }
 0x4f3   : > { %s20016_s22 = sshrl.u32 (!%p12016_p9), %s20223_s12, 6 }
 0x4f4   : > { %10529 = sbr.rel (%p12016_p9) target bundleno = 1336 (0x538), region = 40  ;;  %p12017_p10 = scmp.le.s32.totalorder (!%p12016_p9), %s20016_s22, 0 }
 0x4fb   : > { %10935 = sbr.rel (%p12017_p10) target bundleno = 1315 (0x523), region = 116  ;;  %s20214_s2 = smov (!%p12017_p10), %s20010_s18 }
 0x4fc   : > { %s20215_s21 = smov (!%p12017_p10), %s15319_s11  ;;  %s20025_s23 = smov (!%p12017_p10), 0  }
 0x4fd   : > { %s20027_s24 = smov (!%p12017_p10), 0  }
 0x502 LB: >> { %v10717_v53 = vld [vmem:[%s14774_s21] sm:$0xff]  ;;  %v10719_v54 = vld [vmem:[%s14774_s21 + $0x8] sm:$0xff]  ;;  %v10721_v55 = vld [vmem:[%s14774_s21 + $0x10] sm:$0xff]  ;;  %s10845_s25 = sadd.s32 1, %s14778_s23  ;;  %s10711_s24 = sadd.s32 1, %s14782_s24   ;;  %s14782_s24 = sphi %s20027_s24, %s10711_s24   ;;  %s14778_s23 = sphi %s20025_s23, %s20218_s23   ;;  %s14774_s21 = sphi %s20215_s21, %s20217_s21   ;;  %s14770_s2 = sphi %s20214_s2, %s20216_s2  }
 0x503   : >> { %10718 = vst [vmem:[%s14770_s2] sm:$0xff] %v10717_v53  ;;  %10720 = vst [vmem:[%s14770_s2 + $0x8] sm:$0xff] %v10719_v54  ;;  %v10723_v56 = vld [vmem:[%s14774_s21 + $0x18] sm:$0xff]  ;;  %v10725_v57 = vld [vmem:[%s14774_s21 + $0x20] sm:$0xff]  ;;  %p10846_p11 = scmp.ge.s32.totalorder %s10845_s25, %s20016_s22  ;;  %p10710_p12 = scmp.ge.s32.totalorder %s10711_s24, %s20016_s22 }
 0x504   : >> { %10722 = vst [vmem:[%s14770_s2 + $0x10] sm:$0xff] %v10721_v55  ;;  %v10727_v58 = vld [vmem:[%s14774_s21 + $0x28] sm:$0xff]  ;;  %10724 = vst [vmem:[%s14770_s2 + $0x18] sm:$0xff] %v10723_v56  ;;  %v10729_v59 = vld [vmem:[%s14774_s21 + $0x30] sm:$0xff] }
 0x505   : >> { %10726 = vst [vmem:[%s14770_s2 + $0x20] sm:$0xff] %v10725_v57  ;;  %10728 = vst [vmem:[%s14770_s2 + $0x28] sm:$0xff] %v10727_v58  ;;  %v10731_v60 = vld [vmem:[%s14774_s21 + $0x38] sm:$0xff]  ;;  %v10733_v61 = vld [vmem:[%s14774_s21 + $0x40] sm:$0xff]  ;;  %s20225_s25 = smov (%p10846_p11, %s10845_s25), 0 }
 0x506   : >> { %10730 = vst [vmem:[%s14770_s2 + $0x30] sm:$0xff] %v10729_v59  ;;  %10732 = vst [vmem:[%s14770_s2 + $0x38] sm:$0xff] %v10731_v60  ;;  %v10735_v62 = vld [vmem:[%s14774_s21 + $0x48] sm:$0xff]  ;;  %v10737_v63 = vld [vmem:[%s14774_s21 + $0x50] sm:$0xff]  ;;  %s12018_s26 = sshll.u32 %s20225_s25, 9  ;;  %s20218_s23 = smov %s20225_s25 }
 0x507   : >> { %10734 = vst [vmem:[%s14770_s2 + $0x40] sm:$0xff] %v10733_v61  ;;  %v10739_v4 = vld [vmem:[%s14774_s21 + $0x58] sm:$0xff]  ;;  %10736 = vst [vmem:[%s14770_s2 + $0x48] sm:$0xff] %v10735_v62  ;;  %v10741_v2 = vld [vmem:[%s14774_s21 + $0x60] sm:$0xff]  ;;  %s20083_s27 = scalar_lea.vmem %s15319_s11, %s12018_s26 [#allocation3]   ;;  %s20086_s28 = scalar_lea.vmem %s20010_s18, %s12018_s26  }
 0x508   : >> { %10738 = vst [vmem:[%s14770_s2 + $0x50] sm:$0xff] %v10737_v63  ;;  %10740 = vst [vmem:[%s14770_s2 + $0x58] sm:$0xff] %v10739_v4  ;;  %v10743_v7 = vld [vmem:[%s14774_s21 + $0x68] sm:$0xff]  ;;  %v10745_v3 = vld [vmem:[%s14774_s21 + $0x70] sm:$0xff] }
 0x509   : >> { %10742 = vst [vmem:[%s14770_s2 + $0x60] sm:$0xff] %v10741_v2  ;;  %10744 = vst [vmem:[%s14770_s2 + $0x68] sm:$0xff] %v10743_v7  ;;  %v10747_v1 = vld [vmem:[%s14774_s21 + $0x78] sm:$0xff]  ;;  %v10749_v5 = vld [vmem:[%s14774_s21 + $0x80] sm:$0xff] }
 0x50a   : >> { %10746 = vst [vmem:[%s14770_s2 + $0x70] sm:$0xff] %v10745_v3  ;;  %v10751_v10 = vld [vmem:[%s14774_s21 + $0x88] sm:$0xff]  ;;  %10748 = vst [vmem:[%s14770_s2 + $0x78] sm:$0xff] %v10747_v1  ;;  %v10753_v6 = vld [vmem:[%s14774_s21 + $0x90] sm:$0xff] }
 0x50b   : >> { %10750 = vst [vmem:[%s14770_s2 + $0x80] sm:$0xff] %v10749_v5  ;;  %10752 = vst [vmem:[%s14770_s2 + $0x88] sm:$0xff] %v10751_v10  ;;  %v10755_v8 = vld [vmem:[%s14774_s21 + $0x98] sm:$0xff]  ;;  %v10757_v13 = vld [vmem:[%s14774_s21 + $0xa0] sm:$0xff] }
 0x50c   : >> { %10754 = vst [vmem:[%s14770_s2 + $0x90] sm:$0xff] %v10753_v6  ;;  %10756 = vst [vmem:[%s14770_s2 + $0x98] sm:$0xff] %v10755_v8  ;;  %v10759_v9 = vld [vmem:[%s14774_s21 + $0xa8] sm:$0xff]  ;;  %v10761_v11 = vld [vmem:[%s14774_s21 + $0xb0] sm:$0xff] }
 0x50d   : >> { %10758 = vst [vmem:[%s14770_s2 + $0xa0] sm:$0xff] %v10757_v13  ;;  %v10763_v16 = vld [vmem:[%s14774_s21 + $0xb8] sm:$0xff]  ;;  %10760 = vst [vmem:[%s14770_s2 + $0xa8] sm:$0xff] %v10759_v9  ;;  %v10765_v12 = vld [vmem:[%s14774_s21 + $0xc0] sm:$0xff] }
 0x50e   : >> { %10762 = vst [vmem:[%s14770_s2 + $0xb0] sm:$0xff] %v10761_v11  ;;  %10764 = vst [vmem:[%s14770_s2 + $0xb8] sm:$0xff] %v10763_v16  ;;  %v10767_v14 = vld [vmem:[%s14774_s21 + $0xc8] sm:$0xff]  ;;  %v10769_v21 = vld [vmem:[%s14774_s21 + $0xd0] sm:$0xff] }
 0x50f   : >> { %10766 = vst [vmem:[%s14770_s2 + $0xc0] sm:$0xff] %v10765_v12  ;;  %10768 = vst [vmem:[%s14770_s2 + $0xc8] sm:$0xff] %v10767_v14  ;;  %v10771_v15 = vld [vmem:[%s14774_s21 + $0xd8] sm:$0xff]  ;;  %v10773_v17 = vld [vmem:[%s14774_s21 + $0xe0] sm:$0xff] }
 0x510   : >> { %10770 = vst [vmem:[%s14770_s2 + $0xd0] sm:$0xff] %v10769_v21  ;;  %v10775_v18 = vld [vmem:[%s14774_s21 + $0xe8] sm:$0xff]  ;;  %10772 = vst [vmem:[%s14770_s2 + $0xd8] sm:$0xff] %v10771_v15  ;;  %v10777_v19 = vld [vmem:[%s14774_s21 + $0xf0] sm:$0xff] }
 0x511   : >> { %10774 = vst [vmem:[%s14770_s2 + $0xe0] sm:$0xff] %v10773_v17  ;;  %10776 = vst [vmem:[%s14770_s2 + $0xe8] sm:$0xff] %v10775_v18  ;;  %v10779_v20 = vld [vmem:[%s14774_s21 + $0xf8] sm:$0xff]  ;;  %v10781_v22 = vld [vmem:[%s14774_s21 + $0x100] sm:$0xff] }
 0x512   : >> { %10778 = vst [vmem:[%s14770_s2 + $0xf0] sm:$0xff] %v10777_v19  ;;  %10780 = vst [vmem:[%s14770_s2 + $0xf8] sm:$0xff] %v10779_v20  ;;  %v10783_v23 = vld [vmem:[%s14774_s21 + $0x108] sm:$0xff]  ;;  %v10785_v24 = vld [vmem:[%s14774_s21 + $0x110] sm:$0xff] }
 0x513   : >> { %10782 = vst [vmem:[%s14770_s2 + $0x100] sm:$0xff] %v10781_v22  ;;  %v10787_v25 = vld [vmem:[%s14774_s21 + $0x118] sm:$0xff]  ;;  %10784 = vst [vmem:[%s14770_s2 + $0x108] sm:$0xff] %v10783_v23  ;;  %v10789_v26 = vld [vmem:[%s14774_s21 + $0x120] sm:$0xff] }
 0x514   : >> { %10786 = vst [vmem:[%s14770_s2 + $0x110] sm:$0xff] %v10785_v24  ;;  %10788 = vst [vmem:[%s14770_s2 + $0x118] sm:$0xff] %v10787_v25  ;;  %v10791_v29 = vld [vmem:[%s14774_s21 + $0x128] sm:$0xff]  ;;  %v10793_v27 = vld [vmem:[%s14774_s21 + $0x130] sm:$0xff] }
 0x515   : >> { %10790 = vst [vmem:[%s14770_s2 + $0x120] sm:$0xff] %v10789_v26  ;;  %10792 = vst [vmem:[%s14770_s2 + $0x128] sm:$0xff] %v10791_v29  ;;  %v10795_v28 = vld [vmem:[%s14774_s21 + $0x138] sm:$0xff]  ;;  %v10797_v30 = vld [vmem:[%s14774_s21 + $0x140] sm:$0xff] }
 0x516   : >> { %10794 = vst [vmem:[%s14770_s2 + $0x130] sm:$0xff] %v10793_v27  ;;  %v10799_v31 = vld [vmem:[%s14774_s21 + $0x148] sm:$0xff]  ;;  %10796 = vst [vmem:[%s14770_s2 + $0x138] sm:$0xff] %v10795_v28  ;;  %v10801_v32 = vld [vmem:[%s14774_s21 + $0x150] sm:$0xff] }
 0x517   : >> { %10798 = vst [vmem:[%s14770_s2 + $0x140] sm:$0xff] %v10797_v30  ;;  %10800 = vst [vmem:[%s14770_s2 + $0x148] sm:$0xff] %v10799_v31  ;;  %v10803_v33 = vld [vmem:[%s14774_s21 + $0x158] sm:$0xff]  ;;  %v10805_v34 = vld [vmem:[%s14774_s21 + $0x160] sm:$0xff] }
 0x518   : >> { %10802 = vst [vmem:[%s14770_s2 + $0x150] sm:$0xff] %v10801_v32  ;;  %10804 = vst [vmem:[%s14770_s2 + $0x158] sm:$0xff] %v10803_v33  ;;  %v10807_v35 = vld [vmem:[%s14774_s21 + $0x168] sm:$0xff]  ;;  %v10809_v0 = vld [vmem:[%s14774_s21 + $0x170] sm:$0xff] }
 0x519   : >> { %10806 = vst [vmem:[%s14770_s2 + $0x160] sm:$0xff] %v10805_v34  ;;  %v10811_v36 = vld [vmem:[%s14774_s21 + $0x178] sm:$0xff]  ;;  %10808 = vst [vmem:[%s14770_s2 + $0x168] sm:$0xff] %v10807_v35  ;;  %v10813_v37 = vld [vmem:[%s14774_s21 + $0x180] sm:$0xff] }
 0x51a   : >> { %10810 = vst [vmem:[%s14770_s2 + $0x170] sm:$0xff] %v10809_v0  ;;  %10812 = vst [vmem:[%s14770_s2 + $0x178] sm:$0xff] %v10811_v36  ;;  %v10815_v38 = vld [vmem:[%s14774_s21 + $0x188] sm:$0xff]  ;;  %v10817_v39 = vld [vmem:[%s14774_s21 + $0x190] sm:$0xff] }
 0x51b   : >> { %10814 = vst [vmem:[%s14770_s2 + $0x180] sm:$0xff] %v10813_v37  ;;  %10816 = vst [vmem:[%s14770_s2 + $0x188] sm:$0xff] %v10815_v38  ;;  %v10819_v40 = vld [vmem:[%s14774_s21 + $0x198] sm:$0xff]  ;;  %v10821_v41 = vld [vmem:[%s14774_s21 + $0x1a0] sm:$0xff] }
 0x51c   : >> { %10818 = vst [vmem:[%s14770_s2 + $0x190] sm:$0xff] %v10817_v39  ;;  %v10823_v42 = vld [vmem:[%s14774_s21 + $0x1a8] sm:$0xff]  ;;  %10820 = vst [vmem:[%s14770_s2 + $0x198] sm:$0xff] %v10819_v40  ;;  %v10825_v43 = vld [vmem:[%s14774_s21 + $0x1b0] sm:$0xff]  ;;  %10713 = sbr.rel (!%p10710_p12) target bundleno = 1282 (0x502), region = 122 }
 0x51d   : >> { %10822 = vst [vmem:[%s14770_s2 + $0x1a0] sm:$0xff] %v10821_v41  ;;  %10824 = vst [vmem:[%s14770_s2 + $0x1a8] sm:$0xff] %v10823_v42  ;;  %v10827_v44 = vld [vmem:[%s14774_s21 + $0x1b8] sm:$0xff]  ;;  %v10829_v45 = vld [vmem:[%s14774_s21 + $0x1c0] sm:$0xff] }
 0x51e   : >> { %10826 = vst [vmem:[%s14770_s2 + $0x1b0] sm:$0xff] %v10825_v43  ;;  %10828 = vst [vmem:[%s14770_s2 + $0x1b8] sm:$0xff] %v10827_v44  ;;  %v10831_v46 = vld [vmem:[%s14774_s21 + $0x1c8] sm:$0xff]  ;;  %v10833_v47 = vld [vmem:[%s14774_s21 + $0x1d0] sm:$0xff] }
 0x51f   : >> { %10830 = vst [vmem:[%s14770_s2 + $0x1c0] sm:$0xff] %v10829_v45  ;;  %v10835_v48 = vld [vmem:[%s14774_s21 + $0x1d8] sm:$0xff]  ;;  %10832 = vst [vmem:[%s14770_s2 + $0x1c8] sm:$0xff] %v10831_v46  ;;  %v10837_v49 = vld [vmem:[%s14774_s21 + $0x1e0] sm:$0xff] }
 0x520   : >> { %10834 = vst [vmem:[%s14770_s2 + $0x1d0] sm:$0xff] %v10833_v47  ;;  %10836 = vst [vmem:[%s14770_s2 + $0x1d8] sm:$0xff] %v10835_v48  ;;  %v10839_v50 = vld [vmem:[%s14774_s21 + $0x1e8] sm:$0xff]  ;;  %v10841_v51 = vld [vmem:[%s14774_s21 + $0x1f0] sm:$0xff] }
 0x521   : >> { %10838 = vst [vmem:[%s14770_s2 + $0x1e0] sm:$0xff] %v10837_v49  ;;  %10840 = vst [vmem:[%s14770_s2 + $0x1e8] sm:$0xff] %v10839_v50  ;;  %v10843_v52 = vld [vmem:[%s14774_s21 + $0x1f8] sm:$0xff]  ;;  %s20217_s21 = smov %s20083_s27 }
 0x522   : >> { %10842 = vst [vmem:[%s14770_s2 + $0x1f0] sm:$0xff] %v10841_v51  ;;  %10844 = vst [vmem:[%s14770_s2 + $0x1f8] sm:$0xff] %v10843_v52  ;;  %s20216_s2 = smov %s20086_s28 }
 0x523 PF: > { %s20191_s29 = sand.u32 63, %s20223_s12   ;;  %s12029_s30 = sshll.u32 %s20016_s22, 9 }
 0x524   : > { %s10856_s4 = scalar_lea.vmem %s15319_s11, %s12029_s30 [#allocation3]   ;;  %s10858_s5 = scalar_lea.vmem %s20010_s18, %s12029_s30  }
 0x525   : > { %p12023_p13 = scmp.le.s32.totalorder %s20191_s29, 0 }
 0x526   : > { %s14784_s6 = smov (!%p12023_p13), %s10858_s5   ;;  %s14788_s7 = smov (!%p12023_p13), %s10856_s4  }
 0x527   : > { %10949 = sbr.rel (%p12023_p13) target bundleno = 1336 (0x538), region = 127  ;;  %s14792_s8 = smov (!%p12023_p13), 0  }
 0x528   : > { %s14796_s9 = smov (!%p12023_p13), 0  }
 0x52e LB: >> { %v10868_v53 = vld [vmem:[%s14790_s7] sm:$0xff]  ;;  %s10870_s10 = sadd.s32 1, %s14794_s8  ;;  %s10862_s9 = sadd.s32 1, %s14798_s9   ;;  %s14798_s9 = sphi %s14796_s9, %s10862_s9   ;;  %s14794_s8 = sphi %s14792_s8, %s14793_s8   ;;  %s14790_s7 = sphi %s14788_s7, %s10875_s7   ;;  %s14786_s6 = sphi %s14784_s6, %s10876_s6  }
 0x52f   : >> { %10869 = vst [vmem:[%s14786_s6] sm:$0xff] %v10868_v53  ;;  %p10871_p0 = scmp.ge.s32.totalorder %s10870_s10, %s20191_s29  ;;  %p10861_p1 = scmp.ge.s32.totalorder %s10862_s9, %s20191_s29 }
 0x531   : >> { %s20227_s10 = smov (%p10871_p0, %s10870_s10), 0  ;;  %10864 = sbr.rel (!%p10861_p1) target bundleno = 1326 (0x52e), region = 133 }
 0x532   : >> { %s12024_s11 = sshll.u32 %s20227_s10, 3  ;;  %s14793_s8 = smov %s20227_s10  }
 0x533   : >> { %s10875_s7 = scalar_lea.vmem %s10856_s4, %s12024_s11 [#allocation3]   ;;  %s10876_s6 = scalar_lea.vmem %s10858_s5, %s12024_s11  }
 0x538 PF: > { %p12_p2 = scmp.ge.s32.totalorder %s14838_s17, 5   ;;  %s20219_s14 = smov %s14762_s15 }
 0x539   : > { %s20220_s15 = smov %s14846_s20  ;;  %s20221_s16 = smov %s14838_s17 }
 0x53a   :  { %14 = sbr.rel (!%p12_p2) target bundleno = 5 (0x5), region = 144 }

</bundles_post_ra>
